<compile_context>
chip_gen: v7x
topology: tpu7x:2x2x1
jax: 0.10.0
libtpu: 0.0.40
codegen_flags: <defaults>
</compile_context>

<pallas_src>
import jax
import jax.numpy as jnp
from jax.experimental import pallas as pl
from jax.experimental.pallas import tpu as pltpu

# ----- hyperparameters (from chatbot.py) -----
n_embd = 384
block_size = 32
n_head = 8
n_layer = 8
head_size = n_embd // n_head          # 48
vocab_size = 65                       # chatbot.py has len('') == 0; pick a usable tiny vocab
vocab_pad = 128                       # lane-dense padded lm_head width
LN_EPS = 1e-5                         # nn.LayerNorm default
NEG_INF = -1e30                       # additive mask value (exp underflows to exactly 0 in f32)


def _layernorm(x, g, b):
    """PyTorch nn.LayerNorm over the last dim (biased variance, eps=1e-5)."""
    mu = jnp.mean(x, axis=-1, keepdims=True)
    var = jnp.mean((x - mu) ** 2, axis=-1, keepdims=True)
    return (x - mu) * jax.lax.rsqrt(var + LN_EPS) * g + b


def _causal_mask_add(T):
    """Additive causal mask (T, T): 0 where attendable, -1e30 elsewhere."""
    row = jnp.arange(T)[:, None]
    col = jnp.arange(T)[None, :]
    return jnp.where(col <= row, 0.0, NEG_INF).astype(jnp.float32)


# ---------------------------------------------------------------------------
# Fused kernel: all n_layer transformer Blocks + final LN + lm_head.
# grid = (n_layer,)  ("arbitrary" -> sequential); activations resident in VMEM scratch.
# ---------------------------------------------------------------------------
def _make_gpt_kernel(B, T):
    BT = B * T
    C = n_embd
    HS = head_size
    scale = float(HS) ** -0.5

    def kernel(x_ref, mask_ref, wqkv_ref, wo_ref, bo_ref,
               ln1g_ref, ln1b_ref, w1_ref, b1_ref, w2_ref, b2_ref,
               ln2g_ref, ln2b_ref, lnfg_ref, lnfb_ref, wlm_ref, blm_ref,
               logits_ref, x_sc):
        l = pl.program_id(0)

        # Load the embedding activations once; the slab stays resident across layers.
        @pl.when(l == 0)
        def _():
            x_sc[...] = x_ref[...]

        x = x_sc[...]                                   # (BT, C) f32 residual stream
        xb = x.astype(jnp.bfloat16)
        mask_add = mask_ref[...]                        # (T, T) precomputed additive mask

        # --- fused QKV projection: ONE lane-dense (BT,C)x(C,3C) bf16 matmul ---
        qkv = jnp.dot(xb, wqkv_ref[0], preferred_element_type=jnp.float32)   # (BT, 3C) f32
        qkvb = qkv.astype(jnp.bfloat16)
        q3 = qkvb[:, 0 * C:1 * C].reshape(B, T, C)      # 128-aligned slices, cheap reshape
        k3 = qkvb[:, 1 * C:2 * C].reshape(B, T, C)
        v3 = qkvb[:, 2 * C:3 * C].reshape(B, T, C)

        # --- per-head attention core, batched over B (scores are (B,T,T)) ---
        head_outs = []
        for h in range(n_head):                         # static unroll; heads are tiny
            s = h * HS
            qh = q3[:, :, s:s + HS]                     # (B, T, HS)
            kh = k3[:, :, s:s + HS]
            vh = v3[:, :, s:s + HS]
            wei = jnp.einsum('bqd,bkd->bqk', qh, kh,
                             preferred_element_type=jnp.float32) * scale      # (B, T, T)
            wei = wei + mask_add                        # additive causal mask
            p = jax.nn.softmax(wei, axis=-1)            # attention dropout: identity (eval)
            oh = jnp.einsum('bqk,bkd->bqd', p.astype(jnp.bfloat16), vh,
                            preferred_element_type=jnp.float32)               # (B, T, HS)
            head_outs.append(oh)
        att = jnp.concatenate(head_outs, axis=-1).reshape(BT, C)              # (BT, C)

        # --- fused output projection: ONE (BT,C)x(C,C) matmul ---
        sa = jnp.dot(att.astype(jnp.bfloat16), wo_ref[0],
                     preferred_element_type=jnp.float32) + bo_ref[0]
        # proj dropout: identity (eval)

        # --- residual + LN1 (post-LN, as in the reference Block) ---
        x1 = _layernorm(x + sa, ln1g_ref[0], ln1b_ref[0])

        # --- feed forward ---
        h1 = jnp.dot(x1.astype(jnp.bfloat16), w1_ref[0],
                     preferred_element_type=jnp.float32) + b1_ref[0]
        h1 = jnp.maximum(h1, 0.0)                       # ReLU
        ff = jnp.dot(h1.astype(jnp.bfloat16), w2_ref[0],
                     preferred_element_type=jnp.float32) + b2_ref[0]
        # ffwd dropout: identity (eval)

        # --- residual + LN2 ---
        x2 = _layernorm(x1 + ff, ln2g_ref[0], ln2b_ref[0])
        x_sc[...] = x2

        # --- final LayerNorm + lm_head, fused into the last layer step ---
        @pl.when(l == n_layer - 1)
        def _():
            xn = _layernorm(x2, lnfg_ref[...], lnfb_ref[...])
            logits_ref[...] = jnp.dot(xn.astype(jnp.bfloat16), wlm_ref[...],
                                      preferred_element_type=jnp.float32) + blm_ref[...]

    return kernel


def gpt_fused_forward(x2d, mask_add, p, B, T):
    """x2d: (B*T, C) f32 embeddings.  Returns padded logits (B*T, vocab_pad) f32."""
    BT, C = x2d.shape
    H = 4 * C
    Vp = p['w_lm'].shape[1]

    grid_spec = pltpu.PrefetchScalarGridSpec(
        num_scalar_prefetch=0,
        grid=(n_layer,),
        in_specs=[
            pl.BlockSpec((BT, C), lambda l: (0, 0)),                   # x (loaded once)
            pl.BlockSpec((T, T), lambda l: (0, 0)),                    # additive causal mask
            pl.BlockSpec((1, C, 3 * C), lambda l: (l, 0, 0)),          # fused Wqkv
            pl.BlockSpec((1, C, C), lambda l: (l, 0, 0)),              # Wo (unsplit)
            pl.BlockSpec((1, 1, C), lambda l: (l, 0, 0)),              # bo
            pl.BlockSpec((1, 1, C), lambda l: (l, 0, 0)),              # ln1 gamma
            pl.BlockSpec((1, 1, C), lambda l: (l, 0, 0)),              # ln1 beta
            pl.BlockSpec((1, C, H), lambda l: (l, 0, 0)),              # W1
            pl.BlockSpec((1, 1, H), lambda l: (l, 0, 0)),              # b1
            pl.BlockSpec((1, H, C), lambda l: (l, 0, 0)),              # W2
            pl.BlockSpec((1, 1, C), lambda l: (l, 0, 0)),              # b2
            pl.BlockSpec((1, 1, C), lambda l: (l, 0, 0)),              # ln2 gamma
            pl.BlockSpec((1, 1, C), lambda l: (l, 0, 0)),              # ln2 beta
            pl.BlockSpec((1, C), lambda l: (0, 0)),                    # ln_f gamma
            pl.BlockSpec((1, C), lambda l: (0, 0)),                    # ln_f beta
            pl.BlockSpec((C, Vp), lambda l: (0, 0)),                   # W_lm (padded)
            pl.BlockSpec((1, Vp), lambda l: (0, 0)),                   # b_lm (padded)
        ],
        out_specs=pl.BlockSpec((BT, Vp), lambda l: (0, 0)),
        scratch_shapes=[pltpu.VMEM((BT, C), jnp.float32)],             # resident activations
    )
    return pl.pallas_call(
        _make_gpt_kernel(B, T),
        out_shape=jax.ShapeDtypeStruct((BT, Vp), jnp.float32),
        grid_spec=grid_spec,
        compiler_params=pltpu.CompilerParams(
            dimension_semantics=("arbitrary",),        # layer loop is sequential (carried scratch)
            vmem_limit_bytes=40 * 1024 * 1024,
        ),
    )(x2d, mask_add,
      p['wqkv'], p['wo'], p['bo'],
      p['ln1_g'], p['ln1_b'], p['w1'], p['b1'], p['w2'], p['b2'],
      p['ln2_g'], p['ln2_b'],
      p['ln_f_g'], p['ln_f_b'], p['w_lm'], p['b_lm'])


# ---------------------------------------------------------------------------
# Parameters (deterministic synthetic init: normal(0, 0.02) weights, zero biases).
# Matmul weights stored transposed w.r.t. PyTorch ((in, out)), stacked over layers,
# QKV fused into (L, C, 3C) with head-major column order, and cast to bfloat16.
# ---------------------------------------------------------------------------
def init_params(key):
    keys = iter(jax.random.split(key, 16))

    def normal(shape, dtype=jnp.bfloat16):
        return (0.02 * jax.random.normal(next(keys), shape, jnp.float32)).astype(dtype)

    C, H, L = n_embd, 4 * n_embd, n_layer

    w_lm = jnp.zeros((C, vocab_pad), jnp.float32).at[:, :vocab_size].set(
        0.02 * jax.random.normal(next(keys), (C, vocab_size), jnp.float32))

    return {
        'tok_emb': normal((vocab_size, C), jnp.float32),
        'pos_emb': normal((block_size, C), jnp.float32),
        # columns [0:C)=Q, [C:2C)=K, [2C:3C)=V; within each, head h owns cols [h*HS,(h+1)*HS)
        'wqkv': normal((L, C, 3 * C)),
        # rows ordered to match the head-major concatenation of head outputs
        'wo': normal((L, C, C)),
        'bo': jnp.zeros((L, 1, C), jnp.float32),
        'ln1_g': jnp.ones((L, 1, C), jnp.float32),
        'ln1_b': jnp.zeros((L, 1, C), jnp.float32),
        'w1': normal((L, C, H)),
        'b1': jnp.zeros((L, 1, H), jnp.float32),
        'w2': normal((L, H, C)),
        'b2': jnp.zeros((L, 1, C), jnp.float32),
        'ln2_g': jnp.ones((L, 1, C), jnp.float32),
        'ln2_b': jnp.zeros((L, 1, C), jnp.float32),
        'ln_f_g': jnp.ones((1, C), jnp.float32),
        'ln_f_b': jnp.zeros((1, C), jnp.float32),
        'w_lm': w_lm.astype(jnp.bfloat16),
        'b_lm': jnp.zeros((1, vocab_pad), jnp.float32),
    }


def gpt_forward(params, index, targets=None):
    """index: (B, T) int32, T <= block_size.  Returns (logits (B,T,V), loss)."""
    B, T = index.shape
    tok_emb = params['tok_emb'][index]                  # (B, T, C)  gather glue
    pos_emb = params['pos_emb'][:T]                     # (T, C)
    x = (tok_emb + pos_emb[None, :, :]).reshape(B * T, n_embd)
    mask_add = _causal_mask_add(T)
    logits_pad = gpt_fused_forward(x, mask_add, params, B, T)   # (B*T, vocab_pad)
    logits = logits_pad[:, :vocab_size].reshape(B, T, vocab_size)
    loss = None
    if targets is not None:
        # F.cross_entropy (mean) — plain-JAX glue on the tiny (B*T, V) logits.
        logp = jax.nn.log_softmax(logits.reshape(B * T, vocab_size), axis=-1)
        loss = -jnp.mean(jnp.take_along_axis(logp, targets.reshape(B * T, 1), axis=1))
    return logits, loss


if __name__ == "__main__":
    key = jax.random.PRNGKey(0)
    params = init_params(key)

    B, T = 2, block_size                                # (2, 32) token ids
    index = jax.random.randint(jax.random.fold_in(key, 1234), (B, T),
                               0, vocab_size, dtype=jnp.int32)
    targets = jax.random.randint(jax.random.fold_in(key, 5678), (B, T),
                                 0, vocab_size, dtype=jnp.int32)

    logits, loss = gpt_forward(params, index, targets)
    logits = jax.block_until_ready(logits)
    assert logits.shape == (B, T, vocab_size), logits.shape
    assert bool(jnp.all(jnp.isfinite(logits)))
    assert bool(jnp.isfinite(loss))
    print("KERNEL_OK")
</pallas_src>

<mosaic_0001>
module attributes {stable_mosaic.version = 11 : i64} {
  func.func @kernel(%arg0: i32, %arg1: memref<64x384xf32, #tpu.memory_space<vmem>>, %arg2: memref<32x32xf32, #tpu.memory_space<vmem>>, %arg3: memref<1x384x1152xbf16, #tpu.memory_space<vmem>>, %arg4: memref<1x384x384xbf16, #tpu.memory_space<vmem>>, %arg5: memref<1x1x384xf32, #tpu.memory_space<vmem>>, %arg6: memref<1x1x384xf32, #tpu.memory_space<vmem>>, %arg7: memref<1x1x384xf32, #tpu.memory_space<vmem>>, %arg8: memref<1x384x1536xbf16, #tpu.memory_space<vmem>>, %arg9: memref<1x1x1536xf32, #tpu.memory_space<vmem>>, %arg10: memref<1x1536x384xbf16, #tpu.memory_space<vmem>>, %arg11: memref<1x1x384xf32, #tpu.memory_space<vmem>>, %arg12: memref<1x1x384xf32, #tpu.memory_space<vmem>>, %arg13: memref<1x1x384xf32, #tpu.memory_space<vmem>>, %arg14: memref<1x384xf32, #tpu.memory_space<vmem>>, %arg15: memref<1x384xf32, #tpu.memory_space<vmem>>, %arg16: memref<384x128xbf16, #tpu.memory_space<vmem>>, %arg17: memref<1x128xf32, #tpu.memory_space<vmem>>, %arg18: memref<64x128xf32, #tpu.memory_space<vmem>>, %arg19: memref<64x384xf32, #tpu.memory_space<vmem>>) attributes {dimension_semantics = [#tpu.dimension_semantics<arbitrary>], iteration_bounds = array<i64: 8>, scalar_prefetch = 0 : i64, scratch_operands = 1 : i64, tpu.core_type = #tpu.core_type<tc>, window_params = [{pipeline_mode = #tpu.pipeline_mode<synchronous>, transform_indices = @transform_0, window_bounds = array<i64: 64, 384>}, {pipeline_mode = #tpu.pipeline_mode<synchronous>, transform_indices = @transform_1, window_bounds = array<i64: 32, 32>}, {transform_indices = @transform_2, window_bounds = array<i64: 1, 384, 1152>}, {transform_indices = @transform_3, window_bounds = array<i64: 1, 384, 384>}, {transform_indices = @transform_4, window_bounds = array<i64: 1, 1, 384>}, {transform_indices = @transform_5, window_bounds = array<i64: 1, 1, 384>}, {transform_indices = @transform_6, window_bounds = array<i64: 1, 1, 384>}, {transform_indices = @transform_7, window_bounds = array<i64: 1, 384, 1536>}, {transform_indices = @transform_8, window_bounds = array<i64: 1, 1, 1536>}, {transform_indices = @transform_9, window_bounds = array<i64: 1, 1536, 384>}, {transform_indices = @transform_10, window_bounds = array<i64: 1, 1, 384>}, {transform_indices = @transform_11, window_bounds = array<i64: 1, 1, 384>}, {transform_indices = @transform_12, window_bounds = array<i64: 1, 1, 384>}, {pipeline_mode = #tpu.pipeline_mode<synchronous>, transform_indices = @transform_13, window_bounds = array<i64: 1, 384>}, {pipeline_mode = #tpu.pipeline_mode<synchronous>, transform_indices = @transform_14, window_bounds = array<i64: 1, 384>}, {pipeline_mode = #tpu.pipeline_mode<synchronous>, transform_indices = @transform_15, window_bounds = array<i64: 384, 128>}, {pipeline_mode = #tpu.pipeline_mode<synchronous>, transform_indices = @transform_16, window_bounds = array<i64: 1, 128>}, {pipeline_mode = #tpu.pipeline_mode<synchronous>, transform_indices = @transform_17, window_bounds = array<i64: 64, 128>}]} {
    %c0_i32 = arith.constant 0 : i32
    %0 = arith.cmpi eq, %arg0, %c0_i32 : i32
    %1 = arith.extui %0 : i1 to i32
    %c0_i32_0 = arith.constant 0 : i32
    %2 = arith.cmpi ne, %1, %c0_i32_0 : i32
    scf.if %2 {
      %c0_102 = arith.constant 0 : index
      %c0_103 = arith.constant 0 : index
      %278 = vector.load %arg1[%c0_102, %c0_103] : memref<64x384xf32, #tpu.memory_space<vmem>>, vector<64x384xf32>
      %c0_104 = arith.constant 0 : index
      %c0_105 = arith.constant 0 : index
      %279 = vector.load %arg19[%c0_104, %c0_105] : memref<64x384xf32, #tpu.memory_space<vmem>>, vector<64x384xf32>
      tpu.vector_store %arg19[%c0_104, %c0_105], %278 {strides = array<i32>} : memref<64x384xf32, #tpu.memory_space<vmem>>, vector<64x384xf32>,
    } else {
    }
    %c0 = arith.constant 0 : index
    %c0_1 = arith.constant 0 : index
    %3 = vector.load %arg19[%c0, %c0_1] : memref<64x384xf32, #tpu.memory_space<vmem>>, vector<64x384xf32>
    %4 = arith.truncf %3 : vector<64x384xf32> to vector<64x384xbf16>
    %c0_2 = arith.constant 0 : index
    %c0_3 = arith.constant 0 : index
    %5 = vector.load %arg2[%c0_2, %c0_3] : memref<32x32xf32, #tpu.memory_space<vmem>>, vector<32x32xf32>
    %c0_4 = arith.constant 0 : index
    %c0_5 = arith.constant 0 : index
    %c0_6 = arith.constant 0 : index
    %6 = vector.load %arg3[%c0_4, %c0_5, %c0_6] : memref<1x384x1152xbf16, #tpu.memory_space<vmem>>, vector<1x384x1152xbf16>
    %7 = vector.shape_cast %6 : vector<1x384x1152xbf16> to vector<384x1152xbf16>
    %cst = arith.constant dense<0.000000e+00> : vector<64x1152xf32>
    %8 = tpu.matmul %4, %7, %cst {dimension_numbers = #tpu.dot_dimension_numbers<[1], [0], [0], [1], [0, 0, 1, 1], [], []>} : vector<64x384xbf16>, vector<384x1152xbf16>, vector<64x1152xf32> -> vector<64x1152xf32>
    %9 = arith.truncf %8 : vector<64x1152xf32> to vector<64x1152xbf16>
    %10 = vector.extract_strided_slice %9 {offsets = [0, 0], sizes = [64, 384], strides = [1, 1]} : vector<64x1152xbf16> to vector<64x384xbf16>
    %11 = vector.shape_cast %10 : vector<64x384xbf16> to vector<2x32x384xbf16>
    %12 = vector.extract_strided_slice %9 {offsets = [0, 384], sizes = [64, 384], strides = [1, 1]} : vector<64x1152xbf16> to vector<64x384xbf16>
    %13 = vector.shape_cast %12 : vector<64x384xbf16> to vector<2x32x384xbf16>
    %14 = vector.extract_strided_slice %9 {offsets = [0, 768], sizes = [64, 384], strides = [1, 1]} : vector<64x1152xbf16> to vector<64x384xbf16>
    %15 = vector.shape_cast %14 : vector<64x384xbf16> to vector<2x32x384xbf16>
    %16 = vector.extract_strided_slice %11 {offsets = [0, 0, 0], sizes = [2, 32, 48], strides = [1, 1, 1]} : vector<2x32x384xbf16> to vector<2x32x48xbf16>
    %17 = vector.extract_strided_slice %13 {offsets = [0, 0, 0], sizes = [2, 32, 48], strides = [1, 1, 1]} : vector<2x32x384xbf16> to vector<2x32x48xbf16>
    %18 = vector.extract_strided_slice %15 {offsets = [0, 0, 0], sizes = [2, 32, 48], strides = [1, 1, 1]} : vector<2x32x384xbf16> to vector<2x32x48xbf16>
    "tpu.trace_start"() <{level = 10 : i32, message = "bqd,bkd->bqk"}> : () -> ()
    %cst_7 = arith.constant dense<0.000000e+00> : vector<2x32x32xf32>
    %19 = tpu.matmul %16, %17, %cst_7 {dimension_numbers = #tpu.dot_dimension_numbers<[2], [2], [1], [1], [0, 0, 0, 1, 1, 1], [0], [0]>} : vector<2x32x48xbf16>, vector<2x32x48xbf16>, vector<2x32x32xf32> -> vector<2x32x32xf32>
    "tpu.trace_stop"() : () -> ()
    %cst_8 = arith.constant 0.144337565 : f32
    %20 = vector.broadcast %cst_8 : f32 to vector<2x32x32xf32>
    %21 = arith.mulf %19, %20 : vector<2x32x32xf32>
    %22 = vector.shape_cast %5 : vector<32x32xf32> to vector<1x32x32xf32>
    %23 = vector.broadcast %22 : vector<1x32x32xf32> to vector<2x32x32xf32>
    %24 = arith.addf %21, %23 : vector<2x32x32xf32>
    %cst_9 = arith.constant dense<0xFF800000> : vector<2x32xf32>
    %25 = vector.multi_reduction <maximumf>, %24, %cst_9 [2] : vector<2x32x32xf32> to vector<2x32xf32>
    %cst_10 = arith.constant 0xFF800000 : f32
    %26 = vector.broadcast %cst_10 : f32 to vector<2x32xf32>
    %27 = arith.maximumf %26, %25 : vector<2x32xf32>
    %28 = vector.shape_cast %27 : vector<2x32xf32> to vector<2x32x1xf32>
    %29 = vector.broadcast %28 : vector<2x32x1xf32> to vector<2x32x32xf32>
    %30 = arith.subf %24, %29 : vector<2x32x32xf32>
    %31 = math.exp %30 : vector<2x32x32xf32>
    %cst_11 = arith.constant dense<0.000000e+00> : vector<2x32xf32>
    %32 = vector.multi_reduction <add>, %31, %cst_11 [2] : vector<2x32x32xf32> to vector<2x32xf32>
    %33 = vector.shape_cast %32 : vector<2x32xf32> to vector<2x32x1xf32>
    %34 = vector.broadcast %33 : vector<2x32x1xf32> to vector<2x32x32xf32>
    %35 = arith.divf %31, %34 : vector<2x32x32xf32>
    %36 = arith.truncf %35 : vector<2x32x32xf32> to vector<2x32x32xbf16>
    "tpu.trace_start"() <{level = 10 : i32, message = "bqk,bkd->bqd"}> : () -> ()
    %cst_12 = arith.constant dense<0.000000e+00> : vector<2x32x48xf32>
    %37 = tpu.matmul %36, %18, %cst_12 {dimension_numbers = #tpu.dot_dimension_numbers<[2], [1], [1], [2], [0, 0, 0, 1, 1, 2], [0], [0]>} : vector<2x32x32xbf16>, vector<2x32x48xbf16>, vector<2x32x48xf32> -> vector<2x32x48xf32>
    "tpu.trace_stop"() : () -> ()
    %38 = vector.extract_strided_slice %11 {offsets = [0, 0, 48], sizes = [2, 32, 48], strides = [1, 1, 1]} : vector<2x32x384xbf16> to vector<2x32x48xbf16>
    %39 = vector.extract_strided_slice %13 {offsets = [0, 0, 48], sizes = [2, 32, 48], strides = [1, 1, 1]} : vector<2x32x384xbf16> to vector<2x32x48xbf16>
    %40 = vector.extract_strided_slice %15 {offsets = [0, 0, 48], sizes = [2, 32, 48], strides = [1, 1, 1]} : vector<2x32x384xbf16> to vector<2x32x48xbf16>
    "tpu.trace_start"() <{level = 10 : i32, message = "bqd,bkd->bqk"}> : () -> ()
    %cst_13 = arith.constant dense<0.000000e+00> : vector<2x32x32xf32>
    %41 = tpu.matmul %38, %39, %cst_13 {dimension_numbers = #tpu.dot_dimension_numbers<[2], [2], [1], [1], [0, 0, 0, 1, 1, 1], [0], [0]>} : vector<2x32x48xbf16>, vector<2x32x48xbf16>, vector<2x32x32xf32> -> vector<2x32x32xf32>
    "tpu.trace_stop"() : () -> ()
    %cst_14 = arith.constant 0.144337565 : f32
    %42 = vector.broadcast %cst_14 : f32 to vector<2x32x32xf32>
    %43 = arith.mulf %41, %42 : vector<2x32x32xf32>
    %44 = vector.shape_cast %5 : vector<32x32xf32> to vector<1x32x32xf32>
    %45 = vector.broadcast %44 : vector<1x32x32xf32> to vector<2x32x32xf32>
    %46 = arith.addf %43, %45 : vector<2x32x32xf32>
    %cst_15 = arith.constant dense<0xFF800000> : vector<2x32xf32>
    %47 = vector.multi_reduction <maximumf>, %46, %cst_15 [2] : vector<2x32x32xf32> to vector<2x32xf32>
    %cst_16 = arith.constant 0xFF800000 : f32
    %48 = vector.broadcast %cst_16 : f32 to vector<2x32xf32>
    %49 = arith.maximumf %48, %47 : vector<2x32xf32>
    %50 = vector.shape_cast %49 : vector<2x32xf32> to vector<2x32x1xf32>
    %51 = vector.broadcast %50 : vector<2x32x1xf32> to vector<2x32x32xf32>
    %52 = arith.subf %46, %51 : vector<2x32x32xf32>
    %53 = math.exp %52 : vector<2x32x32xf32>
    %cst_17 = arith.constant dense<0.000000e+00> : vector<2x32xf32>
    %54 = vector.multi_reduction <add>, %53, %cst_17 [2] : vector<2x32x32xf32> to vector<2x32xf32>
    %55 = vector.shape_cast %54 : vector<2x32xf32> to vector<2x32x1xf32>
    %56 = vector.broadcast %55 : vector<2x32x1xf32> to vector<2x32x32xf32>
    %57 = arith.divf %53, %56 : vector<2x32x32xf32>
    %58 = arith.truncf %57 : vector<2x32x32xf32> to vector<2x32x32xbf16>
    "tpu.trace_start"() <{level = 10 : i32, message = "bqk,bkd->bqd"}> : () -> ()
    %cst_18 = arith.constant dense<0.000000e+00> : vector<2x32x48xf32>
    %59 = tpu.matmul %58, %40, %cst_18 {dimension_numbers = #tpu.dot_dimension_numbers<[2], [1], [1], [2], [0, 0, 0, 1, 1, 2], [0], [0]>} : vector<2x32x32xbf16>, vector<2x32x48xbf16>, vector<2x32x48xf32> -> vector<2x32x48xf32>
    "tpu.trace_stop"() : () -> ()
    %60 = vector.extract_strided_slice %11 {offsets = [0, 0, 96], sizes = [2, 32, 48], strides = [1, 1, 1]} : vector<2x32x384xbf16> to vector<2x32x48xbf16>
    %61 = vector.extract_strided_slice %13 {offsets = [0, 0, 96], sizes = [2, 32, 48], strides = [1, 1, 1]} : vector<2x32x384xbf16> to vector<2x32x48xbf16>
    %62 = vector.extract_strided_slice %15 {offsets = [0, 0, 96], sizes = [2, 32, 48], strides = [1, 1, 1]} : vector<2x32x384xbf16> to vector<2x32x48xbf16>
    "tpu.trace_start"() <{level = 10 : i32, message = "bqd,bkd->bqk"}> : () -> ()
    %cst_19 = arith.constant dense<0.000000e+00> : vector<2x32x32xf32>
    %63 = tpu.matmul %60, %61, %cst_19 {dimension_numbers = #tpu.dot_dimension_numbers<[2], [2], [1], [1], [0, 0, 0, 1, 1, 1], [0], [0]>} : vector<2x32x48xbf16>, vector<2x32x48xbf16>, vector<2x32x32xf32> -> vector<2x32x32xf32>
    "tpu.trace_stop"() : () -> ()
    %cst_20 = arith.constant 0.144337565 : f32
    %64 = vector.broadcast %cst_20 : f32 to vector<2x32x32xf32>
    %65 = arith.mulf %63, %64 : vector<2x32x32xf32>
    %66 = vector.shape_cast %5 : vector<32x32xf32> to vector<1x32x32xf32>
    %67 = vector.broadcast %66 : vector<1x32x32xf32> to vector<2x32x32xf32>
    %68 = arith.addf %65, %67 : vector<2x32x32xf32>
    %cst_21 = arith.constant dense<0xFF800000> : vector<2x32xf32>
    %69 = vector.multi_reduction <maximumf>, %68, %cst_21 [2] : vector<2x32x32xf32> to vector<2x32xf32>
    %cst_22 = arith.constant 0xFF800000 : f32
    %70 = vector.broadcast %cst_22 : f32 to vector<2x32xf32>
    %71 = arith.maximumf %70, %69 : vector<2x32xf32>
    %72 = vector.shape_cast %71 : vector<2x32xf32> to vector<2x32x1xf32>
    %73 = vector.broadcast %72 : vector<2x32x1xf32> to vector<2x32x32xf32>
    %74 = arith.subf %68, %73 : vector<2x32x32xf32>
    %75 = math.exp %74 : vector<2x32x32xf32>
    %cst_23 = arith.constant dense<0.000000e+00> : vector<2x32xf32>
    %76 = vector.multi_reduction <add>, %75, %cst_23 [2] : vector<2x32x32xf32> to vector<2x32xf32>
    %77 = vector.shape_cast %76 : vector<2x32xf32> to vector<2x32x1xf32>
    %78 = vector.broadcast %77 : vector<2x32x1xf32> to vector<2x32x32xf32>
    %79 = arith.divf %75, %78 : vector<2x32x32xf32>
    %80 = arith.truncf %79 : vector<2x32x32xf32> to vector<2x32x32xbf16>
    "tpu.trace_start"() <{level = 10 : i32, message = "bqk,bkd->bqd"}> : () -> ()
    %cst_24 = arith.constant dense<0.000000e+00> : vector<2x32x48xf32>
    %81 = tpu.matmul %80, %62, %cst_24 {dimension_numbers = #tpu.dot_dimension_numbers<[2], [1], [1], [2], [0, 0, 0, 1, 1, 2], [0], [0]>} : vector<2x32x32xbf16>, vector<2x32x48xbf16>, vector<2x32x48xf32> -> vector<2x32x48xf32>
    "tpu.trace_stop"() : () -> ()
    %82 = vector.extract_strided_slice %11 {offsets = [0, 0, 144], sizes = [2, 32, 48], strides = [1, 1, 1]} : vector<2x32x384xbf16> to vector<2x32x48xbf16>
    %83 = vector.extract_strided_slice %13 {offsets = [0, 0, 144], sizes = [2, 32, 48], strides = [1, 1, 1]} : vector<2x32x384xbf16> to vector<2x32x48xbf16>
    %84 = vector.extract_strided_slice %15 {offsets = [0, 0, 144], sizes = [2, 32, 48], strides = [1, 1, 1]} : vector<2x32x384xbf16> to vector<2x32x48xbf16>
    "tpu.trace_start"() <{level = 10 : i32, message = "bqd,bkd->bqk"}> : () -> ()
    %cst_25 = arith.constant dense<0.000000e+00> : vector<2x32x32xf32>
    %85 = tpu.matmul %82, %83, %cst_25 {dimension_numbers = #tpu.dot_dimension_numbers<[2], [2], [1], [1], [0, 0, 0, 1, 1, 1], [0], [0]>} : vector<2x32x48xbf16>, vector<2x32x48xbf16>, vector<2x32x32xf32> -> vector<2x32x32xf32>
    "tpu.trace_stop"() : () -> ()
    %cst_26 = arith.constant 0.144337565 : f32
    %86 = vector.broadcast %cst_26 : f32 to vector<2x32x32xf32>
    %87 = arith.mulf %85, %86 : vector<2x32x32xf32>
    %88 = vector.shape_cast %5 : vector<32x32xf32> to vector<1x32x32xf32>
    %89 = vector.broadcast %88 : vector<1x32x32xf32> to vector<2x32x32xf32>
    %90 = arith.addf %87, %89 : vector<2x32x32xf32>
    %cst_27 = arith.constant dense<0xFF800000> : vector<2x32xf32>
    %91 = vector.multi_reduction <maximumf>, %90, %cst_27 [2] : vector<2x32x32xf32> to vector<2x32xf32>
    %cst_28 = arith.constant 0xFF800000 : f32
    %92 = vector.broadcast %cst_28 : f32 to vector<2x32xf32>
    %93 = arith.maximumf %92, %91 : vector<2x32xf32>
    %94 = vector.shape_cast %93 : vector<2x32xf32> to vector<2x32x1xf32>
    %95 = vector.broadcast %94 : vector<2x32x1xf32> to vector<2x32x32xf32>
    %96 = arith.subf %90, %95 : vector<2x32x32xf32>
    %97 = math.exp %96 : vector<2x32x32xf32>
    %cst_29 = arith.constant dense<0.000000e+00> : vector<2x32xf32>
    %98 = vector.multi_reduction <add>, %97, %cst_29 [2] : vector<2x32x32xf32> to vector<2x32xf32>
    %99 = vector.shape_cast %98 : vector<2x32xf32> to vector<2x32x1xf32>
    %100 = vector.broadcast %99 : vector<2x32x1xf32> to vector<2x32x32xf32>
    %101 = arith.divf %97, %100 : vector<2x32x32xf32>
    %102 = arith.truncf %101 : vector<2x32x32xf32> to vector<2x32x32xbf16>
    "tpu.trace_start"() <{level = 10 : i32, message = "bqk,bkd->bqd"}> : () -> ()
    %cst_30 = arith.constant dense<0.000000e+00> : vector<2x32x48xf32>
    %103 = tpu.matmul %102, %84, %cst_30 {dimension_numbers = #tpu.dot_dimension_numbers<[2], [1], [1], [2], [0, 0, 0, 1, 1, 2], [0], [0]>} : vector<2x32x32xbf16>, vector<2x32x48xbf16>, vector<2x32x48xf32> -> vector<2x32x48xf32>
    "tpu.trace_stop"() : () -> ()
    %104 = vector.extract_strided_slice %11 {offsets = [0, 0, 192], sizes = [2, 32, 48], strides = [1, 1, 1]} : vector<2x32x384xbf16> to vector<2x32x48xbf16>
    %105 = vector.extract_strided_slice %13 {offsets = [0, 0, 192], sizes = [2, 32, 48], strides = [1, 1, 1]} : vector<2x32x384xbf16> to vector<2x32x48xbf16>
    %106 = vector.extract_strided_slice %15 {offsets = [0, 0, 192], sizes = [2, 32, 48], strides = [1, 1, 1]} : vector<2x32x384xbf16> to vector<2x32x48xbf16>
    "tpu.trace_start"() <{level = 10 : i32, message = "bqd,bkd->bqk"}> : () -> ()
    %cst_31 = arith.constant dense<0.000000e+00> : vector<2x32x32xf32>
    %107 = tpu.matmul %104, %105, %cst_31 {dimension_numbers = #tpu.dot_dimension_numbers<[2], [2], [1], [1], [0, 0, 0, 1, 1, 1], [0], [0]>} : vector<2x32x48xbf16>, vector<2x32x48xbf16>, vector<2x32x32xf32> -> vector<2x32x32xf32>
    "tpu.trace_stop"() : () -> ()
    %cst_32 = arith.constant 0.144337565 : f32
    %108 = vector.broadcast %cst_32 : f32 to vector<2x32x32xf32>
    %109 = arith.mulf %107, %108 : vector<2x32x32xf32>
    %110 = vector.shape_cast %5 : vector<32x32xf32> to vector<1x32x32xf32>
    %111 = vector.broadcast %110 : vector<1x32x32xf32> to vector<2x32x32xf32>
    %112 = arith.addf %109, %111 : vector<2x32x32xf32>
    %cst_33 = arith.constant dense<0xFF800000> : vector<2x32xf32>
    %113 = vector.multi_reduction <maximumf>, %112, %cst_33 [2] : vector<2x32x32xf32> to vector<2x32xf32>
    %cst_34 = arith.constant 0xFF800000 : f32
    %114 = vector.broadcast %cst_34 : f32 to vector<2x32xf32>
    %115 = arith.maximumf %114, %113 : vector<2x32xf32>
    %116 = vector.shape_cast %115 : vector<2x32xf32> to vector<2x32x1xf32>
    %117 = vector.broadcast %116 : vector<2x32x1xf32> to vector<2x32x32xf32>
    %118 = arith.subf %112, %117 : vector<2x32x32xf32>
    %119 = math.exp %118 : vector<2x32x32xf32>
    %cst_35 = arith.constant dense<0.000000e+00> : vector<2x32xf32>
    %120 = vector.multi_reduction <add>, %119, %cst_35 [2] : vector<2x32x32xf32> to vector<2x32xf32>
    %121 = vector.shape_cast %120 : vector<2x32xf32> to vector<2x32x1xf32>
    %122 = vector.broadcast %121 : vector<2x32x1xf32> to vector<2x32x32xf32>
    %123 = arith.divf %119, %122 : vector<2x32x32xf32>
    %124 = arith.truncf %123 : vector<2x32x32xf32> to vector<2x32x32xbf16>
    "tpu.trace_start"() <{level = 10 : i32, message = "bqk,bkd->bqd"}> : () -> ()
    %cst_36 = arith.constant dense<0.000000e+00> : vector<2x32x48xf32>
    %125 = tpu.matmul %124, %106, %cst_36 {dimension_numbers = #tpu.dot_dimension_numbers<[2], [1], [1], [2], [0, 0, 0, 1, 1, 2], [0], [0]>} : vector<2x32x32xbf16>, vector<2x32x48xbf16>, vector<2x32x48xf32> -> vector<2x32x48xf32>
    "tpu.trace_stop"() : () -> ()
    %126 = vector.extract_strided_slice %11 {offsets = [0, 0, 240], sizes = [2, 32, 48], strides = [1, 1, 1]} : vector<2x32x384xbf16> to vector<2x32x48xbf16>
    %127 = vector.extract_strided_slice %13 {offsets = [0, 0, 240], sizes = [2, 32, 48], strides = [1, 1, 1]} : vector<2x32x384xbf16> to vector<2x32x48xbf16>
    %128 = vector.extract_strided_slice %15 {offsets = [0, 0, 240], sizes = [2, 32, 48], strides = [1, 1, 1]} : vector<2x32x384xbf16> to vector<2x32x48xbf16>
    "tpu.trace_start"() <{level = 10 : i32, message = "bqd,bkd->bqk"}> : () -> ()
    %cst_37 = arith.constant dense<0.000000e+00> : vector<2x32x32xf32>
    %129 = tpu.matmul %126, %127, %cst_37 {dimension_numbers = #tpu.dot_dimension_numbers<[2], [2], [1], [1], [0, 0, 0, 1, 1, 1], [0], [0]>} : vector<2x32x48xbf16>, vector<2x32x48xbf16>, vector<2x32x32xf32> -> vector<2x32x32xf32>
    "tpu.trace_stop"() : () -> ()
    %cst_38 = arith.constant 0.144337565 : f32
    %130 = vector.broadcast %cst_38 : f32 to vector<2x32x32xf32>
    %131 = arith.mulf %129, %130 : vector<2x32x32xf32>
    %132 = vector.shape_cast %5 : vector<32x32xf32> to vector<1x32x32xf32>
    %133 = vector.broadcast %132 : vector<1x32x32xf32> to vector<2x32x32xf32>
    %134 = arith.addf %131, %133 : vector<2x32x32xf32>
    %cst_39 = arith.constant dense<0xFF800000> : vector<2x32xf32>
    %135 = vector.multi_reduction <maximumf>, %134, %cst_39 [2] : vector<2x32x32xf32> to vector<2x32xf32>
    %cst_40 = arith.constant 0xFF800000 : f32
    %136 = vector.broadcast %cst_40 : f32 to vector<2x32xf32>
    %137 = arith.maximumf %136, %135 : vector<2x32xf32>
    %138 = vector.shape_cast %137 : vector<2x32xf32> to vector<2x32x1xf32>
    %139 = vector.broadcast %138 : vector<2x32x1xf32> to vector<2x32x32xf32>
    %140 = arith.subf %134, %139 : vector<2x32x32xf32>
    %141 = math.exp %140 : vector<2x32x32xf32>
    %cst_41 = arith.constant dense<0.000000e+00> : vector<2x32xf32>
    %142 = vector.multi_reduction <add>, %141, %cst_41 [2] : vector<2x32x32xf32> to vector<2x32xf32>
    %143 = vector.shape_cast %142 : vector<2x32xf32> to vector<2x32x1xf32>
    %144 = vector.broadcast %143 : vector<2x32x1xf32> to vector<2x32x32xf32>
    %145 = arith.divf %141, %144 : vector<2x32x32xf32>
    %146 = arith.truncf %145 : vector<2x32x32xf32> to vector<2x32x32xbf16>
    "tpu.trace_start"() <{level = 10 : i32, message = "bqk,bkd->bqd"}> : () -> ()
    %cst_42 = arith.constant dense<0.000000e+00> : vector<2x32x48xf32>
    %147 = tpu.matmul %146, %128, %cst_42 {dimension_numbers = #tpu.dot_dimension_numbers<[2], [1], [1], [2], [0, 0, 0, 1, 1, 2], [0], [0]>} : vector<2x32x32xbf16>, vector<2x32x48xbf16>, vector<2x32x48xf32> -> vector<2x32x48xf32>
    "tpu.trace_stop"() : () -> ()
    %148 = vector.extract_strided_slice %11 {offsets = [0, 0, 288], sizes = [2, 32, 48], strides = [1, 1, 1]} : vector<2x32x384xbf16> to vector<2x32x48xbf16>
    %149 = vector.extract_strided_slice %13 {offsets = [0, 0, 288], sizes = [2, 32, 48], strides = [1, 1, 1]} : vector<2x32x384xbf16> to vector<2x32x48xbf16>
    %150 = vector.extract_strided_slice %15 {offsets = [0, 0, 288], sizes = [2, 32, 48], strides = [1, 1, 1]} : vector<2x32x384xbf16> to vector<2x32x48xbf16>
    "tpu.trace_start"() <{level = 10 : i32, message = "bqd,bkd->bqk"}> : () -> ()
    %cst_43 = arith.constant dense<0.000000e+00> : vector<2x32x32xf32>
    %151 = tpu.matmul %148, %149, %cst_43 {dimension_numbers = #tpu.dot_dimension_numbers<[2], [2], [1], [1], [0, 0, 0, 1, 1, 1], [0], [0]>} : vector<2x32x48xbf16>, vector<2x32x48xbf16>, vector<2x32x32xf32> -> vector<2x32x32xf32>
    "tpu.trace_stop"() : () -> ()
    %cst_44 = arith.constant 0.144337565 : f32
    %152 = vector.broadcast %cst_44 : f32 to vector<2x32x32xf32>
    %153 = arith.mulf %151, %152 : vector<2x32x32xf32>
    %154 = vector.shape_cast %5 : vector<32x32xf32> to vector<1x32x32xf32>
    %155 = vector.broadcast %154 : vector<1x32x32xf32> to vector<2x32x32xf32>
    %156 = arith.addf %153, %155 : vector<2x32x32xf32>
    %cst_45 = arith.constant dense<0xFF800000> : vector<2x32xf32>
    %157 = vector.multi_reduction <maximumf>, %156, %cst_45 [2] : vector<2x32x32xf32> to vector<2x32xf32>
    %cst_46 = arith.constant 0xFF800000 : f32
    %158 = vector.broadcast %cst_46 : f32 to vector<2x32xf32>
    %159 = arith.maximumf %158, %157 : vector<2x32xf32>
    %160 = vector.shape_cast %159 : vector<2x32xf32> to vector<2x32x1xf32>
    %161 = vector.broadcast %160 : vector<2x32x1xf32> to vector<2x32x32xf32>
    %162 = arith.subf %156, %161 : vector<2x32x32xf32>
    %163 = math.exp %162 : vector<2x32x32xf32>
    %cst_47 = arith.constant dense<0.000000e+00> : vector<2x32xf32>
    %164 = vector.multi_reduction <add>, %163, %cst_47 [2] : vector<2x32x32xf32> to vector<2x32xf32>
    %165 = vector.shape_cast %164 : vector<2x32xf32> to vector<2x32x1xf32>
    %166 = vector.broadcast %165 : vector<2x32x1xf32> to vector<2x32x32xf32>
    %167 = arith.divf %163, %166 : vector<2x32x32xf32>
    %168 = arith.truncf %167 : vector<2x32x32xf32> to vector<2x32x32xbf16>
    "tpu.trace_start"() <{level = 10 : i32, message = "bqk,bkd->bqd"}> : () -> ()
    %cst_48 = arith.constant dense<0.000000e+00> : vector<2x32x48xf32>
    %169 = tpu.matmul %168, %150, %cst_48 {dimension_numbers = #tpu.dot_dimension_numbers<[2], [1], [1], [2], [0, 0, 0, 1, 1, 2], [0], [0]>} : vector<2x32x32xbf16>, vector<2x32x48xbf16>, vector<2x32x48xf32> -> vector<2x32x48xf32>
    "tpu.trace_stop"() : () -> ()
    %170 = vector.extract_strided_slice %11 {offsets = [0, 0, 336], sizes = [2, 32, 48], strides = [1, 1, 1]} : vector<2x32x384xbf16> to vector<2x32x48xbf16>
    %171 = vector.extract_strided_slice %13 {offsets = [0, 0, 336], sizes = [2, 32, 48], strides = [1, 1, 1]} : vector<2x32x384xbf16> to vector<2x32x48xbf16>
    %172 = vector.extract_strided_slice %15 {offsets = [0, 0, 336], sizes = [2, 32, 48], strides = [1, 1, 1]} : vector<2x32x384xbf16> to vector<2x32x48xbf16>
    "tpu.trace_start"() <{level = 10 : i32, message = "bqd,bkd->bqk"}> : () -> ()
    %cst_49 = arith.constant dense<0.000000e+00> : vector<2x32x32xf32>
    %173 = tpu.matmul %170, %171, %cst_49 {dimension_numbers = #tpu.dot_dimension_numbers<[2], [2], [1], [1], [0, 0, 0, 1, 1, 1], [0], [0]>} : vector<2x32x48xbf16>, vector<2x32x48xbf16>, vector<2x32x32xf32> -> vector<2x32x32xf32>
    "tpu.trace_stop"() : () -> ()
    %cst_50 = arith.constant 0.144337565 : f32
    %174 = vector.broadcast %cst_50 : f32 to vector<2x32x32xf32>
    %175 = arith.mulf %173, %174 : vector<2x32x32xf32>
    %176 = vector.shape_cast %5 : vector<32x32xf32> to vector<1x32x32xf32>
    %177 = vector.broadcast %176 : vector<1x32x32xf32> to vector<2x32x32xf32>
    %178 = arith.addf %175, %177 : vector<2x32x32xf32>
    %cst_51 = arith.constant dense<0xFF800000> : vector<2x32xf32>
    %179 = vector.multi_reduction <maximumf>, %178, %cst_51 [2] : vector<2x32x32xf32> to vector<2x32xf32>
    %cst_52 = arith.constant 0xFF800000 : f32
    %180 = vector.broadcast %cst_52 : f32 to vector<2x32xf32>
    %181 = arith.maximumf %180, %179 : vector<2x32xf32>
    %182 = vector.shape_cast %181 : vector<2x32xf32> to vector<2x32x1xf32>
    %183 = vector.broadcast %182 : vector<2x32x1xf32> to vector<2x32x32xf32>
    %184 = arith.subf %178, %183 : vector<2x32x32xf32>
    %185 = math.exp %184 : vector<2x32x32xf32>
    %cst_53 = arith.constant dense<0.000000e+00> : vector<2x32xf32>
    %186 = vector.multi_reduction <add>, %185, %cst_53 [2] : vector<2x32x32xf32> to vector<2x32xf32>
    %187 = vector.shape_cast %186 : vector<2x32xf32> to vector<2x32x1xf32>
    %188 = vector.broadcast %187 : vector<2x32x1xf32> to vector<2x32x32xf32>
    %189 = arith.divf %185, %188 : vector<2x32x32xf32>
    %190 = arith.truncf %189 : vector<2x32x32xf32> to vector<2x32x32xbf16>
    "tpu.trace_start"() <{level = 10 : i32, message = "bqk,bkd->bqd"}> : () -> ()
    %cst_54 = arith.constant dense<0.000000e+00> : vector<2x32x48xf32>
    %191 = tpu.matmul %190, %172, %cst_54 {dimension_numbers = #tpu.dot_dimension_numbers<[2], [1], [1], [2], [0, 0, 0, 1, 1, 2], [0], [0]>} : vector<2x32x32xbf16>, vector<2x32x48xbf16>, vector<2x32x48xf32> -> vector<2x32x48xf32>
    "tpu.trace_stop"() : () -> ()
    %192 = tpu.concatenate %37, %59, %81, %103, %125, %147, %169, %191 in 2 : vector<2x32x48xf32>, vector<2x32x48xf32>, vector<2x32x48xf32>, vector<2x32x48xf32>, vector<2x32x48xf32>, vector<2x32x48xf32>, vector<2x32x48xf32>, vector<2x32x48xf32> -> vector<2x32x384xf32>
    %193 = vector.shape_cast %192 : vector<2x32x384xf32> to vector<64x384xf32>
    %194 = arith.truncf %193 : vector<64x384xf32> to vector<64x384xbf16>
    %c0_55 = arith.constant 0 : index
    %c0_56 = arith.constant 0 : index
    %c0_57 = arith.constant 0 : index
    %195 = vector.load %arg4[%c0_55, %c0_56, %c0_57] : memref<1x384x384xbf16, #tpu.memory_space<vmem>>, vector<1x384x384xbf16>
    %196 = vector.shape_cast %195 : vector<1x384x384xbf16> to vector<384x384xbf16>
    %cst_58 = arith.constant dense<0.000000e+00> : vector<64x384xf32>
    %197 = tpu.matmul %194, %196, %cst_58 {dimension_numbers = #tpu.dot_dimension_numbers<[1], [0], [0], [1], [0, 0, 1, 1], [], []>} : vector<64x384xbf16>, vector<384x384xbf16>, vector<64x384xf32> -> vector<64x384xf32>
    %c0_59 = arith.constant 0 : index
    %c0_60 = arith.constant 0 : index
    %c0_61 = arith.constant 0 : index
    %198 = vector.load %arg5[%c0_59, %c0_60, %c0_61] : memref<1x1x384xf32, #tpu.memory_space<vmem>>, vector<1x1x384xf32>
    %199 = vector.shape_cast %198 : vector<1x1x384xf32> to vector<1x384xf32>
    %200 = vector.broadcast %199 : vector<1x384xf32> to vector<64x384xf32>
    %201 = arith.addf %197, %200 : vector<64x384xf32>
    %202 = arith.addf %3, %201 : vector<64x384xf32>
    %c0_62 = arith.constant 0 : index
    %c0_63 = arith.constant 0 : index
    %c0_64 = arith.constant 0 : index
    %203 = vector.load %arg6[%c0_62, %c0_63, %c0_64] : memref<1x1x384xf32, #tpu.memory_space<vmem>>, vector<1x1x384xf32>
    %204 = vector.shape_cast %203 : vector<1x1x384xf32> to vector<1x384xf32>
    %c0_65 = arith.constant 0 : index
    %c0_66 = arith.constant 0 : index
    %c0_67 = arith.constant 0 : index
    %205 = vector.load %arg7[%c0_65, %c0_66, %c0_67] : memref<1x1x384xf32, #tpu.memory_space<vmem>>, vector<1x1x384xf32>
    %206 = vector.shape_cast %205 : vector<1x1x384xf32> to vector<1x384xf32>
    %cst_68 = arith.constant dense<0.000000e+00> : vector<64xf32>
    %207 = vector.multi_reduction <add>, %202, %cst_68 [1] : vector<64x384xf32> to vector<64xf32>
    %208 = vector.shape_cast %207 : vector<64xf32> to vector<64x1xf32>
    %cst_69 = arith.constant 3.840000e+02 : f32
    %209 = vector.broadcast %cst_69 : f32 to vector<64x1xf32>
    %210 = arith.divf %208, %209 : vector<64x1xf32>
    %211 = vector.broadcast %210 : vector<64x1xf32> to vector<64x384xf32>
    %212 = arith.subf %202, %211 : vector<64x384xf32>
    %213 = arith.mulf %212, %212 : vector<64x384xf32>
    %cst_70 = arith.constant dense<0.000000e+00> : vector<64xf32>
    %214 = vector.multi_reduction <add>, %213, %cst_70 [1] : vector<64x384xf32> to vector<64xf32>
    %215 = vector.shape_cast %214 : vector<64xf32> to vector<64x1xf32>
    %cst_71 = arith.constant 3.840000e+02 : f32
    %216 = vector.broadcast %cst_71 : f32 to vector<64x1xf32>
    %217 = arith.divf %215, %216 : vector<64x1xf32>
    %218 = vector.broadcast %210 : vector<64x1xf32> to vector<64x384xf32>
    %219 = arith.subf %202, %218 : vector<64x384xf32>
    %cst_72 = arith.constant 9.99999974E-6 : f32
    %220 = vector.broadcast %cst_72 : f32 to vector<64x1xf32>
    %221 = arith.addf %217, %220 : vector<64x1xf32>
    %222 = math.rsqrt %221 : vector<64x1xf32>
    %223 = vector.broadcast %222 : vector<64x1xf32> to vector<64x384xf32>
    %224 = arith.mulf %219, %223 : vector<64x384xf32>
    %225 = vector.broadcast %204 : vector<1x384xf32> to vector<64x384xf32>
    %226 = arith.mulf %224, %225 : vector<64x384xf32>
    %227 = vector.broadcast %206 : vector<1x384xf32> to vector<64x384xf32>
    %228 = arith.addf %226, %227 : vector<64x384xf32>
    %229 = arith.truncf %228 : vector<64x384xf32> to vector<64x384xbf16>
    %c0_73 = arith.constant 0 : index
    %c0_74 = arith.constant 0 : index
    %c0_75 = arith.constant 0 : index
    %230 = vector.load %arg8[%c0_73, %c0_74, %c0_75] : memref<1x384x1536xbf16, #tpu.memory_space<vmem>>, vector<1x384x1536xbf16>
    %231 = vector.shape_cast %230 : vector<1x384x1536xbf16> to vector<384x1536xbf16>
    %cst_76 = arith.constant dense<0.000000e+00> : vector<64x1536xf32>
    %232 = tpu.matmul %229, %231, %cst_76 {dimension_numbers = #tpu.dot_dimension_numbers<[1], [0], [0], [1], [0, 0, 1, 1], [], []>} : vector<64x384xbf16>, vector<384x1536xbf16>, vector<64x1536xf32> -> vector<64x1536xf32>
    %c0_77 = arith.constant 0 : index
    %c0_78 = arith.constant 0 : index
    %c0_79 = arith.constant 0 : index
    %233 = vector.load %arg9[%c0_77, %c0_78, %c0_79] : memref<1x1x1536xf32, #tpu.memory_space<vmem>>, vector<1x1x1536xf32>
    %234 = vector.shape_cast %233 : vector<1x1x1536xf32> to vector<1x1536xf32>
    %235 = vector.broadcast %234 : vector<1x1536xf32> to vector<64x1536xf32>
    %236 = arith.addf %232, %235 : vector<64x1536xf32>
    %cst_80 = arith.constant 0.000000e+00 : f32
    %237 = vector.broadcast %cst_80 : f32 to vector<64x1536xf32>
    %238 = arith.maximumf %236, %237 : vector<64x1536xf32>
    %239 = arith.truncf %238 : vector<64x1536xf32> to vector<64x1536xbf16>
    %c0_81 = arith.constant 0 : index
    %c0_82 = arith.constant 0 : index
    %c0_83 = arith.constant 0 : index
    %240 = vector.load %arg10[%c0_81, %c0_82, %c0_83] : memref<1x1536x384xbf16, #tpu.memory_space<vmem>>, vector<1x1536x384xbf16>
    %241 = vector.shape_cast %240 : vector<1x1536x384xbf16> to vector<1536x384xbf16>
    %cst_84 = arith.constant dense<0.000000e+00> : vector<64x384xf32>
    %242 = tpu.matmul %239, %241, %cst_84 {dimension_numbers = #tpu.dot_dimension_numbers<[1], [0], [0], [1], [0, 0, 1, 1], [], []>} : vector<64x1536xbf16>, vector<1536x384xbf16>, vector<64x384xf32> -> vector<64x384xf32>
    %c0_85 = arith.constant 0 : index
    %c0_86 = arith.constant 0 : index
    %c0_87 = arith.constant 0 : index
    %243 = vector.load %arg11[%c0_85, %c0_86, %c0_87] : memref<1x1x384xf32, #tpu.memory_space<vmem>>, vector<1x1x384xf32>
    %244 = vector.shape_cast %243 : vector<1x1x384xf32> to vector<1x384xf32>
    %245 = vector.broadcast %244 : vector<1x384xf32> to vector<64x384xf32>
    %246 = arith.addf %242, %245 : vector<64x384xf32>
    %247 = arith.addf %228, %246 : vector<64x384xf32>
    %c0_88 = arith.constant 0 : index
    %c0_89 = arith.constant 0 : index
    %c0_90 = arith.constant 0 : index
    %248 = vector.load %arg12[%c0_88, %c0_89, %c0_90] : memref<1x1x384xf32, #tpu.memory_space<vmem>>, vector<1x1x384xf32>
    %249 = vector.shape_cast %248 : vector<1x1x384xf32> to vector<1x384xf32>
    %c0_91 = arith.constant 0 : index
    %c0_92 = arith.constant 0 : index
    %c0_93 = arith.constant 0 : index
    %250 = vector.load %arg13[%c0_91, %c0_92, %c0_93] : memref<1x1x384xf32, #tpu.memory_space<vmem>>, vector<1x1x384xf32>
    %251 = vector.shape_cast %250 : vector<1x1x384xf32> to vector<1x384xf32>
    %cst_94 = arith.constant dense<0.000000e+00> : vector<64xf32>
    %252 = vector.multi_reduction <add>, %247, %cst_94 [1] : vector<64x384xf32> to vector<64xf32>
    %253 = vector.shape_cast %252 : vector<64xf32> to vector<64x1xf32>
    %cst_95 = arith.constant 3.840000e+02 : f32
    %254 = vector.broadcast %cst_95 : f32 to vector<64x1xf32>
    %255 = arith.divf %253, %254 : vector<64x1xf32>
    %256 = vector.broadcast %255 : vector<64x1xf32> to vector<64x384xf32>
    %257 = arith.subf %247, %256 : vector<64x384xf32>
    %258 = arith.mulf %257, %257 : vector<64x384xf32>
    %cst_96 = arith.constant dense<0.000000e+00> : vector<64xf32>
    %259 = vector.multi_reduction <add>, %258, %cst_96 [1] : vector<64x384xf32> to vector<64xf32>
    %260 = vector.shape_cast %259 : vector<64xf32> to vector<64x1xf32>
    %cst_97 = arith.constant 3.840000e+02 : f32
    %261 = vector.broadcast %cst_97 : f32 to vector<64x1xf32>
    %262 = arith.divf %260, %261 : vector<64x1xf32>
    %263 = vector.broadcast %255 : vector<64x1xf32> to vector<64x384xf32>
    %264 = arith.subf %247, %263 : vector<64x384xf32>
    %cst_98 = arith.constant 9.99999974E-6 : f32
    %265 = vector.broadcast %cst_98 : f32 to vector<64x1xf32>
    %266 = arith.addf %262, %265 : vector<64x1xf32>
    %267 = math.rsqrt %266 : vector<64x1xf32>
    %268 = vector.broadcast %267 : vector<64x1xf32> to vector<64x384xf32>
    %269 = arith.mulf %264, %268 : vector<64x384xf32>
    %270 = vector.broadcast %249 : vector<1x384xf32> to vector<64x384xf32>
    %271 = arith.mulf %269, %270 : vector<64x384xf32>
    %272 = vector.broadcast %251 : vector<1x384xf32> to vector<64x384xf32>
    %273 = arith.addf %271, %272 : vector<64x384xf32>
    %c0_99 = arith.constant 0 : index
    %c0_100 = arith.constant 0 : index
    %274 = vector.load %arg19[%c0_99, %c0_100] : memref<64x384xf32, #tpu.memory_space<vmem>>, vector<64x384xf32>
    tpu.vector_store %arg19[%c0_99, %c0_100], %273 {strides = array<i32>} : memref<64x384xf32, #tpu.memory_space<vmem>>, vector<64x384xf32>,
    %c7_i32 = arith.constant 7 : i32
    %275 = arith.cmpi eq, %arg0, %c7_i32 : i32
    %276 = arith.extui %275 : i1 to i32
    %c0_i32_101 = arith.constant 0 : i32
    %277 = arith.cmpi ne, %276, %c0_i32_101 : i32
    scf.if %277 {
      %c0_102 = arith.constant 0 : index
      %c0_103 = arith.constant 0 : index
      %278 = vector.load %arg14[%c0_102, %c0_103] : memref<1x384xf32, #tpu.memory_space<vmem>>, vector<1x384xf32>
      %c0_104 = arith.constant 0 : index
      %c0_105 = arith.constant 0 : index
      %279 = vector.load %arg15[%c0_104, %c0_105] : memref<1x384xf32, #tpu.memory_space<vmem>>, vector<1x384xf32>
      %cst_106 = arith.constant dense<0.000000e+00> : vector<64xf32>
      %280 = vector.multi_reduction <add>, %273, %cst_106 [1] : vector<64x384xf32> to vector<64xf32>
      %281 = vector.shape_cast %280 : vector<64xf32> to vector<64x1xf32>
      %cst_107 = arith.constant 3.840000e+02 : f32
      %282 = vector.broadcast %cst_107 : f32 to vector<64x1xf32>
      %283 = arith.divf %281, %282 : vector<64x1xf32>
      %284 = vector.broadcast %283 : vector<64x1xf32> to vector<64x384xf32>
      %285 = arith.subf %273, %284 : vector<64x384xf32>
      %286 = arith.mulf %285, %285 : vector<64x384xf32>
      %cst_108 = arith.constant dense<0.000000e+00> : vector<64xf32>
      %287 = vector.multi_reduction <add>, %286, %cst_108 [1] : vector<64x384xf32> to vector<64xf32>
      %288 = vector.shape_cast %287 : vector<64xf32> to vector<64x1xf32>
      %cst_109 = arith.constant 3.840000e+02 : f32
      %289 = vector.broadcast %cst_109 : f32 to vector<64x1xf32>
      %290 = arith.divf %288, %289 : vector<64x1xf32>
      %291 = vector.broadcast %283 : vector<64x1xf32> to vector<64x384xf32>
      %292 = arith.subf %273, %291 : vector<64x384xf32>
      %cst_110 = arith.constant 9.99999974E-6 : f32
      %293 = vector.broadcast %cst_110 : f32 to vector<64x1xf32>
      %294 = arith.addf %290, %293 : vector<64x1xf32>
      %295 = math.rsqrt %294 : vector<64x1xf32>
      %296 = vector.broadcast %295 : vector<64x1xf32> to vector<64x384xf32>
      %297 = arith.mulf %292, %296 : vector<64x384xf32>
      %298 = vector.broadcast %278 : vector<1x384xf32> to vector<64x384xf32>
      %299 = arith.mulf %297, %298 : vector<64x384xf32>
      %300 = vector.broadcast %279 : vector<1x384xf32> to vector<64x384xf32>
      %301 = arith.addf %299, %300 : vector<64x384xf32>
      %302 = arith.truncf %301 : vector<64x384xf32> to vector<64x384xbf16>
      %c0_111 = arith.constant 0 : index
      %c0_112 = arith.constant 0 : index
      %303 = vector.load %arg16[%c0_111, %c0_112] : memref<384x128xbf16, #tpu.memory_space<vmem>>, vector<384x128xbf16>
      %cst_113 = arith.constant dense<0.000000e+00> : vector<64x128xf32>
      %304 = tpu.matmul %302, %303, %cst_113 {dimension_numbers = #tpu.dot_dimension_numbers<[1], [0], [0], [1], [0, 0, 1, 1], [], []>} : vector<64x384xbf16>, vector<384x128xbf16>, vector<64x128xf32> -> vector<64x128xf32>
      %c0_114 = arith.constant 0 : index
      %c0_115 = arith.constant 0 : index
      %305 = vector.load %arg17[%c0_114, %c0_115] : memref<1x128xf32, #tpu.memory_space<vmem>>, vector<1x128xf32>
      %306 = vector.broadcast %305 : vector<1x128xf32> to vector<64x128xf32>
      %307 = arith.addf %304, %306 : vector<64x128xf32>
      %c0_116 = arith.constant 0 : index
      %c0_117 = arith.constant 0 : index
      %308 = vector.load %arg18[%c0_116, %c0_117] : memref<64x128xf32, #tpu.memory_space<vmem>>, vector<64x128xf32>
      tpu.vector_store %arg18[%c0_116, %c0_117], %307 {strides = array<i32>} : memref<64x128xf32, #tpu.memory_space<vmem>>, vector<64x128xf32>,
    } else {
    }
    return
  }
  func.func @transform_0(%arg0: i32) -> (i32, i32) {
    %c0_i32 = arith.constant 0 : i32
    %c0_i32_0 = arith.constant 0 : i32
    %c0_i32_1 = arith.constant 0 : i32
    return %c0_i32, %c0_i32_0 : i32, i32
  }
  func.func @transform_1(%arg0: i32) -> (i32, i32) {
    %c0_i32 = arith.constant 0 : i32
    %c0_i32_0 = arith.constant 0 : i32
    %c0_i32_1 = arith.constant 0 : i32
    return %c0_i32, %c0_i32_0 : i32, i32
  }
  func.func @transform_2(%arg0: i32) -> (i32, i32, i32) {
    %c0_i32 = arith.constant 0 : i32
    %c0_i32_0 = arith.constant 0 : i32
    %c0_i32_1 = arith.constant 0 : i32
    return %arg0, %c0_i32, %c0_i32_0 : i32, i32, i32
  }
  func.func @transform_3(%arg0: i32) -> (i32, i32, i32) {
    %c0_i32 = arith.constant 0 : i32
    %c0_i32_0 = arith.constant 0 : i32
    %c0_i32_1 = arith.constant 0 : i32
    return %arg0, %c0_i32, %c0_i32_0 : i32, i32, i32
  }
  func.func @transform_4(%arg0: i32) -> (i32, i32, i32) {
    %c0_i32 = arith.constant 0 : i32
    %c0_i32_0 = arith.constant 0 : i32
    %c0_i32_1 = arith.constant 0 : i32
    return %arg0, %c0_i32, %c0_i32_0 : i32, i32, i32
  }
  func.func @transform_5(%arg0: i32) -> (i32, i32, i32) {
    %c0_i32 = arith.constant 0 : i32
    %c0_i32_0 = arith.constant 0 : i32
    %c0_i32_1 = arith.constant 0 : i32
    return %arg0, %c0_i32, %c0_i32_0 : i32, i32, i32
  }
  func.func @transform_6(%arg0: i32) -> (i32, i32, i32) {
    %c0_i32 = arith.constant 0 : i32
    %c0_i32_0 = arith.constant 0 : i32
    %c0_i32_1 = arith.constant 0 : i32
    return %arg0, %c0_i32, %c0_i32_0 : i32, i32, i32
  }
  func.func @transform_7(%arg0: i32) -> (i32, i32, i32) {
    %c0_i32 = arith.constant 0 : i32
    %c0_i32_0 = arith.constant 0 : i32
    %c0_i32_1 = arith.constant 0 : i32
    return %arg0, %c0_i32, %c0_i32_0 : i32, i32, i32
  }
  func.func @transform_8(%arg0: i32) -> (i32, i32, i32) {
    %c0_i32 = arith.constant 0 : i32
    %c0_i32_0 = arith.constant 0 : i32
    %c0_i32_1 = arith.constant 0 : i32
    return %arg0, %c0_i32, %c0_i32_0 : i32, i32, i32
  }
  func.func @transform_9(%arg0: i32) -> (i32, i32, i32) {
    %c0_i32 = arith.constant 0 : i32
    %c0_i32_0 = arith.constant 0 : i32
    %c0_i32_1 = arith.constant 0 : i32
    return %arg0, %c0_i32, %c0_i32_0 : i32, i32, i32
  }
  func.func @transform_10(%arg0: i32) -> (i32, i32, i32) {
    %c0_i32 = arith.constant 0 : i32
    %c0_i32_0 = arith.constant 0 : i32
    %c0_i32_1 = arith.constant 0 : i32
    return %arg0, %c0_i32, %c0_i32_0 : i32, i32, i32
  }
  func.func @transform_11(%arg0: i32) -> (i32, i32, i32) {
    %c0_i32 = arith.constant 0 : i32
    %c0_i32_0 = arith.constant 0 : i32
    %c0_i32_1 = arith.constant 0 : i32
    return %arg0, %c0_i32, %c0_i32_0 : i32, i32, i32
  }
  func.func @transform_12(%arg0: i32) -> (i32, i32, i32) {
    %c0_i32 = arith.constant 0 : i32
    %c0_i32_0 = arith.constant 0 : i32
    %c0_i32_1 = arith.constant 0 : i32
    return %arg0, %c0_i32, %c0_i32_0 : i32, i32, i32
  }
  func.func @transform_13(%arg0: i32) -> (i32, i32) {
    %c0_i32 = arith.constant 0 : i32
    %c0_i32_0 = arith.constant 0 : i32
    %c0_i32_1 = arith.constant 0 : i32
    return %c0_i32, %c0_i32_0 : i32, i32
  }
  func.func @transform_14(%arg0: i32) -> (i32, i32) {
    %c0_i32 = arith.constant 0 : i32
    %c0_i32_0 = arith.constant 0 : i32
    %c0_i32_1 = arith.constant 0 : i32
    return %c0_i32, %c0_i32_0 : i32, i32
  }
  func.func @transform_15(%arg0: i32) -> (i32, i32) {
    %c0_i32 = arith.constant 0 : i32
    %c0_i32_0 = arith.constant 0 : i32
    %c0_i32_1 = arith.constant 0 : i32
    return %c0_i32, %c0_i32_0 : i32, i32
  }
  func.func @transform_16(%arg0: i32) -> (i32, i32) {
    %c0_i32 = arith.constant 0 : i32
    %c0_i32_0 = arith.constant 0 : i32
    %c0_i32_1 = arith.constant 0 : i32
    return %c0_i32, %c0_i32_0 : i32, i32
  }
  func.func @transform_17(%arg0: i32) -> (i32, i32) {
    %c0_i32 = arith.constant 0 : i32
    %c0_i32_0 = arith.constant 0 : i32
    %c0_i32_1 = arith.constant 0 : i32
    return %c0_i32, %c0_i32_0 : i32, i32
  }
}

</mosaic_0001>

<bundles_post_ra>
// kernel: tpu_custom_call.1
= control target key start
LH: loop header
LB: loop body
LE: loop exit
PB: predicated region body
PF: predicated region fallthrough
CT: control target
= control target key end

     0   :  { %s23867_s0 = inlined_call_operand.hbm [shape: f32[64,384], index: 0, kind: input, shape index: {}]   ;;  %s23868_s1 = inlined_call_operand.hbm [shape: f32[32,32], index: 1, kind: input, shape index: {}]   ;;  %s23869_s2 = inlined_call_operand.hbm [shape: bf16[8,384,1152], index: 2, kind: input, shape index: {}]   ;;  %s23870_s3 = inlined_call_operand.hbm [shape: bf16[8,384,384], index: 3, kind: input, shape index: {}]   ;;  %s23871_s4 = inlined_call_operand.hbm [shape: f32[8,1,384], index: 4, kind: input, shape index: {}]   ;;  %s23872_s5 = inlined_call_operand.hbm [shape: f32[8,1,384], index: 5, kind: input, shape index: {}]   ;;  %s23873_s6 = inlined_call_operand.hbm [shape: f32[8,1,384], index: 6, kind: input, shape index: {}]   ;;  %s23874_s7 = inlined_call_operand.hbm [shape: bf16[8,384,1536], index: 7, kind: input, shape index: {}]   ;;  %s23875_s8 = inlined_call_operand.hbm [shape: f32[8,1,1536], index: 8, kind: input, shape index: {}]   ;;  %s23876_s9 = inlined_call_operand.hbm [shape: bf16[8,1536,384], index: 9, kind: input, shape index: {}]   ;;  %s23877_s10 = inlined_call_operand.hbm [shape: f32[8,1,384], index: 10, kind: input, shape index: {}]   ;;  %s23878_s11 = inlined_call_operand.hbm [shape: f32[8,1,384], index: 11, kind: input, shape index: {}]   ;;  %s23879_s12 = inlined_call_operand.hbm [shape: f32[8,1,384], index: 12, kind: input, shape index: {}]   ;;  %s23880_s13 = inlined_call_operand.hbm [shape: f32[1,384], index: 13, kind: input, shape index: {}]   ;;  %s23881_s14 = inlined_call_operand.hbm [shape: f32[1,384], index: 14, kind: input, shape index: {}]   ;;  %s23882_s15 = inlined_call_operand.hbm [shape: bf16[384,128], index: 15, kind: input, shape index: {}]   ;;  %s23883_s16 = inlined_call_operand.hbm [shape: f32[1,128], index: 16, kind: input, shape index: {}]   ;;  %s23884_s17 = inlined_call_operand.hbm [shape: f32[64,128], index: 17, kind: output, shape index: {}]  }
   0x1   :  { %23945 = sst [smem:[#allocation62_spill]] %s23867_s0 }
   0x2   :  { %23946 = sst [smem:[#allocation63_spill]] %s23868_s1 }
   0x3   :  { %23947 = sst [smem:[#allocation64_spill]] %s23869_s2 }
   0x4   :  { %23948 = sst [smem:[#allocation65_spill]] %s23870_s3 }
   0x5   :  { %23949 = sst [smem:[#allocation66_spill]] %s23871_s4 }
   0x6   :  { %23950 = sst [smem:[#allocation67_spill]] %s23872_s5 }
   0x7   :  { %23951 = sst [smem:[#allocation68_spill]] %s23873_s6 }
   0x8   :  { %23952 = sst [smem:[#allocation69_spill]] %s23874_s7 }
   0x9   :  { %23953 = sst [smem:[#allocation70_spill]] %s23875_s8 }
   0xa   :  { %23954 = sst [smem:[#allocation71_spill]] %s23876_s9 }
   0xb   :  { %23955 = sst [smem:[#allocation72_spill]] %s23877_s10 }
   0xc   :  { %23956 = sst [smem:[#allocation73_spill]] %s23879_s12 }
   0xd   :  { %23957 = sst [smem:[#allocation74_spill]] %s23880_s13 }
   0xe   :  { %23958 = sst [smem:[#allocation75_spill]] %s23882_s15 }
   0xf   :  { %23959 = sst [smem:[#allocation76_spill]] %s23883_s16 }
  0x10   :  { %23960 = sst [smem:[#allocation77_spill]] %s23884_s17 }
  0x11   :  { %22 = vsyncpa [#allocation4], 0 }
  0x12   :  { %23 = vsyncpa [#allocation7], 0 }
  0x13   :  { %24 = vsyncpa [#allocation21], 0 }
  0x14   :  { %25 = vsyncpa [#allocation24], 0 }
  0x15   :  { %26 = vsyncpa [#allocation5], 0  ;;  %s19254_s24 = smov 0   ;;  %s19256_s25 = smov 0  }
  0x16   :  { %s19258_s26 = smov 0   ;;  %s19260_s27 = smov 0  }
  0x17 LB: > { %23961 = sst [smem:[#allocation33_spill]] %s19114_s25  ;;  %s19273_s28 = sadd.s32 4294967295, %s19122_s27   ;;  %s19122_s27 = sphi %s19260_s27, %s24105_s27   ;;  %s19118_s26 = sphi %s19258_s26, %s24108_s26   ;;  %s19114_s25 = sphi %s19256_s25, %s24107_s25   ;;  %s19110_s24 = sphi %s19254_s24, %s24106_s24  }
  0x18   : > { %23962 = sst [smem:[#allocation34_spill]] %s19118_s26  ;;  %p94_p0 = scmp.ne.s32.totalorder %s19114_s25, %s19110_s24 }
  0x19   : > { %23963 = sst [smem:[#allocation35_spill]] %s19273_s28  ;;  %p23896_p1 = scmp.eq.s32.totalorder %s19273_s28, 0 }
  0x1a   : > { %p14357_p2 = scmp.ge.s32.totalorder %s19122_s27, 1  ;;  %p470_p3 = scmp.lt.s32.totalorder %s19122_s27, 9 }
  0x1b   : > { %p19282_p5 = por %p23896_p1, %p94_p0  ;;  %s19124_s30 = smov [#allocation3]  }
  0x1c   : > { %p19286_p6 = pnand %p14357_p2, %p470_p3  ;;  %s482_s18 = sshll.u32 %s19124_s30, 4  ;;  %s483_s18 = int_to_ptr.vmem [resolvable:$true] %s482_s18 }
  0x1d   : > { %s23964_s29 = scalar_select %p19282_p5, 1, 0 }
  0x1e   : > { %s23966_s0 = scalar_select %p19286_p6, 1, 0 }
  0x1f   : > { %23965 = sst [smem:[#allocation36_spill]] %s23964_s29  ;;  %p16687_p7 = pneg %p19286_p6 }
  0x20   : > { %23967 = sst [smem:[#allocation37_spill]] %s23966_s0  ;;  %s19299_s1 = sadd.s32 1, %s19122_s27  }
  0x21   : > { %p19294_p8 = pnand %p16687_p7, %p23896_p1  ;;  %23969 = sst [smem:[#allocation38_spill]] %s19299_s1 }
  0x22   : > { %s81_s20 = sadd.s32 1, %s19118_s26  ;;  %s78_s21 = ssub.s32 %s19122_s27, %s19299_s1 }
  0x23   : > { %s23968_s19 = scalar_select %p19294_p8, 1, 0 }
  0x24   : > { %s23970_s24 = sld [smem:[#allocation62_spill]]  ;;  %p19312_p10 = pneg %p19294_p8 }
  0x26   : > { %s23972_s28 = scalar_select %p19312_p10, 1, 0 }
  0x2a   : > { %s23971_s17 = smov %s23970_s24  ;;  %s18540_s29 = scalar_lea.hbm %s23970_s24, 3072 }
  0x2b   : > { %p18541_p9 = scmp.ne.s32.totalorder %s23971_s17, %s18540_s29  ;;  %p18547_p13 = scmp.lt.u32.totalorder %s18540_s29, %s23971_s17 }
  0x2d   : > { %p18543_p11 = pnand %p19312_p10, %p18541_p9 }
  0x2f   : > { %p18544_p12 = pneg %p18543_p11 }
  0x31   : > { %p18549_p0 = pnand %p18547_p13, %p18544_p12 }
  0x33   : > { %18552 = shalt.err (!%p18549_p0)
}
  0x34   : > { %s18553_s22 = scalar_lea.vmem %s483_s18, 3072  ;;  %p18561_p4 = scmp.lt.s32.totalorder %s483_s18, %s483_s18 }
  0x35   : > { %p18554_p2 = scmp.ne.s32.totalorder %s483_s18, %s18553_s22  ;;  %p18562_p1 = scmp.lt.s32.totalorder %s18553_s22, %s18553_s22 }
  0x37   : > { %p18556_p3 = pnand %p18554_p2, %p19312_p10  ;;  %p18563_p5 = por %p18562_p1, %p18561_p4 }
  0x39   : > { %p18557_p7 = pneg %p18556_p3 }
  0x3b   : > { %p18564_p6 = pnand %p18563_p5, %p18557_p7 }
  0x3d   : > { %18567 = shalt.err (!%p18564_p6)
}
  0x3e   : > { %s19125_s16 = smov 384   ;;  %s19126_s12 = smov 24  }
  0x3f   : > { %16690 = dma.hbm_to_vmem [thread:$0]  (!%p19294_p8), %s23971_s17, 3072, %s483_s18, [#allocation4], %s19125_s16, %s19125_s16, %s19126_s12  }
  0x40   : > { %p79_p9 = scmp.eq.s32.totalorder %s78_s21, 0  ;;  %p88_p1 = scmp.ne.s32.totalorder %s19118_s26, %s19114_s25 }
  0x41   : > { %p89_p4 = scmp.eq.s32.totalorder %s19122_s27, 0  ;;  %p16746_p5 = scmp.lt.s32.totalorder %s19122_s27, 8 }
  0x42   : > { %s19333_s23 = scalar_select %p79_p9, %s19118_s26, %s81_s20  }
  0x43   : > { %p90_p6 = por %p89_p4, %p88_p1  ;;  %s555_s24 = sand.u32 1, %s19122_s27  }
  0x44   : > { %23973 = sst [smem:[#allocation39_spill]] %s19333_s23  ;;  %s19337_s30 = sand.u32 1, %s19118_s26  }
  0x45   : > { %s16610_s22 = smul.u32 1728, %s19337_s30  ;;  %p19340_p11 = pnand %p16746_p5, %p90_p6 }
  0x46   : > { %s16611_s15 = smul.u32 27648, %s19122_s27  ;;  %s23975_s2 = sld [smem:[#allocation64_spill]] }
  0x47   : > { %s23974_s1 = scalar_select %p19340_p11, 1, 0 }
  0x48   : > { %s559_s20 = scalar_lea.vmem [#allocation8], %s16610_s22  ;;  %s19352_s12 = scalar_lea.sflag [#allocation4], %s555_s24 }
  0x49   : > { %s566_s16 = sshll.u32 %s559_s20, 4  ;;  %p19358_p13 = pneg %p19340_p11  ;;  %s19350_s16 = int_to_ptr.vmem [resolvable:$true] %s566_s16 }
  0x4b   : > { %s23976_s17 = scalar_select %p19358_p13, 1, 0 }
  0x4c   : > { %s19348_s21 = scalar_lea.hbm %s23975_s2, %s16611_s15  ;;  %s18573_s22 = scalar_lea.hbm %s23975_s2, 221184 }
  0x4d   : > { %s18568_s0 = scalar_lea.hbm %s19348_s21, 27648  ;;  %p18574_p3 = scmp.lt.u32.totalorder %s19348_s21, %s23975_s2 }
  0x4e   : > { %p18569_p12 = scmp.ne.s32.totalorder %s19348_s21, %s18568_s0  ;;  %p18575_p7 = scmp.lt.u32.totalorder %s18573_s22, %s18568_s0 }
  0x4f   : > { %p18577_p1 = scmp.lt.u32.totalorder %s18568_s0, %s19348_s21 }
  0x50   : > { %p18571_p0 = pnand %p19358_p13, %p18569_p12  ;;  %p18576_p9 = por %p18575_p7, %p18574_p3 }
  0x52   : > { %p18572_p2 = pneg %p18571_p0  ;;  %p18578_p4 = por %p18577_p1, %p18576_p9 }
  0x54   : > { %p18579_p5 = pnand %p18578_p4, %p18572_p2 }
  0x56   : > { %18582 = shalt.err (!%p18579_p5)
}
  0x57   : > { %s18583_s24 = scalar_lea.vmem %s19350_s16, 27648  ;;  %s19127_s15 = smov [#allocation8]  }
  0x58   : > { %p18584_p6 = scmp.ne.s32.totalorder %s19350_s16, %s18583_s24  ;;  %s18588_s29 = sshll.u32 %s19127_s15, 4  ;;  %s18589_s29 = int_to_ptr.vmem [resolvable:$false] %s18588_s29 }
  0x59   : > { %s18590_s18 = scalar_lea.vmem %s18589_s29, 55296  ;;  %p18591_p8 = scmp.lt.s32.totalorder %s19350_s16, %s18589_s29 }
  0x5a   : > { %p18586_p12 = pnand %p18584_p6, %p19358_p13  ;;  %p18592_p10 = scmp.lt.s32.totalorder %s18590_s18, %s18583_s24 }
  0x5c   : > { %p18587_p0 = pneg %p18586_p12  ;;  %p18593_p3 = por %p18592_p10, %p18591_p8 }
  0x5e   : > { %p18594_p7 = pnand %p18593_p3, %p18587_p0 }
  0x60   : > { %18597 = shalt.err (!%p18594_p7)
}
  0x61   : > { %s19128_s0 = smov 576   ;;  %s19129_s22 = smov 36  }
  0x62   : > { %16709 = dma.hbm_to_vmem [thread:$0]  (!%p19340_p11), %s19348_s21, 27648, %s19350_s16, %s19352_s12, %s19128_s0, %s19128_s0, %s19129_s22  }
  0x63   : > { %s16612_s20 = smul.u32 576, %s19337_s30  ;;  %s23977_s3 = sld [smem:[#allocation65_spill]] }
  0x64   : > { %s16613_s15 = smul.u32 9216, %s19122_s27 }
  0x65   : > { %s19385_s2 = smul.u32 3, %s19337_s30  ;;  %s580_s23 = scalar_lea.vmem [#allocation9], %s16612_s20 }
  0x66   : > { %s587_s26 = sshll.u32 %s580_s23, 4  ;;  %s19392_s26 = int_to_ptr.vmem [resolvable:$true] %s587_s26 }
  0x69   : > { %s19390_s18 = scalar_lea.hbm %s23977_s3, %s16613_s15  ;;  %s18603_s0 = scalar_lea.hbm %s23977_s3, 73728 }
  0x6a   : > { %s18598_s25 = scalar_lea.hbm %s19390_s18, 9216  ;;  %p18604_p9 = scmp.lt.u32.totalorder %s19390_s18, %s23977_s3 }
  0x6b   : > { %p18599_p8 = scmp.ne.s32.totalorder %s19390_s18, %s18598_s25  ;;  %p18605_p1 = scmp.lt.u32.totalorder %s18603_s0, %s18598_s25 }
  0x6c   : > { %p18607_p5 = scmp.lt.u32.totalorder %s18598_s25, %s19390_s18 }
  0x6d   : > { %p18601_p10 = pnand %p18599_p8, %p19358_p13  ;;  %p18606_p4 = por %p18605_p1, %p18604_p9 }
  0x6f   : > { %p18602_p2 = pneg %p18601_p10  ;;  %p18608_p6 = por %p18607_p5, %p18606_p4 }
  0x71   : > { %p18609_p12 = pnand %p18608_p6, %p18602_p2 }
  0x73   : > { %18612 = shalt.err (!%p18609_p12)
}
  0x74   : > { %s18613_s23 = scalar_lea.vmem %s19392_s26, 9216  ;;  %s19130_s20 = smov [#allocation9]  }
  0x75   : > { %p18614_p0 = scmp.ne.s32.totalorder %s19392_s26, %s18613_s23  ;;  %s18618_s24 = sshll.u32 %s19130_s20, 4  ;;  %s18619_s24 = int_to_ptr.vmem [resolvable:$false] %s18618_s24 }
  0x76   : > { %s18620_s29 = scalar_lea.vmem %s18619_s24, 18432  ;;  %p18621_p8 = scmp.lt.s32.totalorder %s19392_s26, %s18619_s24 }
  0x77   : > { %p18616_p3 = pnand %p18614_p0, %p19358_p13  ;;  %p18622_p10 = scmp.lt.s32.totalorder %s18620_s29, %s18613_s23 }
  0x79   : > { %p18617_p7 = pneg %p18616_p3  ;;  %p18623_p9 = por %p18622_p10, %p18621_p8 }
  0x7b   : > { %p18624_p1 = pnand %p18623_p9, %p18617_p7 }
  0x7d   : > { %18627 = shalt.err (!%p18624_p1)
}
  0x7e   : > { %s23910_s25 = smov 192   ;;  %s23911_s21 = smov 12  }
  0x7f   : > { %16712 = dma.hbm_to_vmem [thread:$0]  (!%p19340_p11), %s19390_s18, 9216, %s19392_s26, %s19352_s12, %s23910_s25, %s23910_s25, %s23911_s21  }
  0x80   : > { %s19420_s16 = smul.u32 48, %s19122_s27  ;;  %s601_s0 = scalar_lea.vmem [#allocation10], %s19385_s2 }
  0x81   : > { %s609_s22 = sshll.u32 %s601_s0, 4  ;;  %s23978_s4 = sld [smem:[#allocation66_spill]]  ;;  %s19423_s22 = int_to_ptr.vmem [resolvable:$true] %s609_s22 }
  0x82   : > { %s23979_s5 = sld [smem:[#allocation67_spill]] }
  0x87   : > { %s607_s20 = scalar_lea.hbm %s23978_s4, %s19420_s16  ;;  %s18633_s0 = scalar_lea.hbm %s23978_s4, 384 }
  0x88   : > { %s19433_s3 = scalar_lea.hbm %s23979_s5, %s19420_s16  ;;  %s18628_s13 = scalar_lea.hbm %s607_s20, 48 }
  0x89   : > { %p18629_p2 = scmp.ne.s32.totalorder %s607_s20, %s18628_s13  ;;  %p18634_p6 = scmp.lt.u32.totalorder %s607_s20, %s23978_s4 }
  0x8a   : > { %p18635_p12 = scmp.lt.u32.totalorder %s18633_s0, %s18628_s13  ;;  %p18637_p3 = scmp.lt.u32.totalorder %s18628_s13, %s607_s20 }
  0x8b   : > { %p18631_p4 = pnand %p18629_p2, %p19358_p13 }
  0x8c   : > { %p18636_p0 = por %p18635_p12, %p18634_p6 }
  0x8d   : > { %p18632_p5 = pneg %p18631_p4 }
  0x8e   : > { %p18638_p7 = por %p18637_p3, %p18636_p0 }
  0x90   : > { %p18639_p8 = pnand %p18638_p7, %p18632_p5 }
  0x92   : > { %18642 = shalt.err (!%p18639_p8)
}
  0x93   : > { %s18643_s15 = scalar_lea.vmem %s19423_s22, 48  ;;  %s19133_s23 = smov [#allocation10]  }
  0x94   : > { %p18644_p10 = scmp.ne.s32.totalorder %s19423_s22, %s18643_s15  ;;  %s18648_s24 = sshll.u32 %s19133_s23, 4  ;;  %s18649_s24 = int_to_ptr.vmem [resolvable:$false] %s18648_s24 }
  0x95   : > { %s18650_s25 = scalar_lea.vmem %s18649_s24, 96  ;;  %p18651_p2 = scmp.lt.s32.totalorder %s19423_s22, %s18649_s24 }
  0x96   : > { %p18646_p9 = pnand %p18644_p10, %p19358_p13  ;;  %p18652_p4 = scmp.lt.s32.totalorder %s18650_s25, %s18643_s15 }
  0x98   : > { %p18647_p1 = pneg %p18646_p9  ;;  %p18653_p6 = por %p18652_p4, %p18651_p2 }
  0x9a   : > { %p18654_p12 = pnand %p18653_p6, %p18647_p1 }
  0x9c   : > { %18657 = shalt.err (!%p18654_p12)
}
  0x9d   : > { %16715 = dma.hbm_to_vmem [thread:$0]  (!%p19340_p11), %s607_s20, 48, %s19423_s22, %s19352_s12  }
  0x9e   : > { %s620_s13 = scalar_lea.vmem [#allocation11], %s19385_s2  ;;  %s23980_s6 = sld [smem:[#allocation68_spill]] }
  0x9f   : > { %s628_s21 = sshll.u32 %s620_s13, 4  ;;  %s18658_s0 = scalar_lea.hbm %s19433_s3, 48  ;;  %s629_s21 = int_to_ptr.vmem [resolvable:$true] %s628_s21 }
  0xa0   : > { %p18659_p5 = scmp.ne.s32.totalorder %s19433_s3, %s18658_s0  ;;  %s18663_s24 = scalar_lea.hbm %s23979_s5, 384 }
  0xa1   : > { %p18664_p7 = scmp.lt.u32.totalorder %s19433_s3, %s23979_s5  ;;  %p18665_p8 = scmp.lt.u32.totalorder %s18663_s24, %s18658_s0 }
  0xa2   : > { %p18661_p0 = pnand %p18659_p5, %p19358_p13  ;;  %p18667_p9 = scmp.lt.u32.totalorder %s18658_s0, %s19433_s3 }
  0xa3   : > { %p18666_p10 = por %p18665_p8, %p18664_p7 }
  0xa4   : > { %s19457_s18 = scalar_lea.hbm %s23980_s6, %s19420_s16  ;;  %p18662_p3 = pneg %p18661_p0 }
  0xa5   : > { %p18668_p1 = por %p18667_p9, %p18666_p10 }
  0xa7   : > { %p18669_p2 = pnand %p18668_p1, %p18662_p3 }
  0xa9   : > { %18672 = shalt.err (!%p18669_p2)
}
  0xaa   : > { %s18673_s22 = scalar_lea.vmem %s629_s21, 48  ;;  %s19134_s20 = smov [#allocation11]  }
  0xab   : > { %p18674_p4 = scmp.ne.s32.totalorder %s629_s21, %s18673_s22  ;;  %s18678_s13 = sshll.u32 %s19134_s20, 4  ;;  %s18679_s13 = int_to_ptr.vmem [resolvable:$false] %s18678_s13 }
  0xac   : > { %s18680_s29 = scalar_lea.vmem %s18679_s13, 96  ;;  %p18681_p5 = scmp.lt.s32.totalorder %s629_s21, %s18679_s13 }
  0xad   : > { %p18676_p6 = pnand %p18674_p4, %p19358_p13  ;;  %p18682_p0 = scmp.lt.s32.totalorder %s18680_s29, %s18673_s22 }
  0xaf   : > { %p18677_p12 = pneg %p18676_p6  ;;  %p18683_p11 = por %p18682_p0, %p18681_p5 }
  0xb1   : > { %p18684_p7 = pnand %p18683_p11, %p18677_p12 }
  0xb3   : > { %18687 = shalt.err (!%p18684_p7)
}
  0xb4   : > { %p23981_p8 = scmp.ne.s32.totalorder %s23974_s1, 0  ;;  %s639_s4 = scalar_lea.vmem [#allocation12], %s19385_s2 }
  0xb5   : > { %s647_s26 = sshll.u32 %s639_s4, 4  ;;  %s16620_s0 = smul.u32 2304, %s19337_s30  ;;  %s648_s26 = int_to_ptr.vmem [resolvable:$true] %s647_s26 }
  0xb6   : > { %16718 = dma.hbm_to_vmem [thread:$0]  (!%p23981_p8), %s19433_s3, 48, %s629_s21, %s19352_s12  }
  0xb7   : > { %s16621_s15 = smul.u32 36864, %s19122_s27  ;;  %s18688_s23 = scalar_lea.hbm %s19457_s18, 48 }
  0xb8   : > { %p18689_p11 = scmp.ne.s32.totalorder %s19457_s18, %s18688_s23  ;;  %s18693_s22 = scalar_lea.hbm %s23980_s6, 384 }
  0xb9   : > { %p18694_p9 = scmp.lt.u32.totalorder %s19457_s18, %s23980_s6  ;;  %p18695_p1 = scmp.lt.u32.totalorder %s18693_s22, %s18688_s23 }
  0xba   : > { %p18691_p3 = pnand %p18689_p11, %p19358_p13  ;;  %p18697_p4 = scmp.lt.u32.totalorder %s18688_s23, %s19457_s18 }
  0xbb   : > { %p18696_p2 = por %p18695_p1, %p18694_p9 }
  0xbc   : > { %p18692_p10 = pneg %p18691_p3 }
  0xbd   : > { %p18698_p6 = por %p18697_p4, %p18696_p2 }
  0xbf   : > { %p18699_p12 = pnand %p18698_p6, %p18692_p10 }
  0xc1   : > { %18702 = shalt.err (!%p18699_p12)
}
  0xc2   : > { %s18703_s3 = scalar_lea.vmem %s648_s26, 48  ;;  %s19135_s21 = smov [#allocation12]  }
  0xc3   : > { %p18704_p5 = scmp.ne.s32.totalorder %s648_s26, %s18703_s3  ;;  %s18708_s29 = sshll.u32 %s19135_s21, 4  ;;  %s18709_s29 = int_to_ptr.vmem [resolvable:$false] %s18708_s29 }
  0xc4   : > { %s18710_s4 = scalar_lea.vmem %s18709_s29, 96  ;;  %p18711_p11 = scmp.lt.s32.totalorder %s648_s26, %s18709_s29 }
  0xc5   : > { %p18706_p0 = pnand %p18704_p5, %p19358_p13  ;;  %p18712_p3 = scmp.lt.s32.totalorder %s18710_s4, %s18703_s3 }
  0xc7   : > { %p18707_p7 = pneg %p18706_p0  ;;  %p18713_p8 = por %p18712_p3, %p18711_p11 }
  0xc9   : > { %p18714_p1 = pnand %p18713_p8, %p18707_p7 }
  0xcb   : > { %18717 = shalt.err (!%p18714_p1)
}
  0xcc   : > { %p23982_p9 = scmp.ne.s32.totalorder %s23974_s1, 0  ;;  %s23983_s7 = sld [smem:[#allocation69_spill]] }
  0xcd   : > { %s658_s22 = scalar_lea.vmem [#allocation13], %s16620_s0 }
  0xce   : > { %16721 = dma.hbm_to_vmem [thread:$0]  (!%p23982_p9), %s19457_s18, 48, %s648_s26, %s19352_s12  }
  0xcf   : > { %s665_s20 = sshll.u32 %s658_s22, 4  ;;  %s19507_s20 = int_to_ptr.vmem [resolvable:$true] %s665_s20 }
  0xd2   : > { %s19503_s25 = scalar_lea.hbm %s23983_s7, %s16621_s15  ;;  %s18723_s3 = scalar_lea.hbm %s23983_s7, 294912 }
  0xd3   : > { %s18718_s13 = scalar_lea.hbm %s19503_s25, 36864  ;;  %p18724_p4 = scmp.lt.u32.totalorder %s19503_s25, %s23983_s7 }
  0xd4   : > { %p18719_p8 = scmp.ne.s32.totalorder %s19503_s25, %s18718_s13  ;;  %p18725_p6 = scmp.lt.u32.totalorder %s18723_s3, %s18718_s13 }
  0xd5   : > { %p18727_p5 = scmp.lt.u32.totalorder %s18718_s13, %s19503_s25 }
  0xd6   : > { %p18721_p10 = pnand %p18719_p8, %p19358_p13  ;;  %p18726_p12 = por %p18725_p6, %p18724_p4 }
  0xd8   : > { %p18722_p2 = pneg %p18721_p10  ;;  %p18728_p0 = por %p18727_p5, %p18726_p12 }
  0xda   : > { %p18729_p7 = pnand %p18728_p0, %p18722_p2 }
  0xdc   : > { %18732 = shalt.err (!%p18729_p7)
}
  0xdd   : > { %s18733_s4 = scalar_lea.vmem %s19507_s20, 36864  ;;  %s19136_s23 = smov [#allocation13]  }
  0xde   : > { %p18734_p11 = scmp.ne.s32.totalorder %s19507_s20, %s18733_s4  ;;  %s18738_s24 = sshll.u32 %s19136_s23, 4  ;;  %s18739_s24 = int_to_ptr.vmem [resolvable:$false] %s18738_s24 }
  0xdf   : > { %s18740_s22 = scalar_lea.vmem %s18739_s24, 73728  ;;  %p18741_p8 = scmp.lt.s32.totalorder %s19507_s20, %s18739_s24 }
  0xe0   : > { %p18736_p3 = pnand %p18734_p11, %p19358_p13  ;;  %p18742_p10 = scmp.lt.s32.totalorder %s18740_s22, %s18733_s4 }
  0xe2   : > { %p18737_p1 = pneg %p18736_p3  ;;  %p18743_p4 = por %p18742_p10, %p18741_p8 }
  0xe4   : > { %p18744_p6 = pnand %p18743_p4, %p18737_p1 }
  0xe6   : > { %18747 = shalt.err (!%p18744_p6)
}
  0xe7   : > { %s19137_s13 = smov 768   ;;  %s19138_s18 = smov 48  }
  0xe8   : > { %16724 = dma.hbm_to_vmem [thread:$0]  (!%p23982_p9), %s19503_s25, 36864, %s19507_s20, %s19352_s12, %s19137_s13, %s19137_s13, %s19138_s18  }
  0xe9   : > { %s16622_s26 = smul.u32 12, %s19337_s30  ;;  %s23984_s9 = sld [smem:[#allocation71_spill]] }
  0xea   : > { %s16623_s3 = smul.u32 192, %s19122_s27  ;;  %s698_s23 = scalar_lea.vmem [#allocation15], %s16620_s0 }
  0xeb   : > { %s705_s24 = sshll.u32 %s698_s23, 4  ;;  %s23985_s8 = sld [smem:[#allocation70_spill]]  ;;  %s19547_s24 = int_to_ptr.vmem [resolvable:$true] %s705_s24 }
  0xec   : > { %s679_s25 = scalar_lea.vmem [#allocation14], %s16622_s26 }
  0xed   : > { %s687_s20 = sshll.u32 %s679_s25, 4  ;;  %s688_s20 = int_to_ptr.vmem [resolvable:$true] %s687_s20 }
  0xef   : > { %s19538_s4 = scalar_lea.hbm %s23984_s9, %s16621_s15 }
  0xf1   : > { %s19545_s6 = scalar_lea.hbm %s23985_s8, %s16623_s3  ;;  %s18753_s5 = scalar_lea.hbm %s23985_s8, 1536 }
  0xf2   : > { %s18748_s27 = scalar_lea.hbm %s19545_s6, 192  ;;  %p18754_p0 = scmp.lt.u32.totalorder %s19545_s6, %s23985_s8 }
  0xf3   : > { %p18749_p2 = scmp.ne.s32.totalorder %s19545_s6, %s18748_s27  ;;  %p18755_p7 = scmp.lt.u32.totalorder %s18753_s5, %s18748_s27 }
  0xf4   : > { %p18757_p3 = scmp.lt.u32.totalorder %s18748_s27, %s19545_s6 }
  0xf5   : > { %p18751_p12 = pnand %p18749_p2, %p19358_p13  ;;  %p18756_p11 = por %p18755_p7, %p18754_p0 }
  0xf7   : > { %p18752_p5 = pneg %p18751_p12  ;;  %p18758_p1 = por %p18757_p3, %p18756_p11 }
  0xf9   : > { %p18759_p8 = pnand %p18758_p1, %p18752_p5 }
  0xfb   : > { %18762 = shalt.err (!%p18759_p8)
}
  0xfc   : > { %s18763_s18 = scalar_lea.vmem %s688_s20, 192  ;;  %s19139_s26 = smov [#allocation14]  }
  0xfd   : > { %p18764_p10 = scmp.ne.s32.totalorder %s688_s20, %s18763_s18  ;;  %s18768_s3 = sshll.u32 %s19139_s26, 4  ;;  %s18769_s3 = int_to_ptr.vmem [resolvable:$false] %s18768_s3 }
  0xfe   : > { %s18770_s21 = scalar_lea.vmem %s18769_s3, 384  ;;  %p18771_p2 = scmp.lt.s32.totalorder %s688_s20, %s18769_s3 }
  0xff   : > { %p18766_p4 = pnand %p18764_p10, %p19358_p13  ;;  %p18772_p12 = scmp.lt.s32.totalorder %s18770_s21, %s18763_s18 }
 0x101   : > { %p18767_p6 = pneg %p18766_p4  ;;  %p18773_p9 = por %p18772_p12, %p18771_p2 }
 0x103   : > { %p18774_p0 = pnand %p18773_p9, %p18767_p6 }
 0x105   : > { %18777 = shalt.err (!%p18774_p0)
}
 0x106   : > { %p23986_p7 = scmp.ne.s32.totalorder %s23974_s1, 0  ;;  %s18778_s29 = scalar_lea.hbm %s19538_s4, 36864 }
 0x107   : > { %p18779_p5 = scmp.ne.s32.totalorder %s19538_s4, %s18778_s29  ;;  %s18783_s25 = scalar_lea.hbm %s23984_s9, 294912 }
 0x108   : > { %16727 = dma.hbm_to_vmem [thread:$0]  (!%p23986_p7), %s19545_s6, 192, %s688_s20, %s19352_s12  }
 0x109   : > { %p18781_p11 = pnand %p18779_p5, %p19358_p13  ;;  %p18784_p9 = scmp.lt.u32.totalorder %s19538_s4, %s23984_s9 }
 0x10a   : > { %p18785_p1 = scmp.lt.u32.totalorder %s18783_s25, %s18778_s29  ;;  %p18787_p10 = scmp.lt.u32.totalorder %s18778_s29, %s19538_s4 }
 0x10b   : > { %p18782_p3 = pneg %p18781_p11 }
 0x10c   : > { %p18786_p8 = por %p18785_p1, %p18784_p9 }
 0x10e   : > { %p18788_p4 = por %p18787_p10, %p18786_p8 }
 0x110   : > { %p18789_p6 = pnand %p18788_p4, %p18782_p3 }
 0x112   : > { %18792 = shalt.err (!%p18789_p6)
}
 0x113   : > { %s18793_s6 = scalar_lea.vmem %s19547_s24, 36864  ;;  %s19140_s20 = smov [#allocation15]  }
 0x114   : > { %p18794_p2 = scmp.ne.s32.totalorder %s19547_s24, %s18793_s6  ;;  %s18798_s0 = sshll.u32 %s19140_s20, 4  ;;  %s18799_s0 = int_to_ptr.vmem [resolvable:$false] %s18798_s0 }
 0x115   : > { %s18800_s5 = scalar_lea.vmem %s18799_s0, 73728  ;;  %p18801_p5 = scmp.lt.s32.totalorder %s19547_s24, %s18799_s0 }
 0x116   : > { %p18796_p12 = pnand %p18794_p2, %p19358_p13  ;;  %p18802_p11 = scmp.lt.s32.totalorder %s18800_s5, %s18793_s6 }
 0x118   : > { %p18797_p0 = pneg %p18796_p12  ;;  %p18803_p9 = por %p18802_p11, %p18801_p5 }
 0x11a   : > { %p18804_p1 = pnand %p18803_p9, %p18797_p0 }
 0x11c   : > { %18807 = shalt.err (!%p18804_p1)
}
 0x11d   : > { %s23987_s15 = smov 12   ;;  %s23988_s13 = smov 192  }
 0x11e   : > { %16730 = dma.hbm_to_vmem [thread:$0]  (!%p23986_p7), %s19538_s4, 36864, %s19547_s24, %s19352_s12, %s23988_s13, %s23988_s13, %s23987_s15  }
 0x11f   : > { %s23989_s10 = sld [smem:[#allocation72_spill]]  ;;  %s719_s21 = scalar_lea.vmem [#allocation16], %s19385_s2 }
 0x120   : > { %s727_s29 = sshll.u32 %s719_s21, 4  ;;  %s19141_s23 = smov [#allocation6]   ;;  %s19599_s29 = int_to_ptr.vmem [resolvable:$true] %s727_s29 }
 0x121   : > { %s495_s22 = sshll.u32 %s19141_s23, 4  ;;  %s496_s22 = int_to_ptr.vmem [resolvable:$true] %s495_s22 }
 0x125   : > { %s19596_s3 = scalar_lea.hbm %s23989_s10, %s19420_s16  ;;  %s18813_s27 = scalar_lea.hbm %s23989_s10, 384 }
 0x126   : > { %s18808_s25 = scalar_lea.hbm %s19596_s3, 48  ;;  %p18814_p4 = scmp.lt.u32.totalorder %s19596_s3, %s23989_s10 }
 0x127   : > { %p18809_p3 = scmp.ne.s32.totalorder %s19596_s3, %s18808_s25  ;;  %p18815_p6 = scmp.lt.u32.totalorder %s18813_s27, %s18808_s25 }
 0x128   : > { %p18817_p12 = scmp.lt.u32.totalorder %s18808_s25, %s19596_s3 }
 0x129   : > { %p18811_p8 = pnand %p18809_p3, %p19358_p13  ;;  %p18816_p2 = por %p18815_p6, %p18814_p4 }
 0x12b   : > { %p18812_p10 = pneg %p18811_p8  ;;  %p18818_p0 = por %p18817_p12, %p18816_p2 }
 0x12d   : > { %p18819_p5 = pnand %p18818_p0, %p18812_p10 }
 0x12f   : > { %18822 = shalt.err (!%p18819_p5)
}
 0x130   : > { %s18823_s20 = scalar_lea.vmem %s19599_s29, 48  ;;  %s19142_s0 = smov [#allocation16]  }
 0x131   : > { %p18824_p11 = scmp.ne.s32.totalorder %s19599_s29, %s18823_s20  ;;  %s18828_s5 = sshll.u32 %s19142_s0, 4  ;;  %s18829_s5 = int_to_ptr.vmem [resolvable:$false] %s18828_s5 }
 0x132   : > { %s18830_s15 = scalar_lea.vmem %s18829_s5, 96  ;;  %p18831_p3 = scmp.lt.s32.totalorder %s19599_s29, %s18829_s5 }
 0x133   : > { %p18826_p9 = pnand %p18824_p11, %p19358_p13  ;;  %p18832_p8 = scmp.lt.s32.totalorder %s18830_s15, %s18823_s20 }
 0x135   : > { %p18827_p1 = pneg %p18826_p9  ;;  %p18833_p4 = por %p18832_p8, %p18831_p3 }
 0x137   : > { %p18834_p6 = pnand %p18833_p4, %p18827_p1 }
 0x139   : > { %18837 = shalt.err (!%p18834_p6)
}
 0x13a   : > { %16733 = dma.hbm_to_vmem [thread:$0]  (!%p23986_p7), %s19596_s3, 48, %s19599_s29, %s19352_s12  }
 0x13b   : > { %s23990_s26 = sld [smem:[#allocation63_spill]]  ;;  %p23992_p2 = scmp.ne.s32.totalorder %s23972_s28, 0 }
 0x141   : > { %s23991_s21 = smov %s23990_s26  ;;  %s18838_s23 = scalar_lea.hbm %s23990_s26, 512 }
 0x142   : > { %p18839_p10 = scmp.ne.s32.totalorder %s23991_s21, %s18838_s23  ;;  %p18845_p5 = scmp.lt.u32.totalorder %s18838_s23, %s23991_s21 }
 0x144   : > { %p18841_p12 = pnand %p18839_p10, %p23992_p2 }
 0x146   : > { %p18842_p0 = pneg %p18841_p12 }
 0x148   : > { %p18847_p11 = pnand %p18845_p5, %p18842_p0 }
 0x14a   : > { %18850 = shalt.err (!%p18847_p11)
}
 0x14b   : > { %s18851_s30 = scalar_lea.vmem %s496_s22, 512  ;;  %p18859_p8 = scmp.lt.s32.totalorder %s496_s22, %s496_s22 }
 0x14c   : > { %p18852_p9 = scmp.ne.s32.totalorder %s496_s22, %s18851_s30  ;;  %p18860_p4 = scmp.lt.s32.totalorder %s18851_s30, %s18851_s30 }
 0x14e   : > { %p18854_p1 = pnand %p18852_p9, %p23992_p2  ;;  %p18861_p6 = por %p18860_p4, %p18859_p8 }
 0x150   : > { %p18855_p3 = pneg %p18854_p1 }
 0x152   : > { %p18862_p7 = pnand %p18861_p6, %p18855_p3 }
 0x154   : > { %18865 = shalt.err (!%p18862_p7)
}
 0x155   : > { %s19143_s3 = smov 128   ;;  %s19144_s29 = smov 8  }
 0x156   : > { %p23993_p10 = scmp.ne.s32.totalorder %s23968_s19, 0  ;;  %s19145_s0 = smov [#allocation20]  }
 0x157   : > { %s520_s5 = sshll.u32 %s19145_s0, 4  ;;  %s19645_s18 = scalar_lea.hbm %s23878_s11, %s19420_s16  ;;  %s521_s5 = int_to_ptr.vmem [resolvable:$true] %s520_s5 }
 0x158   : > { %16693 = dma.hbm_to_vmem [thread:$0]  (!%p23993_p10), %s23991_s21, 512, %s496_s22, [#allocation7], %s19143_s3, %s19143_s3, %s19144_s29  }
 0x159   : > { %s18866_s25 = scalar_lea.hbm %s23881_s14, 48 }
 0x15a   : > { %p18867_p7 = scmp.ne.s32.totalorder %s23881_s14, %s18866_s25  ;;  %p18873_p5 = scmp.lt.u32.totalorder %s18866_s25, %s23881_s14 }
 0x15c   : > { %p18869_p12 = pnand %p18867_p7, %p23992_p2 }
 0x15e   : > { %p18870_p0 = pneg %p18869_p12 }
 0x160   : > { %p18875_p11 = pnand %p18873_p5, %p18870_p0 }
 0x162   : > { %18878 = shalt.err (!%p18875_p11)
}
 0x163   : > { %s18879_s30 = scalar_lea.vmem %s521_s5, 48  ;;  %s18886_s3 = scalar_lea.vmem %s521_s5, 64 }
 0x164   : > { %p18880_p9 = scmp.ne.s32.totalorder %s521_s5, %s18879_s30  ;;  %p18887_p8 = scmp.lt.s32.totalorder %s521_s5, %s521_s5 }
 0x165   : > { %p18888_p4 = scmp.lt.s32.totalorder %s18886_s3, %s18879_s30 }
 0x166   : > { %p18882_p1 = pnand %p18880_p9, %p23992_p2 }
 0x167   : > { %p18889_p6 = por %p18888_p4, %p18887_p8 }
 0x168   : > { %p18883_p3 = pneg %p18882_p1 }
 0x16a   : > { %p18890_p13 = pnand %p18889_p6, %p18883_p3 }
 0x16c   : > { %18893 = shalt.err (!%p18890_p13)
}
 0x16d   : > { %16699 = dma.hbm_to_vmem [thread:$0]  (!%p23993_p10), %s23881_s14, 48, %s521_s5, [#allocation21]  }
 0x16e   : > { %s738_s20 = scalar_lea.vmem [#allocation17], %s19385_s2  ;;  %s19146_s15 = smov [#allocation19]  }
 0x16f   : > { %s746_s0 = sshll.u32 %s738_s20, 4  ;;  %s509_s13 = sshll.u32 %s19146_s15, 4  ;;  %s19666_s0 = int_to_ptr.vmem [resolvable:$true] %s746_s0  ;;  %s510_s13 = int_to_ptr.vmem [resolvable:$true] %s509_s13 }
 0x170   : > { %s18894_s26 = scalar_lea.hbm %s19645_s18, 48  ;;  %p23994_p7 = scmp.ne.s32.totalorder %s23976_s17, 0 }
 0x171   : > { %p18895_p13 = scmp.ne.s32.totalorder %s19645_s18, %s18894_s26  ;;  %s18899_s4 = scalar_lea.hbm %s23878_s11, 384 }
 0x172   : > { %p18900_p5 = scmp.lt.u32.totalorder %s19645_s18, %s23878_s11  ;;  %p18901_p11 = scmp.lt.u32.totalorder %s18899_s4, %s18894_s26 }
 0x173   : > { %p18897_p12 = pnand %p18895_p13, %p23994_p7  ;;  %p18903_p1 = scmp.lt.u32.totalorder %s18894_s26, %s19645_s18 }
 0x174   : > { %p18902_p9 = por %p18901_p11, %p18900_p5 }
 0x175   : > { %p18898_p0 = pneg %p18897_p12 }
 0x176   : > { %p18904_p3 = por %p18903_p1, %p18902_p9 }
 0x178   : > { %p18905_p8 = pnand %p18904_p3, %p18898_p0 }
 0x17a   : > { %18908 = shalt.err (!%p18905_p8)
}
 0x17b   : > { %s18909_s5 = scalar_lea.vmem %s19666_s0, 48  ;;  %s19147_s27 = smov [#allocation17]  }
 0x17c   : > { %p18910_p4 = scmp.ne.s32.totalorder %s19666_s0, %s18909_s5  ;;  %s18914_s30 = sshll.u32 %s19147_s27, 4  ;;  %s18915_s30 = int_to_ptr.vmem [resolvable:$false] %s18914_s30 }
 0x17d   : > { %s18916_s3 = scalar_lea.vmem %s18915_s30, 96  ;;  %p18917_p12 = scmp.lt.s32.totalorder %s19666_s0, %s18915_s30 }
 0x17e   : > { %p18912_p6 = pnand %p18910_p4, %p23994_p7  ;;  %p18918_p10 = scmp.lt.s32.totalorder %s18916_s3, %s18909_s5 }
 0x180   : > { %p18913_p13 = pneg %p18912_p6  ;;  %p18919_p5 = por %p18918_p10, %p18917_p12 }
 0x182   : > { %p18920_p11 = pnand %p18919_p5, %p18913_p13 }
 0x184   : > { %18923 = shalt.err (!%p18920_p11)
}
 0x185   : > { %p23995_p0 = scmp.ne.s32.totalorder %s23974_s1, 0  ;;  %s23996_s20 = sld [smem:[#allocation74_spill]] }
 0x187   : > { %16736 = dma.hbm_to_vmem [thread:$0]  (!%p23995_p0), %s19645_s18, 48, %s19666_s0, %s19352_s12  }
 0x18b   : > { %s18924_s15 = scalar_lea.hbm %s23996_s20, 48 }
 0x18c   : > { %p18925_p9 = scmp.ne.s32.totalorder %s23996_s20, %s18924_s15  ;;  %p18931_p3 = scmp.lt.u32.totalorder %s18924_s15, %s23996_s20 }
 0x18e   : > { %p18927_p10 = pnand %p18925_p9, %p23992_p2 }
 0x190   : > { %p18928_p1 = pneg %p18927_p10 }
 0x192   : > { %p18933_p8 = pnand %p18931_p3, %p18928_p1 }
 0x194   : > { %18936 = shalt.err (!%p18933_p8)
}
 0x195   : > { %s18937_s24 = scalar_lea.vmem %s510_s13, 48  ;;  %s18944_s18 = scalar_lea.vmem %s510_s13, 64 }
 0x196   : > { %p18938_p4 = scmp.ne.s32.totalorder %s510_s13, %s18937_s24  ;;  %p18945_p12 = scmp.lt.s32.totalorder %s510_s13, %s510_s13 }
 0x197   : > { %p18946_p5 = scmp.lt.s32.totalorder %s18944_s18, %s18937_s24 }
 0x198   : > { %p18940_p6 = pnand %p18938_p4, %p23992_p2 }
 0x199   : > { %p18947_p11 = por %p18946_p5, %p18945_p12 }
 0x19a   : > { %p18941_p13 = pneg %p18940_p6 }
 0x19c   : > { %p18948_p0 = pnand %p18947_p11, %p18941_p13 }
 0x19e   : > { %18951 = shalt.err (!%p18948_p0)
}
 0x19f   : > { %p23997_p9 = scmp.ne.s32.totalorder %s23968_s19, 0  ;;  %s19148_s5 = smov [#allocation22]  }
 0x1a0   : > { %s530_s27 = sshll.u32 %s19148_s5, 4  ;;  %s23998_s29 = sld [smem:[#allocation75_spill]]  ;;  %s531_s27 = int_to_ptr.vmem [resolvable:$true] %s530_s27 }
 0x1a1   : > { %16696 = dma.hbm_to_vmem [thread:$0]  (!%p23997_p9), %s23996_s20, 48, %s510_s13, [#allocation7]  }
 0x1a6   : > { %s18952_s6 = scalar_lea.hbm %s23998_s29, 3072 }
 0x1a7   : > { %p18953_p10 = scmp.ne.s32.totalorder %s23998_s29, %s18952_s6  ;;  %p18959_p3 = scmp.lt.u32.totalorder %s18952_s6, %s23998_s29 }
 0x1a9   : > { %p18955_p0 = pnand %p18953_p10, %p23992_p2 }
 0x1ab   : > { %p18956_p1 = pneg %p18955_p0 }
 0x1ad   : > { %p18961_p8 = pnand %p18959_p3, %p18956_p1 }
 0x1af   : > { %18964 = shalt.err (!%p18961_p8)
}
 0x1b0   : > { %s18965_s13 = scalar_lea.vmem %s531_s27, 3072  ;;  %p18973_p12 = scmp.lt.s32.totalorder %s531_s27, %s531_s27 }
 0x1b1   : > { %p18966_p4 = scmp.ne.s32.totalorder %s531_s27, %s18965_s13  ;;  %p18974_p5 = scmp.lt.s32.totalorder %s18965_s13, %s18965_s13 }
 0x1b3   : > { %p18968_p6 = pnand %p18966_p4, %p23992_p2  ;;  %p18975_p11 = por %p18974_p5, %p18973_p12 }
 0x1b5   : > { %p18969_p13 = pneg %p18968_p6 }
 0x1b7   : > { %p18976_p7 = pnand %p18975_p11, %p18969_p13 }
 0x1b9   : > { %18979 = shalt.err (!%p18976_p7)
}
 0x1ba   : > { %s19149_s4 = smov 64   ;;  %s19150_s24 = smov 4  }
 0x1bb   : > { %16702 = dma.hbm_to_vmem [thread:$0]  (!%p23997_p9), %s23998_s29, 3072, %s531_s27, [#allocation21], %s19149_s4, %s19149_s4, %s19150_s24  }
 0x1bc   : > { %s19151_s22 = smov [#allocation23]   ;;  %s23999_s6 = sld [smem:[#allocation73_spill]] }
 0x1bd   : > { %s544_s5 = sshll.u32 %s19151_s22, 4  ;;  %s757_s26 = scalar_lea.vmem [#allocation18], %s19385_s2  ;;  %s545_s5 = int_to_ptr.vmem [resolvable:$true] %s544_s5 }
 0x1be   : > { %s765_s23 = sshll.u32 %s757_s26, 4  ;;  %s24000_s7 = sld [smem:[#allocation76_spill]]  ;;  %s766_s23 = int_to_ptr.vmem [resolvable:$true] %s765_s23 }
 0x1c2   : > { %s19730_s15 = scalar_lea.hbm %s23999_s6, %s19420_s16 }
 0x1c4   : > { %s18980_s8 = scalar_lea.hbm %s24000_s7, 16 }
 0x1c5   : > { %p18981_p7 = scmp.ne.s32.totalorder %s24000_s7, %s18980_s8  ;;  %p18987_p1 = scmp.lt.u32.totalorder %s18980_s8, %s24000_s7 }
 0x1c7   : > { %p18983_p10 = pnand %p18981_p7, %p23992_p2 }
 0x1c9   : > { %p18984_p0 = pneg %p18983_p10 }
 0x1cb   : > { %p18989_p3 = pnand %p18987_p1, %p18984_p0 }
 0x1cd   : > { %18992 = shalt.err (!%p18989_p3)
}
 0x1ce   : > { %s18993_s16 = scalar_lea.vmem %s545_s5, 16  ;;  %s19000_s2 = scalar_lea.vmem %s545_s5, 32 }
 0x1cf   : > { %p18994_p8 = scmp.ne.s32.totalorder %s545_s5, %s18993_s16  ;;  %p19001_p13 = scmp.lt.s32.totalorder %s545_s5, %s545_s5 }
 0x1d0   : > { %p19002_p12 = scmp.lt.s32.totalorder %s19000_s2, %s18993_s16 }
 0x1d1   : > { %p18996_p4 = pnand %p18994_p8, %p23992_p2 }
 0x1d2   : > { %p19003_p5 = por %p19002_p12, %p19001_p13 }
 0x1d3   : > { %p18997_p6 = pneg %p18996_p4 }
 0x1d5   : > { %p19004_p11 = pnand %p19003_p5, %p18997_p6 }
 0x1d7   : > { %19007 = shalt.err (!%p19004_p11)
}
 0x1d8   : > { %16705 = dma.hbm_to_vmem [thread:$0]  (!%p23997_p9), %s24000_s7, 16, %s545_s5, [#allocation24]  }
 0x1d9   : > { %s19008_s8 = scalar_lea.hbm %s19730_s15, 48  ;;  %p24001_p7 = scmp.ne.s32.totalorder %s23976_s17, 0 }
 0x1da   : > { %p19009_p2 = scmp.ne.s32.totalorder %s19730_s15, %s19008_s8  ;;  %s19013_s18 = scalar_lea.hbm %s23999_s6, 384 }
 0x1db   : > { %p19014_p1 = scmp.lt.u32.totalorder %s19730_s15, %s23999_s6  ;;  %p19015_p3 = scmp.lt.u32.totalorder %s19013_s18, %s19008_s8 }
 0x1dc   : > { %p19011_p10 = pnand %p19009_p2, %p24001_p7  ;;  %p19017_p4 = scmp.lt.u32.totalorder %s19008_s8, %s19730_s15 }
 0x1dd   : > { %p19016_p8 = por %p19015_p3, %p19014_p1 }
 0x1de   : > { %p19012_p0 = pneg %p19011_p10 }
 0x1df   : > { %p19018_p6 = por %p19017_p4, %p19016_p8 }
 0x1e1   : > { %p19019_p13 = pnand %p19018_p6, %p19012_p0 }
 0x1e3   : > { %19022 = shalt.err (!%p19019_p13)
}
 0x1e4   : > { %s19023_s22 = scalar_lea.vmem %s766_s23, 48  ;;  %s19152_s5 = smov [#allocation18]  }
 0x1e5   : > { %p19024_p9 = scmp.ne.s32.totalorder %s766_s23, %s19023_s22  ;;  %s19028_s30 = sshll.u32 %s19152_s5, 4  ;;  %s19029_s30 = int_to_ptr.vmem [resolvable:$false] %s19028_s30 }
 0x1e6   : > { %s19030_s3 = scalar_lea.vmem %s19029_s30, 96  ;;  %p19031_p11 = scmp.lt.s32.totalorder %s766_s23, %s19029_s30 }
 0x1e7   : > { %p19026_p12 = pnand %p19024_p9, %p24001_p7  ;;  %p19032_p2 = scmp.lt.s32.totalorder %s19030_s3, %s19023_s22 }
 0x1e9   : > { %p19027_p5 = pneg %p19026_p12  ;;  %p19033_p10 = por %p19032_p2, %p19031_p11 }
 0x1eb   : > { %p19034_p1 = pnand %p19033_p10, %p19027_p5 }
 0x1ed   : > { %19037 = shalt.err (!%p19034_p1)
}
 0x1ee   : > { %p24002_p3 = scmp.ne.s32.totalorder %s23974_s1, 0  ;;  %s24003_s26 = sld [smem:[#allocation37_spill]] }
 0x1f0   : > { %16739 = dma.hbm_to_vmem [thread:$0]  (!%p24002_p3), %s19730_s15, 48, %s766_s23, %s19352_s12  }
 0x1f4   : > { %p24004_p0 = scmp.ne.s32.totalorder %s24003_s26, 0 }
 0x1f6   : > { %774 = sbr.rel (%p24004_p0) target bundleno = 8513 (0x2141), region = 88 }
 0x1fd   : > { %s24005_s17 = sld [smem:[#allocation35_spill]] }
 0x203   : > { %p24006_p7 = scmp.eq.s32.totalorder %s24005_s17, 0 }
 0x205   : > { %19081 = dma.done.wait (%p24006_p7), [#allocation4], 3072   ;;  %p24007_p8 = pmov %p24006_p7 }
 0x206   : > { %p24008_p4 = pmov %p24006_p7 }
 0x207   : > { %19083 = vsyncadd (%p24007_p8), [#allocation4], 4294964224 }
 0x208   : > { %19085 = dma.done.wait (%p24008_p4), [#allocation7], 512   ;;  %p24009_p6 = pmov %p24008_p4 }
 0x209   : > { %s24010_s1 = sld [smem:[#allocation33_spill]]  ;;  %s24011_s25 = sld [smem:[#allocation36_spill]] }
 0x20a   : > { %19087 = vsyncadd (%p24009_p6), [#allocation7], 4294966784  ;;  %s784_s13 = sand.u32 1, %s24005_s17  }
 0x20b   : > { %s785_s23 = scalar_lea.sflag [#allocation4], %s784_s13 }
 0x20f   : > { %s786_s12 = sand.u32 1, %s24010_s1   ;;  %p24012_p13 = scmp.ne.s32.totalorder %s24011_s25, 0 }
 0x210   : > { %s16632_s15 = smul.u32 1728, %s786_s12 }
 0x212   : > { %s19781_s27 = scalar_lea.vmem [#allocation8], %s16632_s15 }
 0x213   : > { %19089 = dma.done.wait (%p24012_p13), %s785_s23, 111072  }
 0x214   : > { %19091 = vsyncadd (%p24012_p13), %s785_s23, 4294856224  ;;  %s16633_s4 = smul.u32 576, %s786_s12  ;;  %p24013_p9 = pmov %p24008_p4 }
 0x215   : > { %s19787_s16 = smul.u32 3, %s786_s12 }
 0x216   : > { %s16635_s2 = smul.u32 2304, %s786_s12  ;;  %s19789_s10 = scalar_lea.vmem [#allocation9], %s16633_s4 }
 0x217   : > { %s16636_s9 = smul.u32 12, %s786_s12  ;;  %s806_s8 = scalar_lea.vmem [#allocation10], %s19787_s16 }
 0x218   : > { %s815_s28 = scalar_lea.vmem [#allocation11], %s19787_s16  ;;  %s824_s24 = scalar_lea.vmem [#allocation12], %s19787_s16 }
 0x219   : > { %s19794_s18 = scalar_lea.vmem [#allocation13], %s16635_s2  ;;  %s19796_s19 = scalar_lea.vmem [#allocation14], %s16636_s9 }
 0x21a   : > { %s19798_s0 = scalar_lea.vmem [#allocation15], %s16635_s2  ;;  %s860_s22 = scalar_lea.vmem [#allocation16], %s19787_s16 }
 0x21b   : > { %s869_s5 = scalar_lea.vmem [#allocation17], %s19787_s16  ;;  %s878_s30 = scalar_lea.vmem [#allocation18], %s19787_s16 }
 0x21c   : > { %19093 = dma.done.wait (%p24013_p9), [#allocation7], 48   ;;  %p24014_p12 = pmov %p24008_p4 }
 0x21d   : > { %p24015_p5 = pmov %p24008_p4 }
 0x21e   : > { %19095 = vsyncadd (%p24014_p12), [#allocation7], 4294967248 }
 0x21f   : > { %19097 = dma.done.wait (%p24015_p5), [#allocation21], 3120   ;;  %p24016_p11 = pmov %p24008_p4 }
 0x220   : > { %p24017_p2 = pmov %p24008_p4 }
 0x221   : > { %19099 = vsyncadd (%p24016_p11), [#allocation21], 4294964176 }
 0x222   : > { %19101 = dma.done.wait (%p24017_p2), [#allocation24], 16   ;;  %p24018_p10 = pmov %p24017_p2 }
 0x223   : > { %p24019_p1 = scmp.ne.s32.totalorder %s24005_s17, 0 }
 0x224   : > { %19103 = vsyncadd (%p24018_p10), [#allocation24], 4294967280  ;;  %v995_v0 = vld [vmem:[#allocation3] sm:$0xff] (!%p24019_p1)  ;;  %v996_v1 = vld [vmem:[#allocation3 + $0x8] sm:$0xff] (!%p24019_p1) }
 0x225   : > { %994 = sbr.rel (%p24019_p1) target bundleno = 561 (0x231), region = 160  ;;  %v997_v2 = vld [vmem:[#allocation3 + $0x10] sm:$0xff] (!%p24019_p1)  ;;  %1019 = vst [vmem:[#allocation2] sm:$0xff] (!%p24019_p1), %v995_v0  ;;  %1020 = vst [vmem:[#allocation2 + $0x8] sm:$0xff] (!%p24019_p1), %v996_v1  ;;  %v998_v3 = vld [vmem:[#allocation3 + $0x18] sm:$0xff] (!%p24019_p1) }
 0x226   : > { %1021 = vst [vmem:[#allocation2 + $0x10] sm:$0xff] (!%p24019_p1), %v997_v2  ;;  %v999_v4 = vld [vmem:[#allocation3 + $0x20] sm:$0xff] (!%p24019_p1)  ;;  %v1000_v5 = vld [vmem:[#allocation3 + $0x28] sm:$0xff] (!%p24019_p1)  ;;  %1022 = vst [vmem:[#allocation2 + $0x18] sm:$0xff] (!%p24019_p1), %v998_v3 }
 0x227   : > { %1023 = vst [vmem:[#allocation2 + $0x20] sm:$0xff] (!%p24019_p1), %v999_v4  ;;  %1024 = vst [vmem:[#allocation2 + $0x28] sm:$0xff] (!%p24019_p1), %v1000_v5  ;;  %v1001_v6 = vld [vmem:[#allocation3 + $0x30] sm:$0xff] (!%p24019_p1)  ;;  %v1002_v7 = vld [vmem:[#allocation3 + $0x38] sm:$0xff] (!%p24019_p1) }
 0x228   : > { %v1003_v8 = vld [vmem:[#allocation3 + $0x40] sm:$0xff] (!%p24019_p1)  ;;  %1025 = vst [vmem:[#allocation2 + $0x30] sm:$0xff] (!%p24019_p1), %v1001_v6  ;;  %1026 = vst [vmem:[#allocation2 + $0x38] sm:$0xff] (!%p24019_p1), %v1002_v7  ;;  %v1004_v9 = vld [vmem:[#allocation3 + $0x48] sm:$0xff] (!%p24019_p1) }
 0x229   : > { %1027 = vst [vmem:[#allocation2 + $0x40] sm:$0xff] (!%p24019_p1), %v1003_v8  ;;  %v1005_v10 = vld [vmem:[#allocation3 + $0x50] sm:$0xff] (!%p24019_p1)  ;;  %v1006_v11 = vld [vmem:[#allocation3 + $0x58] sm:$0xff] (!%p24019_p1)  ;;  %1028 = vst [vmem:[#allocation2 + $0x48] sm:$0xff] (!%p24019_p1), %v1004_v9 }
 0x22a   : > { %1029 = vst [vmem:[#allocation2 + $0x50] sm:$0xff] (!%p24019_p1), %v1005_v10  ;;  %1030 = vst [vmem:[#allocation2 + $0x58] sm:$0xff] (!%p24019_p1), %v1006_v11  ;;  %v1007_v12 = vld [vmem:[#allocation3 + $0x60] sm:$0xff] (!%p24019_p1)  ;;  %v1008_v13 = vld [vmem:[#allocation3 + $0x68] sm:$0xff] (!%p24019_p1) }
 0x22b   : > { %v1009_v14 = vld [vmem:[#allocation3 + $0x70] sm:$0xff] (!%p24019_p1)  ;;  %1031 = vst [vmem:[#allocation2 + $0x60] sm:$0xff] (!%p24019_p1), %v1007_v12  ;;  %1032 = vst [vmem:[#allocation2 + $0x68] sm:$0xff] (!%p24019_p1), %v1008_v13  ;;  %v1010_v15 = vld [vmem:[#allocation3 + $0x78] sm:$0xff] (!%p24019_p1) }
 0x22c   : > { %1033 = vst [vmem:[#allocation2 + $0x70] sm:$0xff] %v1009_v14  ;;  %v1011_v16 = vld [vmem:[#allocation3 + $0x80] sm:$0xff]  ;;  %v1012_v17 = vld [vmem:[#allocation3 + $0x88] sm:$0xff]  ;;  %1034 = vst [vmem:[#allocation2 + $0x78] sm:$0xff] %v1010_v15 }
 0x22d   : > { %1035 = vst [vmem:[#allocation2 + $0x80] sm:$0xff] %v1011_v16  ;;  %1036 = vst [vmem:[#allocation2 + $0x88] sm:$0xff] %v1012_v17  ;;  %v1013_v18 = vld [vmem:[#allocation3 + $0x90] sm:$0xff]  ;;  %v1014_v19 = vld [vmem:[#allocation3 + $0x98] sm:$0xff] }
 0x22e   : > { %v1015_v20 = vld [vmem:[#allocation3 + $0xa0] sm:$0xff]  ;;  %1037 = vst [vmem:[#allocation2 + $0x90] sm:$0xff] %v1013_v18  ;;  %1038 = vst [vmem:[#allocation2 + $0x98] sm:$0xff] %v1014_v19  ;;  %v1016_v21 = vld [vmem:[#allocation3 + $0xa8] sm:$0xff] }
 0x22f   : > { %1039 = vst [vmem:[#allocation2 + $0xa0] sm:$0xff] %v1015_v20  ;;  %v1017_v22 = vld [vmem:[#allocation3 + $0xb0] sm:$0xff]  ;;  %v1018_v23 = vld [vmem:[#allocation3 + $0xb8] sm:$0xff]  ;;  %1040 = vst [vmem:[#allocation2 + $0xa8] sm:$0xff] %v1016_v21 }
 0x230   : > { %1041 = vst [vmem:[#allocation2 + $0xb0] sm:$0xff] %v1017_v22  ;;  %1042 = vst [vmem:[#allocation2 + $0xb8] sm:$0xff] %v1018_v23 }
 0x231 PF: > { %v16956_v24 = vld [vmem:[%s19781_s27 + $0x4] ss:$36 sps:$4 sm:$0xff]   ;;  %v23920_v26 = vmov 0   ;;  %v16959_v27 = vld [vmem:[%s19781_s27 + $0x4c] ss:$36 sps:$4 sm:$0xff]   ;;  %vm3177_vm0 = vcmask 392192  }
 0x232   : > { %v16958_v25 = vld [vmem:[%s19781_s27] ss:$36 sps:$4 sm:$0xff]   ;;  %2678 = vmatprep.mubr.bf16.mxu1 %v23920_v26  ;;  %2427 = vmatprep.subr.bf16.mxu0 %v16956_v24  ;;  %v16961_v28 = vld [vmem:[%s19781_s27 + $0x48] ss:$36 sps:$4 sm:$0xff]   ;;  %v16962_v29 = vld [vmem:[%s19781_s27 + $0x94] ss:$36 sps:$4 sm:$0xff]  }
 0x233   : > { %2428 = vmatpush1.bf16.msra.mxu0 %v16958_v25  ;;  %v16964_v30 = vld [vmem:[%s19781_s27 + $0x90] ss:$36 sps:$4 sm:$0xff]   ;;  %v16965_v31 = vld [vmem:[%s19781_s27 + $0xdc] ss:$36 sps:$4 sm:$0xff]   ;;  %v16968_v33 = vld [vmem:[%s19781_s27 + $0x124] ss:$36 sps:$4 sm:$0xff]  }
 0x234   : > { %2429 = vmatprep.subr.bf16.mxu0 %v16959_v27  ;;  %v16967_v32 = vld [vmem:[%s19781_s27 + $0xd8] ss:$36 sps:$4 sm:$0xff]   ;;  %v16970_v34 = vld [vmem:[%s19781_s27 + $0x120] ss:$36 sps:$4 sm:$0xff]   ;;  %v16971_v35 = vld [vmem:[%s19781_s27 + $0x16c] ss:$36 sps:$4 sm:$0xff]  }
 0x235   : > { %v16973_v36 = vld [vmem:[%s19781_s27 + $0x168] ss:$36 sps:$4 sm:$0xff]   ;;  %v16974_v37 = vld [vmem:[%s19781_s27 + $0x1b4] ss:$36 sps:$4 sm:$0xff]   ;;  %v1047_v39 = vld [vmem:[#allocation2 + $0x20] sm:$0xff]  ;;  %vm3316_vm1 = vcmask 261120  }
 0x236   : > { %v1044_v38 = vld [vmem:[#allocation2 + $0x8] sm:$0xff]  ;;  %v16976_v41 = vld [vmem:[%s19781_s27 + $0x1b0] ss:$36 sps:$4 sm:$0xff]   ;;  %v16977_v42 = vld [vmem:[%s19781_s27 + $0x1fc] ss:$36 sps:$4 sm:$0xff]   ;;  %s19154_s3 = smov 80  }
 0x237   : > { %2430 = vmatpush1.bf16.msra.mxu0 %v16961_v28  ;;  %v19831_v40 = vpack.c.bf16 %v1047_v39, %v1044_v38  ;;  %v16979_v43 = vld [vmem:[%s19781_s27 + $0x1f8] ss:$36 sps:$4 sm:$0xff]   ;;  %v16980_v44 = vld [vmem:[%s19781_s27 + $0x244] ss:$36 sps:$4 sm:$0xff]   ;;  %v16983_v46 = vld [vmem:[%s19781_s27 + $0x28c] ss:$36 sps:$4 sm:$0xff]  }
 0x238   : > { %2431 = vmatprep.subr.bf16.mxu0 %v16962_v29  ;;  %v16982_v45 = vld [vmem:[%s19781_s27 + $0x240] ss:$36 sps:$4 sm:$0xff]   ;;  %v16985_v47 = vld [vmem:[%s19781_s27 + $0x288] ss:$36 sps:$4 sm:$0xff]   ;;  %v16986_v48 = vld [vmem:[%s19781_s27 + $0x2d4] ss:$36 sps:$4 sm:$0xff]  }
 0x239   : > { %2459 = vmatprep.mubr.bf16.mxu0 %v19831_v40  ;;  %v16988_v49 = vld [vmem:[%s19781_s27 + $0x2d0] ss:$36 sps:$4 sm:$0xff]   ;;  %v16989_v50 = vld [vmem:[%s19781_s27 + $0x31c] ss:$36 sps:$4 sm:$0xff]   ;;  %v16992_v52 = vld [vmem:[%s19781_s27 + $0x364] ss:$36 sps:$4 sm:$0xff]  }
 0x23a   : > { %v16991_v51 = vld [vmem:[%s19781_s27 + $0x318] ss:$36 sps:$4 sm:$0xff]   ;;  %v16994_v53 = vld [vmem:[%s19781_s27 + $0x360] ss:$36 sps:$4 sm:$0xff]   ;;  %v16995_v54 = vld [vmem:[%s19781_s27 + $0x3ac] ss:$36 sps:$4 sm:$0xff]  }
 0x23b   : > { %2432 = vmatpush1.bf16.msra.mxu0 %v16964_v30  ;;  %v16997_v55 = vld [vmem:[%s19781_s27 + $0x3a8] ss:$36 sps:$4 sm:$0xff]   ;;  %v16998_v58 = vld [vmem:[%s19781_s27 + $0x3f4] ss:$36 sps:$4 sm:$0xff]   ;;  %v17001_v62 = vld [vmem:[%s19781_s27 + $0x43c] ss:$36 sps:$4 sm:$0xff]  }
 0x23c   : > { %2433 = vmatprep.subr.bf16.mxu0 %v16965_v31  ;;  %v17052_v56 = vld [vmem:[%s19781_s27 + $0x48c] ss:$36 sps:$4 sm:$0xff]   ;;  %v17058_v59 = vld [vmem:[%s19781_s27 + $0x4d4] ss:$36 sps:$4 sm:$0xff]   ;;  %v17064_v63 = vld [vmem:[%s19781_s27 + $0x51c] ss:$36 sps:$4 sm:$0xff]  }
 0x23d   : > { %v17054_v57 = vld [vmem:[%s19781_s27 + $0x488] ss:$36 sps:$4 sm:$0xff]   ;;  %2646 = vmatprep.subr.bf16.mxu1 %v17052_v56  ;;  %v17060_v60 = vld [vmem:[%s19781_s27 + $0x4d0] ss:$36 sps:$4 sm:$0xff]   ;;  %v17003_v0 = vld [vmem:[%s19781_s27 + $0x438] ss:$36 sps:$4 sm:$0xff]  }
 0x23e   : > { %2647 = vmatpush1.bf16.msra.mxu1 %v17054_v57  ;;  %v17000_v61 = vld [vmem:[%s19781_s27 + $0x3f0] ss:$36 sps:$4 sm:$0xff]   ;;  %v1043_v1 = vld [vmem:[#allocation2] sm:$0xff]  ;;  %v1046_v2 = vld [vmem:[#allocation2 + $0x18] sm:$0xff]  ;;  %s19155_s26 = smov 32   ;;  %s19156_s17 = smov 112  }
 0x23f   : > { %2434 = vmatpush1.bf16.msra.mxu0 %v16967_v32  ;;  %2648 = vmatprep.subr.bf16.mxu1 %v17058_v59  ;;  %v17006_v3 = vld [vmem:[%s19781_s27 + $0x484] ss:$36 sps:$4 sm:$0xff]   ;;  %v17066_v4 = vld [vmem:[%s19781_s27 + $0x518] ss:$36 sps:$4 sm:$0xff]   ;;  %v1053_v7 = vld [vmem:[#allocation2 + $0x50] sm:$0xff]  ;;  %v19861_v8 = vpack.c.bf16 %v1046_v2, %v1043_v1  ;;  %s19157_s1 = smov 64  }
 0x240   : > { %2435 = vmatprep.subr.bf16.mxu0 %v16968_v33  ;;  %v1050_v5 = vld [vmem:[#allocation2 + $0x38] sm:$0xff]  ;;  %v17070_v6 = vld [vmem:[%s19781_s27 + $0x564] ss:$36 sps:$4 sm:$0xff]   ;;  %v17009_v11 = vld [vmem:[%s19781_s27 + $0x4cc] ss:$36 sps:$4 sm:$0xff]   ;;  %s19158_s25 = smov 16  }
 0x241   : > { %v17072_v9 = vld [vmem:[%s19781_s27 + $0x560] ss:$36 sps:$4 sm:$0xff]   ;;  %v19866_v12 = vpack.c.bf16 %v1053_v7, %v1050_v5  ;;  %v17076_v13 = vld [vmem:[%s19781_s27 + $0x5ac] ss:$36 sps:$4 sm:$0xff]   ;;  %v17012_v17 = vld [vmem:[%s19781_s27 + $0x514] ss:$36 sps:$4 sm:$0xff]  }
 0x242   : > { %2649 = vmatpush1.bf16.msra.mxu1 %v17060_v60  ;;  %v17004_v10 = vld [vmem:[%s19781_s27 + $0x480] ss:$36 sps:$4 sm:$0xff]   ;;  %v17007_v14 = vld [vmem:[%s19781_s27 + $0x4c8] ss:$36 sps:$4 sm:$0xff]   ;;  %v1049_v15 = vld [vmem:[#allocation2 + $0x30] sm:$0xff]  ;;  %vm5062_vm2 = vcmask 130048  }
 0x243   : > { %2436 = vmatpush1.bf16.msra.mxu0 %v16970_v34  ;;  %2650 = vmatprep.subr.bf16.mxu1 %v17064_v63  ;;  %v1052_v16 = vld [vmem:[#allocation2 + $0x48] sm:$0xff]  ;;  %v17082_v20 = vld [vmem:[%s19781_s27 + $0x5f4] ss:$36 sps:$4 sm:$0xff]   ;;  %v1059_v21 = vld [vmem:[#allocation2 + $0x80] sm:$0xff]  ;;  %s19159_s13 = smov 96   ;;  %s19160_s12 = smov 48  }
 0x244   : > { %2437 = vmatprep.subr.bf16.mxu0 %v16971_v35  ;;  %v17078_v18 = vld [vmem:[%s19781_s27 + $0x5a8] ss:$36 sps:$4 sm:$0xff]   ;;  %v19875_v22 = vpack.c.bf16 %v1052_v16, %v1049_v15  ;;  %v17084_v23 = vld [vmem:[%s19781_s27 + $0x5f0] ss:$36 sps:$4 sm:$0xff]   ;;  %v17015_v25 = vld [vmem:[%s19781_s27 + $0x55c] ss:$36 sps:$4 sm:$0xff]  }
 0x245   : > { %v1056_v19 = vld [vmem:[#allocation2 + $0x68] sm:$0xff]  ;;  %v17010_v24 = vld [vmem:[%s19781_s27 + $0x510] ss:$36 sps:$4 sm:$0xff]   ;;  %v17088_v28 = vld [vmem:[%s19781_s27 + $0x63c] ss:$36 sps:$4 sm:$0xff]   ;;  %vm6455_vm3 = vcmask 523264  }
 0x246   : > { %2651 = vmatpush1.bf16.msra.mxu1 %v17066_v4  ;;  %v19880_v27 = vpack.c.bf16 %v1059_v21, %v1056_v19  ;;  %v17013_v29 = vld [vmem:[%s19781_s27 + $0x558] ss:$36 sps:$4 sm:$0xff]   ;;  %v1055_v30 = vld [vmem:[#allocation2 + $0x60] sm:$0xff]  ;;  %v17138_v59 = vld [vmem:[%s19781_s27 + $0xac] ss:$36 sps:$4 sm:$0xff]   ;;  %vm6464_vm4 = vcmask 916480  }
 0x247   : > { %2438 = vmatpush1.bf16.msra.mxu0 %v16973_v36  ;;  %2652 = vmatprep.subr.bf16.mxu1 %v17070_v6  ;;  %v1058_v31 = vld [vmem:[#allocation2 + $0x78] sm:$0xff]  ;;  %v17018_v32 = vld [vmem:[%s19781_s27 + $0x5a4] ss:$36 sps:$4 sm:$0xff]   ;;  %v1065_v36 = vld [vmem:[#allocation2 + $0xb0] sm:$0xff]  ;;  %vm6437_vm5 = vcmask 785408   ;;  %vm6481_vm6 = vcmask 654336  }
 0x248   : > { %2439 = vmatprep.subr.bf16.mxu0 %v16974_v37  ;;  %v17090_v33 = vld [vmem:[%s19781_s27 + $0x638] ss:$36 sps:$4 sm:$0xff]   ;;  %v17094_v35 = vld [vmem:[%s19781_s27 + $0x684] ss:$36 sps:$4 sm:$0xff]   ;;  %v19889_v37 = vpack.c.bf16 %v1058_v31, %v1055_v30  ;;  %v1057_v4 = vld [vmem:[#allocation2 + $0x70] sm:$0xff]  ;;  %s24102_s15 = sld [smem:[#allocation35_spill]] }
 0x249   : > { %v1062_v34 = vld [vmem:[#allocation2 + $0x98] sm:$0xff]  ;;  %v17016_v38 = vld [vmem:[%s19781_s27 + $0x5a0] ss:$36 sps:$4 sm:$0xff]   ;;  %v17136_v60 = vld [vmem:[%s19781_s27 + $0xa8] ss:$36 sps:$4 sm:$0xff]  }
 0x24a   : > { %2653 = vmatpush1.bf16.msra.mxu1 %v17072_v9  ;;  %v17096_v39 = vld [vmem:[%s19781_s27 + $0x680] ss:$36 sps:$4 sm:$0xff]   ;;  %v17144_v63 = vld [vmem:[%s19781_s27 + $0xf4] ss:$36 sps:$4 sm:$0xff]   ;;  %v17028_v1 = vld [vmem:[%s19781_s27 + $0x8] ss:$36 sps:$4 sm:$0xff]  }
 0x24b   : > { %2440 = vmatpush1.bf16.msra.mxu0 %v16976_v41  ;;  %2654 = vmatprep.subr.bf16.mxu1 %v17076_v13  ;;  %v17021_v41 = vld [vmem:[%s19781_s27 + $0x5ec] ss:$36 sps:$4 sm:$0xff]   ;;  %v17027_v56 = vld [vmem:[%s19781_s27 + $0x67c] ss:$36 sps:$4 sm:$0xff]   ;;  %v17033_v2 = vld [vmem:[%s19781_s27 + $0x54] ss:$36 sps:$4 sm:$0xff]  }
 0x24c   : > { %2441 = vmatprep.subr.bf16.mxu0 %v16977_v42  ;;  %v19894_v42 = vpack.c.bf16 %v1065_v36, %v1062_v34  ;;  %v1051_v57 = vld [vmem:[#allocation2 + $0x40] sm:$0xff]  ;;  %v1060_v5 = vld [vmem:[#allocation2 + $0x88] sm:$0xff]  ;;  %v17148_v7 = vld [vmem:[%s19781_s27 + $0x138] ss:$36 sps:$4 sm:$0xff]  }
 0x24d   : > { %v17150_v6 = vld [vmem:[%s19781_s27 + $0x13c] ss:$36 sps:$4 sm:$0xff]   ;;  %v17031_v9 = vld [vmem:[%s19781_s27 + $0x50] ss:$36 sps:$4 sm:$0xff]   ;;  %v17039_v15 = vld [vmem:[%s19781_s27 + $0xe4] ss:$36 sps:$4 sm:$0xff]  }
 0x24e   : > { %2655 = vmatpush1.bf16.msra.mxu1 %v17078_v18  ;;  %v17036_v13 = vld [vmem:[%s19781_s27 + $0x9c] ss:$36 sps:$4 sm:$0xff]   ;;  %v17162_v19 = vld [vmem:[%s19781_s27 + $0x1cc] ss:$36 sps:$4 sm:$0xff]   ;;  %v17045_v30 = vld [vmem:[%s19781_s27 + $0x174] ss:$36 sps:$4 sm:$0xff]  }
 0x24f   : > { %2442 = vmatpush1.bf16.msra.mxu0 %v16979_v43  ;;  %2656 = vmatprep.subr.bf16.mxu1 %v17082_v20  ;;  %v1045_v43 = vld [vmem:[#allocation2 + $0x10] sm:$0xff]  ;;  %v17154_v16 = vld [vmem:[%s19781_s27 + $0x180] ss:$36 sps:$4 sm:$0xff]   ;;  %v1066_v18 = vld [vmem:[#allocation2 + $0xb8] sm:$0xff]  ;;  %p15312_p3 = scmp.ne.s32.totalorder %s24102_s15, 7 }
 0x250   : > { %2443 = vmatprep.subr.bf16.mxu0 %v16980_v44  ;;  %v1048_v44 = vld [vmem:[#allocation2 + $0x28] sm:$0xff]  ;;  %v17037_v21 = vld [vmem:[%s19781_s27 + $0xe0] ss:$36 sps:$4 sm:$0xff]  }
 0x251   : > { %v17160_v20 = vld [vmem:[%s19781_s27 + $0x1c8] ss:$36 sps:$4 sm:$0xff]   ;;  %v17174_v31 = vld [vmem:[%s19781_s27 + $0x25c] ss:$36 sps:$4 sm:$0xff]  }
 0x252   : > { %2657 = vmatpush1.bf16.msra.mxu1 %v17084_v23  ;;  %v17180_v34 = vld [vmem:[%s19781_s27 + $0x2a4] ss:$36 sps:$4 sm:$0xff]  }
 0x253   : > { %2444 = vmatpush1.bf16.msra.mxu0 %v16982_v45  ;;  %2658 = vmatprep.subr.bf16.mxu1 %v17088_v28  ;;  %v17019_v45 = vld [vmem:[%s19781_s27 + $0x5e8] ss:$36 sps:$4 sm:$0xff]   ;;  %v17166_v28 = vld [vmem:[%s19781_s27 + $0x210] ss:$36 sps:$4 sm:$0xff]   ;;  %v17178_v36 = vld [vmem:[%s19781_s27 + $0x2a0] ss:$36 sps:$4 sm:$0xff]  }
 0x254   : > { %2445 = vmatprep.subr.bf16.mxu0 %v16983_v46  ;;  %v1061_v46 = vld [vmem:[#allocation2 + $0x90] sm:$0xff] }
 0x256   : > { %2659 = vmatpush1.bf16.msra.mxu1 %v17090_v33  ;;  %v17043_v33 = vld [vmem:[%s19781_s27 + $0x170] ss:$36 sps:$4 sm:$0xff]  }
 0x257   : > { %2446 = vmatpush1.bf16.msra.mxu0 %v16985_v47  ;;  %2660 = vmatprep.subr.bf16.mxu1 %v17094_v35  ;;  %v1064_v47 = vld [vmem:[#allocation2 + $0xa8] sm:$0xff]  ;;  %v17048_v35 = vld [vmem:[%s19781_s27 + $0x1bc] ss:$36 sps:$4 sm:$0xff]  }
 0x258   : > { %2447 = vmatprep.subr.bf16.mxu0 %v16986_v48  ;;  %v19899_v48 = vpack.c.bf16 %v1048_v44, %v1045_v43  ;;  %v17184_v43 = vld [vmem:[%s19781_s27 + $0x2e8] ss:$36 sps:$4 sm:$0xff]   ;;  %v17049_v44 = vld [vmem:[%s19781_s27 + $0x200] ss:$36 sps:$4 sm:$0xff]  }
 0x25a   : > { %2661 = vmatpush1.bf16.msra.mxu1 %v17096_v39  ;;  %v17051_v39 = vld [vmem:[%s19781_s27 + $0x204] ss:$36 sps:$4 sm:$0xff]  }
 0x25b   : > { %2448 = vmatpush1.bf16.msra.mxu0 %v16988_v49  ;;  %v17124_v49 = vld [vmem:[%s19781_s27 + $0x18] ss:$36 sps:$4 sm:$0xff]  }
 0x25c   : > { %2449 = vmatprep.subr.bf16.mxu0 %v16989_v50  ;;  %v17126_v50 = vld [vmem:[%s19781_s27 + $0x1c] ss:$36 sps:$4 sm:$0xff]  }
 0x25d   : > { %2679 = vmatmul.mubr.bf16.vlgmr.msra.gmra.mrb[0].mxu1 %v19899_v48  ;;  %2865 = vmatprep.subr.bf16.mxu1 %v17126_v50  ;;  %v17198_v50 = vld [vmem:[%s19781_s27 + $0x37c] ss:$36 sps:$4 sm:$0xff]  }
 0x25e   : > { %2688 = vmatprep.mubr.bf16.mxu1 %v23920_v26  ;;  %2866 = vmatpush1.bf16.msra.mxu1 %v17124_v49  ;;  %v17055_v49 = vld [vmem:[%s19781_s27 + $0x248] ss:$36 sps:$4 sm:$0xff]  }
 0x25f   : > { %2450 = vmatpush1.bf16.msra.mxu0 %v16991_v51  ;;  %v17024_v51 = vld [vmem:[%s19781_s27 + $0x634] ss:$36 sps:$4 sm:$0xff]  }
 0x260   : > { %2451 = vmatprep.subr.bf16.mxu0 %v16992_v52  ;;  %v17022_v52 = vld [vmem:[%s19781_s27 + $0x630] ss:$36 sps:$4 sm:$0xff]  }
 0x263   : > { %2452 = vmatpush1.bf16.msra.mxu0 %v16994_v53  ;;  %v19906_v53 = vpack.c.bf16 %v1064_v47, %v1061_v46  ;;  %v17057_v46 = vld [vmem:[%s19781_s27 + $0x24c] ss:$36 sps:$4 sm:$0xff]  }
 0x264   : > { %2453 = vmatprep.subr.bf16.mxu0 %v16995_v54  ;;  %v17130_v54 = vld [vmem:[%s19781_s27 + $0x60] ss:$36 sps:$4 sm:$0xff]   ;;  %v17190_v47 = vld [vmem:[%s19781_s27 + $0x330] ss:$36 sps:$4 sm:$0xff]  }
 0x267   : > { %2454 = vmatpush1.bf16.msra.mxu0 %v16997_v55  ;;  %v17132_v55 = vld [vmem:[%s19781_s27 + $0x64] ss:$36 sps:$4 sm:$0xff]  }
 0x268   : > { %2455 = vmatprep.subr.bf16.mxu0 %v16998_v58  ;;  %v1054_v58 = vld [vmem:[#allocation2 + $0x58] sm:$0xff]  ;;  %2867 = vmatprep.subr.bf16.mxu1 %v17132_v55 }
 0x269   : > { %2868 = vmatpush1.bf16.msra.mxu1 %v17130_v54  ;;  %v17061_v54 = vld [vmem:[%s19781_s27 + $0x290] ss:$36 sps:$4 sm:$0xff]   ;;  %v17069_v55 = vld [vmem:[%s19781_s27 + $0x2dc] ss:$36 sps:$4 sm:$0xff]  }
 0x26a   : > { %2869 = vmatprep.subr.bf16.mxu1 %v17138_v59  ;;  %v17210_v59 = vld [vmem:[%s19781_s27 + $0x40c] ss:$36 sps:$4 sm:$0xff]  }
 0x26b   : > { %2456 = vmatpush1.bf16.msra.mxu0 %v17000_v61  ;;  %v17025_v61 = vld [vmem:[%s19781_s27 + $0x678] ss:$36 sps:$4 sm:$0xff]  }
 0x26c   : > { %2457 = vmatprep.subr.bf16.mxu0 %v17001_v62  ;;  %v19917_v62 = vpack.c.bf16 %v1054_v58, %v1051_v57  ;;  %v17202_v57 = vld [vmem:[%s19781_s27 + $0x3c0] ss:$36 sps:$4 sm:$0xff]   ;;  %v17067_v58 = vld [vmem:[%s19781_s27 + $0x2d8] ss:$36 sps:$4 sm:$0xff]  }
 0x26d   : > { %2870 = vmatpush1.bf16.msra.mxu1 %v17136_v60  ;;  %v17075_v60 = vld [vmem:[%s19781_s27 + $0x324] ss:$36 sps:$4 sm:$0xff]  }
 0x26e   : > { %2689 = vmatmul.mubr.bf16.gmra.mrb[4].mxu1 %v19917_v62  ;;  %2871 = vmatprep.subr.bf16.mxu1 %v17144_v63  ;;  %v17073_v63 = vld [vmem:[%s19781_s27 + $0x320] ss:$36 sps:$4 sm:$0xff]  }
 0x26f   : > { %2458 = vmatpush1.bf16.msra.mxu0 %v17003_v0  ;;  %v17030_v0 = vld [vmem:[%s19781_s27 + $0xc] ss:$36 sps:$4 sm:$0xff]   ;;  %2698 = vmatprep.mubr.bf16.mxu1 %v23920_v26 }
 0x270   : > { %2500 = vmatprep.subr.bf16.mxu0 %v17006_v3  ;;  %v17142_v3 = vld [vmem:[%s19781_s27 + $0xf0] ss:$36 sps:$4 sm:$0xff]  }
 0x271   : > { %2872 = vmatpush1.bf16.msra.mxu1 %v17142_v3  ;;  %v17079_v3 = vld [vmem:[%s19781_s27 + $0x368] ss:$36 sps:$4 sm:$0xff]  }
 0x272   : > { %2460 = vmatmul.mubr.bf16.vlgmr.msra.gmra.mrb[0].mxu0 %v19861_v8  ;;  %2873 = vmatprep.subr.bf16.mxu1 %v17150_v6  ;;  %v17220_v6 = vld [vmem:[%s19781_s27 + $0x498] ss:$36 sps:$4 sm:$0xff]  }
 0x273   : > { %2501 = vmatpush1.bf16.msra.mxu0 %v17004_v10  ;;  %2469 = vmatprep.mubr.bf16.mxu0 %v19866_v12  ;;  %v19931_v10 = vpack.c.bf16 %v1060_v5, %v1057_v4  ;;  %v17222_v4 = vld [vmem:[%s19781_s27 + $0x49c] ss:$36 sps:$4 sm:$0xff]   ;;  %v17087_v5 = vld [vmem:[%s19781_s27 + $0x3b4] ss:$36 sps:$4 sm:$0xff]  }
 0x274   : > { %2502 = vmatprep.subr.bf16.mxu0 %v17009_v11  ;;  %v17156_v11 = vld [vmem:[%s19781_s27 + $0x184] ss:$36 sps:$4 sm:$0xff]  }
 0x275   : > { %2874 = vmatpush1.bf16.msra.mxu1 %v17148_v7  ;;  %v17085_v7 = vld [vmem:[%s19781_s27 + $0x3b0] ss:$36 sps:$4 sm:$0xff]  }
 0x276   : > { %2699 = vmatmul.mubr.bf16.gmra.mrb[8].mxu1 %v19931_v10  ;;  %2875 = vmatprep.subr.bf16.mxu1 %v17156_v11  ;;  %v17227_v11 = vld [vmem:[%s19781_s27 + $0x4e4] ss:$36 sps:$4 sm:$0xff]  }
 0x277   : > { %2503 = vmatpush1.bf16.msra.mxu0 %v17007_v14  ;;  %v17034_v14 = vld [vmem:[%s19781_s27 + $0x98] ss:$36 sps:$4 sm:$0xff]   ;;  %2708 = vmatprep.mubr.bf16.mxu1 %v23920_v26 }
 0x278   : > { %2504 = vmatprep.subr.bf16.mxu0 %v17012_v17  ;;  %v1063_v17 = vld [vmem:[#allocation2 + $0xa0] sm:$0xff] }
 0x279   : > { %2876 = vmatpush1.bf16.msra.mxu1 %v17154_v16  ;;  %v19945_v23 = vpack.c.bf16 %v1066_v18, %v1063_v17  ;;  %v17099_v16 = vld [vmem:[%s19781_s27 + $0x444] ss:$36 sps:$4 sm:$0xff]  }
 0x27a   : > { %2470 = vmatmul.mubr.bf16.gmra.mrb[4].mxu0 %v19875_v22  ;;  %2877 = vmatprep.subr.bf16.mxu1 %v17162_v19  ;;  %v17230_v17 = vld [vmem:[%s19781_s27 + $0x528] ss:$36 sps:$4 sm:$0xff]   ;;  %v17097_v18 = vld [vmem:[%s19781_s27 + $0x440] ss:$36 sps:$4 sm:$0xff]   ;;  %v17102_v19 = vld [vmem:[%s19781_s27 + $0x14] ss:$36 sps:$4 sm:$0xff]  }
 0x27b   : > { %2505 = vmatpush1.bf16.msra.mxu0 %v17010_v24  ;;  %2479 = vmatprep.mubr.bf16.mxu0 %v19880_v27  ;;  %v17168_v24 = vld [vmem:[%s19781_s27 + $0x214] ss:$36 sps:$4 sm:$0xff]  }
 0x27c   : > { %2506 = vmatprep.subr.bf16.mxu0 %v17015_v25  ;;  %v17042_v25 = vld [vmem:[%s19781_s27 + $0x12c] ss:$36 sps:$4 sm:$0xff]  }
 0x27d   : > { %2878 = vmatpush1.bf16.msra.mxu1 %v17160_v20  ;;  %v17237_v20 = vld [vmem:[%s19781_s27 + $0x574] ss:$36 sps:$4 sm:$0xff]  }
 0x27e   : > { %2709 = vmatmul.mubr.bf16.gmra.mrb[12].mxu1 %v19945_v23  ;;  %2879 = vmatprep.subr.bf16.mxu1 %v17168_v24  ;;  %v17100_v24 = vld [vmem:[%s19781_s27 + $0x10] ss:$36 sps:$4 sm:$0xff]  }
 0x27f   : > { %2507 = vmatpush1.bf16.msra.mxu0 %v17013_v29  ;;  %2897 = vmatprep.mubr.bf16.mxu1 %v19831_v40  ;;  %v17040_v29 = vld [vmem:[%s19781_s27 + $0x128] ss:$36 sps:$4 sm:$0xff]  }
 0x280   : > { %2508 = vmatprep.subr.bf16.mxu0 %v17018_v32  ;;  %v17172_v32 = vld [vmem:[%s19781_s27 + $0x258] ss:$36 sps:$4 sm:$0xff]  }
 0x281   : > { %2880 = vmatpush1.bf16.msra.mxu1 %v17166_v28  ;;  %v17240_v28 = vld [vmem:[%s19781_s27 + $0x5b8] ss:$36 sps:$4 sm:$0xff]  }
 0x282   : > { %2480 = vmatmul.mubr.bf16.gmra.mrb[8].mxu0 %v19889_v37  ;;  %2881 = vmatprep.subr.bf16.mxu1 %v17174_v31  ;;  %v17108_v31 = vld [vmem:[%s19781_s27 + $0xa4] ss:$36 sps:$4 sm:$0xff]  }
 0x283   : > { %2509 = vmatpush1.bf16.msra.mxu0 %v17016_v38  ;;  %2489 = vmatprep.mubr.bf16.mxu0 %v19894_v42  ;;  %v17046_v38 = vld [vmem:[%s19781_s27 + $0x1b8] ss:$36 sps:$4 sm:$0xff]  }
 0x284   : > { %2510 = vmatprep.subr.bf16.mxu0 %v17021_v41  ;;  %v17186_v41 = vld [vmem:[%s19781_s27 + $0x2ec] ss:$36 sps:$4 sm:$0xff]  }
 0x285   : > { %2882 = vmatpush1.bf16.msra.mxu1 %v17172_v32  ;;  %v17247_v32 = vld [vmem:[%s19781_s27 + $0x604] ss:$36 sps:$4 sm:$0xff]  }
 0x286   : > { %2883 = vmatprep.subr.bf16.mxu1 %v17180_v34  ;;  %v17106_v34 = vld [vmem:[%s19781_s27 + $0xa0] ss:$36 sps:$4 sm:$0xff]  }
 0x287   : > { %2511 = vmatpush1.bf16.msra.mxu0 %v17019_v45  ;;  %v17192_v45 = vld [vmem:[%s19781_s27 + $0x334] ss:$36 sps:$4 sm:$0xff]  }
 0x288   : > { %2512 = vmatprep.subr.bf16.mxu0 %v17024_v51  ;;  %v17063_v51 = vld [vmem:[%s19781_s27 + $0x294] ss:$36 sps:$4 sm:$0xff]  }
 0x289   : > { %2884 = vmatpush1.bf16.msra.mxu1 %v17178_v36  ;;  %v17250_v36 = vld [vmem:[%s19781_s27 + $0x648] ss:$36 sps:$4 sm:$0xff]  }
 0x28a   : > { %2490 = vmatmul.mubr.bf16.gmra.mrb[12].mxu0 %v19906_v53  ;;  %2885 = vmatprep.subr.bf16.mxu1 %v17186_v41  ;;  %v17114_v41 = vld [vmem:[%s19781_s27 + $0x134] ss:$36 sps:$4 sm:$0xff]  }
 0x28b   : > { %2513 = vmatpush1.bf16.msra.mxu0 %v17022_v52  ;;  %2532 = vmatprep.mubr.bf16.mxu0 %v23920_v26  ;;  %v17196_v52 = vld [vmem:[%s19781_s27 + $0x378] ss:$36 sps:$4 sm:$0xff]  }
 0x28c   : > { %2514 = vmatprep.subr.bf16.mxu0 %v17027_v56  ;;  %v17204_v56 = vld [vmem:[%s19781_s27 + $0x3c4] ss:$36 sps:$4 sm:$0xff]  }
 0x28d   : > { %2886 = vmatpush1.bf16.msra.mxu1 %v17184_v43  ;;  %v17257_v43 = vld [vmem:[%s19781_s27 + $0x694] ss:$36 sps:$4 sm:$0xff]  }
 0x28e   : > { %2887 = vmatprep.subr.bf16.mxu1 %v17192_v45  ;;  %v17112_v45 = vld [vmem:[%s19781_s27 + $0x130] ss:$36 sps:$4 sm:$0xff]  }
 0x28f   : > { %2515 = vmatpush1.bf16.msra.mxu0 %v17025_v61  ;;  %v17208_v61 = vld [vmem:[%s19781_s27 + $0x408] ss:$36 sps:$4 sm:$0xff]  }
 0x290   : > { %2573 = vmatprep.subr.bf16.mxu0 %v17030_v0  ;;  %v17081_v0 = vld [vmem:[%s19781_s27 + $0x36c] ss:$36 sps:$4 sm:$0xff]  }
 0x291   : > { %2888 = vmatpush1.bf16.msra.mxu1 %v17190_v47  ;;  %v17115_v47 = vld [vmem:[%s19781_s27 + $0x178] ss:$36 sps:$4 sm:$0xff]  }
 0x292   : > { %2533 = vmatmul.mubr.bf16.vlgmr.msra.gmra.mrb[0].mxu0 %v19899_v48  ;;  %2889 = vmatprep.subr.bf16.mxu1 %v17198_v50  ;;  %v17118_v50 = vld [vmem:[%s19781_s27 + $0x1c0] ss:$36 sps:$4 sm:$0xff]  }
 0x293   : > { %2574 = vmatpush1.bf16.msra.mxu0 %v17028_v1  ;;  %2542 = vmatprep.mubr.bf16.mxu0 %v23920_v26  ;;  %v17216_v1 = vld [vmem:[%s19781_s27 + $0x454] ss:$36 sps:$4 sm:$0xff]  }
 0x294   : > { %2575 = vmatprep.subr.bf16.mxu0 %v17033_v2  ;;  %v17214_v2 = vld [vmem:[%s19781_s27 + $0x450] ss:$36 sps:$4 sm:$0xff]  }
 0x295   : > { %2890 = vmatpush1.bf16.msra.mxu1 %v17196_v52  ;;  %v17121_v52 = vld [vmem:[%s19781_s27 + $0x208] ss:$36 sps:$4 sm:$0xff]  }
 0x296   : > { %2891 = vmatprep.subr.bf16.mxu1 %v17204_v56  ;;  %v17135_v56 = vld [vmem:[%s19781_s27 + $0x29c] ss:$36 sps:$4 sm:$0xff]  }
 0x297   : > { %2576 = vmatpush1.bf16.msra.mxu0 %v17031_v9  ;;  %v17093_v9 = vld [vmem:[%s19781_s27 + $0x3fc] ss:$36 sps:$4 sm:$0xff]  }
 0x298   : > { %2577 = vmatprep.subr.bf16.mxu0 %v17036_v13  ;;  %v17225_v13 = vld [vmem:[%s19781_s27 + $0x4e0] ss:$36 sps:$4 sm:$0xff]  }
 0x299   : > { %2892 = vmatpush1.bf16.msra.mxu1 %v17202_v57  ;;  %v17133_v57 = vld [vmem:[%s19781_s27 + $0x298] ss:$36 sps:$4 sm:$0xff]  }
 0x29a   : > { %2543 = vmatmul.mubr.bf16.gmra.mrb[4].mxu0 %v19917_v62  ;;  %2893 = vmatprep.subr.bf16.mxu1 %v17210_v59  ;;  %v17139_v59 = vld [vmem:[%s19781_s27 + $0x2e0] ss:$36 sps:$4 sm:$0xff]  }
 0x29b   : > { %2578 = vmatpush1.bf16.msra.mxu0 %v17034_v14  ;;  %2552 = vmatprep.mubr.bf16.mxu0 %v23920_v26  ;;  %v17091_v14 = vld [vmem:[%s19781_s27 + $0x3f8] ss:$36 sps:$4 sm:$0xff]  }
 0x29c   : > { %2579 = vmatprep.subr.bf16.mxu0 %v17039_v15  ;;  %v17232_v15 = vld [vmem:[%s19781_s27 + $0x52c] ss:$36 sps:$4 sm:$0xff]  }
 0x29d   : > { %2894 = vmatpush1.bf16.msra.mxu1 %v17208_v61  ;;  %v17145_v61 = vld [vmem:[%s19781_s27 + $0x328] ss:$36 sps:$4 sm:$0xff]  }
 0x29e   : > { %2895 = vmatprep.subr.bf16.mxu1 %v17216_v1  ;;  %v17159_v1 = vld [vmem:[%s19781_s27 + $0x3bc] ss:$36 sps:$4 sm:$0xff]  }
 0x29f   : > { %2580 = vmatpush1.bf16.msra.mxu0 %v17037_v21  ;;  %v17235_v21 = vld [vmem:[%s19781_s27 + $0x570] ss:$36 sps:$4 sm:$0xff]  }
 0x2a0   : > { %2581 = vmatprep.subr.bf16.mxu0 %v17042_v25  ;;  %v17105_v25 = vld [vmem:[%s19781_s27 + $0x5c] ss:$36 sps:$4 sm:$0xff]  }
 0x2a1   : > { %2896 = vmatpush1.bf16.msra.mxu1 %v17214_v2  ;;  %v17157_v2 = vld [vmem:[%s19781_s27 + $0x3b8] ss:$36 sps:$4 sm:$0xff]  }
 0x2a2   : > { %2553 = vmatmul.mubr.bf16.gmra.mrb[8].mxu0 %v19931_v10  ;;  %2938 = vmatprep.subr.bf16.mxu1 %v17222_v4  ;;  %v17163_v4 = vld [vmem:[%s19781_s27 + $0x400] ss:$36 sps:$4 sm:$0xff]  }
 0x2a3   : > { %2582 = vmatpush1.bf16.msra.mxu0 %v17040_v29  ;;  %2562 = vmatprep.mubr.bf16.mxu0 %v23920_v26  ;;  %v17242_v29 = vld [vmem:[%s19781_s27 + $0x5bc] ss:$36 sps:$4 sm:$0xff]  }
 0x2a4   : > { %2583 = vmatprep.subr.bf16.mxu0 %v17045_v30  ;;  %2898 = vmatmul.mubr.bf16.vlgmr.msra.gmra.mrb[16].mxu1 %v19861_v8  ;;  %v17103_v30 = vld [vmem:[%s19781_s27 + $0x58] ss:$36 sps:$4 sm:$0xff]  }
 0x2a5   : > { %2939 = vmatpush1.bf16.msra.mxu1 %v17220_v6  ;;  %2907 = vmatprep.mubr.bf16.mxu1 %v19866_v12  ;;  %v17169_v6 = vld [vmem:[%s19781_s27 + $0x448] ss:$36 sps:$4 sm:$0xff]  }
 0x2a6   : > { %2940 = vmatprep.subr.bf16.mxu1 %v17227_v11  ;;  %v17183_v11 = vld [vmem:[%s19781_s27 + $0x4dc] ss:$36 sps:$4 sm:$0xff]  }
 0x2a7   : > { %2584 = vmatpush1.bf16.msra.mxu0 %v17043_v33  ;;  %v17245_v33 = vld [vmem:[%s19781_s27 + $0x600] ss:$36 sps:$4 sm:$0xff]  }
 0x2a8   : > { %2585 = vmatprep.subr.bf16.mxu0 %v17048_v35  ;;  %v17111_v35 = vld [vmem:[%s19781_s27 + $0xec] ss:$36 sps:$4 sm:$0xff]  }
 0x2a9   : > { %2941 = vmatpush1.bf16.msra.mxu1 %v17225_v13  ;;  %v17181_v13 = vld [vmem:[%s19781_s27 + $0x4d8] ss:$36 sps:$4 sm:$0xff]  }
 0x2aa   : > { %2563 = vmatmul.mubr.bf16.gmra.mrb[12].mxu0 %v19945_v23  ;;  %2942 = vmatprep.subr.bf16.mxu1 %v17232_v15  ;;  %v17187_v15 = vld [vmem:[%s19781_s27 + $0x520] ss:$36 sps:$4 sm:$0xff]  }
 0x2ab   : > { %2586 = vmatpush1.bf16.msra.mxu0 %v17046_v38  ;;  %2605 = vmatprep.mubr.bf16.mxu0 %v19831_v40  ;;  %v17252_v38 = vld [vmem:[%s19781_s27 + $0x64c] ss:$36 sps:$4 sm:$0xff]  }
 0x2ac   : > { %2587 = vmatprep.subr.bf16.mxu0 %v17051_v39  ;;  %2908 = vmatmul.mubr.bf16.gmra.mrb[20].mxu1 %v19875_v22  ;;  %v17109_v39 = vld [vmem:[%s19781_s27 + $0xe8] ss:$36 sps:$4 sm:$0xff]  }
 0x2ad   : > { %2943 = vmatpush1.bf16.msra.mxu1 %v17230_v17  ;;  %2917 = vmatprep.mubr.bf16.mxu1 %v19880_v27  ;;  %v17193_v17 = vld [vmem:[%s19781_s27 + $0x568] ss:$36 sps:$4 sm:$0xff]  }
 0x2ae   : > { %2944 = vmatprep.subr.bf16.mxu1 %v17237_v20  ;;  %v17207_v20 = vld [vmem:[%s19781_s27 + $0x5fc] ss:$36 sps:$4 sm:$0xff]  }
 0x2af   : > { %2588 = vmatpush1.bf16.msra.mxu0 %v17049_v44  ;;  %v17255_v44 = vld [vmem:[%s19781_s27 + $0x690] ss:$36 sps:$4 sm:$0xff]  }
 0x2b0   : > { %2589 = vmatprep.subr.bf16.mxu0 %v17057_v46  ;;  %v17117_v46 = vld [vmem:[%s19781_s27 + $0x17c] ss:$36 sps:$4 sm:$0xff]  }
 0x2b1   : > { %2945 = vmatpush1.bf16.msra.mxu1 %v17235_v21  ;;  %v17205_v21 = vld [vmem:[%s19781_s27 + $0x5f8] ss:$36 sps:$4 sm:$0xff]  }
 0x2b2   : > { %2946 = vmatprep.subr.bf16.mxu1 %v17242_v29  ;;  %v17217_v29 = vld [vmem:[%s19781_s27 + $0x688] ss:$36 sps:$4 sm:$0xff]  }
 0x2b3   : > { %2590 = vmatpush1.bf16.msra.mxu0 %v17055_v49  ;;  %v17120_v49 = vld [vmem:[%s19781_s27 + $0x1c4] ss:$36 sps:$4 sm:$0xff]  }
 0x2b4   : > { %2591 = vmatprep.subr.bf16.mxu0 %v17063_v51  ;;  %2918 = vmatmul.mubr.bf16.gmra.mrb[24].mxu1 %v19889_v37  ;;  %v17123_v51 = vld [vmem:[%s19781_s27 + $0x20c] ss:$36 sps:$4 sm:$0xff]  }
 0x2b5   : > { %2947 = vmatpush1.bf16.msra.mxu1 %v17240_v28  ;;  %2927 = vmatprep.mubr.bf16.mxu1 %v19894_v42  ;;  %v17219_v28 = vld [vmem:[%s19781_s27 + $0x68c] ss:$36 sps:$4 sm:$0xff]  }
 0x2b6   : > { %2948 = vmatprep.subr.bf16.mxu1 %v17247_v32  ;;  %v17228_v32 = vld [vmem:[%s19781_s27 + $0x2a8] ss:$36 sps:$4 sm:$0xff]  }
 0x2b7   : > { %2592 = vmatpush1.bf16.msra.mxu0 %v17061_v54  ;;  %v17129_v54 = vld [vmem:[%s19781_s27 + $0x254] ss:$36 sps:$4 sm:$0xff]  }
 0x2b8   : > { %2593 = vmatprep.subr.bf16.mxu0 %v17069_v55  ;;  %v17127_v55 = vld [vmem:[%s19781_s27 + $0x250] ss:$36 sps:$4 sm:$0xff]  }
 0x2b9   : > { %2949 = vmatpush1.bf16.msra.mxu1 %v17245_v33  ;;  %v17229_v33 = vld [vmem:[%s19781_s27 + $0x68] ss:$36 sps:$4 sm:$0xff]  }
 0x2ba   : > { %2950 = vmatprep.subr.bf16.mxu1 %v17252_v38  ;;  %v17239_v38 = vld [vmem:[%s19781_s27 + $0xf8] ss:$36 sps:$4 sm:$0xff]  }
 0x2bb   : > { %2594 = vmatpush1.bf16.msra.mxu0 %v17067_v58  ;;  %v17141_v58 = vld [vmem:[%s19781_s27 + $0x2e4] ss:$36 sps:$4 sm:$0xff]  }
 0x2bc   : > { %2595 = vmatprep.subr.bf16.mxu0 %v17075_v60  ;;  %2928 = vmatmul.mubr.bf16.gmra.mrb[28].mxu1 %v19906_v53  ;;  %v17147_v60 = vld [vmem:[%s19781_s27 + $0x32c] ss:$36 sps:$4 sm:$0xff]  }
 0x2bd   : > { %2951 = vmatpush1.bf16.msra.mxu1 %v17250_v36  ;;  %2970 = vmatprep.mubr.bf16.mxu1 %v23920_v26  ;;  %v17238_v36 = vld [vmem:[%s19781_s27 + $0x338] ss:$36 sps:$4 sm:$0xff]  }
 0x2be   : > { %2952 = vmatprep.subr.bf16.mxu1 %v17257_v43  ;;  %v17248_v43 = vld [vmem:[%s19781_s27 + $0x3c8] ss:$36 sps:$4 sm:$0xff]  }
 0x2bf   : > { %2596 = vmatpush1.bf16.msra.mxu0 %v17073_v63  ;;  %v17153_v63 = vld [vmem:[%s19781_s27 + $0x374] ss:$36 sps:$4 sm:$0xff]  }
 0x2c0   : > { %2597 = vmatprep.subr.bf16.mxu0 %v17081_v0  ;;  %v17151_v0 = vld [vmem:[%s19781_s27 + $0x370] ss:$36 sps:$4 sm:$0xff]  }
 0x2c1   : > { %2953 = vmatpush1.bf16.msra.mxu1 %v17255_v44  ;;  %v17249_v44 = vld [vmem:[%s19781_s27 + $0x188] ss:$36 sps:$4 sm:$0xff]  }
 0x2c3   : > { %2598 = vmatpush1.bf16.msra.mxu0 %v17079_v3  ;;  %v17165_v3 = vld [vmem:[%s19781_s27 + $0x404] ss:$36 sps:$4 sm:$0xff]  }
 0x2c4   : > { %2599 = vmatprep.subr.bf16.mxu0 %v17087_v5  ;;  %2971 = vmatmul.mubr.bf16.vlgmr.msra.gmra.mrb[16].mxu1 %v19899_v48  ;;  %v17171_v5 = vld [vmem:[%s19781_s27 + $0x44c] ss:$36 sps:$4 sm:$0xff]  }
 0x2c5   : > { %2980 = vmatprep.mubr.bf16.mxu1 %v23920_v26 }
 0x2c7   : > { %2600 = vmatpush1.bf16.msra.mxu0 %v17085_v7  ;;  %v17177_v7 = vld [vmem:[%s19781_s27 + $0x494] ss:$36 sps:$4 sm:$0xff]  }
 0x2c8   : > { %2601 = vmatprep.subr.bf16.mxu0 %v17093_v9  ;;  %v17175_v9 = vld [vmem:[%s19781_s27 + $0x490] ss:$36 sps:$4 sm:$0xff]  }
 0x2cb   : > { %2602 = vmatpush1.bf16.msra.mxu0 %v17091_v14  ;;  %v17189_v14 = vld [vmem:[%s19781_s27 + $0x524] ss:$36 sps:$4 sm:$0xff]  }
 0x2cc   : > { %2603 = vmatprep.subr.bf16.mxu0 %v17099_v16  ;;  %2981 = vmatmul.mubr.bf16.gmra.mrb[20].mxu1 %v19917_v62  ;;  %v17195_v16 = vld [vmem:[%s19781_s27 + $0x56c] ss:$36 sps:$4 sm:$0xff]  }
 0x2cd   : > { %2990 = vmatprep.mubr.bf16.mxu1 %v23920_v26 }
 0x2cf   : > { %2604 = vmatpush1.bf16.msra.mxu0 %v17097_v18  ;;  %v17201_v18 = vld [vmem:[%s19781_s27 + $0x5b4] ss:$36 sps:$4 sm:$0xff]  }
 0x2d0   : > { %2719 = vmatprep.subr.bf16.mxu0 %v17102_v19  ;;  %v17199_v19 = vld [vmem:[%s19781_s27 + $0x5b0] ss:$36 sps:$4 sm:$0xff]  }
 0x2d2   : > { %2606 = vmatmul.mubr.bf16.vlgmr.msra.gmra.mrb[16].mxu0 %v19861_v8 }
 0x2d3   : > { %2720 = vmatpush1.bf16.msra.mxu0 %v17100_v24  ;;  %2615 = vmatprep.mubr.bf16.mxu0 %v19866_v12  ;;  %v17213_v24 = vld [vmem:[%s19781_s27 + $0x644] ss:$36 sps:$4 sm:$0xff]  }
 0x2d4   : > { %2721 = vmatprep.subr.bf16.mxu0 %v17105_v25  ;;  %2991 = vmatmul.mubr.bf16.gmra.mrb[24].mxu1 %v19931_v10  ;;  %v17211_v25 = vld [vmem:[%s19781_s27 + $0x640] ss:$36 sps:$4 sm:$0xff]  }
 0x2d5   : > { %3000 = vmatprep.mubr.bf16.mxu1 %v23920_v26 }
 0x2d7   : > { %2722 = vmatpush1.bf16.msra.mxu0 %v17103_v30  ;;  %v17223_v30 = vld [vmem:[%s19781_s27 + $0x260] ss:$36 sps:$4 sm:$0xff]  }
 0x2d8   : > { %2723 = vmatprep.subr.bf16.mxu0 %v17108_v31  ;;  %v17224_v31 = vld [vmem:[%s19781_s27 + $0x20] ss:$36 sps:$4 sm:$0xff]  }
 0x2da   : > { %2616 = vmatmul.mubr.bf16.gmra.mrb[20].mxu0 %v19875_v22 }
 0x2db   : > { %2724 = vmatpush1.bf16.msra.mxu0 %v17106_v34  ;;  %2625 = vmatprep.mubr.bf16.mxu0 %v19880_v27  ;;  %v17233_v34 = vld [vmem:[%s19781_s27 + $0x2f0] ss:$36 sps:$4 sm:$0xff]  }
 0x2dc   : > { %2725 = vmatprep.subr.bf16.mxu0 %v17111_v35  ;;  %3001 = vmatmul.mubr.bf16.gmra.mrb[28].mxu1 %v19945_v23  ;;  %v17234_v35 = vld [vmem:[%s19781_s27 + $0xb0] ss:$36 sps:$4 sm:$0xff]  }
 0x2df   : > { %2726 = vmatpush1.bf16.msra.mxu0 %v17109_v39  ;;  %v17243_v39 = vld [vmem:[%s19781_s27 + $0x380] ss:$36 sps:$4 sm:$0xff]  }
 0x2e0   : > { %2727 = vmatprep.subr.bf16.mxu0 %v17114_v41  ;;  %v17244_v41 = vld [vmem:[%s19781_s27 + $0x140] ss:$36 sps:$4 sm:$0xff]  }
 0x2e2   : > { %2626 = vmatmul.mubr.bf16.gmra.mrb[24].mxu0 %v19889_v37 }
 0x2e3   : > { %2728 = vmatpush1.bf16.msra.mxu0 %v17112_v45  ;;  %2635 = vmatprep.mubr.bf16.mxu0 %v19894_v42  ;;  %v17253_v45 = vld [vmem:[%s19781_s27 + $0x410] ss:$36 sps:$4 sm:$0xff]  }
 0x2e4   : > { %2729 = vmatprep.subr.bf16.mxu0 %v17117_v46  ;;  %v17254_v46 = vld [vmem:[%s19781_s27 + $0x1d0] ss:$36 sps:$4 sm:$0xff]  }
 0x2e7   : > { %2730 = vmatpush1.bf16.msra.mxu0 %v17115_v47  ;;  %v17258_v47 = vld [vmem:[%s19781_s27 + $0x458] ss:$36 sps:$4 sm:$0xff]  }
 0x2e8   : > { %2731 = vmatprep.subr.bf16.mxu0 %v17120_v49  ;;  %v17259_v49 = vld [vmem:[%s19781_s27 + $0x218] ss:$36 sps:$4 sm:$0xff]  }
 0x2ea   : > { %2636 = vmatmul.mubr.bf16.gmra.mrb[28].mxu0 %v19906_v53 }
 0x2eb   : > { %2732 = vmatpush1.bf16.msra.mxu0 %v17118_v50  ;;  %2751 = vmatprep.mubr.bf16.mxu0 %v19831_v40  ;;  %v17260_v50 = vld [vmem:[%s19781_s27 + $0x4a0] ss:$36 sps:$4 sm:$0xff]  }
 0x2ec   : > { %2733 = vmatprep.subr.bf16.mxu0 %v17123_v51  ;;  %v17261_v51 = vld [vmem:[%s19781_s27 + $0x4e8] ss:$36 sps:$4 sm:$0xff]  }
 0x2ef   : > { %2734 = vmatpush1.bf16.msra.mxu0 %v17121_v52  ;;  %v17262_v52 = vld [vmem:[%s19781_s27 + $0x530] ss:$36 sps:$4 sm:$0xff]  }
 0x2f0   : > { %2735 = vmatprep.subr.bf16.mxu0 %v17129_v54  ;;  %v17263_v54 = vld [vmem:[%s19781_s27 + $0x578] ss:$36 sps:$4 sm:$0xff]  }
 0x2f3   : > { %2736 = vmatpush1.bf16.msra.mxu0 %v17127_v55 }
 0x2f4   : > { %2737 = vmatprep.subr.bf16.mxu0 %v17135_v56  ;;  %v17264_v56 = vld [vmem:[%s19781_s27 + $0x5c0] ss:$36 sps:$4 sm:$0xff]  }
 0x2f7   : > { %2738 = vmatpush1.bf16.msra.mxu0 %v17133_v57 }
 0x2f8   : > { %2739 = vmatprep.subr.bf16.mxu0 %v17141_v58 }
 0x2fb   : > { %2740 = vmatpush1.bf16.msra.mxu0 %v17139_v59 }
 0x2fc   : > { %2741 = vmatprep.subr.bf16.mxu0 %v17147_v60 }
 0x2ff   : > { %2742 = vmatpush1.bf16.msra.mxu0 %v17145_v61 }
 0x300   : > { %2743 = vmatprep.subr.bf16.mxu0 %v17153_v63 }
 0x303   : > { %2744 = vmatpush1.bf16.msra.mxu0 %v17151_v0  ;;  %v17267_v0 = vld [vmem:[%s19781_s27 + $0x698] ss:$36 sps:$4 sm:$0xff]  }
 0x304   : > { %2745 = vmatprep.subr.bf16.mxu0 %v17159_v1 }
 0x307   : > { %2746 = vmatpush1.bf16.msra.mxu0 %v17157_v2 }
 0x308   : > { %2747 = vmatprep.subr.bf16.mxu0 %v17165_v3 }
 0x30b   : > { %2748 = vmatpush1.bf16.msra.mxu0 %v17163_v4 }
 0x30c   : > { %2749 = vmatprep.subr.bf16.mxu0 %v17171_v5 }
 0x30f   : > { %2750 = vmatpush1.bf16.msra.mxu0 %v17169_v6 }
 0x310   : > { %2792 = vmatprep.subr.bf16.mxu0 %v17177_v7 }
 0x312   : > { %2752 = vmatmul.mubr.bf16.vlgmr.msra.gmra.mrb[32].mxu0 %v19861_v8 }
 0x313   : > { %2793 = vmatpush1.bf16.msra.mxu0 %v17175_v9  ;;  %2761 = vmatprep.mubr.bf16.mxu0 %v19866_v12 }
 0x314   : > { %2794 = vmatprep.subr.bf16.mxu0 %v17183_v11 }
 0x317   : > { %2795 = vmatpush1.bf16.msra.mxu0 %v17181_v13 }
 0x318   : > { %2796 = vmatprep.subr.bf16.mxu0 %v17189_v14 }
 0x31a   : > { %2762 = vmatmul.mubr.bf16.gmra.mrb[36].mxu0 %v19875_v22 }
 0x31b   : > { %2797 = vmatpush1.bf16.msra.mxu0 %v17187_v15  ;;  %2771 = vmatprep.mubr.bf16.mxu0 %v19880_v27 }
 0x31c   : > { %2798 = vmatprep.subr.bf16.mxu0 %v17195_v16 }
 0x31f   : > { %2799 = vmatpush1.bf16.msra.mxu0 %v17193_v17 }
 0x320   : > { %2800 = vmatprep.subr.bf16.mxu0 %v17201_v18 }
 0x322   : > { %2772 = vmatmul.mubr.bf16.gmra.mrb[40].mxu0 %v19889_v37 }
 0x323   : > { %2801 = vmatpush1.bf16.msra.mxu0 %v17199_v19  ;;  %2781 = vmatprep.mubr.bf16.mxu0 %v19894_v42 }
 0x324   : > { %2802 = vmatprep.subr.bf16.mxu0 %v17207_v20 }
 0x327   : > { %2803 = vmatpush1.bf16.msra.mxu0 %v17205_v21 }
 0x328   : > { %2804 = vmatprep.subr.bf16.mxu0 %v17213_v24 }
 0x32a   : > { %2782 = vmatmul.mubr.bf16.gmra.mrb[44].mxu0 %v19906_v53 }
 0x32b   : > { %2805 = vmatpush1.bf16.msra.mxu0 %v17211_v25  ;;  %2824 = vmatprep.mubr.bf16.mxu0 %v23920_v26 }
 0x32c   : > { %2806 = vmatprep.subr.bf16.mxu0 %v17219_v28 }
 0x32f   : > { %2807 = vmatpush1.bf16.msra.mxu0 %v17217_v29 }
 0x330   : > { %15342 = vmatprep.subr.bf16.mxu0 %v17223_v30  ;;  %v20120_v55 = vpop.f32.mrb[0].mxu1 }
 0x332   : > { %2825 = vmatmul.mubr.bf16.vlgmr.msra.gmra.mrb[32].mxu0 %v19899_v48 }
 0x333   : > { %15343 = vmatpush3.bf16.msra.mxu0 %v17224_v31  ;;  %2834 = vmatprep.mubr.bf16.mxu0 %v23920_v26 }
 0x334   : > { %15344 = vmatprep.subr.bf16.mxu0 %v17228_v32 }
 0x337   : > { %15345 = vmatpush3.bf16.msra.mxu0 %v17229_v33 }
 0x338   : > { %15346 = vmatprep.subr.bf16.mxu0 %v17233_v34 }
 0x33a   : > { %2835 = vmatmul.mubr.bf16.gmra.mrb[36].mxu0 %v19917_v62 }
 0x33b   : > { %15347 = vmatpush3.bf16.msra.mxu0 %v17234_v35  ;;  %2844 = vmatprep.mubr.bf16.mxu0 %v23920_v26 }
 0x33c   : > { %15348 = vmatprep.subr.bf16.mxu0 %v17238_v36 }
 0x33f   : > { %15349 = vmatpush3.bf16.msra.mxu0 %v17239_v38 }
 0x340   : > { %15350 = vmatprep.subr.bf16.mxu0 %v17243_v39 }
 0x342   : > { %2845 = vmatmul.mubr.bf16.gmra.mrb[40].mxu0 %v19931_v10 }
 0x343   : > { %15351 = vmatpush3.bf16.msra.mxu0 %v17244_v41  ;;  %2854 = vmatprep.mubr.bf16.mxu0 %v23920_v26 }
 0x344   : > { %15352 = vmatprep.subr.bf16.mxu0 %v17248_v43 }
 0x347   : > { %15353 = vmatpush3.bf16.msra.mxu0 %v17249_v44 }
 0x348   : > { %15354 = vmatprep.subr.bf16.mxu0 %v17253_v45 }
 0x34a   : > { %2855 = vmatmul.mubr.bf16.gmra.mrb[44].mxu0 %v19945_v23 }
 0x34b   : > { %15355 = vmatpush3.bf16.msra.mxu0 %v17254_v46  ;;  %3043 = vmatprep.mubr.bf16.mxu0 %v19831_v40  ;;  %v20122_v40 = vpop.f32.mrb[1].mxu1 }
 0x34c   : > { %15356 = vmatprep.subr.bf16.mxu0 %v17258_v47  ;;  %v20126_v57 = vpop.f32.mrb[2].mxu1 }
 0x34f   : > { %15357 = vmatpush3.bf16.msra.mxu0 %v17259_v49 }
 0x350   : > { %15866 = vmatprep.subr.bf16.mxu0 %v17260_v50 }
 0x352   : > { %3044 = vmatmul.mubr.bf16.vlgmr.msra.gmra.mrb[48].mxu0 %v19861_v8  ;;  %v20129_v8 = vpop.f32.mrb[3].mxu1 }
 0x353   : > { %15867 = vmatpush3.bf16.msra.mxu0 %v17260_v50  ;;  %3051 = vmatprep.mubr.bf16.mxu0 %v19866_v12  ;;  %v17265_v12 = vld [vmem:[%s19781_s27 + $0x608] ss:$36 sps:$4 sm:$0xff]   ;;  %v20132_v58 = vpop.f32.mrb[4].mxu1 }
 0x354   : > { %15868 = vmatprep.subr.bf16.mxu0 %v17261_v51  ;;  %v20134_v59 = vpop.f32.mrb[5].mxu1 }
 0x355   : > { %v20138_v60 = vpop.f32.mrb[6].mxu1 }
 0x357   : > { %15869 = vmatpush3.bf16.msra.mxu0 %v17261_v51 }
 0x358   : > { %15870 = vmatprep.subr.bf16.mxu0 %v17262_v52 }
 0x35a   : > { %3052 = vmatmul.mubr.bf16.gmra.mrb[52].mxu0 %v19875_v22  ;;  %v17266_v22 = vld [vmem:[%s19781_s27 + $0x650] ss:$36 sps:$4 sm:$0xff]  }
 0x35b   : > { %15871 = vmatpush3.bf16.msra.mxu0 %v17262_v52  ;;  %3059 = vmatprep.mubr.bf16.mxu0 %v19880_v27  ;;  %v20141_v27 = vpop.f32.mrb[7].mxu1 }
 0x35c   : > { %15872 = vmatprep.subr.bf16.mxu0 %v17263_v54 }
 0x35f   : > { %15873 = vmatpush3.bf16.msra.mxu0 %v17263_v54 }
 0x360   : > { %15874 = vmatprep.subr.bf16.mxu0 %v17264_v56 }
 0x362   : > { %3060 = vmatmul.mubr.bf16.gmra.mrb[56].mxu0 %v19889_v37  ;;  %v20146_v37 = vpop.f32.mrb[8].mxu1 }
 0x363   : > { %15875 = vmatpush3.bf16.msra.mxu0 %v17264_v56  ;;  %3067 = vmatprep.mubr.bf16.mxu0 %v19894_v42  ;;  %v20150_v5 = vpop.f32.mrb[9].mxu1 }
 0x364   : > { %15876 = vmatprep.subr.bf16.mxu0 %v17265_v12  ;;  %v20155_v42 = vpop.f32.mrb[10].mxu1 }
 0x365   : > { %v2534_v61 = vpop.f32.mrb[0].mxu0  ;;  %v20158_v6 = vpop.f32.mrb[11].mxu1 }
 0x366   : > { %v2536_v63 = vpop.f32.mrb[1].mxu0  ;;  %v20162_v15 = vpop.f32.mrb[12].mxu1 }
 0x367   : > { %v2538_v1 = vpop.f32.mrb[2].mxu0  ;;  %15877 = vmatpush3.bf16.msra.mxu0 %v17265_v12  ;;  %v20166_v16 = vpop.f32.mrb[13].mxu1 }
 0x368   : > { %v20144_v2 = vpack.c.bf16 %v2538_v1, %v2534_v61  ;;  %v2540_v3 = vpop.f32.mrb[3].mxu0  ;;  %15878 = vmatprep.subr.bf16.mxu0 %v17266_v22  ;;  %v20169_v17 = vpop.f32.mrb[14].mxu1 }
 0x369   : > { %v20148_v4 = vpack.c.bf16 %v2540_v3, %v2536_v63 }
 0x36a   : > { %3068 = vmatmul.mubr.bf16.gmra.mrb[60].mxu0 %v19906_v53  ;;  %15894 = vmatprep.mubr.msk.bf16.mxu1 %vm3177_vm0, %v20144_v2 }
 0x36b   : > { %15879 = vmatpush3.bf16.msra.mxu0 %v17266_v22  ;;  %15882 = vmatprep.mubr.bf16.mxu0 %v19899_v48  ;;  %v20172_v48 = vpop.f32.mrb[15].mxu1 }
 0x36c   : > { %15880 = vmatprep.subr.bf16.mxu0 %v17267_v0 }
 0x36d   : > { %v2544_v7 = vpop.f32.mrb[4].mxu0 }
 0x36e   : > { %v2546_v9 = vpop.f32.mrb[5].mxu0 }
 0x36f   : > { %v2548_v11 = vpop.f32.mrb[6].mxu0  ;;  %15881 = vmatpush3.bf16.msra.mxu0 %v17267_v0 }
 0x370   : > { %v20160_v13 = vpack.c.bf16 %v2548_v11, %v2544_v7  ;;  %v2550_v14 = vpop.f32.mrb[7].mxu0 }
 0x371   : > { %v20164_v53 = vpack.c.bf16 %v2550_v14, %v2546_v9 }
 0x372   : > { %15883 = vmatmul.mubr.bf16.vlgmr.msra.gmra.mrb[64].mxu0 %v19917_v62 }
 0x373   : > { %15886 = vmatprep.mubr.bf16.mxu0 %v19931_v10 }
 0x375   : > { %v2554_v18 = vpop.f32.mrb[8].mxu0 }
 0x376   : > { %v2556_v19 = vpop.f32.mrb[9].mxu0 }
 0x377   : > { %v2558_v20 = vpop.f32.mrb[10].mxu0 }
 0x378   : > { %v20174_v21 = vpack.c.bf16 %v2558_v20, %v2554_v18  ;;  %v2560_v24 = vpop.f32.mrb[11].mxu0 }
 0x379   : > { %v20176_v25 = vpack.c.bf16 %v2560_v24, %v2556_v19 }
 0x37a   : > { %15887 = vmatmul.mubr.bf16.gmra.mrb[68].mxu0 %v19945_v23 }
 0x37b   : > { %15902 = vmatprep.mubr.msk.bf16.mxu0 %vm3177_vm0, %v20174_v21 }
 0x37d   : > { %v2564_v62 = vpop.f32.mrb[12].mxu0 }
 0x37e   : > { %v2566_v28 = vpop.f32.mrb[13].mxu0 }
 0x37f   : > { %v2568_v29 = vpop.f32.mrb[14].mxu0 }
 0x380   : > { %v20181_v30 = vpack.c.bf16 %v2568_v29, %v2564_v62  ;;  %v2570_v10 = vpop.f32.mrb[15].mxu0 }
 0x381   : > { %v20183_v31 = vpack.c.bf16 %v2570_v10, %v2566_v28 }
 0x3a5   : > { %v2607_v32 = vpop.f32.mrb[16].mxu0 }
 0x3a6   : > { %v2681_v33 = vadd.f32 %v20120_v55, %v2607_v32  ;;  %v2609_v34 = vpop.f32.mrb[17].mxu0 }
 0x3a7   : > { %v2683_v35 = vadd.f32 %v20122_v40, %v2609_v34  ;;  %v2611_v36 = vpop.f32.mrb[18].mxu0 }
 0x3a8   : > { %v2685_v23 = vadd.f32 %v20126_v57, %v2611_v36  ;;  %v2613_v38 = vpop.f32.mrb[19].mxu0 }
 0x3a9   : > { %v2687_v39 = vadd.f32 %v20129_v8, %v2613_v38 }
 0x3aa   : > { %v20189_v41 = vpack.c.bf16 %v2685_v23, %v2681_v33 }
 0x3ab   : > { %v20191_v43 = vpack.c.bf16 %v2687_v39, %v2683_v35 }
 0x3ad   : > { %v2617_v44 = vpop.f32.mrb[20].mxu0  ;;  %16578 = vmatprep.subr.msk.bf16.mxu1 %vm3177_vm0, %v20191_v43  ;;  %v3185_v45 = vsel %vm3177_vm0, %v20191_v43, 0 }
 0x3ae   : > { %v2691_v46 = vadd.f32 %v20132_v58, %v2617_v44  ;;  %v2619_v47 = vpop.f32.mrb[21].mxu0  ;;  %15891 = vmatpush3.bf16.xpose.msra.mxu1 %v3185_v45 }
 0x3af   : > { %v2693_v49 = vadd.f32 %v20134_v59, %v2619_v47  ;;  %v2621_v50 = vpop.f32.mrb[22].mxu0 }
 0x3b0   : > { %v2695_v51 = vadd.f32 %v20138_v60, %v2621_v50  ;;  %v2623_v52 = vpop.f32.mrb[23].mxu0 }
 0x3b1   : > { %v2697_v54 = vadd.f32 %v20141_v27, %v2623_v52  ;;  %v2972_v27 = vpop.f32.mrb[16].mxu1 }
 0x3b2   : > { %v20201_v55 = vpack.c.bf16 %v2695_v51, %v2691_v46  ;;  %v2974_v63 = vpop.f32.mrb[17].mxu1 }
 0x3b3   : > { %v20203_v40 = vpack.c.bf16 %v2697_v54, %v2693_v49  ;;  %v2976_v1 = vpop.f32.mrb[18].mxu1 }
 0x3b4   : > { %v20217_v7 = vpack.c.bf16 %v2976_v1, %v2972_v27 }
 0x3b5   : > { %v2627_v56 = vpop.f32.mrb[24].mxu0  ;;  %16579 = vmatprep.subr.msk.bf16.mxu1 %vm3177_vm0, %v20203_v40  ;;  %v3188_v57 = vsel %vm3177_vm0, %v20203_v40, 0 }
 0x3b6   : > { %v2701_v8 = vadd.f32 %v20146_v37, %v2627_v56  ;;  %v2629_v12 = vpop.f32.mrb[25].mxu0  ;;  %15893 = vmatpush3.bf16.xpose.msra.mxu1 %v3188_v57  ;;  %v2978_v37 = vpop.f32.mrb[19].mxu1 }
 0x3b7   : > { %v2703_v58 = vadd.f32 %v20150_v5, %v2629_v12  ;;  %v2631_v59 = vpop.f32.mrb[26].mxu0  ;;  %v20219_v9 = vpack.c.bf16 %v2978_v37, %v2974_v63  ;;  %15906 = vmatprep.subr.bf16.mxu1 %v20217_v7  ;;  %v2982_v24 = vpop.f32.mrb[20].mxu1 }
 0x3b8   : > { %v2705_v22 = vadd.f32 %v20155_v42, %v2631_v59  ;;  %v2633_v60 = vpop.f32.mrb[27].mxu0  ;;  %v2984_v28 = vpop.f32.mrb[21].mxu1 }
 0x3b9   : > { %v2707_v61 = vadd.f32 %v20158_v6, %v2633_v60  ;;  %v2986_v10 = vpop.f32.mrb[22].mxu1 }
 0x3ba   : > { %v20213_v0 = vpack.c.bf16 %v2705_v22, %v2701_v8  ;;  %v20237_v32 = vpack.c.bf16 %v2986_v10, %v2982_v24  ;;  %v2988_v33 = vpop.f32.mrb[23].mxu1 }
 0x3bb   : > { %v20215_v3 = vpack.c.bf16 %v2707_v61, %v2703_v58  ;;  %v20239_v34 = vpack.c.bf16 %v2988_v33, %v2984_v28 }
 0x3bd   : > { %v2637_v11 = vpop.f32.mrb[28].mxu0  ;;  %15895 = vmatmul.mubr.msk.bf16.vlgmr.msra.gmra.mrb[32].mxu1 %vm3177_vm0, %v20160_v13  ;;  %16580 = vmatprep.subr.msk.bf16.mxu0 %vm3177_vm0, %v20215_v3  ;;  %v3246_v5 = vsel %vm3177_vm0, %v20215_v3, 0 }
 0x3be   : > { %v2711_v42 = vadd.f32 %v20162_v15, %v2637_v11  ;;  %v2639_v6 = vpop.f32.mrb[29].mxu0  ;;  %15899 = vmatpush3.bf16.xpose.msra.mxu0 %v3246_v5  ;;  %15907 = vmatpush3.bf16.msra.mxu1 %v20217_v7 }
 0x3bf   : > { %v2713_v14 = vadd.f32 %v20166_v16, %v2639_v6  ;;  %v2641_v18 = vpop.f32.mrb[30].mxu0  ;;  %15908 = vmatprep.subr.bf16.mxu1 %v20237_v32 }
 0x3c0   : > { %v2715_v19 = vadd.f32 %v20169_v17, %v2641_v18  ;;  %v2643_v20 = vpop.f32.mrb[31].mxu0  ;;  %v2992_v17 = vpop.f32.mrb[24].mxu1 }
 0x3c1   : > { %v2717_v62 = vadd.f32 %v20172_v48, %v2643_v20  ;;  %v2994_v48 = vpop.f32.mrb[25].mxu1 }
 0x3c2   : > { %v20233_v29 = vpack.c.bf16 %v2715_v19, %v2711_v42  ;;  %15909 = vmatpush3.bf16.msra.mxu1 %v20237_v32  ;;  %v2996_v35 = vpop.f32.mrb[26].mxu1 }
 0x3c3   : > { %v20235_v15 = vpack.c.bf16 %v2717_v62, %v2713_v14  ;;  %v20247_v36 = vpack.c.bf16 %v2996_v35, %v2992_v17  ;;  %v2998_v23 = vpop.f32.mrb[27].mxu1 }
 0x3c4   : > { %v20249_v38 = vpack.c.bf16 %v2998_v23, %v2994_v48  ;;  %v3002_v39 = vpop.f32.mrb[28].mxu1 }
 0x3c5   : > { %16581 = vmatprep.subr.msk.bf16.mxu0 %vm3177_vm0, %v20235_v15  ;;  %v3249_v16 = vsel %vm3177_vm0, %v20235_v15, 0  ;;  %15914 = vmatprep.subr.bf16.mxu1 %v20247_v36  ;;  %v3004_v44 = vpop.f32.mrb[29].mxu1 }
 0x3c6   : > { %15901 = vmatpush3.bf16.xpose.msra.mxu0 %v3249_v16  ;;  %v3006_v45 = vpop.f32.mrb[30].mxu1 }
 0x3c7   : > { %v20254_v46 = vpack.c.bf16 %v3006_v45, %v3002_v39  ;;  %v3008_v47 = vpop.f32.mrb[31].mxu1 }
 0x3c8   : > { %v20256_v49 = vpack.c.bf16 %v3008_v47, %v3004_v44 }
 0x3cd   : > { %15903 = vmatmul.mubr.msk.bf16.vlgmr.msra.gmra.mrb[72].mxu0 %vm3177_vm0, %v20181_v30 }
 0x405   : > { %v2826_v50 = vpop.f32.mrb[32].mxu0 }
 0x406   : > { %v2828_v51 = vpop.f32.mrb[33].mxu0 }
 0x407   : > { %v2830_v52 = vpop.f32.mrb[34].mxu0 }
 0x408   : > { %v20258_v54 = vpack.c.bf16 %v2830_v52, %v2826_v50  ;;  %v2832_v56 = vpop.f32.mrb[35].mxu0 }
 0x409   : > { %v20260_v57 = vpack.c.bf16 %v2832_v56, %v2828_v51 }
 0x40d   : > { %v2836_v8 = vpop.f32.mrb[36].mxu0 }
 0x40e   : > { %v2838_v12 = vpop.f32.mrb[37].mxu0 }
 0x40f   : > { %v2840_v58 = vpop.f32.mrb[38].mxu0 }
 0x410   : > { %v20262_v59 = vpack.c.bf16 %v2840_v58, %v2836_v8  ;;  %v2842_v22 = vpop.f32.mrb[39].mxu0 }
 0x411   : > { %v20264_v60 = vpack.c.bf16 %v2842_v22, %v2838_v12 }
 0x415   : > { %v2846_v27 = vpop.f32.mrb[40].mxu0 }
 0x416   : > { %v2848_v61 = vpop.f32.mrb[41].mxu0 }
 0x417   : > { %v2850_v63 = vpop.f32.mrb[42].mxu0 }
 0x418   : > { %v20266_v1 = vpack.c.bf16 %v2850_v63, %v2846_v27  ;;  %v2852_v37 = vpop.f32.mrb[43].mxu0 }
 0x419   : > { %v20268_v11 = vpack.c.bf16 %v2852_v37, %v2848_v61 }
 0x41d   : > { %v2856_v5 = vpop.f32.mrb[44].mxu0 }
 0x41e   : > { %v2858_v42 = vpop.f32.mrb[45].mxu0 }
 0x41f   : > { %v2860_v6 = vpop.f32.mrb[46].mxu0 }
 0x420   : > { %v20270_v14 = vpack.c.bf16 %v2860_v6, %v2856_v5  ;;  %v2862_v18 = vpop.f32.mrb[47].mxu0 }
 0x421   : > { %v20272_v19 = vpack.c.bf16 %v2862_v18, %v2858_v42 }
 0x425   : > { %v15358_v20 = vpop.f32.mrb[48].mxu0 }
 0x426   : > { %v15359_v24 = vpop.f32.mrb[49].mxu0 }
 0x427   : > { %v15360_v62 = vadd.f32 %v15359_v24, %v15358_v20  ;;  %v15361_v28 = vpop.f32.mrb[50].mxu0 }
 0x428   : > { %v15362_v10 = vpop.f32.mrb[51].mxu0 }
 0x429   : > { %v15363_v33 = vadd.f32 %v15362_v10, %v15361_v28 }
 0x42d   : > { %v15364_v16 = vpop.f32.mrb[52].mxu0 }
 0x42e   : > { %v15365_v17 = vpop.f32.mrb[53].mxu0 }
 0x42f   : > { %v15366_v48 = vadd.f32 %v15365_v17, %v15364_v16  ;;  %v15367_v35 = vpop.f32.mrb[54].mxu0 }
 0x430   : > { %v15368_v23 = vpop.f32.mrb[55].mxu0 }
 0x431   : > { %v15369_v39 = vadd.f32 %v15368_v23, %v15367_v35 }
 0x435   : > { %v15370_v44 = vpop.f32.mrb[56].mxu0 }
 0x436   : > { %v15371_v45 = vpop.f32.mrb[57].mxu0 }
 0x437   : > { %v15372_v47 = vadd.f32 %v15371_v45, %v15370_v44  ;;  %v15373_v50 = vpop.f32.mrb[58].mxu0 }
 0x438   : > { %v15374_v51 = vpop.f32.mrb[59].mxu0 }
 0x439   : > { %v15375_v52 = vadd.f32 %v15374_v51, %v15373_v50 }
 0x43d   : > { %v15376_v56 = vpop.f32.mrb[60].mxu0 }
 0x43e   : > { %v15377_v8 = vpop.f32.mrb[61].mxu0 }
 0x43f   : > { %v15378_v12 = vadd.f32 %v15377_v8, %v15376_v56  ;;  %v15379_v58 = vpop.f32.mrb[62].mxu0  ;;  %v20284_v8 = vld [vmem:[#allocation6] sm:$0xff] }
 0x440   : > { %v15380_v22 = vpop.f32.mrb[63].mxu0 }
 0x441   : > { %v15381_v27 = vadd.f32 %v15380_v22, %v15379_v58 }
 0x445   : > { %v15884_v61 = vpop.f32.mrb[64].mxu0 }
 0x446   : > { %v3119_v63 = vadd.f32 %v15884_v61, %v15366_v48  ;;  %v3110_v37 = vpop.f32.mrb[65].mxu0  ;;  %v20289_v61 = vld [vmem:[#allocation6 + $0x8] sm:$0xff] }
 0x447   : > { %v3111_v5 = vadd.f32 %v15360_v62, %v3110_v37  ;;  %v15885_v42 = vpop.f32.mrb[66].mxu0 }
 0x448   : > { %v3122_v6 = vadd.f32 %v15885_v42, %v15369_v39  ;;  %v3113_v18 = vpop.f32.mrb[67].mxu0  ;;  %v20282_v39 = vld [vmem:[#allocation6 + $0x10] sm:$0xff] }
 0x449   : > { %v3114_v20 = vadd.f32 %v15363_v33, %v3113_v18 }
 0x44a   : > { %v20274_v24 = vpack.c.bf16 %v3122_v6, %v3119_v63 }
 0x44b   : > { %v20276_v28 = vpack.c.bf16 %v3114_v20, %v3111_v5 }
 0x44d   : > { %v15888_v10 = vpop.f32.mrb[68].mxu0 }
 0x44e   : > { %v3135_v16 = vadd.f32 %v15888_v10, %v15378_v12  ;;  %v3126_v17 = vpop.f32.mrb[69].mxu0  ;;  %v20286_v12 = vld [vmem:[#allocation6 + $0x18] sm:$0xff] }
 0x44f   : > { %v3127_v35 = vadd.f32 %v15372_v47, %v3126_v17  ;;  %v15889_v23 = vpop.f32.mrb[70].mxu0 }
 0x450   : > { %v3138_v44 = vadd.f32 %v15889_v23, %v15381_v27  ;;  %v3129_v45 = vpop.f32.mrb[71].mxu0 }
 0x451   : > { %v3130_v50 = vadd.f32 %v15375_v52, %v3129_v45 }
 0x452   : > { %v20278_v51 = vpack.c.bf16 %v3138_v44, %v3135_v16 }
 0x453   : > { %v20280_v48 = vpack.c.bf16 %v3130_v50, %v3127_v35 }
 0x490   : > { %v15896_v62 = vpop.f32.mrb[32].mxu1 }
 0x491   : > { %v3302_v33 = vmul.f32 0.14433756, %v15896_v62  ;;  %v3224_v56 = vpop.f32.mrb[33].mxu1 }
 0x492   : > { %v3300_v58 = vmul.f32 0.14433756, %v3224_v56  ;;  %v15897_v22 = vpop.f32.mrb[34].mxu1 }
 0x493   : > { %v3303_v47 = vmul.f32 0.14433756, %v15897_v22  ;;  %v3227_v27 = vpop.f32.mrb[35].mxu1  ;;  %v3310_v52 = vadd.f32 %v3302_v33, %v20282_v39 }
 0x494   : > { %v3301_v63 = vmul.f32 0.14433756, %v3227_v27  ;;  %v3308_v37 = vadd.f32 %v3300_v58, %v20284_v8 }
 0x495   : > { %v3323_v5 = vsel %vm3316_vm1, %v3310_v52, -inf  ;;  %v3311_v42 = vadd.f32 %v3303_v47, %v20286_v12 }
 0x496   : > { %3324 = vmax.xlane.f32.xlu1 %v3323_v5  ;;  %v3317_v6 = vsel %vm3316_vm1, %v3308_v37, -inf  ;;  %v3309_v18 = vadd.f32 %v3301_v63, %v20289_v61 }
 0x497   : > { %3318 = vmax.xlane.f32.xlu0 %v3317_v6  ;;  %v3326_v20 = vsel %vm3316_vm1, %v3311_v42, -inf }
 0x498   : > { %v3320_v10 = vsel %vm3316_vm1, %v3309_v18, -inf }
 0x49a   : > { %3327 = vmax.xlane.f32.xlu1 %v3326_v20 }
 0x49b   : > { %3321 = vmax.xlane.f32.xlu0 %v3320_v10 }
 0x4a0   : > { %v15904_v16 = vpop.f32.mrb[72].mxu0 }
 0x4a1   : > { %v3285_v17 = vpop.f32.mrb[73].mxu0  ;;  %v3306_v35 = vmul.f32 0.14433756, %v15904_v16 }
 0x4a2   : > { %v3304_v23 = vmul.f32 0.14433756, %v3285_v17  ;;  %v15905_v44 = vpop.f32.mrb[74].mxu0 }
 0x4a3   : > { %v3288_v45 = vpop.f32.mrb[75].mxu0  ;;  %v3307_v50 = vmul.f32 0.14433756, %v15905_v44  ;;  %v3314_v22 = vadd.f32 %v3306_v35, %v20282_v39 }
 0x4a4   : > { %v3305_v62 = vmul.f32 0.14433756, %v3288_v45  ;;  %v20299_v33 = vadd.f32 %v3304_v23, %v20284_v8 }
 0x4a5   : > { %v3315_v27 = vadd.f32 %v3307_v50, %v20286_v12  ;;  %v3335_v63 = vsel %vm3316_vm1, %v3314_v22, -inf }
 0x4a6   : > { %v3329_v56 = vsel %vm3316_vm1, %v20299_v33, -inf  ;;  %v3313_v58 = vadd.f32 %v3305_v62, %v20289_v61 }
 0x4a7   : > { %3330 = vmax.xlane.f32.xlu0 %v3329_v56  ;;  %v3338_v5 = vsel %vm3316_vm1, %v3315_v27, -inf }
 0x4a8   : > { %v3332_v47 = vsel %vm3316_vm1, %v3313_v58, -inf }
 0x4a9   : > { %3333 = vmax.xlane.f32.xlu1 %v3332_v47 }
 0x4ab   : > { %3336 = vmax.xlane.f32.xlu0 %v3335_v63 }
 0x4ad   : > { %3339 = vmax.xlane.f32.xlu1 %v3338_v5 }
 0x4be   : > { %3529 = vrot.lane.b32.xlu1 %v20203_v40, %s19154_s3 }
 0x4c2   : > { %3521 = vrot.lane.b32.xlu1 %v20144_v2, %s19154_s3 }
 0x523   : > { %v3325_v6 = vpop.xlane.xlu1 %3324 }
 0x524   : > { %v3343_v20 = vsub.f32 %v3310_v52, %v3325_v6  ;;  %v3319_v10 = vpop.xlane.xlu0 %3318 }
 0x525   : > { %v3341_v16 = vsub.f32 %v3308_v37, %v3319_v10 }
 0x526   : > { %v3353_v17 = vmul.f32 1.442695, %v3343_v20 }
 0x527   : > { %v3349_v35 = vmul.f32 1.442695, %v3341_v16  ;;  %v3328_v23 = vpop.xlane.xlu1 %3327 }
 0x528   : > { %18180 = vpow2.f32 %v3353_v17  ;;  %v3344_v44 = vsub.f32 %v3311_v42, %v3328_v23  ;;  %v3322_v45 = vpop.xlane.xlu0 %3321 }
 0x529   : > { %v3342_v50 = vsub.f32 %v3309_v18, %v3322_v45  ;;  %18182 = vpow2.f32 %v3349_v35 }
 0x52a   : > { %v3355_v62 = vmul.f32 1.442695, %v3344_v44 }
 0x52b   : > { %v3351_v56 = vmul.f32 1.442695, %v3342_v50 }
 0x52c   : > { %18184 = vpow2.f32 %v3355_v62 }
 0x52d   : > { %18186 = vpow2.f32 %v3351_v56 }
 0x532   : > { %v20313_v47 = vpop.eup %18180 }
 0x533   : > { %v3371_v63 = vsel %vm3316_vm1, %v20313_v47, 0.0  ;;  %v20317_v52 = vpop.eup %18182 }
 0x534   : > { %3372 = vadd.xlane.f32.xlu0 %v3371_v63  ;;  %v3365_v42 = vsel %vm3316_vm1, %v20317_v52, 0.0 }
 0x536   : > { %v20319_v37 = vpop.eup %18184  ;;  %v3334_v5 = vpop.xlane.xlu1 %3333 }
 0x537   : > { %v3374_v18 = vsel %vm3316_vm1, %v20319_v37, 0.0  ;;  %v18187_v6 = vpop.eup %18186  ;;  %v3346_v20 = vsub.f32 %v3313_v58, %v3334_v5  ;;  %v3331_v58 = vpop.xlane.xlu0 %3330 }
 0x538   : > { %3366 = vadd.xlane.f32.xlu0 %v3365_v42  ;;  %3375 = vadd.xlane.f32.xlu1 %v3374_v18  ;;  %v3368_v17 = vsel %vm3316_vm1, %v18187_v6, 0.0  ;;  %v3345_v42 = vsub.f32 %v20299_v33, %v3331_v58 }
 0x539   : > { %v3359_v35 = vmul.f32 1.442695, %v3346_v20 }
 0x53a   : > { %v3340_v10 = vpop.xlane.xlu1 %3339  ;;  %v3357_v20 = vmul.f32 1.442695, %v3345_v42 }
 0x53b   : > { %v3348_v16 = vsub.f32 %v3315_v27, %v3340_v10  ;;  %v3337_v63 = vpop.xlane.xlu0 %3336 }
 0x53c   : > { %3369 = vadd.xlane.f32.xlu1 %v3368_v17  ;;  %v3347_v5 = vsub.f32 %v3314_v22, %v3337_v63 }
 0x53d   : > { %v3363_v23 = vmul.f32 1.442695, %v3348_v16 }
 0x53e   : > { %v3530_v44 = vpop.permute.xlu1 %3529  ;;  %v3361_v18 = vmul.f32 1.442695, %v3347_v5 }
 0x53f   : > { %18188 = vpow2.f32 %v3363_v23  ;;  %v3541_v5 = vsel %vm3177_vm0, %v3530_v44, 0 }
 0x540   : > { %18190 = vpow2.f32 %v3359_v35 }
 0x541   : > { %18192 = vpow2.f32 %v3361_v18 }
 0x542   : > { %v3522_v45 = vpop.permute.xlu1 %3521  ;;  %18194 = vpow2.f32 %v3357_v20 }
 0x543   : > { %15926 = vmatprep.mubr.msk.bf16.mxu0 %vm3177_vm0, %v3522_v45 }
 0x549   : > { %v20327_v50 = vpop.eup %18188 }
 0x54a   : > { %v3386_v62 = vsel %vm3316_vm1, %v20327_v50, 0.0  ;;  %v20331_v56 = vpop.eup %18190 }
 0x54b   : > { %3387 = vadd.xlane.f32.xlu1 %v3386_v62  ;;  %v3380_v27 = vsel %vm3316_vm1, %v20331_v56, 0.0  ;;  %v18193_v10 = vpop.eup %18192 }
 0x54c   : > { %v3383_v16 = vsel %vm3316_vm1, %v18193_v10, 0.0  ;;  %v18195_v17 = vpop.eup %18194 }
 0x54d   : > { %v3377_v33 = vsel %vm3316_vm1, %v18195_v17, 0.0 }
 0x54e   : > { %3527 = vrot.lane.b32.xlu0 %v20191_v43, %s19154_s3 }
 0x54f   : > { %3381 = vadd.xlane.f32.xlu1 %v3380_v27 }
 0x560   : > { %3523 = vrot.lane.b32.xlu1 %v20160_v13, %s19154_s3 }
 0x564   : > { %3602 = vrot.lane.b32.xlu1 %v20235_v15, %s19154_s3 }
 0x568   : > { %3596 = vrot.lane.b32.xlu1 %v20181_v30, %s19154_s3 }
 0x56d   : > { %3384 = vadd.xlane.f32.xlu0 %v3383_v16 }
 0x571   : > { %3378 = vadd.xlane.f32.xlu0 %v3377_v33 }
 0x587   : > { %3600 = vrot.lane.b32.xlu0 %v20215_v3, %s19154_s3 }
 0x58b   : > { %3594 = vrot.lane.b32.xlu0 %v20174_v21, %s19154_s3 }
 0x5c1   : > { %v3373_v22 = vpop.xlane.xlu0 %3372 }
 0x5c5   : > { %v3367_v35 = vpop.xlane.xlu0 %3366  ;;  %v3376_v23 = vpop.xlane.xlu1 %3375 }
 0x5c6   : > { %18196 = vrcp.f32 %v3376_v23 }
 0x5c7   : > { %18198 = vrcp.f32 %v3367_v35 }
 0x5c8   : > { %18200 = vrcp.f32 %v3373_v22 }
 0x5c9   : > { %v3528_v45 = vpop.permute.xlu0 %3527  ;;  %v3370_v62 = vpop.xlane.xlu1 %3369 }
 0x5ca   : > { %18202 = vrcp.f32 %v3370_v62  ;;  %16582 = vmatprep.subr.msk.bf16.mxu0 %vm3177_vm0, %v3528_v45  ;;  %v3538_v58 = vsel %vm3177_vm0, %v3528_v45, 0 }
 0x5cb   : > { %15923 = vmatpush3.bf16.xpose.msra.mxu0 %v3538_v58 }
 0x5cc   : > { %16583 = vmatprep.subr.msk.bf16.mxu0 %vm3177_vm0, %v3530_v44 }
 0x5d0   : > { %v18197_v27 = vpop.eup %18196 }
 0x5d1   : > { %v18199_v63 = vpop.eup %18198  ;;  %v3396_v20 = vmul.f32 %v18197_v27, %v20319_v37 }
 0x5d2   : > { %v18201_v42 = vpop.eup %18200  ;;  %v3390_v16 = vmul.f32 %v18199_v63, %v20317_v52 }
 0x5d3   : > { %15925 = vmatpush3.bf16.xpose.msra.mxu0 %v3541_v5  ;;  %v3394_v22 = vmul.f32 %v18201_v42, %v20313_v47 }
 0x5d4   : > { %v18203_v18 = vpop.eup %18202 }
 0x5d5   : > { %v3392_v33 = vmul.f32 %v18203_v18, %v18187_v6  ;;  %v3406_v45 = vpack.c.bf16 %v3396_v20, %v3394_v22 }
 0x5d7   : > { %v3405_v35 = vpack.c.bf16 %v3392_v33, %v3390_v16 }
 0x5d8   : > { %v3388_v23 = vpop.xlane.xlu1 %3387 }
 0x5d9   : > { %15910 = vmatprep.mubr.msk.bf16.mxu1 %vm3316_vm1, %v3405_v35 }
 0x5da   : > { %15911 = vmatmul.mubr.msk.bf16.vlgmr.msra.gmra.mrb[36].mxu1 %vm3316_vm1, %v3406_v45 }
 0x5db   : > { %15915 = vmatpush3.bf16.msra.mxu1 %v20247_v36 }
 0x5dc   : > { %15916 = vmatprep.subr.bf16.mxu1 %v20254_v46  ;;  %v3382_v44 = vpop.xlane.xlu1 %3381 }
 0x5df   : > { %15917 = vmatpush3.bf16.msra.mxu1 %v20254_v46 }
 0x5e0   : > { %v3524_v37 = vpop.permute.xlu1 %3523 }
 0x5e1   : > { %15927 = vmatmul.mubr.msk.bf16.vlgmr.msra.gmra.mrb[76].mxu0 %vm3177_vm0, %v3524_v37 }
 0x5fa   : > { %v3385_v52 = vpop.xlane.xlu0 %3384 }
 0x5fb   : > { %18204 = vrcp.f32 %v3385_v52 }
 0x5fc   : > { %18206 = vrcp.f32 %v3382_v44 }
 0x5fd   : > { %18208 = vrcp.f32 %v3388_v23  ;;  %v3603_v23 = vpop.permute.xlu1 %3602 }
 0x5fe   : > { %v3379_v47 = vpop.xlane.xlu0 %3378 }
 0x5ff   : > { %18210 = vrcp.f32 %v3379_v47 }
 0x602   : > { %v3601_v6 = vpop.permute.xlu0 %3600 }
 0x603   : > { %16584 = vmatprep.subr.msk.bf16.mxu1 %vm3177_vm0, %v3601_v6  ;;  %v3611_v35 = vsel %vm3177_vm0, %v3601_v6, 0 }
 0x605   : > { %v18205_v62 = vpop.eup %18204 }
 0x606   : > { %v18207_v58 = vpop.eup %18206  ;;  %v3402_v5 = vmul.f32 %v18205_v62, %v18193_v10  ;;  %v3595_v22 = vpop.permute.xlu0 %3594  ;;  %v3614_v10 = vsel %vm3177_vm0, %v3603_v23, 0 }
 0x607   : > { %v18209_v27 = vpop.eup %18208  ;;  %v3400_v18 = vmul.f32 %v18207_v58, %v20331_v56  ;;  %v3597_v56 = vpop.permute.xlu1 %3596 }
 0x608   : > { %v3404_v20 = vmul.f32 %v18209_v27, %v20327_v50 }
 0x609   : > { %v18211_v63 = vpop.eup %18210 }
 0x60a   : > { %v3398_v42 = vmul.f32 %v18211_v63, %v18195_v17  ;;  %v3408_v33 = vpack.c.bf16 %v3404_v20, %v3402_v5 }
 0x60c   : > { %v3407_v16 = vpack.c.bf16 %v3400_v18, %v3398_v42 }
 0x60e   : > { %15918 = vmatprep.mubr.msk.bf16.mxu1 %vm3316_vm1, %v3407_v16 }
 0x60f   : > { %15919 = vmatmul.mubr.msk.bf16.vlgmr.msra.gmra.mrb[40].mxu1 %vm3316_vm1, %v3408_v33 }
 0x610   : > { %15931 = vmatpush3.bf16.xpose.msra.mxu1 %v3611_v35  ;;  %15934 = vmatprep.mubr.msk.bf16.mxu1 %vm3177_vm0, %v3595_v22 }
 0x611   : > { %16585 = vmatprep.subr.msk.bf16.mxu1 %vm3177_vm0, %v3603_v23 }
 0x618   : > { %15933 = vmatpush3.bf16.xpose.msra.mxu1 %v3614_v10 }
 0x61f   : > { %15935 = vmatmul.mubr.msk.bf16.vlgmr.msra.gmra.mrb[44].mxu1 %vm3177_vm0, %v3597_v56 }
 0x6ad   : > { %v20373_v50 = vpop.f32.mrb[36].mxu1 }
 0x6ae   : > { %24020 = vst [vmem:[#allocation40_spill] sm:$0xff] %v20373_v50  ;;  %v20375_v17 = vpop.f32.mrb[37].mxu1 }
 0x6af   : > { %24021 = vst [vmem:[#allocation41_spill] sm:$0xff] %v20375_v17  ;;  %v20377_v45 = vpop.f32.mrb[38].mxu1 }
 0x6b0   : > { %24022 = vst [vmem:[#allocation42_spill] sm:$0xff] %v20377_v45  ;;  %v20379_v44 = vpop.f32.mrb[39].mxu1 }
 0x6b1   : > { %24023 = vst [vmem:[#allocation43_spill] sm:$0xff] %v20379_v44 }
 0x6b4   : > { %v15928_v37 = vpop.f32.mrb[76].mxu0 }
 0x6b5   : > { %v3577_v52 = vpop.f32.mrb[77].mxu0  ;;  %v3667_v47 = vmul.f32 0.14433756, %v15928_v37 }
 0x6b6   : > { %v3665_v6 = vmul.f32 0.14433756, %v3577_v52  ;;  %v15929_v62 = vpop.f32.mrb[78].mxu0 }
 0x6b7   : > { %v3580_v58 = vpop.f32.mrb[79].mxu0  ;;  %v3668_v5 = vmul.f32 0.14433756, %v15929_v62  ;;  %v3675_v20 = vadd.f32 %v3667_v47, %v20282_v39 }
 0x6b8   : > { %v3666_v27 = vmul.f32 0.14433756, %v3580_v58  ;;  %v3673_v63 = vadd.f32 %v3665_v6, %v20284_v8 }
 0x6b9   : > { %v3687_v33 = vsel %vm3316_vm1, %v3675_v20, -inf  ;;  %v3676_v22 = vadd.f32 %v3668_v5, %v20286_v12 }
 0x6ba   : > { %v3681_v42 = vsel %vm3316_vm1, %v3673_v63, -inf  ;;  %v3674_v18 = vadd.f32 %v3666_v27, %v20289_v61 }
 0x6bb   : > { %3682 = vmax.xlane.f32.xlu0 %v3681_v42  ;;  %v3690_v35 = vsel %vm3316_vm1, %v3676_v22, -inf }
 0x6bc   : > { %v3684_v16 = vsel %vm3316_vm1, %v3674_v18, -inf }
 0x6bd   : > { %3685 = vmax.xlane.f32.xlu1 %v3684_v16 }
 0x6bf   : > { %3688 = vmax.xlane.f32.xlu0 %v3687_v33 }
 0x6c3   : > { %3691 = vmax.xlane.f32.xlu0 %v3690_v35 }
 0x6e2   : > { %v20389_v23 = vpop.f32.mrb[40].mxu1 }
 0x6e3   : > { %24024 = vst [vmem:[#allocation44_spill] sm:$0xff] %v20389_v23  ;;  %v20391_v10 = vpop.f32.mrb[41].mxu1 }
 0x6e4   : > { %24025 = vst [vmem:[#allocation45_spill] sm:$0xff] %v20391_v10  ;;  %v20393_v56 = vpop.f32.mrb[42].mxu1 }
 0x6e5   : > { %24026 = vst [vmem:[#allocation46_spill] sm:$0xff] %v20393_v56  ;;  %v20395_v37 = vpop.f32.mrb[43].mxu1 }
 0x6e6   : > { %24027 = vst [vmem:[#allocation47_spill] sm:$0xff] %v20395_v37 }
 0x6f2   : > { %v15936_v52 = vpop.f32.mrb[44].mxu1 }
 0x6f3   : > { %v3650_v47 = vpop.f32.mrb[45].mxu1  ;;  %v3671_v6 = vmul.f32 0.14433756, %v15936_v52 }
 0x6f4   : > { %v3669_v62 = vmul.f32 0.14433756, %v3650_v47  ;;  %v15937_v58 = vpop.f32.mrb[46].mxu1 }
 0x6f5   : > { %v3653_v27 = vpop.f32.mrb[47].mxu1  ;;  %v20400_v16 = vadd.f32 %v3671_v6, %v20282_v39 }
 0x6f6   : > { %v3677_v5 = vadd.f32 %v3669_v62, %v20284_v8 }
 0x6f7   : > { %v3699_v33 = vsel %vm3316_vm1, %v20400_v16, -inf }
 0x6f8   : > { %v3693_v42 = vsel %vm3316_vm1, %v3677_v5, -inf }
 0x6f9   : > { %3694 = vmax.xlane.f32.xlu0 %v3693_v42 }
 0x6fd   : > { %3700 = vmax.xlane.f32.xlu0 %v3699_v33 }
 0x748   : > { %v3683_v35 = vpop.xlane.xlu0 %3682 }
 0x749   : > { %v3705_v26 = vsub.f32 %v3673_v63, %v3683_v35 }
 0x74a   : > { %v3686_v23 = vpop.xlane.xlu1 %3685 }
 0x74b   : > { %v3713_v10 = vmul.f32 1.442695, %v3705_v26  ;;  %v3706_v52 = vsub.f32 %v3674_v18, %v3686_v23 }
 0x74c   : > { %v3689_v47 = vpop.xlane.xlu0 %3688 }
 0x74d   : > { %18212 = vpow2.f32 %v3713_v10  ;;  %v3715_v37 = vmul.f32 1.442695, %v3706_v52  ;;  %v3707_v56 = vsub.f32 %v3675_v20, %v3689_v47  ;;  %v3672_v10 = vmul.f32 0.14433756, %v15937_v58 }
 0x74f   : > { %18214 = vpow2.f32 %v3715_v37  ;;  %v3717_v62 = vmul.f32 1.442695, %v3707_v56  ;;  %v3670_v56 = vmul.f32 0.14433756, %v3653_v27  ;;  %v20443_v37 = vadd.f32 %v3672_v10, %v20286_v12 }
 0x750   : > { %v3692_v45 = vpop.xlane.xlu0 %3691 }
 0x751   : > { %18216 = vpow2.f32 %v3717_v62  ;;  %v3708_v6 = vsub.f32 %v3676_v22, %v3692_v45  ;;  %v20452_v52 = vadd.f32 %v3670_v56, %v20289_v61 }
 0x753   : > { %v3719_v50 = vmul.f32 1.442695, %v3708_v6 }
 0x755   : > { %18218 = vpow2.f32 %v3719_v50 }
 0x757   : > { %v20404_v42 = vpop.eup %18212 }
 0x758   : > { %v3729_v33 = vsel %vm3316_vm1, %v20404_v42, 0.0 }
 0x759   : > { %v20408_v63 = vpop.eup %18214  ;;  %3730 = vadd.xlane.f32.xlu0 %v3729_v33 }
 0x75a   : > { %v3732_v26 = vsel %vm3316_vm1, %v20408_v63, 0.0 }
 0x75b   : > { %v20412_v18 = vpop.eup %18216  ;;  %3733 = vadd.xlane.f32.xlu1 %v3732_v26 }
 0x75c   : > { %v3735_v20 = vsel %vm3316_vm1, %v20412_v18, 0.0 }
 0x75d   : > { %3736 = vadd.xlane.f32.xlu0 %v3735_v20 }
 0x75f   : > { %v20416_v45 = vpop.eup %18218 }
 0x760   : > { %v3738_v50 = vsel %vm3316_vm1, %v20416_v45, 0.0 }
 0x761   : > { %3739 = vadd.xlane.f32.xlu1 %v3738_v50 }
 0x772   : > { %3777 = vrot.lane.b32.xlu1 %v20237_v32, %s19154_s3 }
 0x773   : > { %3775 = vrot.lane.b32.xlu0 %v20217_v7, %s19154_s3 }
 0x776   : > { %3916 = vrot.lane.b32.xlu1 %v20258_v54, %s19155_s26 }
 0x777   : > { %3914 = vrot.lane.b32.xlu0 %v20191_v43, %s19155_s26 }
 0x77a   : > { %3840 = vrot.lane.b32.xlu1 %v20254_v46, %s19154_s3 }
 0x77b   : > { %3838 = vrot.lane.b32.xlu0 %v20247_v36, %s19154_s3 }
 0x77e   : > { %3920 = vrot.lane.b32.xlu1 %v20262_v59, %s19155_s26 }
 0x77f   : > { %3918 = vrot.lane.b32.xlu0 %v20203_v40, %s19155_s26 }
 0x782   : > { %3903 = vrot.lane.b32.xlu1 %v20148_v4, %s19155_s26 }
 0x783   : > { %3901 = vrot.lane.b32.xlu0 %v20144_v2, %s19155_s26  ;;  %v3702_v2 = vsel %vm3316_vm1, %v20443_v37, -inf }
 0x786   : > { %v3695_v43 = vpop.xlane.xlu0 %3694 }
 0x787   : > { %3905 = vrot.lane.b32.xlu0 %v20160_v13, %s19155_s26  ;;  %v3709_v22 = vsub.f32 %v3677_v5, %v3695_v43  ;;  %v3696_v13 = vsel %vm3316_vm1, %v20452_v52, -inf }
 0x789   : > { %v3721_v23 = vmul.f32 1.442695, %v3709_v22 }
 0x78a   : > { %v3701_v58 = vpop.xlane.xlu0 %3700 }
 0x78b   : > { %18220 = vpow2.f32 %v3721_v23  ;;  %v3711_v27 = vsub.f32 %v20400_v16, %v3701_v58 }
 0x78d   : > { %v3725_v5 = vmul.f32 1.442695, %v3711_v27 }
 0x78f   : > { %18222 = vpow2.f32 %v3725_v5 }
 0x795   : > { %v20445_v35 = vpop.eup %18220 }
 0x796   : > { %v3741_v40 = vsel %vm3316_vm1, %v20445_v35, 0.0 }
 0x799   : > { %v20467_v47 = vpop.eup %18222 }
 0x79a   : > { %v3747_v62 = vsel %vm3316_vm1, %v20467_v47, 0.0 }
 0x7a6   : > { %3742 = vadd.xlane.f32.xlu0 %v3741_v40  ;;  %3703 = vmax.xlane.f32.xlu1 %v3702_v2 }
 0x7aa   : > { %3697 = vmax.xlane.f32.xlu1 %v3696_v13 }
 0x7bb   : > { %3907 = vrot.lane.b32.xlu1 %v20164_v53, %s19155_s26 }
 0x7bc   : > { %3999 = vrot.lane.b32.xlu0 %v20215_v3, %s19155_s26 }
 0x7c0   : > { %4003 = vrot.lane.b32.xlu0 %v20235_v15, %s19155_s26 }
 0x7c4   : > { %3987 = vrot.lane.b32.xlu0 %v20174_v21, %s19155_s26 }
 0x7c8   : > { %3991 = vrot.lane.b32.xlu0 %v20181_v30, %s19155_s26 }
 0x7df   : > { %3748 = vadd.xlane.f32.xlu1 %v3747_v62 }
 0x7e6   : > { %v3731_v3 = vpop.xlane.xlu0 %3730 }
 0x7e7   : > { %18224 = vrcp.f32 %v3731_v3 }
 0x7e8   : > { %v3734_v15 = vpop.xlane.xlu1 %3733 }
 0x7e9   : > { %18226 = vrcp.f32 %v3734_v15 }
 0x7ea   : > { %v3737_v6 = vpop.xlane.xlu0 %3736 }
 0x7eb   : > { %18228 = vrcp.f32 %v3737_v6 }
 0x7ee   : > { %v3776_v21 = vpop.permute.xlu0 %3775  ;;  %v3740_v33 = vpop.xlane.xlu1 %3739 }
 0x7ef   : > { %18230 = vrcp.f32 %v3740_v33  ;;  %15938 = vmatprep.subr.bf16.mxu0 %v3776_v21 }
 0x7f0   : > { %15939 = vmatpush3.bf16.msra.mxu0 %v3776_v21  ;;  %4001 = vrot.lane.b32.xlu1 %v20266_v1, %s19155_s26 }
 0x7f1   : > { %v18225_v30 = vpop.eup %18224 }
 0x7f2   : > { %v3915_v16 = vpop.permute.xlu0 %3914  ;;  %v3778_v26 = vpop.permute.xlu1 %3777  ;;  %v3754_v50 = vmul.f32 %v18225_v30, %v20404_v42 }
 0x7f3   : > { %v18227_v20 = vpop.eup %18226  ;;  %15940 = vmatprep.subr.bf16.mxu0 %v3778_v26 }
 0x7f4   : > { %15941 = vmatpush3.bf16.msra.mxu0 %v3778_v26  ;;  %v3756_v43 = vmul.f32 %v18227_v20, %v20408_v63 }
 0x7f5   : > { %v18229_v56 = vpop.eup %18228 }
 0x7f6   : > { %v3839_v22 = vpop.permute.xlu0 %3838  ;;  %v3917_v23 = vpop.permute.xlu1 %3916  ;;  %v3769_v10 = vpack.c.bf16 %v3756_v43, %v3754_v50  ;;  %v3758_v13 = vmul.f32 %v18229_v56, %v20412_v18 }
 0x7f7   : > { %v3922_v40 = vsel %vm3316_vm1, %v3915_v16, %v3917_v23  ;;  %15946 = vmatprep.subr.bf16.mxu1 %v3839_v22 }
 0x7f8   : > { %15942 = vmatprep.mubr.msk.bf16.mxu0 %vm3316_vm1, %v3769_v10  ;;  %15947 = vmatpush3.bf16.msra.mxu1 %v3839_v22  ;;  %v3931_v5 = vsel %vm3177_vm0, %v3922_v40, 0 }
 0x7f9   : > { %v18231_v2 = vpop.eup %18230  ;;  %16586 = vmatprep.subr.msk.bf16.mxu0 %vm3177_vm0, %v3922_v40 }
 0x7fa   : > { %v3760_v58 = vmul.f32 %v18231_v2, %v20416_v45  ;;  %v3841_v42 = vpop.permute.xlu1 %3840  ;;  %v3919_v63 = vpop.permute.xlu0 %3918 }
 0x7fb   : > { %15948 = vmatprep.subr.bf16.mxu1 %v3841_v42 }
 0x7fc   : > { %15949 = vmatpush3.bf16.msra.mxu1 %v3841_v42  ;;  %v3770_v27 = vpack.c.bf16 %v3760_v58, %v3758_v13 }
 0x7fe   : > { %15943 = vmatmul.mubr.msk.bf16.vlgmr.msra.gmra.mrb[80].mxu0 %vm3316_vm1, %v3770_v27  ;;  %v3921_v62 = vpop.permute.xlu1 %3920  ;;  %v3902_v15 = vpop.permute.xlu0 %3901 }
 0x7ff   : > { %15955 = vmatpush3.bf16.xpose.msra.mxu0 %v3931_v5  ;;  %v3923_v3 = vsel %vm3316_vm1, %v3919_v63, %v3921_v62 }
 0x800   : > { %16587 = vmatprep.subr.msk.bf16.mxu0 %vm3177_vm0, %v3923_v3  ;;  %v3934_v45 = vsel %vm3177_vm0, %v3923_v3, 0 }
 0x802   : > { %v3904_v6 = vpop.permute.xlu1 %3903  ;;  %v3906_v50 = vpop.permute.xlu0 %3905 }
 0x803   : > { %v3910_v18 = vsel %vm3316_vm1, %v3902_v15, %v3904_v6 }
 0x804   : > { %15958 = vmatprep.mubr.msk.bf16.mxu0 %vm3177_vm0, %v3910_v18 }
 0x807   : > { %15957 = vmatpush3.bf16.xpose.msra.mxu0 %v3934_v45 }
 0x833   : > { %v3704_v21 = vpop.xlane.xlu1 %3703 }
 0x834   : > { %v3712_v33 = vsub.f32 %v20443_v37, %v3704_v21 }
 0x836   : > { %v3727_v30 = vmul.f32 1.442695, %v3712_v33 }
 0x837   : > { %v3698_v16 = vpop.xlane.xlu1 %3697 }
 0x838   : > { %18232 = vpow2.f32 %v3727_v30  ;;  %v3710_v26 = vsub.f32 %v20452_v52, %v3698_v16  ;;  %v3743_v52 = vpop.xlane.xlu0 %3742 }
 0x83a   : > { %v3723_v20 = vmul.f32 1.442695, %v3710_v26 }
 0x83b   : > { %v3908_v43 = vpop.permute.xlu1 %3907 }
 0x83c   : > { %18234 = vpow2.f32 %v3723_v20  ;;  %v3911_v22 = vsel %vm3316_vm1, %v3906_v50, %v3908_v43  ;;  %v4000_v2 = vpop.permute.xlu0 %3999 }
 0x83d   : > { %15959 = vmatmul.mubr.msk.bf16.vlgmr.msra.gmra.mrb[84].mxu0 %vm3177_vm0, %v3911_v22 }
 0x840   : > { %v4004_v30 = vpop.permute.xlu0 %4003 }
 0x842   : > { %v18233_v23 = vpop.eup %18232 }
 0x843   : > { %v3750_v10 = vsel %vm3316_vm1, %v18233_v23, 0.0 }
 0x844   : > { %3751 = vadd.xlane.f32.xlu1 %v3750_v10 }
 0x846   : > { %v18235_v56 = vpop.eup %18234 }
 0x847   : > { %v3744_v37 = vsel %vm3316_vm1, %v18235_v56, 0.0 }
 0x848   : > { %3745 = vadd.xlane.f32.xlu1 %v3744_v37 }
 0x859   : > { %4005 = vrot.lane.b32.xlu1 %v20270_v14, %s19155_s26 }
 0x85d   : > { %3989 = vrot.lane.b32.xlu1 %v20176_v25, %s19155_s26 }
 0x861   : > { %3993 = vrot.lane.b32.xlu1 %v20183_v31, %s19155_s26 }
 0x86c   : > { %v3749_v40 = vpop.xlane.xlu1 %3748 }
 0x870   : > { %v4002_v13 = vpop.permute.xlu1 %4001 }
 0x871   : > { %v4007_v58 = vsel %vm3316_vm1, %v4000_v2, %v4002_v13 }
 0x872   : > { %16588 = vmatprep.subr.msk.bf16.mxu1 %vm3177_vm0, %v4007_v58 }
 0x8d1   : > { %v20501_v42 = vpop.f32.mrb[80].mxu0  ;;  %v3752_v63 = vpop.xlane.xlu1 %3751 }
 0x8d2   : > { %v20503_v27 = vpop.f32.mrb[81].mxu0  ;;  %18236 = vrcp.f32 %v3752_v63 }
 0x8d3   : > { %v20505_v5 = vpop.f32.mrb[82].mxu0  ;;  %18238 = vrcp.f32 %v3743_v52  ;;  %v3988_v52 = vpop.permute.xlu0 %3987 }
 0x8d4   : > { %v20509_v3 = vpop.f32.mrb[83].mxu0  ;;  %18240 = vrcp.f32 %v3749_v40  ;;  %v4016_v40 = vsel %vm3177_vm0, %v4007_v58, 0 }
 0x8d5   : > { %v3746_v6 = vpop.xlane.xlu1 %3745 }
 0x8d6   : > { %18242 = vrcp.f32 %v3746_v6 }
 0x8d9   : > { %v4006_v45 = vpop.permute.xlu1 %4005 }
 0x8da   : > { %v4008_v13 = vsel %vm3316_vm1, %v4004_v30, %v4006_v45 }
 0x8dc   : > { %v18237_v18 = vpop.eup %18236 }
 0x8dd   : > { %v18239_v21 = vpop.eup %18238  ;;  %v3768_v26 = vmul.f32 %v18237_v18, %v18233_v23  ;;  %v3990_v22 = vpop.permute.xlu1 %3989 }
 0x8de   : > { %v18241_v33 = vpop.eup %18240  ;;  %v3762_v20 = vmul.f32 %v18239_v21, %v20445_v35  ;;  %v3995_v2 = vsel %vm3316_vm1, %v3988_v52, %v3990_v22  ;;  %v4019_v35 = vsel %vm3177_vm0, %v4008_v13, 0  ;;  %v3992_v23 = vpop.permute.xlu0 %3991 }
 0x8df   : > { %v3766_v43 = vmul.f32 %v18241_v33, %v20467_v47 }
 0x8e0   : > { %v18243_v16 = vpop.eup %18242 }
 0x8e1   : > { %v3764_v50 = vmul.f32 %v18243_v16, %v18235_v56  ;;  %v3772_v37 = vpack.c.bf16 %v3768_v26, %v3766_v43  ;;  %v3994_v47 = vpop.permute.xlu1 %3993 }
 0x8e2   : > { %v3996_v56 = vsel %vm3316_vm1, %v3992_v23, %v3994_v47 }
 0x8e3   : > { %v3771_v10 = vpack.c.bf16 %v3764_v50, %v3762_v20 }
 0x8e5   : > { %15950 = vmatprep.mubr.msk.bf16.mxu1 %vm3316_vm1, %v3771_v10 }
 0x8e6   : > { %15951 = vmatmul.mubr.msk.bf16.vlgmr.msra.gmra.mrb[48].mxu1 %vm3316_vm1, %v3772_v37 }
 0x8e7   : > { %15963 = vmatpush3.bf16.xpose.msra.mxu1 %v4016_v40  ;;  %15966 = vmatprep.mubr.msk.bf16.mxu1 %vm3177_vm0, %v3995_v2 }
 0x8e8   : > { %16589 = vmatprep.subr.msk.bf16.mxu1 %vm3177_vm0, %v4008_v13 }
 0x8ef   : > { %15965 = vmatpush3.bf16.xpose.msra.mxu1 %v4019_v35 }
 0x8f6   : > { %15967 = vmatmul.mubr.msk.bf16.vlgmr.msra.gmra.mrb[52].mxu1 %vm3177_vm0, %v3996_v56 }
 0x910   : > { %v15960_v58 = vpop.f32.mrb[84].mxu0 }
 0x911   : > { %v3970_v63 = vpop.f32.mrb[85].mxu0  ;;  %v4072_v6 = vmul.f32 0.14433756, %v15960_v58 }
 0x912   : > { %v4070_v18 = vmul.f32 0.14433756, %v3970_v63  ;;  %v15961_v21 = vpop.f32.mrb[86].mxu0 }
 0x913   : > { %v3973_v45 = vpop.f32.mrb[87].mxu0  ;;  %v4073_v16 = vmul.f32 0.14433756, %v15961_v21  ;;  %v4080_v50 = vadd.f32 %v4072_v6, %v20282_v39 }
 0x914   : > { %v4071_v33 = vmul.f32 0.14433756, %v3973_v45  ;;  %v4078_v30 = vadd.f32 %v4070_v18, %v20284_v8 }
 0x915   : > { %v4092_v22 = vsel %vm3316_vm1, %v4080_v50, -inf  ;;  %v4081_v10 = vadd.f32 %v4073_v16, %v20286_v12 }
 0x916   : > { %v4086_v26 = vsel %vm3316_vm1, %v4078_v30, -inf  ;;  %v4079_v20 = vadd.f32 %v4071_v33, %v20289_v61 }
 0x917   : > { %4087 = vmax.xlane.f32.xlu0 %v4086_v26  ;;  %v4095_v37 = vsel %vm3316_vm1, %v4081_v10, -inf }
 0x918   : > { %v4089_v43 = vsel %vm3316_vm1, %v4079_v20, -inf }
 0x919   : > { %4090 = vmax.xlane.f32.xlu1 %v4089_v43 }
 0x91b   : > { %4093 = vmax.xlane.f32.xlu0 %v4092_v22 }
 0x91f   : > { %4096 = vmax.xlane.f32.xlu0 %v4095_v37 }
 0x9a4   : > { %v4088_v52 = vpop.xlane.xlu0 %4087 }
 0x9a5   : > { %v4110_v63 = vsub.f32 %v4078_v30, %v4088_v52 }
 0x9a6   : > { %v4091_v58 = vpop.xlane.xlu1 %4090 }
 0x9a7   : > { %v4111_v6 = vsub.f32 %v4079_v20, %v4091_v58  ;;  %v4118_v21 = vmul.f32 1.442695, %v4110_v63 }
 0x9a8   : > { %v4094_v23 = vpop.xlane.xlu0 %4093 }
 0x9a9   : > { %v4112_v45 = vsub.f32 %v4080_v50, %v4094_v23  ;;  %v4120_v16 = vmul.f32 1.442695, %v4111_v6  ;;  %18244 = vpow2.f32 %v4118_v21 }
 0x9ab   : > { %v4122_v43 = vmul.f32 1.442695, %v4112_v45  ;;  %18246 = vpow2.f32 %v4120_v16 }
 0x9ac   : > { %v4097_v18 = vpop.xlane.xlu0 %4096 }
 0x9ad   : > { %v4113_v33 = vsub.f32 %v4081_v10, %v4097_v18  ;;  %18248 = vpow2.f32 %v4122_v43 }
 0x9af   : > { %v4124_v22 = vmul.f32 1.442695, %v4113_v33 }
 0x9b1   : > { %18250 = vpow2.f32 %v4124_v22 }
 0x9b3   : > { %v20552_v58 = vpop.eup %18244 }
 0x9b9   : > { %v20533_v40 = vpop.f32.mrb[48].mxu1 }
 0x9ba   : > { %24028 = vst [vmem:[#allocation48_spill] sm:$0xff] %v20533_v40  ;;  %v20535_v2 = vpop.f32.mrb[49].mxu1 }
 0x9bb   : > { %24029 = vst [vmem:[#allocation49_spill] sm:$0xff] %v20535_v2  ;;  %v20537_v13 = vpop.f32.mrb[50].mxu1 }
 0x9bc   : > { %24030 = vst [vmem:[#allocation50_spill] sm:$0xff] %v20537_v13  ;;  %v20541_v47 = vpop.f32.mrb[51].mxu1 }
 0x9bd   : > { %24031 = vst [vmem:[#allocation51_spill] sm:$0xff] %v20541_v47 }
 0x9c9   : > { %v15968_v26 = vpop.f32.mrb[52].mxu1 }
 0x9ca   : > { %v4055_v37 = vpop.f32.mrb[53].mxu1  ;;  %v4076_v35 = vmul.f32 0.14433756, %v15968_v26 }
 0x9cb   : > { %v4074_v15 = vmul.f32 0.14433756, %v4055_v37  ;;  %v15969_v62 = vpop.f32.mrb[54].mxu1 }
 0x9cc   : > { %v4077_v17 = vmul.f32 0.14433756, %v15969_v62  ;;  %v4058_v44 = vpop.f32.mrb[55].mxu1  ;;  %v4084_v10 = vadd.f32 %v4076_v35, %v20282_v39 }
 0x9cd   : > { %v4075_v56 = vmul.f32 0.14433756, %v4058_v44  ;;  %v4082_v30 = vadd.f32 %v4074_v15, %v20284_v8  ;;  %v20555_v44 = vpop.eup %18246 }
 0x9ce   : > { %v4085_v20 = vadd.f32 %v4077_v17, %v20286_v12  ;;  %v4104_v62 = vsel %vm3316_vm1, %v4084_v10, -inf  ;;  %v4134_v12 = vsel %vm3316_vm1, %v20552_v58, 0.0  ;;  %v20559_v39 = vpop.eup %18248 }
 0x9cf   : > { %v4098_v50 = vsel %vm3316_vm1, %v4082_v30, -inf  ;;  %v4083_v23 = vadd.f32 %v4075_v56, %v20289_v61  ;;  %v4137_v61 = vsel %vm3316_vm1, %v20555_v44, 0.0  ;;  %v20563_v17 = vpop.eup %18250  ;;  %v4140_v15 = vsel %vm3316_vm1, %v20559_v39, 0.0 }
 0x9d0   : > { %4099 = vmax.xlane.f32.xlu0 %v4098_v50  ;;  %v4107_v52 = vsel %vm3316_vm1, %v4085_v20, -inf  ;;  %v4143_v35 = vsel %vm3316_vm1, %v20563_v17, 0.0 }
 0x9d1   : > { %4108 = vmax.xlane.f32.xlu1 %v4107_v52  ;;  %v4101_v8 = vsel %vm3316_vm1, %v4083_v23, -inf }
 0x9d4   : > { %4105 = vmax.xlane.f32.xlu0 %v4104_v62 }
 0x9d5   : > { %4102 = vmax.xlane.f32.xlu1 %v4101_v8 }
 0x9d8   : > { %4135 = vadd.xlane.f32.xlu0 %v4134_v12 }
 0x9d9   : > { %4138 = vadd.xlane.f32.xlu1 %v4137_v61 }
 0x9dc   : > { %4141 = vadd.xlane.f32.xlu0 %v4140_v15 }
 0x9dd   : > { %4144 = vadd.xlane.f32.xlu1 %v4143_v35 }
 0x9ee   : > { %4182 = vrot.lane.b32.xlu1 %v20219_v9, %s19155_s26 }
 0x9f2   : > { %4180 = vrot.lane.b32.xlu0 %v20217_v7, %s19155_s26  ;;  %4186 = vrot.lane.b32.xlu1 %v20239_v34, %s19155_s26 }
 0x9f6   : > { %4184 = vrot.lane.b32.xlu0 %v20237_v32, %s19155_s26  ;;  %4320 = vrot.lane.b32.xlu1 %v20258_v54, %s19156_s17 }
 0x9fa   : > { %4251 = vrot.lane.b32.xlu0 %v20249_v38, %s19155_s26  ;;  %4249 = vrot.lane.b32.xlu1 %v20247_v36, %s19155_s26 }
 0x9fe   : > { %4255 = vrot.lane.b32.xlu0 %v20256_v49, %s19155_s26  ;;  %4253 = vrot.lane.b32.xlu1 %v20254_v46, %s19155_s26 }
 0xa02   : > { %4316 = vrot.lane.b32.xlu0 %v20148_v4, %s19156_s17  ;;  %4322 = vrot.lane.b32.xlu1 %v20262_v59, %s19156_s17 }
 0xa06   : > { %4318 = vrot.lane.b32.xlu1 %v20164_v53, %s19156_s17 }
 0xa5d   : > { %v4100_v7 = vpop.xlane.xlu0 %4099 }
 0xa5e   : > { %v4114_v32 = vsub.f32 %v4082_v30, %v4100_v7  ;;  %v4109_v56 = vpop.xlane.xlu1 %4108 }
 0xa5f   : > { %v4117_v63 = vsub.f32 %v4085_v20, %v4109_v56 }
 0xa60   : > { %v4126_v36 = vmul.f32 1.442695, %v4114_v32 }
 0xa61   : > { %v4132_v6 = vmul.f32 1.442695, %v4117_v63  ;;  %v4106_v18 = vpop.xlane.xlu0 %4105 }
 0xa62   : > { %18252 = vpow2.f32 %v4126_v36  ;;  %v4116_v21 = vsub.f32 %v4084_v10, %v4106_v18  ;;  %v4103_v45 = vpop.xlane.xlu1 %4102 }
 0xa63   : > { %v4115_v46 = vsub.f32 %v4083_v23, %v4103_v45  ;;  %18254 = vpow2.f32 %v4132_v6 }
 0xa64   : > { %v4130_v33 = vmul.f32 1.442695, %v4116_v21 }
 0xa65   : > { %v4128_v16 = vmul.f32 1.442695, %v4115_v46  ;;  %v4136_v26 = vpop.xlane.xlu0 %4135 }
 0xa66   : > { %18256 = vpow2.f32 %v4130_v33  ;;  %v4139_v43 = vpop.xlane.xlu1 %4138 }
 0xa67   : > { %18258 = vpow2.f32 %v4128_v16 }
 0xa68   : > { %18260 = vrcp.f32 %v4136_v26 }
 0xa69   : > { %18262 = vrcp.f32 %v4139_v43  ;;  %v4142_v22 = vpop.xlane.xlu0 %4141 }
 0xa6a   : > { %18264 = vrcp.f32 %v4142_v22  ;;  %v4145_v37 = vpop.xlane.xlu1 %4144 }
 0xa6b   : > { %18266 = vrcp.f32 %v4145_v37 }
 0xa6c   : > { %v20593_v30 = vpop.eup %18252 }
 0xa6d   : > { %v4181_v20 = vpop.permute.xlu0 %4180  ;;  %v4146_v50 = vsel %vm3316_vm1, %v20593_v30, 0.0  ;;  %v20597_v10 = vpop.eup %18254 }
 0xa6e   : > { %4147 = vadd.xlane.f32.xlu1 %v4146_v50  ;;  %v4183_v52 = vpop.permute.xlu1 %4182  ;;  %v4155_v15 = vsel %vm3316_vm1, %v20597_v10, 0.0 }
 0xa6f   : > { %v4188_v23 = vsel %vm3316_vm1, %v4181_v20, %v4183_v52 }
 0xa70   : > { %v20600_v62 = vpop.eup %18256  ;;  %15970 = vmatprep.subr.bf16.mxu0 %v4188_v23 }
 0xa71   : > { %v20602_v8 = vpop.eup %18258  ;;  %v4185_v12 = vpop.permute.xlu0 %4184  ;;  %15971 = vmatpush3.bf16.msra.mxu0 %v4188_v23  ;;  %v4152_v61 = vsel %vm3316_vm1, %v20600_v62, 0.0 }
 0xa72   : > { %v18261_v35 = vpop.eup %18260  ;;  %4153 = vadd.xlane.f32.xlu0 %v4152_v61  ;;  %4156 = vadd.xlane.f32.xlu1 %v4155_v15  ;;  %v4187_v7 = vpop.permute.xlu1 %4186  ;;  %v4149_v46 = vsel %vm3316_vm1, %v20602_v8, 0.0 }
 0xa73   : > { %v18263_v32 = vpop.eup %18262  ;;  %v4189_v56 = vsel %vm3316_vm1, %v4185_v12, %v4187_v7  ;;  %v4159_v63 = vmul.f32 %v18261_v35, %v20552_v58 }
 0xa74   : > { %v18265_v36 = vpop.eup %18264  ;;  %15972 = vmatprep.subr.bf16.mxu0 %v4189_v56  ;;  %v4161_v6 = vmul.f32 %v18263_v32, %v20555_v44 }
 0xa75   : > { %v18267_v18 = vpop.eup %18266  ;;  %v4163_v21 = vmul.f32 %v18265_v36, %v20559_v39  ;;  %v4252_v45 = vpop.permute.xlu0 %4251  ;;  %15973 = vmatpush3.bf16.msra.mxu0 %v4189_v56 }
 0xa76   : > { %v4165_v33 = vmul.f32 %v18267_v18, %v20563_v17  ;;  %4150 = vadd.xlane.f32.xlu0 %v4149_v46  ;;  %v4174_v16 = vpack.c.bf16 %v4161_v6, %v4159_v63  ;;  %v4321_v26 = vpop.permute.xlu1 %4320 }
 0xa77   : > { %16590 = vmatprep.subr.msk.bf16.mxu0 %vm3177_vm0, %v4321_v26  ;;  %v4331_v37 = vsel %vm3177_vm0, %v4321_v26, 0 }
 0xa78   : > { %15974 = vmatprep.mubr.msk.bf16.mxu0 %vm3316_vm1, %v4174_v16  ;;  %v4175_v58 = vpack.c.bf16 %v4165_v33, %v4163_v21 }
 0xa79   : > { %v4256_v43 = vpop.permute.xlu0 %4255 }
 0xa7a   : > { %15975 = vmatmul.mubr.msk.bf16.vlgmr.msra.gmra.mrb[88].mxu0 %vm3316_vm1, %v4175_v58  ;;  %v4250_v44 = vpop.permute.xlu1 %4249 }
 0xa7b   : > { %v4257_v39 = vsel %vm3316_vm1, %v4250_v44, %v4252_v45 }
 0xa7c   : > { %15978 = vmatprep.subr.bf16.mxu1 %v4257_v39 }
 0xa7d   : > { %v4317_v22 = vpop.permute.xlu0 %4316  ;;  %15979 = vmatpush3.bf16.msra.mxu1 %v4257_v39 }
 0xa7e   : > { %15987 = vmatpush3.bf16.xpose.msra.mxu0 %v4331_v37  ;;  %15990 = vmatprep.mubr.msk.bf16.mxu0 %vm3177_vm0, %v4317_v22  ;;  %v4254_v17 = vpop.permute.xlu1 %4253 }
 0xa7f   : > { %v4258_v20 = vsel %vm3316_vm1, %v4254_v17, %v4256_v43 }
 0xa80   : > { %15980 = vmatprep.subr.bf16.mxu1 %v4258_v20 }
 0xa81   : > { %15981 = vmatpush3.bf16.msra.mxu1 %v4258_v20 }
 0xa82   : > { %v4323_v50 = vpop.permute.xlu1 %4322 }
 0xa83   : > { %4391 = vrot.lane.b32.xlu1 %v20270_v14, %s19156_s17  ;;  %16591 = vmatprep.subr.msk.bf16.mxu0 %vm3177_vm0, %v4323_v50  ;;  %v4334_v52 = vsel %vm3177_vm0, %v4323_v50, 0 }
 0xa86   : > { %15989 = vmatpush3.bf16.xpose.msra.mxu0 %v4334_v52  ;;  %v4319_v23 = vpop.permute.xlu1 %4318 }
 0xa87   : > { %4387 = vrot.lane.b32.xlu1 %v20183_v31, %s19156_s17 }
 0xa8c   : > { %4389 = vrot.lane.b32.xlu0 %v20266_v1, %s19156_s17 }
 0xa8d   : > { %15991 = vmatmul.mubr.msk.bf16.vlgmr.msra.gmra.mrb[92].mxu0 %vm3177_vm0, %v4319_v23 }
 0xa90   : > { %4385 = vrot.lane.b32.xlu0 %v20176_v25, %s19156_s17 }
 0xafb   : > { %v4148_v12 = vpop.xlane.xlu1 %4147 }
 0xaff   : > { %v4154_v61 = vpop.xlane.xlu0 %4153  ;;  %v4157_v15 = vpop.xlane.xlu1 %4156 }
 0xb00   : > { %18268 = vrcp.f32 %v4154_v61  ;;  %v20657_v61 = vld [vmem:[#allocation6] sm:$0xff] }
 0xb01   : > { %18270 = vrcp.f32 %v4157_v15 }
 0xb02   : > { %18272 = vrcp.f32 %v4148_v12 }
 0xb03   : > { %v4151_v35 = vpop.xlane.xlu0 %4150  ;;  %v4392_v58 = vpop.permute.xlu1 %4391 }
 0xb04   : > { %18274 = vrcp.f32 %v4151_v35 }
 0xb07   : > { %v4390_v7 = vpop.permute.xlu0 %4389 }
 0xb08   : > { %16592 = vmatprep.subr.msk.bf16.mxu1 %vm3177_vm0, %v4390_v7  ;;  %v4400_v26 = vsel %vm3177_vm0, %v4390_v7, 0 }
 0xb0a   : > { %v18269_v32 = vpop.eup %18268 }
 0xb0b   : > { %v18271_v56 = vpop.eup %18270  ;;  %v4171_v6 = vmul.f32 %v18269_v32, %v20600_v62  ;;  %v4386_v16 = vpop.permute.xlu0 %4385  ;;  %v20661_v32 = vld [vmem:[#allocation6 + $0x8] sm:$0xff] }
 0xb0c   : > { %v18273_v63 = vpop.eup %18272  ;;  %v4173_v18 = vmul.f32 %v18271_v56, %v20597_v10  ;;  %v4403_v10 = vsel %vm3177_vm0, %v4392_v58, 0 }
 0xb0d   : > { %v4167_v21 = vmul.f32 %v18273_v63, %v20593_v30  ;;  %v4388_v30 = vpop.permute.xlu1 %4387  ;;  %v20664_v63 = vld [vmem:[#allocation6 + $0x10] sm:$0xff] }
 0xb0e   : > { %v18275_v36 = vpop.eup %18274  ;;  %v4177_v33 = vpack.c.bf16 %v4173_v18, %v4171_v6 }
 0xb0f   : > { %v4169_v45 = vmul.f32 %v18275_v36, %v20602_v8 }
 0xb11   : > { %v4176_v46 = vpack.c.bf16 %v4169_v45, %v4167_v21  ;;  %v20669_v21 = vld [vmem:[#allocation6 + $0x18] sm:$0xff] }
 0xb13   : > { %15982 = vmatprep.mubr.msk.bf16.mxu1 %vm3316_vm1, %v4176_v46 }
 0xb14   : > { %15983 = vmatmul.mubr.msk.bf16.vlgmr.msra.gmra.mrb[56].mxu1 %vm3316_vm1, %v4177_v33 }
 0xb15   : > { %15995 = vmatpush3.bf16.xpose.msra.mxu1 %v4400_v26  ;;  %15998 = vmatprep.mubr.msk.bf16.mxu1 %vm3177_vm0, %v4386_v16 }
 0xb16   : > { %16593 = vmatprep.subr.msk.bf16.mxu1 %vm3177_vm0, %v4392_v58 }
 0xb1d   : > { %15997 = vmatpush3.bf16.xpose.msra.mxu1 %v4403_v10 }
 0xb24   : > { %15999 = vmatmul.mubr.msk.bf16.vlgmr.msra.gmra.mrb[60].mxu1 %vm3177_vm0, %v4388_v30 }
 0xb4d   : > { %v20645_v62 = vpop.f32.mrb[88].mxu0 }
 0xb4e   : > { %24032 = vst [vmem:[#allocation52_spill] sm:$0xff] %v20645_v62  ;;  %v20647_v8 = vpop.f32.mrb[89].mxu0 }
 0xb4f   : > { %v20649_v43 = vpop.f32.mrb[90].mxu0 }
 0xb50   : > { %24033 = vst [vmem:[#allocation53_spill] sm:$0xff] %v20649_v43  ;;  %v20653_v39 = vpop.f32.mrb[91].mxu0 }
 0xb60   : > { %v15992_v37 = vpop.f32.mrb[92].mxu0 }
 0xb61   : > { %v4370_v17 = vpop.f32.mrb[93].mxu0  ;;  %v4456_v20 = vmul.f32 0.14433756, %v15992_v37 }
 0xb62   : > { %v4454_v50 = vmul.f32 0.14433756, %v4370_v17  ;;  %v15993_v52 = vpop.f32.mrb[94].mxu0 }
 0xb63   : > { %v4373_v23 = vpop.f32.mrb[95].mxu0  ;;  %v4457_v35 = vmul.f32 0.14433756, %v15993_v52  ;;  %v4464_v36 = vadd.f32 %v20664_v63, %v4456_v20 }
 0xb64   : > { %v4455_v12 = vmul.f32 0.14433756, %v4373_v23  ;;  %v4462_v15 = vadd.f32 %v20657_v61, %v4454_v50 }
 0xb65   : > { %v4476_v18 = vsel %vm3316_vm1, %v4464_v36, -inf  ;;  %v4465_v45 = vadd.f32 %v20669_v21, %v4457_v35 }
 0xb66   : > { %v4470_v7 = vsel %vm3316_vm1, %v4462_v15, -inf  ;;  %v4463_v56 = vadd.f32 %v20661_v32, %v4455_v12 }
 0xb67   : > { %4471 = vmax.xlane.f32.xlu0 %v4470_v7  ;;  %v4479_v46 = vsel %vm3316_vm1, %v4465_v45, -inf }
 0xb68   : > { %v4473_v6 = vsel %vm3316_vm1, %v4463_v56, -inf }
 0xb69   : > { %4474 = vmax.xlane.f32.xlu1 %v4473_v6 }
 0xb6b   : > { %4477 = vmax.xlane.f32.xlu0 %v4476_v18 }
 0xb6f   : > { %4480 = vmax.xlane.f32.xlu0 %v4479_v46 }
 0xbe7   : > { %v20673_v33 = vpop.f32.mrb[56].mxu1 }
 0xbe8   : > { %24034 = vst [vmem:[#allocation54_spill] sm:$0xff] %v20673_v33  ;;  %v20675_v16 = vpop.f32.mrb[57].mxu1 }
 0xbe9   : > { %v20677_v26 = vpop.f32.mrb[58].mxu1 }
 0xbea   : > { %24035 = vst [vmem:[#allocation55_spill] sm:$0xff] %v20677_v26  ;;  %v20681_v10 = vpop.f32.mrb[59].mxu1 }
 0xbf4   : > { %v4472_v37 = vpop.xlane.xlu0 %4471 }
 0xbf5   : > { %v4494_v17 = vsub.f32 %v4462_v15, %v4472_v37 }
 0xbf6   : > { %v4475_v20 = vpop.xlane.xlu1 %4474 }
 0xbf7   : > { %v4502_v50 = vmul.f32 1.442695, %v4494_v17  ;;  %v16000_v52 = vpop.f32.mrb[60].mxu1  ;;  %v4495_v23 = vsub.f32 %v4463_v56, %v4475_v20 }
 0xbf8   : > { %v4460_v12 = vmul.f32 0.14433756, %v16000_v52  ;;  %v4439_v35 = vpop.f32.mrb[61].mxu1  ;;  %v4478_v7 = vpop.xlane.xlu0 %4477 }
 0xbf9   : > { %18276 = vpow2.f32 %v4502_v50  ;;  %v4504_v6 = vmul.f32 1.442695, %v4495_v23  ;;  %v4458_v18 = vmul.f32 0.14433756, %v4439_v35  ;;  %v4496_v46 = vsub.f32 %v4464_v36, %v4478_v7  ;;  %v16001_v44 = vpop.f32.mrb[62].mxu1 }
 0xbfa   : > { %v4461_v58 = vmul.f32 0.14433756, %v16001_v44  ;;  %v4442_v22 = vpop.f32.mrb[63].mxu1  ;;  %v4468_v15 = vadd.f32 %v20664_v63, %v4460_v12 }
 0xbfb   : > { %18278 = vpow2.f32 %v4504_v6  ;;  %v4506_v33 = vmul.f32 1.442695, %v4496_v46  ;;  %v4459_v26 = vmul.f32 0.14433756, %v4442_v22  ;;  %v4466_v30 = vadd.f32 %v20657_v61, %v4458_v18 }
 0xbfc   : > { %v4481_v37 = vpop.xlane.xlu0 %4480  ;;  %v4469_v36 = vadd.f32 %v20669_v21, %v4461_v58  ;;  %v4488_v22 = vsel %vm3316_vm1, %v4468_v15, -inf }
 0xbfd   : > { %18280 = vpow2.f32 %v4506_v33  ;;  %v4497_v56 = vsub.f32 %v4465_v45, %v4481_v37  ;;  %v4482_v17 = vsel %vm3316_vm1, %v4466_v30, -inf  ;;  %v4467_v20 = vadd.f32 %v20661_v32, %v4459_v26 }
 0xbfe   : > { %4483 = vmax.xlane.f32.xlu0 %v4482_v17  ;;  %v4491_v33 = vsel %vm3316_vm1, %v4469_v36, -inf }
 0xbff   : > { %v4508_v50 = vmul.f32 1.442695, %v4497_v56  ;;  %v4485_v44 = vsel %vm3316_vm1, %v4467_v20, -inf }
 0xc00   : > { %4486 = vmax.xlane.f32.xlu1 %v4485_v44 }
 0xc01   : > { %18282 = vpow2.f32 %v4508_v50 }
 0xc02   : > { %4489 = vmax.xlane.f32.xlu0 %v4488_v22 }
 0xc03   : > { %v20692_v52 = vpop.eup %18276 }
 0xc04   : > { %4492 = vmax.xlane.f32.xlu1 %v4491_v33  ;;  %v4518_v45 = vsel %vm3316_vm1, %v20692_v52, 0.0 }
 0xc05   : > { %v18279_v26 = vpop.eup %18278 }
 0xc06   : > { %4519 = vadd.xlane.f32.xlu0 %v4518_v45  ;;  %v4521_v58 = vsel %vm3316_vm1, %v18279_v26, 0.0 }
 0xc07   : > { %v20698_v23 = vpop.eup %18280 }
 0xc08   : > { %4522 = vadd.xlane.f32.xlu1 %v4521_v58  ;;  %v4524_v12 = vsel %vm3316_vm1, %v20698_v23, 0.0 }
 0xc0a   : > { %4525 = vadd.xlane.f32.xlu0 %v4524_v12 }
 0xc0b   : > { %v20702_v35 = vpop.eup %18282 }
 0xc0c   : > { %v4527_v7 = vsel %vm3316_vm1, %v20702_v35, 0.0 }
 0xc0d   : > { %4528 = vadd.xlane.f32.xlu1 %v4527_v7 }
 0xc1e   : > { %4564 = vrot.lane.b32.xlu1 %v20239_v34, %s19156_s17 }
 0xc20   : > { %4562 = vrot.lane.b32.xlu0 %v20219_v9, %s19156_s17 }
 0xc22   : > { %4623 = vrot.lane.b32.xlu1 %v20249_v38, %s19156_s17 }
 0xc24   : > { %4688 = vrot.lane.b32.xlu0 %v20258_v54, %s19157_s1 }
 0xc26   : > { %4690 = vrot.lane.b32.xlu1 %v20262_v59, %s19157_s1 }
 0xc28   : > { %4625 = vrot.lane.b32.xlu0 %v20256_v49, %s19156_s17 }
 0xc2c   : > { %4684 = vrot.lane.b32.xlu0 %v20148_v4, %s19157_s1 }
 0xc8b   : > { %v4484_v6 = vpop.xlane.xlu0 %4483 }
 0xc8c   : > { %v4498_v18 = vsub.f32 %v4466_v30, %v4484_v6 }
 0xc8d   : > { %v4487_v46 = vpop.xlane.xlu1 %4486 }
 0xc8e   : > { %v4510_v37 = vmul.f32 1.442695, %v4498_v18  ;;  %v4499_v44 = vsub.f32 %v4467_v20, %v4487_v46 }
 0xc8f   : > { %v4490_v56 = vpop.xlane.xlu0 %4489 }
 0xc90   : > { %18284 = vpow2.f32 %v4510_v37  ;;  %v4500_v17 = vsub.f32 %v4468_v15, %v4490_v56  ;;  %v4512_v7 = vmul.f32 1.442695, %v4499_v44 }
 0xc91   : > { %v4493_v50 = vpop.xlane.xlu1 %4492 }
 0xc92   : > { %v4514_v22 = vmul.f32 1.442695, %v4500_v17  ;;  %v4501_v33 = vsub.f32 %v4469_v36, %v4493_v50 }
 0xc93   : > { %v4520_v45 = vpop.xlane.xlu0 %4519 }
 0xc94   : > { %18286 = vpow2.f32 %v4514_v22  ;;  %v4516_v58 = vmul.f32 1.442695, %v4501_v33 }
 0xc95   : > { %18288 = vrcp.f32 %v4520_v45  ;;  %v4523_v12 = vpop.xlane.xlu1 %4522 }
 0xc96   : > { %18290 = vpow2.f32 %v4516_v58 }
 0xc97   : > { %18292 = vrcp.f32 %v4523_v12  ;;  %v4526_v2 = vpop.xlane.xlu0 %4525 }
 0xc98   : > { %18294 = vrcp.f32 %v4526_v2 }
 0xc99   : > { %18296 = vpow2.f32 %v4512_v7 }
 0xc9a   : > { %v20720_v30 = vpop.eup %18284  ;;  %v4529_v6 = vpop.xlane.xlu1 %4528 }
 0xc9b   : > { %v4563_v18 = vpop.permute.xlu0 %4562  ;;  %18298 = vrcp.f32 %v4529_v6  ;;  %v4530_v15 = vsel %vm3316_vm1, %v20720_v30, 0.0 }
 0xc9c   : > { %4531 = vadd.xlane.f32.xlu0 %v4530_v15  ;;  %16002 = vmatprep.subr.bf16.mxu0 %v4563_v18 }
 0xc9d   : > { %16003 = vmatpush3.bf16.msra.mxu0 %v4563_v18 }
 0xc9e   : > { %v20724_v20 = vpop.eup %18286  ;;  %v4565_v36 = vpop.permute.xlu1 %4564 }
 0xc9f   : > { %v18289_v46 = vpop.eup %18288  ;;  %v4689_v37 = vpop.permute.xlu0 %4688  ;;  %v4536_v2 = vsel %vm3316_vm1, %v20724_v20, 0.0  ;;  %16004 = vmatprep.subr.bf16.mxu0 %v4565_v36 }
 0xca0   : > { %v18291_v56 = vpop.eup %18290  ;;  %4537 = vadd.xlane.f32.xlu1 %v4536_v2  ;;  %v4543_v44 = vmul.f32 %v18289_v46, %v20692_v52  ;;  %v4699_v46 = vsel %vm3177_vm0, %v4689_v37, 0 }
 0xca1   : > { %v18293_v17 = vpop.eup %18292  ;;  %16005 = vmatpush3.bf16.msra.mxu0 %v4565_v36  ;;  %v4539_v45 = vsel %vm3316_vm1, %v18291_v56, 0.0 }
 0xca2   : > { %16594 = vmatprep.subr.msk.bf16.mxu0 %vm3177_vm0, %v4689_v37  ;;  %v4624_v50 = vpop.permute.xlu1 %4623  ;;  %v4545_v22 = vmul.f32 %v18293_v17, %v18279_v26  ;;  %v18295_v33 = vpop.eup %18294 }
 0xca3   : > { %16010 = vmatprep.subr.bf16.mxu1 %v4624_v50  ;;  %v18297_v58 = vpop.eup %18296  ;;  %v4626_v12 = vpop.permute.xlu0 %4625  ;;  %v4547_v18 = vmul.f32 %v18295_v33, %v20698_v23 }
 0xca4   : > { %4540 = vadd.xlane.f32.xlu1 %v4539_v45  ;;  %v4558_v7 = vpack.c.bf16 %v4545_v22, %v4543_v44  ;;  %16011 = vmatpush3.bf16.msra.mxu1 %v4624_v50  ;;  %v4533_v52 = vsel %vm3316_vm1, %v18297_v58, 0.0 }
 0xca5   : > { %v18299_v6 = vpop.eup %18298  ;;  %16012 = vmatprep.subr.bf16.mxu1 %v4626_v12 }
 0xca6   : > { %v4549_v15 = vmul.f32 %v18299_v6, %v20702_v35  ;;  %16006 = vmatprep.mubr.msk.bf16.mxu0 %vm3316_vm1, %v4558_v7  ;;  %v4691_v2 = vpop.permute.xlu1 %4690 }
 0xca7   : > { %v4685_v36 = vpop.permute.xlu0 %4684  ;;  %v4702_v23 = vsel %vm3177_vm0, %v4691_v2, 0 }
 0xca8   : > { %4534 = vadd.xlane.f32.xlu1 %v4533_v52  ;;  %16013 = vmatpush3.bf16.msra.mxu1 %v4626_v12  ;;  %v4559_v26 = vpack.c.bf16 %v4549_v15, %v4547_v18 }
 0xcaa   : > { %16007 = vmatmul.mubr.msk.bf16.vlgmr.msra.gmra.mrb[96].mxu0 %vm3316_vm1, %v4559_v26 }
 0xcab   : > { %16019 = vmatpush3.bf16.xpose.msra.mxu0 %v4699_v46  ;;  %16022 = vmatprep.mubr.msk.bf16.mxu0 %vm3177_vm0, %v4685_v36 }
 0xcac   : > { %16595 = vmatprep.subr.msk.bf16.mxu0 %vm3177_vm0, %v4691_v2 }
 0xcb2   : > { %4757 = vrot.lane.b32.xlu0 %v20266_v1, %s19157_s1 }
 0xcb3   : > { %16021 = vmatpush3.bf16.xpose.msra.mxu0 %v4702_v23 }
 0xcb6   : > { %4753 = vrot.lane.b32.xlu0 %v20176_v25, %s19157_s1 }
 0xcb9   : > { %4686 = vrot.lane.b32.xlu1 %v20164_v53, %s19157_s1 }
 0xcbd   : > { %4759 = vrot.lane.b32.xlu1 %v20270_v14, %s19157_s1 }
 0xcc1   : > { %4755 = vrot.lane.b32.xlu1 %v20183_v31, %s19157_s1 }
 0xd29   : > { %v4532_v35 = vpop.xlane.xlu0 %4531 }
 0xd2d   : > { %v4758_v37 = vpop.permute.xlu0 %4757  ;;  %v4538_v17 = vpop.xlane.xlu1 %4537 }
 0xd2e   : > { %16596 = vmatprep.subr.msk.bf16.mxu1 %vm3177_vm0, %v4758_v37  ;;  %v4768_v2 = vsel %vm3177_vm0, %v4758_v37, 0 }
 0xd31   : > { %v4541_v50 = vpop.xlane.xlu1 %4540  ;;  %v4754_v46 = vpop.permute.xlu0 %4753 }
 0xd32   : > { %18300 = vrcp.f32 %v4541_v50 }
 0xd33   : > { %18302 = vrcp.f32 %v4532_v35 }
 0xd34   : > { %18304 = vrcp.f32 %v4538_v17 }
 0xd35   : > { %v4535_v44 = vpop.xlane.xlu1 %4534 }
 0xd36   : > { %18306 = vrcp.f32 %v4535_v44 }
 0xd39   : > { %v4687_v22 = vpop.permute.xlu1 %4686 }
 0xd3a   : > { %16023 = vmatmul.mubr.msk.bf16.vlgmr.msra.gmra.mrb[100].mxu0 %vm3177_vm0, %v4687_v22 }
 0xd3c   : > { %v18301_v33 = vpop.eup %18300 }
 0xd3d   : > { %v18303_v45 = vpop.eup %18302  ;;  %v4557_v6 = vmul.f32 %v18301_v33, %v18291_v56  ;;  %v4760_v23 = vpop.permute.xlu1 %4759 }
 0xd3e   : > { %v18305_v12 = vpop.eup %18304  ;;  %v4551_v18 = vmul.f32 %v18303_v45, %v20720_v30  ;;  %v4771_v30 = vsel %vm3177_vm0, %v4760_v23, 0 }
 0xd3f   : > { %v4555_v52 = vmul.f32 %v18305_v12, %v20724_v20 }
 0xd40   : > { %v18307_v7 = vpop.eup %18306 }
 0xd41   : > { %v4553_v15 = vmul.f32 %v18307_v7, %v18297_v58  ;;  %v4561_v36 = vpack.c.bf16 %v4557_v6, %v4555_v52  ;;  %v4756_v56 = vpop.permute.xlu1 %4755 }
 0xd43   : > { %v4560_v26 = vpack.c.bf16 %v4553_v15, %v4551_v18 }
 0xd45   : > { %16014 = vmatprep.mubr.msk.bf16.mxu1 %vm3316_vm1, %v4560_v26 }
 0xd46   : > { %16015 = vmatmul.mubr.msk.bf16.vlgmr.msra.gmra.mrb[64].mxu1 %vm3316_vm1, %v4561_v36 }
 0xd47   : > { %16027 = vmatpush3.bf16.xpose.msra.mxu1 %v4768_v2  ;;  %16030 = vmatprep.mubr.msk.bf16.mxu1 %vm3177_vm0, %v4754_v46 }
 0xd48   : > { %16597 = vmatprep.subr.msk.bf16.mxu1 %vm3177_vm0, %v4760_v23 }
 0xd4f   : > { %16029 = vmatpush3.bf16.xpose.msra.mxu1 %v4771_v30 }
 0xd56   : > { %16031 = vmatmul.mubr.msk.bf16.vlgmr.msra.gmra.mrb[68].mxu1 %vm3177_vm0, %v4756_v56 }
 0xd7d   : > { %v20761_v20 = vpop.f32.mrb[96].mxu0 }
 0xd7e   : > { %v20763_v58 = vpop.f32.mrb[97].mxu0 }
 0xd7f   : > { %v20765_v35 = vpop.f32.mrb[98].mxu0 }
 0xd80   : > { %v20769_v17 = vpop.f32.mrb[99].mxu0 }
 0xe0d   : > { %v16024_v44 = vpop.f32.mrb[100].mxu0 }
 0xe0e   : > { %v4738_v22 = vpop.f32.mrb[101].mxu0  ;;  %v4824_v33 = vmul.f32 0.14433756, %v16024_v44 }
 0xe0f   : > { %v4822_v45 = vmul.f32 0.14433756, %v4738_v22  ;;  %v16025_v12 = vpop.f32.mrb[102].mxu0 }
 0xe10   : > { %v4741_v7 = vpop.f32.mrb[103].mxu0  ;;  %v4832_v15 = vadd.f32 %v20664_v63, %v4824_v33  ;;  %v4825_v52 = vmul.f32 0.14433756, %v16025_v12 }
 0xe11   : > { %v4830_v6 = vadd.f32 %v20657_v61, %v4822_v45  ;;  %v4823_v18 = vmul.f32 0.14433756, %v4741_v7 }
 0xe12   : > { %v4833_v2 = vadd.f32 %v20669_v21, %v4825_v52  ;;  %v4844_v23 = vsel %vm3316_vm1, %v4832_v15, -inf }
 0xe13   : > { %v4831_v26 = vadd.f32 %v20661_v32, %v4823_v18  ;;  %v4838_v36 = vsel %vm3316_vm1, %v4830_v6, -inf }
 0xe14   : > { %4839 = vmax.xlane.f32.xlu0 %v4838_v36  ;;  %v4847_v22 = vsel %vm3316_vm1, %v4833_v2, -inf }
 0xe15   : > { %v4841_v46 = vsel %vm3316_vm1, %v4831_v26, -inf }
 0xe16   : > { %4842 = vmax.xlane.f32.xlu1 %v4841_v46 }
 0xe18   : > { %4845 = vmax.xlane.f32.xlu0 %v4844_v23 }
 0xe19   : > { %v20780_v30 = vpop.f32.mrb[64].mxu1 }
 0xe1a   : > { %v20782_v56 = vpop.f32.mrb[65].mxu1 }
 0xe1b   : > { %24036 = vst [vmem:[#allocation56_spill] sm:$0xff] %v20782_v56  ;;  %v20784_v44 = vpop.f32.mrb[66].mxu1 }
 0xe1c   : > { %v20789_v45 = vpop.f32.mrb[67].mxu1  ;;  %4848 = vmax.xlane.f32.xlu0 %v4847_v22 }
 0xe1d   : > { %24037 = vst [vmem:[#allocation57_spill] sm:$0xff] %v20789_v45 }
 0xe29   : > { %v16032_v7 = vpop.f32.mrb[68].mxu1 }
 0xe2a   : > { %v4807_v18 = vpop.f32.mrb[69].mxu1  ;;  %v4828_v52 = vmul.f32 0.14433756, %v16032_v7 }
 0xe2b   : > { %v4826_v36 = vmul.f32 0.14433756, %v4807_v18  ;;  %v16033_v46 = vpop.f32.mrb[70].mxu1 }
 0xe2c   : > { %v4810_v23 = vpop.f32.mrb[71].mxu1  ;;  %v20795_v37 = vadd.f32 %v20664_v63, %v4828_v52 }
 0xe2d   : > { %v4834_v50 = vadd.f32 %v20657_v61, %v4826_v36 }
 0xe2e   : > { %v4856_v22 = vsel %vm3316_vm1, %v20795_v37, -inf }
 0xe2f   : > { %v4850_v47 = vsel %vm3316_vm1, %v4834_v50, -inf }
 0xe30   : > { %4851 = vmax.xlane.f32.xlu0 %v4850_v47 }
 0xe34   : > { %4857 = vmax.xlane.f32.xlu0 %v4856_v22 }
 0xea1   : > { %v4840_v33 = vpop.xlane.xlu0 %4839 }
 0xea2   : > { %v4862_v12 = vsub.f32 %v4830_v6, %v4840_v33 }
 0xea3   : > { %v4843_v56 = vpop.xlane.xlu1 %4842 }
 0xea4   : > { %v4870_v45 = vmul.f32 1.442695, %v4862_v12  ;;  %v4863_v7 = vsub.f32 %v4831_v26, %v4843_v56 }
 0xea5   : > { %v4846_v18 = vpop.xlane.xlu0 %4845 }
 0xea6   : > { %18308 = vpow2.f32 %v4870_v45  ;;  %v4872_v62 = vmul.f32 1.442695, %v4863_v7  ;;  %v4864_v43 = vsub.f32 %v4832_v15, %v4846_v18  ;;  %v4827_v45 = vmul.f32 0.14433756, %v4810_v23 }
 0xea8   : > { %18310 = vpow2.f32 %v4872_v62  ;;  %v4874_v36 = vmul.f32 1.442695, %v4864_v43 }
 0xea9   : > { %v4849_v52 = vpop.xlane.xlu0 %4848 }
 0xeaa   : > { %18312 = vpow2.f32 %v4874_v36  ;;  %v4865_v40 = vsub.f32 %v4833_v2, %v4849_v52  ;;  %v4829_v2 = vmul.f32 0.14433756, %v16033_v46 }
 0xeac   : > { %v4876_v13 = vmul.f32 1.442695, %v4865_v40  ;;  %v20839_v33 = vadd.f32 %v20669_v21, %v4829_v2 }
 0xeae   : > { %18314 = vpow2.f32 %v4876_v13 }
 0xeb0   : > { %v20800_v47 = vpop.eup %18308 }
 0xeb1   : > { %v4886_v22 = vsel %vm3316_vm1, %v20800_v47, 0.0 }
 0xeb2   : > { %v20804_v6 = vpop.eup %18310  ;;  %4887 = vadd.xlane.f32.xlu0 %v4886_v22 }
 0xeb3   : > { %v4889_v26 = vsel %vm3316_vm1, %v20804_v6, 0.0 }
 0xeb4   : > { %v20808_v56 = vpop.eup %18312  ;;  %4890 = vadd.xlane.f32.xlu1 %v4889_v26 }
 0xeb5   : > { %v4892_v62 = vsel %vm3316_vm1, %v20808_v56, 0.0 }
 0xeb6   : > { %4893 = vadd.xlane.f32.xlu0 %v4892_v62 }
 0xeb8   : > { %v20812_v40 = vpop.eup %18314 }
 0xeb9   : > { %v4895_v13 = vsel %vm3316_vm1, %v20812_v40, 0.0 }
 0xeba   : > { %4896 = vadd.xlane.f32.xlu1 %v4895_v13 }
 0xecb   : > { %4932 = vrot.lane.b32.xlu1 %v20239_v34, %s19157_s1 }
 0xecc   : > { %4930 = vrot.lane.b32.xlu0 %v20219_v9, %s19157_s1 }
 0xecf   : > { %5069 = vrot.lane.b32.xlu1 %v20260_v57, %s19158_s25 }
 0xed0   : > { %5067 = vrot.lane.b32.xlu0 %v20258_v54, %s19158_s25  ;;  %v4852_v54 = vpop.xlane.xlu0 %4851 }
 0xed1   : > { %v4866_v43 = vsub.f32 %v4834_v50, %v4852_v54 }
 0xed3   : > { %4993 = vrot.lane.b32.xlu1 %v20256_v49, %s19157_s1  ;;  %v4878_v15 = vmul.f32 1.442695, %v4866_v43 }
 0xed4   : > { %4991 = vrot.lane.b32.xlu0 %v20249_v38, %s19157_s1  ;;  %v4858_v46 = vpop.xlane.xlu0 %4857 }
 0xed5   : > { %18316 = vpow2.f32 %v4878_v15  ;;  %v4868_v23 = vsub.f32 %v20795_v37, %v4858_v46 }
 0xed7   : > { %5073 = vrot.lane.b32.xlu1 %v20264_v60, %s19158_s25  ;;  %v4882_v7 = vmul.f32 1.442695, %v4868_v23 }
 0xed8   : > { %5071 = vrot.lane.b32.xlu0 %v20262_v59, %s19158_s25  ;;  %v20844_v59 = vadd.f32 %v20661_v32, %v4827_v45 }
 0xed9   : > { %18318 = vpow2.f32 %v4882_v7 }
 0xeda   : > { %v4853_v50 = vsel %vm3316_vm1, %v20844_v59, -inf }
 0xedb   : > { %5056 = vrot.lane.b32.xlu1 %v20189_v41, %s19158_s25 }
 0xedc   : > { %5054 = vrot.lane.b32.xlu0 %v20148_v4, %s19158_s25 }
 0xedf   : > { %v20841_v12 = vpop.eup %18316 }
 0xee0   : > { %5058 = vrot.lane.b32.xlu0 %v20164_v53, %s19158_s25  ;;  %v4898_v4 = vsel %vm3316_vm1, %v20841_v12, 0.0  ;;  %v4859_v53 = vsel %vm3316_vm1, %v20839_v33, -inf }
 0xee3   : > { %v20863_v18 = vpop.eup %18318 }
 0xee4   : > { %v4904_v36 = vsel %vm3316_vm1, %v20863_v18, 0.0 }
 0xeff   : > { %4899 = vadd.xlane.f32.xlu0 %v4898_v4  ;;  %4860 = vmax.xlane.f32.xlu1 %v4859_v53 }
 0xf03   : > { %4854 = vmax.xlane.f32.xlu1 %v4853_v50 }
 0xf14   : > { %5060 = vrot.lane.b32.xlu1 %v20201_v55, %s19158_s25 }
 0xf15   : > { %5152 = vrot.lane.b32.xlu0 %v20266_v1, %s19158_s25 }
 0xf19   : > { %5156 = vrot.lane.b32.xlu0 %v20270_v14, %s19158_s25 }
 0xf1d   : > { %5140 = vrot.lane.b32.xlu0 %v20176_v25, %s19158_s25 }
 0xf21   : > { %5144 = vrot.lane.b32.xlu0 %v20183_v31, %s19158_s25 }
 0xf38   : > { %4905 = vadd.xlane.f32.xlu1 %v4904_v36 }
 0xf3f   : > { %v4888_v1 = vpop.xlane.xlu0 %4887 }
 0xf40   : > { %18320 = vrcp.f32 %v4888_v1 }
 0xf41   : > { %v4891_v14 = vpop.xlane.xlu1 %4890 }
 0xf42   : > { %18322 = vrcp.f32 %v4891_v14 }
 0xf43   : > { %v4894_v52 = vpop.xlane.xlu0 %4893 }
 0xf44   : > { %18324 = vrcp.f32 %v4894_v52 }
 0xf47   : > { %v4931_v25 = vpop.permute.xlu0 %4930  ;;  %v4897_v22 = vpop.xlane.xlu1 %4896 }
 0xf48   : > { %18326 = vrcp.f32 %v4897_v22  ;;  %16034 = vmatprep.subr.bf16.mxu0 %v4931_v25 }
 0xf49   : > { %16035 = vmatpush3.bf16.msra.mxu0 %v4931_v25  ;;  %5154 = vrot.lane.b32.xlu1 %v20268_v11, %s19158_s25 }
 0xf4a   : > { %v18321_v31 = vpop.eup %18320 }
 0xf4b   : > { %v5068_v37 = vpop.permute.xlu0 %5067  ;;  %v4933_v26 = vpop.permute.xlu1 %4932  ;;  %v4911_v13 = vmul.f32 %v18321_v31, %v20800_v47 }
 0xf4c   : > { %v18323_v62 = vpop.eup %18322  ;;  %16036 = vmatprep.subr.bf16.mxu0 %v4933_v26 }
 0xf4d   : > { %16037 = vmatpush3.bf16.msra.mxu0 %v4933_v26  ;;  %v4913_v54 = vmul.f32 %v18323_v62, %v20804_v6 }
 0xf4e   : > { %v18325_v45 = vpop.eup %18324 }
 0xf4f   : > { %v4992_v43 = vpop.permute.xlu0 %4991  ;;  %v5070_v15 = vpop.permute.xlu1 %5069  ;;  %v4926_v2 = vpack.c.bf16 %v4913_v54, %v4911_v13  ;;  %v4915_v50 = vmul.f32 %v18325_v45, %v20808_v56 }
 0xf50   : > { %v5075_v4 = vsel %vm5062_vm2, %v5068_v37, %v5070_v15  ;;  %16042 = vmatprep.subr.bf16.mxu1 %v4992_v43 }
 0xf51   : > { %16038 = vmatprep.mubr.msk.bf16.mxu0 %vm3316_vm1, %v4926_v2  ;;  %16043 = vmatpush3.bf16.msra.mxu1 %v4992_v43  ;;  %v5084_v7 = vsel %vm3177_vm0, %v5075_v4, 0 }
 0xf52   : > { %v18327_v53 = vpop.eup %18326  ;;  %16598 = vmatprep.subr.msk.bf16.mxu0 %vm3177_vm0, %v5075_v4 }
 0xf53   : > { %v4917_v46 = vmul.f32 %v18327_v53, %v20812_v40  ;;  %v4994_v47 = vpop.permute.xlu1 %4993  ;;  %v5072_v6 = vpop.permute.xlu0 %5071 }
 0xf54   : > { %16044 = vmatprep.subr.bf16.mxu1 %v4994_v47 }
 0xf55   : > { %16045 = vmatpush3.bf16.msra.mxu1 %v4994_v47  ;;  %v4927_v23 = vpack.c.bf16 %v4917_v46, %v4915_v50 }
 0xf57   : > { %16039 = vmatmul.mubr.msk.bf16.vlgmr.msra.gmra.mrb[104].mxu0 %vm3316_vm1, %v4927_v23  ;;  %v5074_v36 = vpop.permute.xlu1 %5073  ;;  %v5055_v14 = vpop.permute.xlu0 %5054 }
 0xf58   : > { %16051 = vmatpush3.bf16.xpose.msra.mxu0 %v5084_v7  ;;  %v5076_v1 = vsel %vm5062_vm2, %v5072_v6, %v5074_v36 }
 0xf59   : > { %16599 = vmatprep.subr.msk.bf16.mxu0 %vm3177_vm0, %v5076_v1  ;;  %v5087_v40 = vsel %vm3177_vm0, %v5076_v1, 0 }
 0xf5b   : > { %v5057_v52 = vpop.permute.xlu1 %5056  ;;  %v5059_v13 = vpop.permute.xlu0 %5058 }
 0xf5c   : > { %v5063_v56 = vsel %vm5062_vm2, %v5055_v14, %v5057_v52 }
 0xf5d   : > { %16054 = vmatprep.mubr.msk.bf16.mxu0 %vm3177_vm0, %v5063_v56 }
 0xf60   : > { %16053 = vmatpush3.bf16.xpose.msra.mxu0 %v5087_v40 }
 0xf8c   : > { %v4861_v25 = vpop.xlane.xlu1 %4860 }
 0xf8d   : > { %v4869_v22 = vsub.f32 %v20839_v33, %v4861_v25 }
 0xf8f   : > { %v4884_v31 = vmul.f32 1.442695, %v4869_v22 }
 0xf90   : > { %v4855_v37 = vpop.xlane.xlu1 %4854 }
 0xf91   : > { %18328 = vpow2.f32 %v4884_v31  ;;  %v4867_v26 = vsub.f32 %v20844_v59, %v4855_v37  ;;  %v4900_v59 = vpop.xlane.xlu0 %4899 }
 0xf93   : > { %v4880_v62 = vmul.f32 1.442695, %v4867_v26 }
 0xf94   : > { %v5061_v54 = vpop.permute.xlu1 %5060 }
 0xf95   : > { %18330 = vpow2.f32 %v4880_v62  ;;  %v5064_v43 = vsel %vm5062_vm2, %v5059_v13, %v5061_v54  ;;  %v5153_v53 = vpop.permute.xlu0 %5152 }
 0xf96   : > { %16055 = vmatmul.mubr.msk.bf16.vlgmr.msra.gmra.mrb[108].mxu0 %vm3177_vm0, %v5064_v43 }
 0xf99   : > { %v5157_v31 = vpop.permute.xlu0 %5156 }
 0xf9b   : > { %v18329_v15 = vpop.eup %18328 }
 0xf9c   : > { %v4907_v2 = vsel %vm3316_vm1, %v18329_v15, 0.0 }
 0xf9d   : > { %4908 = vadd.xlane.f32.xlu1 %v4907_v2 }
 0xf9f   : > { %v18331_v45 = vpop.eup %18330 }
 0xfa0   : > { %v4901_v33 = vsel %vm3316_vm1, %v18331_v45, 0.0 }
 0xfa1   : > { %4902 = vadd.xlane.f32.xlu1 %v4901_v33 }
 0xfb2   : > { %5158 = vrot.lane.b32.xlu1 %v20272_v19, %s19158_s25 }
 0xfb6   : > { %5142 = vrot.lane.b32.xlu1 %v20213_v0, %s19158_s25 }
 0xfba   : > { %5146 = vrot.lane.b32.xlu1 %v20233_v29, %s19158_s25 }
 0xfc5   : > { %v4906_v4 = vpop.xlane.xlu1 %4905 }
 0xfc9   : > { %v5155_v50 = vpop.permute.xlu1 %5154 }
 0xfca   : > { %v5160_v46 = vsel %vm5062_vm2, %v5153_v53, %v5155_v50 }
 0xfcb   : > { %16600 = vmatprep.subr.msk.bf16.mxu1 %vm3177_vm0, %v5160_v46 }
0x102a   : > { %v20897_v47 = vpop.f32.mrb[104].mxu0  ;;  %v4909_v6 = vpop.xlane.xlu1 %4908 }
0x102b   : > { %v20899_v23 = vpop.f32.mrb[105].mxu0  ;;  %18332 = vrcp.f32 %v4909_v6 }
0x102c   : > { %v20901_v7 = vpop.f32.mrb[106].mxu0  ;;  %18334 = vrcp.f32 %v4900_v59  ;;  %v5141_v59 = vpop.permute.xlu0 %5140 }
0x102d   : > { %v20905_v1 = vpop.f32.mrb[107].mxu0  ;;  %18336 = vrcp.f32 %v4906_v4  ;;  %v5169_v4 = vsel %vm3177_vm0, %v5160_v46, 0 }
0x102e   : > { %v4903_v52 = vpop.xlane.xlu1 %4902 }
0x102f   : > { %18338 = vrcp.f32 %v4903_v52 }
0x1032   : > { %v5159_v40 = vpop.permute.xlu1 %5158 }
0x1033   : > { %v5161_v50 = vsel %vm5062_vm2, %v5157_v31, %v5159_v40 }
0x1035   : > { %v18333_v56 = vpop.eup %18332 }
0x1036   : > { %v18335_v25 = vpop.eup %18334  ;;  %v4925_v26 = vmul.f32 %v18333_v56, %v18329_v15  ;;  %v5143_v43 = vpop.permute.xlu1 %5142 }
0x1037   : > { %v18337_v22 = vpop.eup %18336  ;;  %v4919_v62 = vmul.f32 %v18335_v25, %v20841_v12  ;;  %v5148_v53 = vsel %vm5062_vm2, %v5141_v59, %v5143_v43  ;;  %v5172_v12 = vsel %vm3177_vm0, %v5161_v50, 0  ;;  %v5145_v15 = vpop.permute.xlu0 %5144 }
0x1038   : > { %v4923_v54 = vmul.f32 %v18337_v22, %v20863_v18 }
0x1039   : > { %v18339_v37 = vpop.eup %18338 }
0x103a   : > { %v4921_v13 = vmul.f32 %v18339_v37, %v18331_v45  ;;  %v4929_v33 = vpack.c.bf16 %v4925_v26, %v4923_v54  ;;  %v5147_v18 = vpop.permute.xlu1 %5146 }
0x103b   : > { %v5149_v45 = vsel %vm5062_vm2, %v5145_v15, %v5147_v18 }
0x103c   : > { %v4928_v2 = vpack.c.bf16 %v4921_v13, %v4919_v62 }
0x103e   : > { %16046 = vmatprep.mubr.msk.bf16.mxu1 %vm3316_vm1, %v4928_v2 }
0x103f   : > { %16047 = vmatmul.mubr.msk.bf16.vlgmr.msra.gmra.mrb[72].mxu1 %vm3316_vm1, %v4929_v33 }
0x1040   : > { %16059 = vmatpush3.bf16.xpose.msra.mxu1 %v5169_v4  ;;  %16062 = vmatprep.mubr.msk.bf16.mxu1 %vm3177_vm0, %v5148_v53 }
0x1041   : > { %16601 = vmatprep.subr.msk.bf16.mxu1 %vm3177_vm0, %v5161_v50 }
0x1048   : > { %16061 = vmatpush3.bf16.xpose.msra.mxu1 %v5172_v12 }
0x104f   : > { %16063 = vmatmul.mubr.msk.bf16.vlgmr.msra.gmra.mrb[76].mxu1 %vm3177_vm0, %v5149_v45 }
0x1069   : > { %v16056_v46 = vpop.f32.mrb[108].mxu0 }
0x106a   : > { %v5123_v6 = vpop.f32.mrb[109].mxu0  ;;  %v5225_v52 = vmul.f32 0.14433756, %v16056_v46 }
0x106b   : > { %v5223_v56 = vmul.f32 0.14433756, %v5123_v6  ;;  %v16057_v25 = vpop.f32.mrb[110].mxu0 }
0x106c   : > { %v5126_v40 = vpop.f32.mrb[111].mxu0  ;;  %v5233_v37 = vadd.f32 %v20664_v63, %v5225_v52  ;;  %v5226_v26 = vmul.f32 0.14433756, %v16057_v25 }
0x106d   : > { %v5231_v22 = vadd.f32 %v20657_v61, %v5223_v56  ;;  %v5224_v31 = vmul.f32 0.14433756, %v5126_v40 }
0x106e   : > { %v5234_v43 = vadd.f32 %v20669_v21, %v5226_v26  ;;  %v5245_v2 = vsel %vm3316_vm1, %v5233_v37, -inf }
0x106f   : > { %v5232_v62 = vadd.f32 %v20661_v32, %v5224_v31  ;;  %v5239_v13 = vsel %vm3316_vm1, %v5231_v22, -inf }
0x1070   : > { %5240 = vmax.xlane.f32.xlu0 %v5239_v13  ;;  %v5248_v33 = vsel %vm3316_vm1, %v5234_v43, -inf }
0x1071   : > { %v5242_v54 = vsel %vm3316_vm1, %v5232_v62, -inf }
0x1072   : > { %5243 = vmax.xlane.f32.xlu1 %v5242_v54 }
0x1074   : > { %5246 = vmax.xlane.f32.xlu0 %v5245_v2 }
0x1078   : > { %5249 = vmax.xlane.f32.xlu0 %v5248_v33 }
0x10fd   : > { %v5241_v59 = vpop.xlane.xlu0 %5240 }
0x10fe   : > { %v5263_v6 = vsub.f32 %v5231_v22, %v5241_v59 }
0x10ff   : > { %v5244_v46 = vpop.xlane.xlu1 %5243 }
0x1100   : > { %v5264_v52 = vsub.f32 %v5232_v62, %v5244_v46  ;;  %v5271_v25 = vmul.f32 1.442695, %v5263_v6 }
0x1101   : > { %v5247_v15 = vpop.xlane.xlu0 %5246 }
0x1102   : > { %v5265_v40 = vsub.f32 %v5233_v37, %v5247_v15  ;;  %v5273_v26 = vmul.f32 1.442695, %v5264_v52  ;;  %18340 = vpow2.f32 %v5271_v25 }
0x1104   : > { %v5275_v54 = vmul.f32 1.442695, %v5265_v40  ;;  %18342 = vpow2.f32 %v5273_v26 }
0x1105   : > { %v5250_v56 = vpop.xlane.xlu0 %5249 }
0x1106   : > { %v5266_v31 = vsub.f32 %v5234_v43, %v5250_v56  ;;  %18344 = vpow2.f32 %v5275_v54 }
0x1108   : > { %v5277_v2 = vmul.f32 1.442695, %v5266_v31 }
0x110a   : > { %18346 = vpow2.f32 %v5277_v2 }
0x110c   : > { %v20948_v46 = vpop.eup %18340 }
0x1112   : > { %v20929_v4 = vpop.f32.mrb[72].mxu1 }
0x1113   : > { %24038 = vst [vmem:[#allocation58_spill] sm:$0xff] %v20929_v4  ;;  %v20931_v53 = vpop.f32.mrb[73].mxu1 }
0x1114   : > { %v20933_v50 = vpop.f32.mrb[74].mxu1 }
0x1115   : > { %24039 = vst [vmem:[#allocation59_spill] sm:$0xff] %v20933_v50  ;;  %v20937_v18 = vpop.f32.mrb[75].mxu1 }
0x1122   : > { %v16064_v13 = vpop.f32.mrb[76].mxu1 }
0x1123   : > { %v5208_v33 = vpop.f32.mrb[77].mxu1  ;;  %v5229_v12 = vmul.f32 0.14433756, %v16064_v13 }
0x1124   : > { %v5227_v36 = vmul.f32 0.14433756, %v5208_v33  ;;  %v16065_v14 = vpop.f32.mrb[78].mxu1 }
0x1125   : > { %v5230_v4 = vmul.f32 0.14433756, %v16065_v14  ;;  %v5211_v50 = vpop.f32.mrb[79].mxu1  ;;  %v5237_v37 = vadd.f32 %v20664_v63, %v5229_v12  ;;  %v5287_v63 = vsel %vm3316_vm1, %v20948_v46, 0.0 }
0x1126   : > { %v5235_v45 = vadd.f32 %v20657_v61, %v5227_v36  ;;  %v5228_v22 = vmul.f32 0.14433756, %v5211_v50  ;;  %v20951_v36 = vpop.eup %18342 }
0x1127   : > { %v5238_v62 = vadd.f32 %v20669_v21, %v5230_v4  ;;  %v5257_v14 = vsel %vm3316_vm1, %v5237_v37, -inf  ;;  %v20955_v21 = vpop.eup %18344 }
0x1128   : > { %v5251_v43 = vsel %vm3316_vm1, %v5235_v45, -inf  ;;  %v5236_v59 = vadd.f32 %v20661_v32, %v5228_v22  ;;  %v5290_v32 = vsel %vm3316_vm1, %v20951_v36, 0.0  ;;  %v20959_v4 = vpop.eup %18346  ;;  %v5293_v50 = vsel %vm3316_vm1, %v20955_v21, 0.0 }
0x1129   : > { %5252 = vmax.xlane.f32.xlu0 %v5251_v43  ;;  %v5260_v15 = vsel %vm3316_vm1, %v5238_v62, -inf  ;;  %v5296_v12 = vsel %vm3316_vm1, %v20959_v4, 0.0 }
0x112a   : > { %5261 = vmax.xlane.f32.xlu1 %v5260_v15  ;;  %v5254_v61 = vsel %vm3316_vm1, %v5236_v59, -inf }
0x112d   : > { %5258 = vmax.xlane.f32.xlu0 %v5257_v14 }
0x112e   : > { %5255 = vmax.xlane.f32.xlu1 %v5254_v61 }
0x1131   : > { %5288 = vadd.xlane.f32.xlu0 %v5287_v63 }
0x1132   : > { %5291 = vadd.xlane.f32.xlu1 %v5290_v32 }
0x1135   : > { %5294 = vadd.xlane.f32.xlu0 %v5293_v50 }
0x1136   : > { %5297 = vadd.xlane.f32.xlu1 %v5296_v12 }
0x1147   : > { %5335 = vrot.lane.b32.xlu1 %v20276_v28, %s19158_s25 }
0x114b   : > { %5333 = vrot.lane.b32.xlu0 %v20219_v9, %s19158_s25  ;;  %5339 = vrot.lane.b32.xlu1 %v20274_v24, %s19158_s25 }
0x114f   : > { %5337 = vrot.lane.b32.xlu0 %v20239_v34, %s19158_s25  ;;  %5473 = vrot.lane.b32.xlu1 %v20260_v57, %s19159_s13 }
0x1153   : > { %5404 = vrot.lane.b32.xlu0 %v20280_v48, %s19158_s25  ;;  %5402 = vrot.lane.b32.xlu1 %v20249_v38, %s19158_s25 }
0x1157   : > { %5408 = vrot.lane.b32.xlu0 %v20278_v51, %s19158_s25  ;;  %5406 = vrot.lane.b32.xlu1 %v20256_v49, %s19158_s25 }
0x115b   : > { %5469 = vrot.lane.b32.xlu0 %v20189_v41, %s19159_s13  ;;  %5475 = vrot.lane.b32.xlu1 %v20264_v60, %s19159_s13 }
0x115f   : > { %5471 = vrot.lane.b32.xlu1 %v20201_v55, %s19159_s13 }
0x11b6   : > { %v5253_v9 = vpop.xlane.xlu0 %5252 }
0x11b7   : > { %v5267_v34 = vsub.f32 %v5235_v45, %v5253_v9  ;;  %v5262_v6 = vpop.xlane.xlu1 %5261 }
0x11b8   : > { %v5270_v52 = vsub.f32 %v5238_v62, %v5262_v6 }
0x11b9   : > { %v5279_v38 = vmul.f32 1.442695, %v5267_v34 }
0x11ba   : > { %v5285_v56 = vmul.f32 1.442695, %v5270_v52  ;;  %v5259_v25 = vpop.xlane.xlu0 %5258 }
0x11bb   : > { %18348 = vpow2.f32 %v5279_v38  ;;  %v5269_v40 = vsub.f32 %v5237_v37, %v5259_v25  ;;  %v5256_v31 = vpop.xlane.xlu1 %5255 }
0x11bc   : > { %v5268_v49 = vsub.f32 %v5236_v59, %v5256_v31  ;;  %18350 = vpow2.f32 %v5285_v56 }
0x11bd   : > { %v5283_v26 = vmul.f32 1.442695, %v5269_v40 }
0x11be   : > { %v5281_v13 = vmul.f32 1.442695, %v5268_v49  ;;  %v5289_v54 = vpop.xlane.xlu0 %5288 }
0x11bf   : > { %18352 = vpow2.f32 %v5283_v26  ;;  %v5292_v2 = vpop.xlane.xlu1 %5291 }
0x11c0   : > { %18354 = vpow2.f32 %v5281_v13 }
0x11c1   : > { %18356 = vrcp.f32 %v5289_v54 }
0x11c2   : > { %18358 = vrcp.f32 %v5292_v2  ;;  %v5295_v33 = vpop.xlane.xlu0 %5294 }
0x11c3   : > { %18360 = vrcp.f32 %v5295_v33  ;;  %v5298_v45 = vpop.xlane.xlu1 %5297 }
0x11c4   : > { %18362 = vrcp.f32 %v5298_v45 }
0x11c5   : > { %v20989_v22 = vpop.eup %18348 }
0x11c6   : > { %v5334_v62 = vpop.permute.xlu0 %5333  ;;  %v5299_v37 = vsel %vm3316_vm1, %v20989_v22, 0.0  ;;  %v20993_v43 = vpop.eup %18350 }
0x11c7   : > { %5300 = vadd.xlane.f32.xlu1 %v5299_v37  ;;  %v5336_v59 = vpop.permute.xlu1 %5335  ;;  %v5308_v50 = vsel %vm3316_vm1, %v20993_v43, 0.0 }
0x11c8   : > { %v5341_v15 = vsel %vm5062_vm2, %v5334_v62, %v5336_v59 }
0x11c9   : > { %v20996_v14 = vpop.eup %18352  ;;  %16066 = vmatprep.subr.bf16.mxu0 %v5341_v15 }
0x11ca   : > { %v20998_v61 = vpop.eup %18354  ;;  %v5338_v63 = vpop.permute.xlu0 %5337  ;;  %16067 = vmatpush3.bf16.msra.mxu0 %v5341_v15  ;;  %v5305_v32 = vsel %vm3316_vm1, %v20996_v14, 0.0 }
0x11cb   : > { %v18357_v12 = vpop.eup %18356  ;;  %5306 = vadd.xlane.f32.xlu0 %v5305_v32  ;;  %5309 = vadd.xlane.f32.xlu1 %v5308_v50  ;;  %v5340_v9 = vpop.permute.xlu1 %5339  ;;  %v5302_v49 = vsel %vm3316_vm1, %v20998_v61, 0.0 }
0x11cc   : > { %v18359_v34 = vpop.eup %18358  ;;  %v5342_v6 = vsel %vm5062_vm2, %v5338_v63, %v5340_v9  ;;  %v5312_v52 = vmul.f32 %v18357_v12, %v20948_v46 }
0x11cd   : > { %v18361_v38 = vpop.eup %18360  ;;  %16068 = vmatprep.subr.bf16.mxu0 %v5342_v6  ;;  %v5314_v56 = vmul.f32 %v18359_v34, %v20951_v36 }
0x11ce   : > { %v18363_v25 = vpop.eup %18362  ;;  %v5316_v40 = vmul.f32 %v18361_v38, %v20955_v21  ;;  %v5405_v31 = vpop.permute.xlu0 %5404  ;;  %16069 = vmatpush3.bf16.msra.mxu0 %v5342_v6 }
0x11cf   : > { %v5318_v26 = vmul.f32 %v18363_v25, %v20959_v4  ;;  %5303 = vadd.xlane.f32.xlu0 %v5302_v49  ;;  %v5327_v13 = vpack.c.bf16 %v5314_v56, %v5312_v52  ;;  %v5474_v54 = vpop.permute.xlu1 %5473 }
0x11d0   : > { %16602 = vmatprep.subr.msk.bf16.mxu0 %vm3177_vm0, %v5474_v54  ;;  %v5484_v45 = vsel %vm3177_vm0, %v5474_v54, 0 }
0x11d1   : > { %16070 = vmatprep.mubr.msk.bf16.mxu0 %vm3316_vm1, %v5327_v13  ;;  %v5328_v46 = vpack.c.bf16 %v5318_v26, %v5316_v40 }
0x11d2   : > { %v5409_v2 = vpop.permute.xlu0 %5408 }
0x11d3   : > { %16071 = vmatmul.mubr.msk.bf16.vlgmr.msra.gmra.mrb[112].mxu0 %vm3316_vm1, %v5328_v46  ;;  %v5403_v36 = vpop.permute.xlu1 %5402 }
0x11d4   : > { %v5410_v21 = vsel %vm5062_vm2, %v5403_v36, %v5405_v31 }
0x11d5   : > { %16074 = vmatprep.subr.bf16.mxu1 %v5410_v21 }
0x11d6   : > { %v5470_v33 = vpop.permute.xlu0 %5469  ;;  %16075 = vmatpush3.bf16.msra.mxu1 %v5410_v21 }
0x11d7   : > { %16083 = vmatpush3.bf16.xpose.msra.mxu0 %v5484_v45  ;;  %16086 = vmatprep.mubr.msk.bf16.mxu0 %vm3177_vm0, %v5470_v33  ;;  %v5407_v4 = vpop.permute.xlu1 %5406 }
0x11d8   : > { %v5411_v62 = vsel %vm5062_vm2, %v5407_v4, %v5409_v2 }
0x11d9   : > { %16076 = vmatprep.subr.bf16.mxu1 %v5411_v62 }
0x11da   : > { %16077 = vmatpush3.bf16.msra.mxu1 %v5411_v62 }
0x11db   : > { %v5476_v37 = vpop.permute.xlu1 %5475 }
0x11dc   : > { %5544 = vrot.lane.b32.xlu1 %v20272_v19, %s19159_s13  ;;  %16603 = vmatprep.subr.msk.bf16.mxu0 %vm3177_vm0, %v5476_v37  ;;  %v5487_v59 = vsel %vm3177_vm0, %v5476_v37, 0 }
0x11df   : > { %16085 = vmatpush3.bf16.xpose.msra.mxu0 %v5487_v59  ;;  %v5472_v15 = vpop.permute.xlu1 %5471 }
0x11e0   : > { %5540 = vrot.lane.b32.xlu1 %v20233_v29, %s19159_s13 }
0x11e5   : > { %5542 = vrot.lane.b32.xlu0 %v20268_v11, %s19159_s13 }
0x11e6   : > { %16087 = vmatmul.mubr.msk.bf16.vlgmr.msra.gmra.mrb[116].mxu0 %vm3177_vm0, %v5472_v15 }
0x11e9   : > { %5538 = vrot.lane.b32.xlu0 %v20213_v0, %s19159_s13 }
0x1254   : > { %v5301_v63 = vpop.xlane.xlu1 %5300 }
0x1258   : > { %v5307_v32 = vpop.xlane.xlu0 %5306  ;;  %v5310_v50 = vpop.xlane.xlu1 %5309 }
0x1259   : > { %18364 = vrcp.f32 %v5307_v32 }
0x125a   : > { %18366 = vrcp.f32 %v5310_v50 }
0x125b   : > { %18368 = vrcp.f32 %v5301_v63  ;;  %v21053_v63 = vld [vmem:[#allocation6] sm:$0xff] }
0x125c   : > { %v5304_v12 = vpop.xlane.xlu0 %5303  ;;  %v5545_v46 = vpop.permute.xlu1 %5544 }
0x125d   : > { %18370 = vrcp.f32 %v5304_v12  ;;  %v21056_v12 = vld [vmem:[#allocation6 + $0x10] sm:$0xff] }
0x1260   : > { %v5543_v9 = vpop.permute.xlu0 %5542 }
0x1261   : > { %16604 = vmatprep.subr.msk.bf16.mxu1 %vm3177_vm0, %v5543_v9  ;;  %v5553_v54 = vsel %vm3177_vm0, %v5543_v9, 0 }
0x1263   : > { %v18365_v34 = vpop.eup %18364 }
0x1264   : > { %v18367_v6 = vpop.eup %18366  ;;  %v5324_v56 = vmul.f32 %v18365_v34, %v20996_v14  ;;  %v5539_v13 = vpop.permute.xlu0 %5538 }
0x1265   : > { %v18369_v52 = vpop.eup %18368  ;;  %v5326_v25 = vmul.f32 %v18367_v6, %v20993_v43  ;;  %v5556_v43 = vsel %vm3177_vm0, %v5545_v46, 0  ;;  %v21059_v6 = vld [vmem:[#allocation6 + $0x8] sm:$0xff] }
0x1266   : > { %v5320_v40 = vmul.f32 %v18369_v52, %v20989_v22  ;;  %v5541_v22 = vpop.permute.xlu1 %5540 }
0x1267   : > { %v18371_v38 = vpop.eup %18370  ;;  %v5330_v26 = vpack.c.bf16 %v5326_v25, %v5324_v56  ;;  %v21064_v25 = vld [vmem:[#allocation6 + $0x18] sm:$0xff] }
0x1268   : > { %v5322_v31 = vmul.f32 %v18371_v38, %v20998_v61 }
0x126a   : > { %v5329_v49 = vpack.c.bf16 %v5322_v31, %v5320_v40 }
0x126c   : > { %16078 = vmatprep.mubr.msk.bf16.mxu1 %vm3316_vm1, %v5329_v49 }
0x126d   : > { %16079 = vmatmul.mubr.msk.bf16.vlgmr.msra.gmra.mrb[80].mxu1 %vm3316_vm1, %v5330_v26 }
0x126e   : > { %16091 = vmatpush3.bf16.xpose.msra.mxu1 %v5553_v54  ;;  %16094 = vmatprep.mubr.msk.bf16.mxu1 %vm3177_vm0, %v5539_v13 }
0x126f   : > { %16605 = vmatprep.subr.msk.bf16.mxu1 %vm3177_vm0, %v5545_v46 }
0x1276   : > { %16093 = vmatpush3.bf16.xpose.msra.mxu1 %v5556_v43 }
0x127d   : > { %16095 = vmatmul.mubr.msk.bf16.vlgmr.msra.gmra.mrb[84].mxu1 %vm3177_vm0, %v5541_v22 }
0x12a6   : > { %v21041_v14 = vpop.f32.mrb[112].mxu0 }
0x12a7   : > { %v21043_v61 = vpop.f32.mrb[113].mxu0 }
0x12a8   : > { %v21045_v2 = vpop.f32.mrb[114].mxu0 }
0x12a9   : > { %v21049_v21 = vpop.f32.mrb[115].mxu0 }
0x12b9   : > { %v16088_v45 = vpop.f32.mrb[116].mxu0 }
0x12ba   : > { %v5523_v4 = vpop.f32.mrb[117].mxu0  ;;  %v5609_v62 = vmul.f32 0.14433756, %v16088_v45 }
0x12bb   : > { %v5607_v37 = vmul.f32 0.14433756, %v5523_v4  ;;  %v16089_v59 = vpop.f32.mrb[118].mxu0 }
0x12bc   : > { %v5526_v15 = vpop.f32.mrb[119].mxu0  ;;  %v5617_v9 = vadd.f32 %v21056_v12, %v5609_v62  ;;  %v5610_v34 = vmul.f32 0.14433756, %v16089_v59 }
0x12bd   : > { %v5615_v32 = vadd.f32 %v21053_v63, %v5607_v37  ;;  %v5608_v50 = vmul.f32 0.14433756, %v5526_v15 }
0x12be   : > { %v5618_v40 = vadd.f32 %v21064_v25, %v5610_v34  ;;  %v5629_v31 = vsel %vm3316_vm1, %v5617_v9, -inf }
0x12bf   : > { %v5616_v52 = vadd.f32 %v21059_v6, %v5608_v50  ;;  %v5623_v38 = vsel %vm3316_vm1, %v5615_v32, -inf }
0x12c0   : > { %5624 = vmax.xlane.f32.xlu0 %v5623_v38  ;;  %v5632_v49 = vsel %vm3316_vm1, %v5618_v40, -inf }
0x12c1   : > { %v5626_v56 = vsel %vm3316_vm1, %v5616_v52, -inf }
0x12c2   : > { %5627 = vmax.xlane.f32.xlu1 %v5626_v56 }
0x12c4   : > { %5630 = vmax.xlane.f32.xlu0 %v5629_v31 }
0x12c8   : > { %5633 = vmax.xlane.f32.xlu0 %v5632_v49 }
0x1340   : > { %v21069_v26 = vpop.f32.mrb[80].mxu1 }
0x1341   : > { %24040 = vst [vmem:[#allocation60_spill] sm:$0xff] %v21069_v26  ;;  %v21071_v13 = vpop.f32.mrb[81].mxu1 }
0x1342   : > { %v21073_v54 = vpop.f32.mrb[82].mxu1 }
0x1343   : > { %24041 = vst [vmem:[#allocation61_spill] sm:$0xff] %v21073_v54  ;;  %v21077_v43 = vpop.f32.mrb[83].mxu1 }
0x134d   : > { %v5625_v45 = vpop.xlane.xlu0 %5624 }
0x134e   : > { %v5647_v4 = vsub.f32 %v5615_v32, %v5625_v45 }
0x134f   : > { %v5628_v62 = vpop.xlane.xlu1 %5627 }
0x1350   : > { %v5655_v37 = vmul.f32 1.442695, %v5647_v4  ;;  %v16096_v59 = vpop.f32.mrb[84].mxu1  ;;  %v5648_v15 = vsub.f32 %v5616_v52, %v5628_v62 }
0x1351   : > { %v5613_v50 = vmul.f32 0.14433756, %v16096_v59  ;;  %v5592_v34 = vpop.f32.mrb[85].mxu1  ;;  %v5631_v38 = vpop.xlane.xlu0 %5630 }
0x1352   : > { %18372 = vpow2.f32 %v5655_v37  ;;  %v5657_v56 = vmul.f32 1.442695, %v5648_v15  ;;  %v5611_v31 = vmul.f32 0.14433756, %v5592_v34  ;;  %v5649_v49 = vsub.f32 %v5617_v9, %v5631_v38  ;;  %v16097_v36 = vpop.f32.mrb[86].mxu1 }
0x1353   : > { %v5614_v46 = vmul.f32 0.14433756, %v16097_v36  ;;  %v5595_v33 = vpop.f32.mrb[87].mxu1  ;;  %v5621_v32 = vadd.f32 %v21056_v12, %v5613_v50 }
0x1354   : > { %18374 = vpow2.f32 %v5657_v56  ;;  %v5619_v26 = vadd.f32 %v21053_v63, %v5611_v31  ;;  %v5659_v22 = vmul.f32 1.442695, %v5649_v49  ;;  %v5612_v54 = vmul.f32 0.14433756, %v5595_v33 }
0x1355   : > { %v5634_v45 = vpop.xlane.xlu0 %5633  ;;  %v5622_v9 = vadd.f32 %v21064_v25, %v5614_v46  ;;  %v5641_v59 = vsel %vm3316_vm1, %v5621_v32, -inf }
0x1356   : > { %18376 = vpow2.f32 %v5659_v22  ;;  %v5620_v52 = vadd.f32 %v21059_v6, %v5612_v54  ;;  %v5650_v4 = vsub.f32 %v5618_v40, %v5634_v45  ;;  %v5635_v62 = vsel %vm3316_vm1, %v5619_v26, -inf }
0x1357   : > { %5636 = vmax.xlane.f32.xlu0 %v5635_v62  ;;  %v5644_v22 = vsel %vm3316_vm1, %v5622_v9, -inf }
0x1358   : > { %v5661_v37 = vmul.f32 1.442695, %v5650_v4  ;;  %v5638_v36 = vsel %vm3316_vm1, %v5620_v52, -inf }
0x1359   : > { %5639 = vmax.xlane.f32.xlu1 %v5638_v36 }
0x135a   : > { %18378 = vpow2.f32 %v5661_v37 }
0x135b   : > { %5642 = vmax.xlane.f32.xlu0 %v5641_v59 }
0x135c   : > { %v21088_v33 = vpop.eup %18372 }
0x135d   : > { %5645 = vmax.xlane.f32.xlu1 %v5644_v22  ;;  %v5671_v40 = vsel %vm3316_vm1, %v21088_v33, 0.0 }
0x135e   : > { %v18375_v54 = vpop.eup %18374 }
0x135f   : > { %5672 = vadd.xlane.f32.xlu0 %v5671_v40  ;;  %v5674_v46 = vsel %vm3316_vm1, %v18375_v54, 0.0 }
0x1360   : > { %v21094_v15 = vpop.eup %18376 }
0x1361   : > { %5675 = vadd.xlane.f32.xlu1 %v5674_v46  ;;  %v5677_v50 = vsel %vm3316_vm1, %v21094_v15, 0.0 }
0x1363   : > { %5678 = vadd.xlane.f32.xlu0 %v5677_v50 }
0x1364   : > { %v21098_v34 = vpop.eup %18378 }
0x1365   : > { %v5680_v38 = vsel %vm3316_vm1, %v21098_v34, 0.0 }
0x1366   : > { %5681 = vadd.xlane.f32.xlu1 %v5680_v38 }
0x1377   : > { %5717 = vrot.lane.b32.xlu1 %v20274_v24, %s19159_s13 }
0x1379   : > { %5715 = vrot.lane.b32.xlu0 %v20276_v28, %s19159_s13 }
0x137b   : > { %5776 = vrot.lane.b32.xlu1 %v20280_v48, %s19159_s13 }
0x137d   : > { %5841 = vrot.lane.b32.xlu0 %v20260_v57, %s19160_s12 }
0x137f   : > { %5843 = vrot.lane.b32.xlu1 %v20264_v60, %s19160_s12 }
0x1381   : > { %5778 = vrot.lane.b32.xlu0 %v20278_v51, %s19159_s13 }
0x1385   : > { %5837 = vrot.lane.b32.xlu0 %v20189_v41, %s19160_s12 }
0x13e4   : > { %v5637_v56 = vpop.xlane.xlu0 %5636 }
0x13e5   : > { %v5651_v31 = vsub.f32 %v5619_v26, %v5637_v56 }
0x13e6   : > { %v5640_v49 = vpop.xlane.xlu1 %5639 }
0x13e7   : > { %v5663_v45 = vmul.f32 1.442695, %v5651_v31  ;;  %v5652_v36 = vsub.f32 %v5620_v52, %v5640_v49 }
0x13e8   : > { %v5643_v4 = vpop.xlane.xlu0 %5642 }
0x13e9   : > { %18380 = vpow2.f32 %v5663_v45  ;;  %v5653_v62 = vsub.f32 %v5621_v32, %v5643_v4  ;;  %v5665_v46 = vmul.f32 1.442695, %v5652_v36 }
0x13ea   : > { %v5646_v37 = vpop.xlane.xlu1 %5645 }
0x13eb   : > { %v5667_v59 = vmul.f32 1.442695, %v5653_v62  ;;  %v5654_v57 = vsub.f32 %v5622_v9, %v5646_v37 }
0x13ec   : > { %v5673_v22 = vpop.xlane.xlu0 %5672 }
0x13ed   : > { %18382 = vpow2.f32 %v5667_v59  ;;  %v5669_v60 = vmul.f32 1.442695, %v5654_v57 }
0x13ee   : > { %18384 = vrcp.f32 %v5673_v22  ;;  %v5676_v40 = vpop.xlane.xlu1 %5675 }
0x13ef   : > { %18386 = vpow2.f32 %v5669_v60 }
0x13f0   : > { %18388 = vrcp.f32 %v5676_v40  ;;  %v5679_v41 = vpop.xlane.xlu0 %5678 }
0x13f1   : > { %18390 = vrcp.f32 %v5679_v41 }
0x13f2   : > { %18392 = vpow2.f32 %v5665_v46 }
0x13f3   : > { %v21116_v26 = vpop.eup %18380  ;;  %v5682_v50 = vpop.xlane.xlu1 %5681 }
0x13f4   : > { %v5716_v38 = vpop.permute.xlu0 %5715  ;;  %18394 = vrcp.f32 %v5682_v50  ;;  %v5683_v32 = vsel %vm3316_vm1, %v21116_v26, 0.0 }
0x13f5   : > { %5684 = vadd.xlane.f32.xlu0 %v5683_v32  ;;  %16098 = vmatprep.subr.bf16.mxu0 %v5716_v38 }
0x13f6   : > { %16099 = vmatpush3.bf16.msra.mxu0 %v5716_v38 }
0x13f7   : > { %v21120_v52 = vpop.eup %18382  ;;  %v5718_v9 = vpop.permute.xlu1 %5717 }
0x13f8   : > { %v18385_v56 = vpop.eup %18384  ;;  %v5842_v31 = vpop.permute.xlu0 %5841  ;;  %v5689_v49 = vsel %vm3316_vm1, %v21120_v52, 0.0  ;;  %16100 = vmatprep.subr.bf16.mxu0 %v5718_v9 }
0x13f9   : > { %v18387_v45 = vpop.eup %18386  ;;  %5690 = vadd.xlane.f32.xlu1 %v5689_v49  ;;  %v5696_v37 = vmul.f32 %v18385_v56, %v21088_v33  ;;  %v5852_v38 = vsel %vm3177_vm0, %v5842_v31, 0 }
0x13fa   : > { %v18389_v4 = vpop.eup %18388  ;;  %16101 = vmatpush3.bf16.msra.mxu0 %v5718_v9  ;;  %v5692_v57 = vsel %vm3316_vm1, %v18387_v45, 0.0 }
0x13fb   : > { %16606 = vmatprep.subr.msk.bf16.mxu0 %vm3177_vm0, %v5842_v31  ;;  %v5777_v62 = vpop.permute.xlu1 %5776  ;;  %v5698_v36 = vmul.f32 %v18389_v4, %v18375_v54  ;;  %v18391_v59 = vpop.eup %18390 }
0x13fc   : > { %16106 = vmatprep.subr.bf16.mxu1 %v5777_v62  ;;  %v18393_v22 = vpop.eup %18392  ;;  %v5779_v60 = vpop.permute.xlu0 %5778  ;;  %v5700_v41 = vmul.f32 %v18391_v59, %v21094_v15 }
0x13fd   : > { %5693 = vadd.xlane.f32.xlu1 %v5692_v57  ;;  %v5711_v40 = vpack.c.bf16 %v5698_v36, %v5696_v37  ;;  %16107 = vmatpush3.bf16.msra.mxu1 %v5777_v62  ;;  %v5686_v33 = vsel %vm3316_vm1, %v18393_v22, 0.0 }
0x13fe   : > { %v18395_v46 = vpop.eup %18394  ;;  %16108 = vmatprep.subr.bf16.mxu1 %v5779_v60 }
0x13ff   : > { %v5702_v50 = vmul.f32 %v18395_v46, %v21098_v34  ;;  %16102 = vmatprep.mubr.msk.bf16.mxu0 %vm3316_vm1, %v5711_v40  ;;  %v5844_v9 = vpop.permute.xlu1 %5843 }
0x1400   : > { %v5838_v32 = vpop.permute.xlu0 %5837  ;;  %v5855_v15 = vsel %vm3177_vm0, %v5844_v9, 0 }
0x1401   : > { %5687 = vadd.xlane.f32.xlu1 %v5686_v33  ;;  %16109 = vmatpush3.bf16.msra.mxu1 %v5779_v60  ;;  %v5712_v54 = vpack.c.bf16 %v5702_v50, %v5700_v41 }
0x1403   : > { %16103 = vmatmul.mubr.msk.bf16.vlgmr.msra.gmra.mrb[120].mxu0 %vm3316_vm1, %v5712_v54 }
0x1404   : > { %16115 = vmatpush3.bf16.xpose.msra.mxu0 %v5852_v38  ;;  %16118 = vmatprep.mubr.msk.bf16.mxu0 %vm3177_vm0, %v5838_v32 }
0x1405   : > { %16607 = vmatprep.subr.msk.bf16.mxu0 %vm3177_vm0, %v5844_v9 }
0x140b   : > { %5910 = vrot.lane.b32.xlu0 %v20268_v11, %s19160_s12 }
0x140c   : > { %16117 = vmatpush3.bf16.xpose.msra.mxu0 %v5855_v15 }
0x140f   : > { %5906 = vrot.lane.b32.xlu0 %v20213_v0, %s19160_s12 }
0x1412   : > { %5839 = vrot.lane.b32.xlu1 %v20201_v55, %s19160_s12 }
0x1416   : > { %5912 = vrot.lane.b32.xlu1 %v20272_v19, %s19160_s12 }
0x141a   : > { %5908 = vrot.lane.b32.xlu1 %v20233_v29, %s19160_s12 }
0x1482   : > { %v5685_v34 = vpop.xlane.xlu0 %5684 }
0x1486   : > { %v5911_v56 = vpop.permute.xlu0 %5910  ;;  %v5691_v31 = vpop.xlane.xlu1 %5690 }
0x1487   : > { %16608 = vmatprep.subr.msk.bf16.mxu1 %vm3177_vm0, %v5911_v56  ;;  %v5921_v40 = vsel %vm3177_vm0, %v5911_v56, 0 }
0x148a   : > { %v5694_v49 = vpop.xlane.xlu1 %5693  ;;  %v5907_v46 = vpop.permute.xlu0 %5906 }
0x148b   : > { %18396 = vrcp.f32 %v5694_v49 }
0x148c   : > { %18398 = vrcp.f32 %v5685_v34 }
0x148d   : > { %18400 = vrcp.f32 %v5691_v31 }
0x148e   : > { %v5688_v11 = vpop.xlane.xlu1 %5687 }
0x148f   : > { %18402 = vrcp.f32 %v5688_v11 }
0x1492   : > { %v5840_v0 = vpop.permute.xlu1 %5839 }
0x1493   : > { %16119 = vmatmul.mubr.msk.bf16.vlgmr.msra.gmra.mrb[124].mxu0 %vm3177_vm0, %v5840_v0 }
0x1495   : > { %v18397_v55 = vpop.eup %18396 }
0x1496   : > { %v18399_v4 = vpop.eup %18398  ;;  %v5710_v37 = vmul.f32 %v18397_v55, %v18387_v45  ;;  %v5913_v41 = vpop.permute.xlu1 %5912 }
0x1497   : > { %v18401_v19 = vpop.eup %18400  ;;  %v5704_v29 = vmul.f32 %v18399_v4, %v21116_v26  ;;  %v5924_v26 = vsel %vm3177_vm0, %v5913_v41, 0 }
0x1498   : > { %v5708_v59 = vmul.f32 %v18401_v19, %v21120_v52 }
0x1499   : > { %v18403_v62 = vpop.eup %18402 }
0x149a   : > { %v5706_v36 = vmul.f32 %v18403_v62, %v18393_v22  ;;  %v5714_v60 = vpack.c.bf16 %v5710_v37, %v5708_v59  ;;  %v5909_v45 = vpop.permute.xlu1 %5908 }
0x149c   : > { %v5713_v57 = vpack.c.bf16 %v5706_v36, %v5704_v29 }
0x149e   : > { %16110 = vmatprep.mubr.msk.bf16.mxu1 %vm3316_vm1, %v5713_v57 }
0x149f   : > { %16111 = vmatmul.mubr.msk.bf16.vlgmr.msra.gmra.mrb[88].mxu1 %vm3316_vm1, %v5714_v60 }
0x14a0   : > { %16123 = vmatpush3.bf16.xpose.msra.mxu1 %v5921_v40  ;;  %16126 = vmatprep.mubr.msk.bf16.mxu1 %vm3177_vm0, %v5907_v46 }
0x14a1   : > { %16609 = vmatprep.subr.msk.bf16.mxu1 %vm3177_vm0, %v5913_v41 }
0x14a8   : > { %16125 = vmatpush3.bf16.xpose.msra.mxu1 %v5924_v26 }
0x14af   : > { %16127 = vmatmul.mubr.msk.bf16.vlgmr.msra.gmra.mrb[92].mxu1 %vm3177_vm0, %v5909_v45 }
0x14d6   : > { %v21157_v52 = vpop.f32.mrb[120].mxu0 }
0x14d7   : > { %v21159_v22 = vpop.f32.mrb[121].mxu0 }
0x14d8   : > { %v21161_v50 = vpop.f32.mrb[122].mxu0 }
0x14d9   : > { %v16926_v33 = vpack.i.bf16 %v21161_v50, %v21157_v52  ;;  %v21165_v54 = vpop.f32.mrb[123].mxu0  ;;  %v24074_v50 = vld [vmem:[#allocation60_spill] sm:$0xff] }
0x14da   : > { %v16916_v38 = vpack.i.bf16 %v21165_v54, %v21159_v22  ;;  %v24073_v22 = vld [vmem:[#allocation61_spill] sm:$0xff] }
0x1566   : > { %v16120_v32 = vpop.f32.mrb[124].mxu0 }
0x1567   : > { %v5891_v9 = vpop.f32.mrb[125].mxu0  ;;  %v5977_v15 = vmul.f32 0.14433756, %v16120_v32 }
0x1568   : > { %v5975_v34 = vmul.f32 0.14433756, %v5891_v9  ;;  %v16121_v56 = vpop.f32.mrb[126].mxu0 }
0x1569   : > { %v5894_v31 = vpop.f32.mrb[127].mxu0  ;;  %v5985_v0 = vadd.f32 %v21056_v12, %v5977_v15  ;;  %v5978_v55 = vmul.f32 0.14433756, %v16121_v56 }
0x156a   : > { %v5983_v49 = vadd.f32 %v21053_v63, %v5975_v34  ;;  %v5976_v11 = vmul.f32 0.14433756, %v5894_v31 }
0x156b   : > { %v5986_v37 = vadd.f32 %v21064_v25, %v5978_v55  ;;  %v5997_v29 = vsel %vm3316_vm1, %v5985_v0, -inf }
0x156c   : > { %v5984_v4 = vadd.f32 %v21059_v6, %v5976_v11  ;;  %v5991_v19 = vsel %vm3316_vm1, %v5983_v49, -inf }
0x156d   : > { %5992 = vmax.xlane.f32.xlu0 %v5991_v19  ;;  %v6000_v60 = vsel %vm3316_vm1, %v5986_v37, -inf }
0x156e   : > { %v5994_v62 = vsel %vm3316_vm1, %v5984_v4, -inf }
0x156f   : > { %5995 = vmax.xlane.f32.xlu1 %v5994_v62 }
0x1571   : > { %5998 = vmax.xlane.f32.xlu0 %v5997_v29 }
0x1572   : > { %v21176_v36 = vpop.f32.mrb[88].mxu1 }
0x1573   : > { %v21178_v59 = vpop.f32.mrb[89].mxu1 }
0x1574   : > { %v21180_v57 = vpop.f32.mrb[90].mxu1 }
0x1575   : > { %v16941_v40 = vpack.i.bf16 %v21180_v57, %v21176_v36  ;;  %v21185_v46 = vpop.f32.mrb[91].mxu1  ;;  %6001 = vmax.xlane.f32.xlu0 %v6000_v60 }
0x1576   : > { %v16936_v41 = vpack.i.bf16 %v21185_v46, %v21178_v59 }
0x1582   : > { %v16128_v26 = vpop.f32.mrb[92].mxu1 }
0x1583   : > { %v5960_v45 = vpop.f32.mrb[93].mxu1  ;;  %v5981_v32 = vmul.f32 0.14433756, %v16128_v26 }
0x1584   : > { %v5979_v9 = vmul.f32 0.14433756, %v5960_v45  ;;  %v16129_v15 = vpop.f32.mrb[94].mxu1 }
0x1585   : > { %v5963_v34 = vpop.f32.mrb[95].mxu1  ;;  %v5982_v31 = vmul.f32 0.14433756, %v16129_v15  ;;  %v5989_v55 = vadd.f32 %v21056_v12, %v5981_v32 }
0x1586   : > { %v5987_v56 = vadd.f32 %v21053_v63, %v5979_v9  ;;  %v5980_v11 = vmul.f32 0.14433756, %v5963_v34 }
0x1587   : > { %v5990_v29 = vadd.f32 %v21064_v25, %v5982_v31  ;;  %v6009_v26 = vsel %vm3316_vm1, %v5989_v55, -inf }
0x1588   : > { %v5988_v19 = vadd.f32 %v21059_v6, %v5980_v11  ;;  %v6003_v62 = vsel %vm3316_vm1, %v5987_v56, -inf }
0x1589   : > { %6004 = vmax.xlane.f32.xlu0 %v6003_v62  ;;  %v6012_v45 = vsel %vm3316_vm1, %v5990_v29, -inf }
0x158a   : > { %v6006_v60 = vsel %vm3316_vm1, %v5988_v19, -inf }
0x158b   : > { %6007 = vmax.xlane.f32.xlu1 %v6006_v60 }
0x158d   : > { %6010 = vmax.xlane.f32.xlu0 %v6009_v26 }
0x158f   : > { %6013 = vmax.xlane.f32.xlu1 %v6012_v45 }
0x15fa   : > { %v5993_v63 = vpop.xlane.xlu0 %5992 }
0x15fb   : > { %v6015_v9 = vsub.f32 %v5983_v49, %v5993_v63 }
0x15fc   : > { %v5996_v15 = vpop.xlane.xlu1 %5995 }
0x15fd   : > { %v6023_v12 = vmul.f32 1.442695, %v6015_v9  ;;  %v6016_v32 = vsub.f32 %v5984_v4, %v5996_v15 }
0x15fe   : > { %v5999_v6 = vpop.xlane.xlu0 %5998 }
0x15ff   : > { %18404 = vpow2.f32 %v6023_v12  ;;  %v6025_v34 = vmul.f32 1.442695, %v6016_v32  ;;  %v6017_v11 = vsub.f32 %v5985_v0, %v5999_v6 }
0x1601   : > { %18406 = vpow2.f32 %v6025_v34  ;;  %v6027_v25 = vmul.f32 1.442695, %v6017_v11 }
0x1602   : > { %v6002_v31 = vpop.xlane.xlu0 %6001 }
0x1603   : > { %18408 = vpow2.f32 %v6027_v25  ;;  %v6018_v62 = vsub.f32 %v5986_v37, %v6002_v31 }
0x1605   : > { %v6029_v60 = vmul.f32 1.442695, %v6018_v62 }
0x1607   : > { %18410 = vpow2.f32 %v6029_v60 }
0x1609   : > { %v21197_v26 = vpop.eup %18404 }
0x160a   : > { %v6039_v45 = vsel %vm3316_vm1, %v21197_v26, 0.0 }
0x160b   : > { %v21201_v49 = vpop.eup %18406  ;;  %6040 = vadd.xlane.f32.xlu0 %v6039_v45 }
0x160c   : > { %v6042_v4 = vsel %vm3316_vm1, %v21201_v49, 0.0 }
0x160d   : > { %v21205_v63 = vpop.eup %18408  ;;  %6043 = vadd.xlane.f32.xlu1 %v6042_v4 }
0x160e   : > { %v6045_v0 = vsel %vm3316_vm1, %v21205_v63, 0.0 }
0x160f   : > { %6046 = vadd.xlane.f32.xlu0 %v6045_v0 }
0x1611   : > { %v21209_v37 = vpop.eup %18410 }
0x1612   : > { %v6048_v9 = vsel %vm3316_vm1, %v21209_v37, 0.0 }
0x1613   : > { %6049 = vadd.xlane.f32.xlu1 %v6048_v9  ;;  %v24042_v9 = vpack.i.bf16 %v20653_v39, %v20647_v8  ;;  %v24044_v8 = vpack.i.bf16 %v21049_v21, %v21043_v61  ;;  %v24045_v39 = vpack.i.bf16 %v20765_v35, %v20761_v20  ;;  %v24049_v20 = vpack.i.bf16 %v21077_v43, %v21071_v13  ;;  %v24067_v61 = vld [vmem:[#allocation55_spill] sm:$0xff]  ;;  %v24071_v43 = vld [vmem:[#allocation58_spill] sm:$0xff] }
0x1614   : > { %v24070_v13 = vld [vmem:[#allocation59_spill] sm:$0xff] }
0x1615   : > { %v24072_v52 = vpack.i.bf16 %v24070_v13, %v24071_v43  ;;  %v17292_v13 = vld [vmem:[%s19789_s10 + $0xc0] ss:$12 sps:$4 sm:$0xff]  }
0x1616   : > { %v6005_v15 = vpop.xlane.xlu0 %6004 }
0x1617   : > { %v6019_v12 = vsub.f32 %v5987_v56, %v6005_v15 }
0x1618   : > { %v6008_v56 = vpop.xlane.xlu1 %6007 }
0x1619   : > { %v6031_v34 = vmul.f32 1.442695, %v6019_v12  ;;  %v6020_v4 = vsub.f32 %v5988_v19, %v6008_v56  ;;  %v24043_v19 = vpack.i.bf16 %v20905_v1, %v20899_v23  ;;  %v24047_v23 = vpack.i.bf16 %v20681_v10, %v20675_v16  ;;  %v24054_v10 = vld [vmem:[#allocation48_spill] sm:$0xff] }
0x161a   : > { %v6011_v32 = vpop.xlane.xlu0 %6010  ;;  %v24048_v1 = vpack.i.bf16 %v20937_v18, %v20931_v53  ;;  %v24052_v16 = vpack.i.bf16 %v20509_v3, %v20503_v27  ;;  %v24056_v53 = vld [vmem:[#allocation53_spill] sm:$0xff]  ;;  %v24057_v18 = vld [vmem:[#allocation52_spill] sm:$0xff]  ;;  %v24059_v27 = vpack.i.bf16 %v20901_v7, %v20897_v47  ;;  %v24060_v3 = vpack.i.bf16 %v21045_v2, %v21041_v14  ;;  %v24064_v47 = vld [vmem:[#allocation51_spill] sm:$0xff] }
0x161b   : > { %v6021_v6 = vsub.f32 %v5989_v55, %v6011_v32  ;;  %v6033_v0 = vmul.f32 1.442695, %v6020_v4  ;;  %v24065_v7 = vld [vmem:[#allocation49_spill] sm:$0xff]  ;;  %v24068_v2 = vld [vmem:[#allocation54_spill] sm:$0xff] }
0x161c   : > { %v6014_v60 = vpop.xlane.xlu1 %6013  ;;  %v24066_v14 = vpack.i.bf16 %v24064_v47, %v24065_v7  ;;  %v24069_v21 = vpack.i.bf16 %v24067_v61, %v24068_v2 }
0x161d   : > { %v6035_v11 = vmul.f32 1.442695, %v6021_v6  ;;  %v6022_v45 = vsub.f32 %v5990_v29, %v6014_v60  ;;  %v24046_v29 = vpack.i.bf16 %v20505_v5, %v20501_v42  ;;  %v24050_v42 = vpack.i.bf16 %v20769_v17, %v20763_v58  ;;  %v24061_v17 = vld [vmem:[#allocation57_spill] sm:$0xff] }
0x161e   : > { %v24051_v5 = vpack.i.bf16 %v20784_v44, %v20780_v30  ;;  %v24058_v58 = vpack.i.bf16 %v24056_v53, %v24057_v18  ;;  %v24062_v30 = vld [vmem:[#allocation56_spill] sm:$0xff] }
0x161f   : > { %18412 = vpow2.f32 %v6035_v11  ;;  %v24063_v44 = vpack.i.bf16 %v24061_v17, %v24062_v30  ;;  %v17270_v60 = vld [vmem:[%s19789_s10 + $0x4] ss:$12 sps:$4 sm:$0xff]   ;;  %v17291_v53 = vld [vmem:[%s19789_s10 + $0xac] ss:$12 sps:$4 sm:$0xff]  }
0x1620   : > { %18414 = vpow2.f32 %v6031_v34  ;;  %v17294_v17 = vld [vmem:[%s19789_s10 + $0xc4] ss:$12 sps:$4 sm:$0xff]  }
0x1624   : > { %6085 = vrot.lane.b32.xlu1 %v20274_v24, %s19160_s12  ;;  %v6037_v24 = vmul.f32 1.442695, %v6022_v45 }
0x1626   : > { %18416 = vpow2.f32 %v6037_v24  ;;  %v17268_v24 = vld [vmem:[%s19789_s10] ss:$12 sps:$4 sm:$0xff]  }
0x1627   : > { %18418 = vpow2.f32 %v6033_v0 }
0x1628   : > { %6144 = vrot.lane.b32.xlu1 %v20280_v48, %s19160_s12 }
0x1629   : > { %v21217_v25 = vpop.eup %18412 }
0x162a   : > { %v6057_v31 = vsel %vm3316_vm1, %v21217_v25, 0.0  ;;  %v21221_v62 = vpop.eup %18414 }
0x162b   : > { %6058 = vadd.xlane.f32.xlu0 %v6057_v31  ;;  %v6051_v55 = vsel %vm3316_vm1, %v21221_v62, 0.0 }
0x162f   : > { %6052 = vadd.xlane.f32.xlu0 %v6051_v55 }
0x1630   : > { %v21227_v48 = vpop.eup %18416 }
0x1631   : > { %v6060_v15 = vsel %vm3316_vm1, %v21227_v48, 0.0  ;;  %v21235_v12 = vpop.eup %18418 }
0x1645   : > { %6083 = vrot.lane.b32.xlu0 %v20276_v28, %s19160_s12  ;;  %v6054_v28 = vsel %vm3316_vm1, %v21235_v12, 0.0 }
0x1649   : > { %16817 = vrot.lane.b32.xlu0 %v24042_v9, %s19159_s13  ;;  %v17273_v9 = vld [vmem:[%s19789_s10 + $0x1c] ss:$12 sps:$4 sm:$0xff]  }
0x164c   : > { %6061 = vadd.xlane.f32.xlu1 %v6060_v15 }
0x164d   : > { %16827 = vrot.lane.b32.xlu0 %v24043_v19, %s19157_s1  ;;  %v17276_v19 = vld [vmem:[%s19789_s10 + $0x34] ss:$12 sps:$4 sm:$0xff]  }
0x1650   : > { %6055 = vadd.xlane.f32.xlu1 %v6054_v28 }
0x1651   : > { %16837 = vrot.lane.b32.xlu0 %v24044_v8, %s19156_s17  ;;  %v17279_v8 = vld [vmem:[%s19789_s10 + $0x4c] ss:$12 sps:$4 sm:$0xff]  }
0x1655   : > { %16847 = vrot.lane.b32.xlu0 %v24045_v39, %s19158_s25  ;;  %v17277_v39 = vld [vmem:[%s19789_s10 + $0x48] ss:$12 sps:$4 sm:$0xff]  }
0x1659   : > { %16857 = vrot.lane.b32.xlu0 %v24046_v29, %s19160_s12  ;;  %v17282_v29 = vld [vmem:[%s19789_s10 + $0x64] ss:$12 sps:$4 sm:$0xff]  }
0x165d   : > { %16867 = vrot.lane.b32.xlu0 %v24047_v23, %s19159_s13 }
0x1661   : > { %16877 = vrot.lane.b32.xlu0 %v24048_v1, %s19157_s1  ;;  %6146 = vrot.lane.b32.xlu1 %v20278_v51, %s19160_s12  ;;  %v24053_v51 = vld [vmem:[#allocation50_spill] sm:$0xff]  ;;  %v17280_v1 = vld [vmem:[%s19789_s10 + $0x60] ss:$12 sps:$4 sm:$0xff]  }
0x1662   : > { %v24055_v35 = vpack.i.bf16 %v24053_v51, %v24054_v10  ;;  %v17288_v51 = vld [vmem:[%s19789_s10 + $0x94] ss:$12 sps:$4 sm:$0xff]  }
0x1665   : > { %16887 = vrot.lane.b32.xlu0 %v24049_v20, %s19156_s17  ;;  %16822 = vrot.lane.b32.xlu1 %v24050_v42, %s19158_s25  ;;  %v17285_v20 = vld [vmem:[%s19789_s10 + $0x7c] ss:$12 sps:$4 sm:$0xff]  }
0x1669   : > { %16897 = vrot.lane.b32.xlu0 %v24051_v5, %s19158_s25  ;;  %16832 = vrot.lane.b32.xlu1 %v24052_v16, %s19160_s12  ;;  %v17283_v16 = vld [vmem:[%s19789_s10 + $0x78] ss:$12 sps:$4 sm:$0xff]  }
0x166d   : > { %16907 = vrot.lane.b32.xlu0 %v24055_v35, %s19160_s12  ;;  %16842 = vrot.lane.b32.xlu1 %v24058_v58, %s19159_s13  ;;  %v17286_v35 = vld [vmem:[%s19789_s10 + $0x90] ss:$12 sps:$4 sm:$0xff]   ;;  %v17298_v58 = vld [vmem:[%s19789_s10 + $0xc8] ss:$12 sps:$4 sm:$0xff]  }
0x1671   : > { %16917 = vrot.lane.b32.xlu0 %v16916_v38, %s19155_s26  ;;  %16852 = vrot.lane.b32.xlu1 %v24059_v27, %s19157_s1 }
0x1675   : > { %16927 = vrot.lane.b32.xlu0 %v16926_v33, %s19155_s26  ;;  %16862 = vrot.lane.b32.xlu1 %v24060_v3, %s19156_s17  ;;  %v24075_v33 = vpack.i.bf16 %v24073_v22, %v24074_v50  ;;  %v17289_v3 = vld [vmem:[%s19789_s10 + $0xa8] ss:$12 sps:$4 sm:$0xff]  }
0x1676   : > { %v17297_v22 = vld [vmem:[%s19789_s10 + $0xdc] ss:$12 sps:$4 sm:$0xff]  }
0x1679   : > { %16937 = vrot.lane.b32.xlu0 %v16936_v41, %s19155_s26  ;;  %16872 = vrot.lane.b32.xlu1 %v24063_v44, %s19158_s25 }
0x167d   : > { %16942 = vrot.lane.b32.xlu0 %v16941_v40, %s19155_s26  ;;  %16882 = vrot.lane.b32.xlu1 %v24066_v14, %s19160_s12 }
0x1681   : > { %16892 = vrot.lane.b32.xlu1 %v24069_v21, %s19159_s13 }
0x1685   : > { %16902 = vrot.lane.b32.xlu1 %v24072_v52, %s19157_s1 }
0x1689   : > { %16912 = vrot.lane.b32.xlu1 %v24075_v33, %s19156_s17 }
0x1698   : > { %v6041_v54 = vpop.xlane.xlu0 %6040 }
0x1699   : > { %18420 = vrcp.f32 %v6041_v54 }
0x169a   : > { %v6044_v38 = vpop.xlane.xlu1 %6043 }
0x169b   : > { %18422 = vrcp.f32 %v6044_v38 }
0x169c   : > { %v6047_v34 = vpop.xlane.xlu0 %6046 }
0x16a0   : > { %v6050_v36 = vpop.xlane.xlu1 %6049 }
0x16a1   : > { %18424 = vrcp.f32 %v6050_v36 }
0x16a2   : > { %18426 = vrcp.f32 %v6047_v34  ;;  %v17295_v34 = vld [vmem:[%s19789_s10 + $0xd8] ss:$12 sps:$4 sm:$0xff]  }
0x16a3   : > { %v18421_v59 = vpop.eup %18420 }
0x16a4   : > { %v6086_v57 = vpop.permute.xlu1 %6085  ;;  %v6064_v46 = vmul.f32 %v18421_v59, %v21197_v26 }
0x16a5   : > { %v18423_v40 = vpop.eup %18422 }
0x16a6   : > { %v6066_v41 = vmul.f32 %v18423_v40, %v21201_v49 }
0x16a8   : > { %v6145_v32 = vpop.permute.xlu1 %6144  ;;  %v6079_v6 = vpack.c.bf16 %v6066_v41, %v6064_v46 }
0x16a9   : > { %16138 = vmatprep.subr.bf16.mxu1 %v6145_v32 }
0x16aa   : > { %16134 = vmatprep.mubr.msk.bf16.mxu0 %vm3316_vm1, %v6079_v6  ;;  %16139 = vmatpush3.bf16.msra.mxu1 %v6145_v32 }
0x16ab   : > { %v18425_v56 = vpop.eup %18424 }
0x16ac   : > { %v18427_v26 = vpop.eup %18426  ;;  %v6070_v49 = vmul.f32 %v18425_v56, %v21209_v37  ;;  %v17271_v37 = vld [vmem:[%s19789_s10 + $0x18] ss:$12 sps:$4 sm:$0xff]  }
0x16ad   : > { %v6068_v4 = vmul.f32 %v18427_v26, %v21205_v63  ;;  %v17274_v63 = vld [vmem:[%s19789_s10 + $0x30] ss:$12 sps:$4 sm:$0xff]   ;;  %v17302_v26 = vld [vmem:[%s19789_s10 + $0xf4] ss:$12 sps:$4 sm:$0xff]  }
0x16af   : > { %v6080_v0 = vpack.c.bf16 %v6070_v49, %v6068_v4 }
0x16b8   : > { %v6059_v11 = vpop.xlane.xlu0 %6058 }
0x16bc   : > { %v6053_v31 = vpop.xlane.xlu0 %6052 }
0x16bd   : > { %18428 = vrcp.f32 %v6053_v31 }
0x16c0   : > { %v6084_v55 = vpop.permute.xlu0 %6083 }
0x16c1   : > { %16130 = vmatprep.subr.bf16.mxu0 %v6084_v55 }
0x16c2   : > { %16131 = vmatpush3.bf16.msra.mxu0 %v6084_v55 }
0x16c3   : > { %16132 = vmatprep.subr.bf16.mxu0 %v6086_v57 }
0x16c4   : > { %v21338_v45 = vpop.permute.xlu0 %16817 }
0x16c5   : > { %v16820_v7 = vunpack.i.h.bf16 %v21338_v45  ;;  %v16819_v14 = vunpack.i.l.bf16 %v21338_v45  ;;  %v24076_v45 = vld [vmem:[#allocation43_spill] sm:$0xff] }
0x16c6   : > { %16133 = vmatpush3.bf16.msra.mxu0 %v6086_v57 }
0x16c7   : > { %6999 = vmatprep.subr.bf16.mxu0 %v17270_v60  ;;  %v18429_v30 = vpop.eup %18428 }
0x16c8   : > { %v21343_v15 = vpop.permute.xlu0 %16827  ;;  %v6072_v50 = vmul.f32 %v18429_v30, %v21221_v62  ;;  %v17305_v30 = vld [vmem:[%s19789_s10 + $0x108] ss:$12 sps:$4 sm:$0xff]  }
0x16c9   : > { %16135 = vmatmul.mubr.msk.bf16.vlgmr.msra.gmra.mrb[128].mxu0 %vm3316_vm1, %v6080_v0  ;;  %v16829_v52 = vunpack.i.l.bf16 %v21343_v15  ;;  %v16830_v54 = vunpack.i.h.bf16 %v21343_v15 }
0x16ca   : > { %7000 = vmatpush1.bf16.msra.mxu0 %v17268_v24  ;;  %v24077_v24 = vld [vmem:[#allocation41_spill] sm:$0xff] }
0x16cb   : > { %7001 = vmatprep.subr.bf16.mxu0 %v17273_v9  ;;  %v17299_v9 = vld [vmem:[%s19789_s10 + $0x8] ss:$12 sps:$4 sm:$0xff]  }
0x16cc   : > { %v21348_v28 = vpop.permute.xlu0 %16837 }
0x16cd   : > { %v16839_v38 = vunpack.i.l.bf16 %v21348_v28  ;;  %v16840_v57 = vunpack.i.h.bf16 %v21348_v28 }
0x16ce   : > { %7002 = vmatpush1.bf16.msra.mxu0 %v17271_v37 }
0x16cf   : > { %7003 = vmatprep.subr.bf16.mxu0 %v17276_v19  ;;  %v17303_v19 = vld [vmem:[%s19789_s10 + $0xe0] ss:$12 sps:$4 sm:$0xff]  }
0x16d0   : > { %v21354_v23 = vpop.permute.xlu0 %16847 }
0x16d2   : > { %7004 = vmatpush1.bf16.msra.mxu0 %v17274_v63 }
0x16d3   : > { %7005 = vmatprep.subr.bf16.mxu0 %v17279_v8 }
0x16d4   : > { %v21358_v5 = vpop.permute.xlu0 %16857 }
0x16d5   : > { %v16860_v49 = vunpack.i.h.bf16 %v21358_v5 }
0x16d6   : > { %7006 = vmatpush1.bf16.msra.mxu0 %v17277_v39 }
0x16d7   : > { %7007 = vmatprep.subr.bf16.mxu0 %v17282_v29 }
0x16d8   : > { %v21364_v18 = vpop.permute.xlu0 %16867 }
0x16d9   : > { %v6062_v42 = vpop.xlane.xlu1 %6061 }
0x16da   : > { %7008 = vmatpush1.bf16.msra.mxu0 %v17280_v1  ;;  %18430 = vrcp.f32 %v6062_v42  ;;  %v17300_v1 = vld [vmem:[%s19789_s10 + $0xf0] ss:$12 sps:$4 sm:$0xff]   ;;  %v24078_v42 = vld [vmem:[#allocation40_spill] sm:$0xff] }
0x16db   : > { %7009 = vmatprep.subr.bf16.mxu0 %v17285_v20  ;;  %18432 = vrcp.f32 %v6059_v11 }
0x16dc   : > { %v21371_v61 = vpop.permute.xlu0 %16877 }
0x16dd   : > { %v6056_v10 = vpop.xlane.xlu1 %6055 }
0x16de   : > { %7010 = vmatpush1.bf16.msra.mxu0 %v17283_v16  ;;  %18434 = vrcp.f32 %v6056_v10  ;;  %v17307_v16 = vld [vmem:[%s19789_s10 + $0x10c] ss:$12 sps:$4 sm:$0xff]  }
0x16df   : > { %7011 = vmatprep.subr.bf16.mxu0 %v17288_v51  ;;  %v24079_v51 = vld [vmem:[#allocation42_spill] sm:$0xff] }
0x16e0   : > { %v21397_v60 = vpop.permute.xlu0 %16887  ;;  %v6432_v10 = vsel %vm3177_vm0, %v24079_v51, %v16860_v49 }
0x16e1   : > { %v6147_v27 = vpop.permute.xlu1 %6146 }
0x16e2   : > { %7012 = vmatpush1.bf16.msra.mxu0 %v17286_v35  ;;  %16140 = vmatprep.subr.bf16.mxu1 %v6147_v27  ;;  %v17304_v35 = vld [vmem:[%s19789_s10 + $0x20] ss:$12 sps:$4 sm:$0xff]  }
0x16e3   : > { %16141 = vmatpush3.bf16.msra.mxu1 %v6147_v27  ;;  %7013 = vmatprep.subr.bf16.mxu0 %v17291_v53  ;;  %v17308_v27 = vld [vmem:[%s19789_s10 + $0xf8] ss:$12 sps:$4 sm:$0xff]  }
0x16e4   : > { %15522 = vmatprep.subr.bf16.mxu1 %v17298_v58  ;;  %v18431_v47 = vpop.eup %18430 }
0x16e5   : > { %v16823_v44 = vpop.permute.xlu1 %16822  ;;  %v18433_v43 = vpop.eup %18432  ;;  %v6078_v40 = vmul.f32 %v18431_v47, %v21227_v48  ;;  %v16859_v48 = vunpack.i.l.bf16 %v21358_v5  ;;  %v17312_v47 = vld [vmem:[%s19789_s10 + $0x124] ss:$12 sps:$4 sm:$0xff]  }
0x16e6   : > { %7014 = vmatpush1.bf16.msra.mxu0 %v17289_v3  ;;  %v16825_v2 = vunpack.i.h.bf16 %v16823_v44  ;;  %v16824_v21 = vunpack.i.l.bf16 %v16823_v44  ;;  %v6076_v56 = vmul.f32 %v18433_v43, %v21217_v25 }
0x16e7   : > { %7015 = vmatprep.subr.bf16.mxu0 %v17294_v17  ;;  %v6431_v5 = vsel %vm3177_vm0, %v24078_v42, %v16859_v48  ;;  %v21431_v17 = vpop.permute.xlu0 %16897  ;;  %v24080_v48 = vld [vmem:[#allocation46_spill] sm:$0xff] }
0x16e8   : > { %v18435_v33 = vpop.eup %18434  ;;  %v6448_v36 = vsel %vm5062_vm2, %v16820_v7, %v16825_v2  ;;  %v6447_v59 = vsel %vm5062_vm2, %v16819_v14, %v16824_v21  ;;  %v6082_v37 = vpack.c.bf16 %v6078_v40, %v6076_v56  ;;  %v17313_v2 = vld [vmem:[%s19789_s10 + $0x110] ss:$12 sps:$4 sm:$0xff]   ;;  %v17310_v21 = vld [vmem:[%s19789_s10 + $0x120] ss:$12 sps:$4 sm:$0xff]   ;;  %v16869_v56 = vunpack.i.l.bf16 %v21364_v18 }
0x16e9   : > { %v16833_v46 = vpop.permute.xlu1 %16832  ;;  %v6074_v62 = vmul.f32 %v18435_v33, %v21235_v12  ;;  %v6456_v41 = vsel %vm6455_vm3, %v6447_v59, %v16829_v52  ;;  %v6457_v11 = vsel %vm6455_vm3, %v6448_v36, %v16830_v54  ;;  %v17314_v52 = vld [vmem:[%s19789_s10 + $0x50] ss:$12 sps:$4 sm:$0xff]   ;;  %v17315_v33 = vld [vmem:[%s19789_s10 + $0x138] ss:$12 sps:$4 sm:$0xff]   ;;  %v17322_v36 = vld [vmem:[%s19789_s10 + $0x154] ss:$12 sps:$4 sm:$0xff]  }
0x16ea   : > { %7016 = vmatpush1.bf16.msra.mxu0 %v17292_v13  ;;  %v16835_v32 = vunpack.i.h.bf16 %v16833_v46  ;;  %v16834_v6 = vunpack.i.l.bf16 %v16833_v46  ;;  %v6465_v31 = vsel %vm6464_vm4, %v6456_v41, %v16839_v38  ;;  %v6466_v55 = vsel %vm6464_vm4, %v6457_v11, %v16840_v57  ;;  %v17317_v13 = vld [vmem:[%s19789_s10 + $0x13c] ss:$12 sps:$4 sm:$0xff]   ;;  %v17323_v46 = vld [vmem:[%s19789_s10 + $0x140] ss:$12 sps:$4 sm:$0xff]  }
0x16eb   : > { %7017 = vmatprep.subr.bf16.mxu0 %v17297_v22  ;;  %v6081_v12 = vpack.c.bf16 %v6074_v62, %v6072_v50  ;;  %v6491_v0 = vpack.c.bf16 %v6466_v55, %v6465_v31  ;;  %v16908_v43 = vpop.permute.xlu0 %16907  ;;  %v17318_v50 = vld [vmem:[%s19789_s10 + $0x128] ss:$12 sps:$4 sm:$0xff]   ;;  %v16850_v62 = vunpack.i.h.bf16 %v21354_v23  ;;  %v16849_v11 = vunpack.i.l.bf16 %v21354_v23  ;;  %v17327_v55 = vld [vmem:[%s19789_s10 + $0x16c] ss:$12 sps:$4 sm:$0xff]  }
0x16ec   : > { %v6430_v4 = vsel %vm3177_vm0, %v24076_v45, %v16835_v32  ;;  %v6429_v25 = vsel %vm3177_vm0, %v24077_v24, %v16834_v6  ;;  %v16910_v54 = vunpack.i.h.bf16 %v16908_v43  ;;  %v17319_v59 = vld [vmem:[%s19789_s10 + $0x68] ss:$12 sps:$4 sm:$0xff]   ;;  %v16909_v41 = vunpack.i.l.bf16 %v16908_v43  ;;  %v24081_v45 = vld [vmem:[#allocation47_spill] sm:$0xff] }
0x16ed   : > { %16142 = vmatprep.mubr.msk.bf16.mxu1 %vm3316_vm1, %v6081_v12  ;;  %v21405_v15 = vpop.permute.xlu1 %16842  ;;  %v6438_v63 = vsel %vm6437_vm5, %v6429_v25, %v16819_v14  ;;  %v6439_v8 = vsel %vm6437_vm5, %v6430_v4, %v16820_v7  ;;  %7031 = vmatprep.mubr.bf16.mxu0 %v6491_v0  ;;  %v17309_v7 = vld [vmem:[%s19789_s10 + $0x38] ss:$12 sps:$4 sm:$0xff]   ;;  %v16870_v31 = vunpack.i.h.bf16 %v21364_v18  ;;  %v24082_v24 = vld [vmem:[#allocation45_spill] sm:$0xff]  ;;  %v16880_v43 = vunpack.i.h.bf16 %v21371_v61 }
0x16ee   : > { %7018 = vmatpush1.bf16.msra.mxu0 %v17295_v34  ;;  %v16845_v39 = vunpack.i.h.bf16 %v21405_v15  ;;  %v16844_v29 = vunpack.i.l.bf16 %v21405_v15  ;;  %v21413_v20 = vpack.c.bf16 %v6439_v8, %v6438_v63  ;;  %16143 = vmatmul.mubr.msk.bf16.vlgmr.msra.gmra.mrb[96].mxu1 %vm3316_vm1, %v6082_v37  ;;  %v17320_v34 = vld [vmem:[%s19789_s10 + $0x150] ss:$12 sps:$4 sm:$0xff]   ;;  %v6436_v12 = vsel %vm3177_vm0, %v24080_v48, %v16910_v54  ;;  %v17324_v25 = vld [vmem:[%s19789_s10 + $0x80] ss:$12 sps:$4 sm:$0xff]   ;;  %v17328_v37 = vld [vmem:[%s19789_s10 + $0x158] ss:$12 sps:$4 sm:$0xff]  }
0x16ef   : > { %7019 = vmatprep.subr.bf16.mxu0 %v17302_v26  ;;  %15523 = vmatpush3.bf16.msra.mxu1 %v17299_v9  ;;  %v24083_v8 = vld [vmem:[#allocation44_spill] sm:$0xff]  ;;  %v17330_v15 = vld [vmem:[%s19789_s10 + $0x170] ss:$12 sps:$4 sm:$0xff]  }
0x16f0   : > { %7177 = vmatprep.mubr.bf16.mxu1 %v6491_v0  ;;  %v6440_v53 = vsel %vm6437_vm5, %v6431_v5, %v16844_v29  ;;  %15524 = vmatprep.subr.bf16.mxu1 %v17303_v19  ;;  %v6441_v3 = vsel %vm6437_vm5, %v6432_v10, %v16845_v39  ;;  %v6450_v10 = vsel %vm5062_vm2, %v16845_v39, %v16850_v62 }
0x16f1   : > { %v21425_v58 = vpop.permute.xlu1 %16852  ;;  %v21434_v44 = vpack.c.bf16 %v6441_v3, %v6440_v53 }
0x16f2   : > { %7020 = vmatpush1.bf16.msra.mxu0 %v17300_v1  ;;  %v16855_v26 = vunpack.i.h.bf16 %v21425_v58  ;;  %v16854_v49 = vunpack.i.l.bf16 %v21425_v58  ;;  %v6435_v1 = vsel %vm3177_vm0, %v24083_v8, %v16909_v41  ;;  %v17346_v8 = vld [vmem:[%s19789_s10 + $0x1b8] ss:$12 sps:$4 sm:$0xff]  }
0x16f3   : > { %7021 = vmatprep.subr.bf16.mxu0 %v17307_v16  ;;  %15525 = vmatpush3.bf16.msra.mxu1 %v17304_v35  ;;  %v17325_v16 = vld [vmem:[%s19789_s10 + $0x168] ss:$12 sps:$4 sm:$0xff]   ;;  %v6449_v35 = vsel %vm5062_vm2, %v16844_v29, %v16849_v11  ;;  %v16899_v11 = vunpack.i.l.bf16 %v21431_v17 }
0x16f4   : > { %15526 = vmatprep.subr.bf16.mxu1 %v17308_v27  ;;  %v6458_v27 = vsel %vm6455_vm3, %v6449_v35, %v16854_v49  ;;  %v6459_v3 = vsel %vm6455_vm3, %v6450_v10, %v16855_v26  ;;  %v17354_v10 = vld [vmem:[%s19789_s10 + $0x1e8] ss:$12 sps:$4 sm:$0xff]   ;;  %v17351_v35 = vld [vmem:[%s19789_s10 + $0x1f8] ss:$12 sps:$4 sm:$0xff]  }
0x16f5   : > { %v21438_v14 = vpop.permute.xlu1 %16862 }
0x16f6   : > { %7022 = vmatpush1.bf16.msra.mxu0 %v17305_v30  ;;  %v16865_v18 = vunpack.i.h.bf16 %v21438_v14  ;;  %v16864_v0 = vunpack.i.l.bf16 %v21438_v14  ;;  %v17329_v30 = vld [vmem:[%s19789_s10 + $0x98] ss:$12 sps:$4 sm:$0xff]  }
0x16f7   : > { %7023 = vmatprep.subr.bf16.mxu0 %v17312_v47  ;;  %15527 = vmatpush3.bf16.msra.mxu1 %v17309_v7 }
0x16f8   : > { %15528 = vmatprep.subr.bf16.mxu1 %v17313_v2  ;;  %v6467_v29 = vsel %vm6464_vm4, %v6458_v27, %v16864_v0  ;;  %v6468_v7 = vsel %vm6464_vm4, %v6459_v3, %v16865_v18  ;;  %v17355_v27 = vld [vmem:[%s19789_s10 + $0x210] ss:$12 sps:$4 sm:$0xff]   ;;  %v17361_v3 = vld [vmem:[%s19789_s10 + $0x22c] ss:$12 sps:$4 sm:$0xff]  }
0x16f9   : > { %v21444_v22 = vpop.permute.xlu1 %16872 }
0x16fa   : > { %7024 = vmatpush1.bf16.msra.mxu0 %v17310_v21  ;;  %v16875_v53 = vunpack.i.h.bf16 %v21444_v22  ;;  %v16874_v58 = vunpack.i.l.bf16 %v21444_v22 }
0x16fb   : > { %7025 = vmatprep.subr.bf16.mxu0 %v17317_v13  ;;  %15529 = vmatpush3.bf16.msra.mxu1 %v17314_v52  ;;  %v16879_v52 = vunpack.i.l.bf16 %v21371_v61 }
0x16fc   : > { %15530 = vmatprep.subr.bf16.mxu1 %v17318_v50  ;;  %v6452_v21 = vsel %vm5062_vm2, %v16870_v31, %v16875_v53  ;;  %v6451_v13 = vsel %vm5062_vm2, %v16869_v56, %v16874_v58  ;;  %v6494_v50 = vpack.c.bf16 %v6468_v7, %v6467_v29  ;;  %v17357_v53 = vld [vmem:[%s19789_s10 + $0x214] ss:$12 sps:$4 sm:$0xff]  }
0x16fd   : > { %v16883_v40 = vpop.permute.xlu1 %16882  ;;  %v6460_v54 = vsel %vm6455_vm3, %v6451_v13, %v16879_v52  ;;  %v17358_v58 = vld [vmem:[%s19789_s10 + $0x200] ss:$12 sps:$4 sm:$0xff]  }
0x16fe   : > { %7026 = vmatpush1.bf16.msra.mxu0 %v17315_v33  ;;  %v16885_v32 = vunpack.i.h.bf16 %v16883_v40  ;;  %v16884_v6 = vunpack.i.l.bf16 %v16883_v40  ;;  %v17331_v33 = vld [vmem:[%s19789_s10 + $0xb0] ss:$12 sps:$4 sm:$0xff]   ;;  %v16889_v40 = vunpack.i.l.bf16 %v21397_v60 }
0x16ff   : > { %7027 = vmatprep.subr.bf16.mxu0 %v17322_v36  ;;  %15531 = vmatpush3.bf16.msra.mxu1 %v17319_v59  ;;  %v6461_v36 = vsel %vm6455_vm3, %v6452_v21, %v16880_v43  ;;  %v16890_v59 = vunpack.i.h.bf16 %v21397_v60 }
0x1700   : > { %v6434_v4 = vsel %vm3177_vm0, %v24081_v45, %v16885_v32  ;;  %v6433_v23 = vsel %vm3177_vm0, %v24082_v24, %v16884_v6  ;;  %15532 = vmatprep.subr.bf16.mxu1 %v17323_v46  ;;  %v6469_v61 = vsel %vm6464_vm4, %v6460_v54, %v16889_v40  ;;  %v24084_v45 = vmov 0   ;;  %v17332_v24 = vld [vmem:[%s19789_s10 + $0x180] ss:$12 sps:$4 sm:$0xff]  }
0x1701   : > { %v16893_v9 = vpop.permute.xlu1 %16892  ;;  %v6442_v19 = vsel %vm6437_vm5, %v6433_v23, %v16869_v56  ;;  %v6443_v63 = vsel %vm6437_vm5, %v6434_v4, %v16870_v31  ;;  %v6470_v46 = vsel %vm6464_vm4, %v6461_v36, %v16890_v59  ;;  %v17334_v4 = vld [vmem:[%s19789_s10 + $0x184] ss:$12 sps:$4 sm:$0xff]   ;;  %v17338_v23 = vld [vmem:[%s19789_s10 + $0x188] ss:$12 sps:$4 sm:$0xff]  }
0x1702   : > { %7028 = vmatpush1.bf16.msra.mxu0 %v17320_v34  ;;  %v16895_v42 = vunpack.i.h.bf16 %v16893_v9  ;;  %v16894_v5 = vunpack.i.l.bf16 %v16893_v9  ;;  %v6496_v51 = vpack.c.bf16 %v6443_v63, %v6442_v19  ;;  %v6497_v6 = vpack.c.bf16 %v6470_v46, %v6469_v61  ;;  %v17341_v9 = vld [vmem:[%s19789_s10 + $0x1b4] ss:$12 sps:$4 sm:$0xff]   ;;  %v17339_v19 = vld [vmem:[%s19789_s10 + $0x1b0] ss:$12 sps:$4 sm:$0xff]   ;;  %v17345_v63 = vld [vmem:[%s19789_s10 + $0x1cc] ss:$12 sps:$4 sm:$0xff]  }
0x1703   : > { %7029 = vmatprep.subr.bf16.mxu0 %v17327_v55  ;;  %15533 = vmatpush3.bf16.msra.mxu1 %v17324_v25  ;;  %v16900_v34 = vunpack.i.h.bf16 %v21431_v17  ;;  %v17335_v25 = vld [vmem:[%s19789_s10 + $0x198] ss:$12 sps:$4 sm:$0xff]  }
0x1704   : > { %v6444_v47 = vsel %vm6437_vm5, %v6435_v1, %v16894_v5  ;;  %v6445_v39 = vsel %vm6437_vm5, %v6436_v12, %v16895_v42  ;;  %15534 = vmatprep.subr.bf16.mxu1 %v17328_v37  ;;  %v17342_v37 = vld [vmem:[%s19789_s10 + $0x1a0] ss:$12 sps:$4 sm:$0xff]   ;;  %v17343_v1 = vld [vmem:[%s19789_s10 + $0x1c8] ss:$12 sps:$4 sm:$0xff]  }
0x1705   : > { %v6499_v2 = vpack.c.bf16 %v6445_v39, %v6444_v47  ;;  %v16903_v22 = vpop.permute.xlu1 %16902  ;;  %v6454_v48 = vsel %vm5062_vm2, %v16895_v42, %v16900_v34  ;;  %v17349_v42 = vld [vmem:[%s19789_s10 + $0x1e4] ss:$12 sps:$4 sm:$0xff]   ;;  %v17359_v47 = vld [vmem:[%s19789_s10 + $0x228] ss:$12 sps:$4 sm:$0xff]  }
0x1706   : > { %7030 = vmatpush1.bf16.msra.mxu0 %v17325_v16  ;;  %v16905_v41 = vunpack.i.h.bf16 %v16903_v22  ;;  %v16904_v32 = vunpack.i.l.bf16 %v16903_v22  ;;  %v17347_v16 = vld [vmem:[%s19789_s10 + $0x1e0] ss:$12 sps:$4 sm:$0xff]   ;;  %v17363_v39 = vld [vmem:[%s19789_s10 + $0x230] ss:$12 sps:$4 sm:$0xff]  }
0x1707   : > { %15535 = vmatpush3.bf16.msra.mxu1 %v17329_v30  ;;  %7072 = vmatprep.subr.bf16.mxu0 %v17334_v4  ;;  %v17362_v30 = vld [vmem:[%s19789_s10 + $0x218] ss:$12 sps:$4 sm:$0xff]  }
0x1708   : > { %15536 = vmatprep.subr.bf16.mxu1 %v17330_v15  ;;  %v6463_v55 = vsel %vm6455_vm3, %v6454_v48, %v16905_v41 }
0x1709   : > { %7032 = vmatmul.mubr.bf16.vlgmr.msra.gmra.mrb[132].mxu0 %v21413_v20  ;;  %v21510_v62 = vpop.permute.xlu1 %16912 }
0x170a   : > { %7041 = vmatprep.mubr.bf16.mxu0 %v6494_v50  ;;  %v16915_v31 = vunpack.i.h.bf16 %v21510_v62  ;;  %v16914_v56 = vunpack.i.l.bf16 %v21510_v62  ;;  %7073 = vmatpush1.bf16.msra.mxu0 %v17332_v24 }
0x170b   : > { %15537 = vmatpush3.bf16.msra.mxu1 %v17331_v33 }
0x170c   : > { %v6472_v26 = vsel %vm6464_vm4, %v6463_v55, %v16915_v31  ;;  %16146 = vmatprep.subr.bf16.mxu1 %v17338_v23 }
0x170e   : > { %7178 = vmatmul.mubr.bf16.vlgmr.msra.gmra.mrb[100].mxu1 %v21413_v20  ;;  %v6453_v20 = vsel %vm5062_vm2, %v16894_v5, %v16899_v11  ;;  %v17350_v5 = vld [vmem:[%s19789_s10 + $0x1d0] ss:$12 sps:$4 sm:$0xff]  }
0x170f   : > { %7185 = vmatprep.mubr.bf16.mxu1 %v6494_v50  ;;  %v6462_v12 = vsel %vm6455_vm3, %v6453_v20, %v16904_v32  ;;  %16147 = vmatpush3.bf16.msra.mxu1 %v17338_v23 }
0x1710   : > { %v6471_v17 = vsel %vm6464_vm4, %v6462_v12, %v16914_v56  ;;  %16148 = vmatprep.subr.bf16.mxu1 %v17342_v37 }
0x1711   : > { %7042 = vmatmul.mubr.bf16.gmra.mrb[136].mxu0 %v21434_v44  ;;  %v6500_v49 = vpack.c.bf16 %v6472_v26, %v6471_v17 }
0x1712   : > { %7051 = vmatprep.mubr.bf16.mxu0 %v6497_v6 }
0x1713   : > { %16149 = vmatpush3.bf16.msra.mxu1 %v17342_v37 }
0x1714   : > { %16150 = vmatprep.subr.bf16.mxu1 %v17346_v8 }
0x1716   : > { %7186 = vmatmul.mubr.bf16.gmra.mrb[104].mxu1 %v21434_v44  ;;  %v17337_v44 = vld [vmem:[%s19789_s10 + $0x19c] ss:$12 sps:$4 sm:$0xff]  }
0x1717   : > { %7193 = vmatprep.mubr.bf16.mxu1 %v6497_v6  ;;  %7074 = vmatprep.subr.bf16.mxu0 %v17337_v44 }
0x1718   : > { %7075 = vmatpush1.bf16.msra.mxu0 %v17335_v25  ;;  %16151 = vmatpush3.bf16.msra.mxu1 %v17346_v8  ;;  %v16918_v8 = vpop.permute.xlu0 %16917 }
0x1719   : > { %7052 = vmatmul.mubr.bf16.gmra.mrb[140].mxu0 %v6496_v51  ;;  %7076 = vmatprep.subr.bf16.mxu0 %v17341_v9 }
0x171a   : > { %7061 = vmatprep.mubr.bf16.mxu0 %v6500_v49  ;;  %16152 = vmatprep.subr.bf16.mxu1 %v17350_v5 }
0x171c   : > { %7077 = vmatpush1.bf16.msra.mxu0 %v17339_v19  ;;  %16153 = vmatpush3.bf16.msra.mxu1 %v17350_v5 }
0x171d   : > { %7078 = vmatprep.subr.bf16.mxu0 %v17345_v63  ;;  %16154 = vmatprep.subr.bf16.mxu1 %v17354_v10 }
0x171e   : > { %7194 = vmatmul.mubr.bf16.gmra.mrb[108].mxu1 %v6496_v51  ;;  %v17353_v51 = vld [vmem:[%s19789_s10 + $0x1fc] ss:$12 sps:$4 sm:$0xff]  }
0x171f   : > { %7201 = vmatprep.mubr.bf16.mxu1 %v6500_v49 }
0x1720   : > { %7079 = vmatpush1.bf16.msra.mxu0 %v17343_v1  ;;  %16155 = vmatpush3.bf16.msra.mxu1 %v17354_v10  ;;  %v16920_v1 = vunpack.i.h.bf16 %v16918_v8 }
0x1721   : > { %7062 = vmatmul.mubr.bf16.gmra.mrb[144].mxu0 %v6499_v2  ;;  %7080 = vmatprep.subr.bf16.mxu0 %v17349_v42  ;;  %v16919_v42 = vunpack.i.l.bf16 %v16918_v8 }
0x1722   : > { %7104 = vmatprep.mubr.bf16.mxu0 %v24084_v45  ;;  %16156 = vmatprep.subr.bf16.mxu1 %v17358_v58 }
0x1724   : > { %7081 = vmatpush1.bf16.msra.mxu0 %v17347_v16  ;;  %16157 = vmatpush3.bf16.msra.mxu1 %v17358_v58  ;;  %v16928_v16 = vpop.permute.xlu0 %16927 }
0x1725   : > { %7082 = vmatprep.subr.bf16.mxu0 %v17353_v51  ;;  %16158 = vmatprep.subr.bf16.mxu1 %v17362_v30 }
0x1726   : > { %7202 = vmatmul.mubr.bf16.gmra.mrb[112].mxu1 %v6499_v2 }
0x1728   : > { %7083 = vmatpush1.bf16.msra.mxu0 %v17351_v35  ;;  %16159 = vmatpush3.bf16.msra.mxu1 %v17362_v30  ;;  %v6473_v35 = vsel %vm3316_vm1, %v16839_v38, %v16919_v42  ;;  %v16929_v30 = vunpack.i.l.bf16 %v16928_v16 }
0x1729   : > { %7084 = vmatprep.subr.bf16.mxu0 %v17357_v53  ;;  %16160 = vmatprep.subr.bf16.mxu1 %v17363_v39  ;;  %v6474_v53 = vsel %vm3316_vm1, %v16840_v57, %v16920_v1 }
0x172a   : > { %v6475_v28 = vsel %vm3316_vm1, %v16864_v0, %v16929_v30 }
0x172c   : > { %7085 = vmatpush1.bf16.msra.mxu0 %v17355_v27  ;;  %16161 = vmatpush3.bf16.msra.mxu1 %v17363_v39 }
0x172d   : > { %7086 = vmatprep.subr.bf16.mxu0 %v17361_v3  ;;  %v16930_v3 = vunpack.i.h.bf16 %v16928_v16 }
0x1730   : > { %7087 = vmatpush1.bf16.msra.mxu0 %v17359_v47 }
0x179c   : > { %v16136_v15 = vpop.f32.mrb[128].mxu0 }
0x179d   : > { %v6129_v29 = vpop.f32.mrb[129].mxu0 }
0x179e   : > { %v16137_v7 = vpop.f32.mrb[130].mxu0 }
0x179f   : > { %v16931_v2 = vpack.i.bf16 %v16137_v7, %v16136_v15  ;;  %v6132_v21 = vpop.f32.mrb[131].mxu0  ;;  %v6476_v7 = vsel %vm3316_vm1, %v16865_v18, %v16930_v3 }
0x17a0   : > { %v16921_v13 = vpack.i.bf16 %v6132_v21, %v6129_v29  ;;  %v16938_v21 = vpop.permute.xlu0 %16937 }
0x17a1   : > { %v16939_v18 = vunpack.i.l.bf16 %v16938_v21 }
0x17a2   : > { %16922 = vrot.lane.b32.xlu1 %v16921_v13, %s19154_s3  ;;  %v16940_v13 = vunpack.i.h.bf16 %v16938_v21 }
0x17a4   : > { %v16943_v14 = vpop.permute.xlu0 %16942 }
0x17a6   : > { %16932 = vrot.lane.b32.xlu1 %v16931_v2, %s19154_s3 }
0x17c1   : > { %v16144_v43 = vpop.f32.mrb[96].mxu1 }
0x17c2   : > { %v6190_v52 = vpop.f32.mrb[97].mxu1 }
0x17c3   : > { %v16145_v22 = vpop.f32.mrb[98].mxu1 }
0x17c4   : > { %v16951_v50 = vpack.i.bf16 %v16145_v22, %v16144_v43  ;;  %v6193_v33 = vpop.f32.mrb[99].mxu1  ;;  %v6477_v22 = vsel %vm3316_vm1, %v16889_v40, %v16939_v18  ;;  %v18480_v18 = vld [vmem:[#allocation2 + $0x10] sm:$0xff] }
0x17c5   : > { %v16946_v54 = vpack.i.bf16 %v6193_v33, %v6190_v52 }
0x17c7   : > { %16947 = vrot.lane.b32.xlu1 %v16946_v54, %s19154_s3 }
0x17cb   : > { %16952 = vrot.lane.b32.xlu1 %v16951_v50, %s19154_s3  ;;  %v6478_v50 = vsel %vm3316_vm1, %v16890_v59, %v16940_v13 }
0x17e1   : > { %v15538_v36 = vpop.f32.mrb[100].mxu1 }
0x17e2   : > { %v15539_v61 = vpop.f32.mrb[101].mxu1 }
0x17e3   : > { %v21558_v46 = vadd.f32 %v15539_v61, %v15538_v36  ;;  %v15541_v41 = vpop.f32.mrb[102].mxu1  ;;  %v16945_v36 = vunpack.i.h.bf16 %v16943_v14  ;;  %v16944_v61 = vunpack.i.l.bf16 %v16943_v14 }
0x17e4   : > { %v15542_v32 = vpop.f32.mrb[103].mxu1 }
0x17e5   : > { %v21560_v6 = vadd.f32 %v15542_v32, %v15541_v41  ;;  %v6479_v60 = vsel %vm3316_vm1, %v16914_v56, %v16944_v61  ;;  %v6598_v56 = vld [vmem:[%s806_s8] sm:$0x7]  ;;  %v18482_v61 = vld [vmem:[#allocation2 + $0x30] sm:$0xff] }
0x17e9   : > { %v15544_v34 = vpop.f32.mrb[104].mxu1 }
0x17ea   : > { %v15545_v11 = vpop.f32.mrb[105].mxu1 }
0x17eb   : > { %v21562_v48 = vadd.f32 %v15545_v11, %v15544_v34  ;;  %v15547_v20 = vpop.f32.mrb[106].mxu1 }
0x17ec   : > { %v15548_v12 = vpop.f32.mrb[107].mxu1 }
0x17ed   : > { %v21564_v55 = vadd.f32 %v15548_v12, %v15547_v20  ;;  %v6480_v20 = vsel %vm3316_vm1, %v16915_v31, %v16945_v36 }
0x17f1   : > { %v15550_v17 = vpop.f32.mrb[108].mxu1 }
0x17f2   : > { %v15551_v26 = vpop.f32.mrb[109].mxu1 }
0x17f3   : > { %v21566_v49 = vadd.f32 %v15551_v26, %v15550_v17  ;;  %v15553_v4 = vpop.f32.mrb[110].mxu1  ;;  %v6600_v17 = vlaneseq }
0x17f4   : > { %v15554_v24 = vpop.f32.mrb[111].mxu1 }
0x17f5   : > { %v21568_v44 = vadd.f32 %v15554_v24, %v15553_v4  ;;  %v21609_v26 = vshrl.u32 %v6600_v17, 7  ;;  %v18485_v17 = vld [vmem:[#allocation2 + $0x40] sm:$0xff] }
0x17f7   : > { %v21612_v31 = vsub.s32 0, %v21609_v26  ;;  %v21615_v62 = vsub.s32 1, %v21609_v26  ;;  %v21620_v4 = vsub.s32 2, %v21609_v26 }
0x17f9   : > { %v15556_v23 = vpop.f32.mrb[112].mxu1  ;;  %v21623_v24 = vrot.slane %v6598_v56, %v21612_v31 }
0x17fa   : > { %v15557_v25 = vpop.f32.mrb[113].mxu1 }
0x17fb   : > { %v21570_v9 = vadd.f32 %v15557_v25, %v15556_v23  ;;  %v15559_v37 = vpop.f32.mrb[114].mxu1  ;;  %v21626_v23 = vrot.slane %v6598_v56, %v21615_v62 }
0x17fc   : > { %v15560_v19 = vpop.f32.mrb[115].mxu1 }
0x17fd   : > { %v21572_v63 = vadd.f32 %v15560_v19, %v15559_v37  ;;  %v21629_v37 = vrot.slane %v6598_v56, %v21620_v4 }
0x17ff   : > { %v7180_v30 = vadd.f32 %v21558_v46, %v21629_v37 }
0x1814   : > { %v16923_v5 = vpop.permute.xlu1 %16922 }
0x1815   : > { %v16925_v51 = vunpack.i.h.bf16 %v16923_v5  ;;  %v16924_v10 = vunpack.i.l.bf16 %v16923_v5 }
0x1817   : > { %v6483_v58 = vsel %vm6481_vm6, %v6474_v53, %v16925_v51  ;;  %v6482_v27 = vsel %vm6481_vm6, %v6473_v35, %v16924_v10  ;;  %v7188_v51 = vadd.f32 %v21562_v48, %v21629_v37  ;;  %v18476_v10 = vld [vmem:[#allocation2] sm:$0xff]  ;;  %v18477_v53 = vld [vmem:[#allocation2 + $0x8] sm:$0xff] }
0x1818   : > { %v6492_v47 = vpack.c.bf16 %v6483_v58, %v6482_v27  ;;  %v16933_v39 = vpop.permute.xlu1 %16932  ;;  %v18479_v48 = vld [vmem:[#allocation2 + $0x20] sm:$0xff] }
0x1819   : > { %v16935_v15 = vunpack.i.h.bf16 %v16933_v39  ;;  %v16934_v29 = vunpack.i.l.bf16 %v16933_v39 }
0x181a   : > { %7105 = vmatmul.mubr.bf16.vlgmr.msra.gmra.mrb[132].mxu0 %v6492_v47  ;;  %16162 = vmatprep.mubr.bf16.mxu1 %v6492_v47 }
0x181b   : > { %v6484_v38 = vsel %vm6481_vm6, %v6475_v28, %v16934_v29  ;;  %v6485_v57 = vsel %vm6481_vm6, %v6476_v7, %v16935_v15  ;;  %7114 = vmatprep.mubr.bf16.mxu0 %v24084_v45  ;;  %v7191_v15 = vadd.f32 %v21564_v55, %v21629_v37  ;;  %v18478_v29 = vld [vmem:[#allocation2 + $0x18] sm:$0xff] }
0x181c   : > { %v6495_v2 = vpack.c.bf16 %v6485_v57, %v6484_v38 }
0x181e   : > { %16163 = vmatmul.mubr.bf16.vlgmr.msra.gmra.mrb[116].mxu1 %v6495_v2 }
0x1822   : > { %7115 = vmatmul.mubr.bf16.gmra.mrb[136].mxu0 %v6495_v2  ;;  %v7183_v2 = vadd.f32 %v21560_v6, %v21629_v37 }
0x1823   : > { %7124 = vmatprep.mubr.bf16.mxu0 %v24084_v45 }
0x1839   : > { %v16948_v43 = vpop.permute.xlu1 %16947 }
0x183a   : > { %v16950_v52 = vunpack.i.h.bf16 %v16948_v43  ;;  %v16949_v0 = vunpack.i.l.bf16 %v16948_v43 }
0x183c   : > { %v6486_v33 = vsel %vm6481_vm6, %v6477_v22, %v16949_v0  ;;  %v6487_v54 = vsel %vm6481_vm6, %v6478_v50, %v16950_v52  ;;  %v18481_v50 = vld [vmem:[#allocation2 + $0x28] sm:$0xff] }
0x183d   : > { %v16953_v41 = vpop.permute.xlu1 %16952  ;;  %v6498_v32 = vpack.c.bf16 %v6487_v54, %v6486_v33 }
0x183e   : > { %v16955_v34 = vunpack.i.h.bf16 %v16953_v41  ;;  %v16954_v11 = vunpack.i.l.bf16 %v16953_v41 }
0x183f   : > { %7125 = vmatmul.mubr.bf16.gmra.mrb[140].mxu0 %v6498_v32  ;;  %16166 = vmatprep.mubr.bf16.mxu1 %v6498_v32 }
0x1840   : > { %v6488_v59 = vsel %vm6481_vm6, %v6479_v60, %v16954_v11  ;;  %v6489_v40 = vsel %vm6481_vm6, %v6480_v20, %v16955_v34  ;;  %7134 = vmatprep.mubr.bf16.mxu0 %v24084_v45  ;;  %v18483_v11 = vld [vmem:[#allocation2 + $0x38] sm:$0xff] }
0x1841   : > { %v6501_v12 = vpack.c.bf16 %v6489_v40, %v6488_v59  ;;  %v18484_v40 = vld [vmem:[#allocation2 + $0x48] sm:$0xff] }
0x1843   : > { %16167 = vmatmul.mubr.bf16.gmra.mrb[120].mxu1 %v6501_v12 }
0x1847   : > { %7135 = vmatmul.mubr.bf16.gmra.mrb[144].mxu0 %v6501_v12 }
0x18ed   : > { %v7106_v25 = vpop.f32.mrb[132].mxu0 }
0x18ee   : > { %v16210_v19 = vadd.f32 %v7106_v25, %v21623_v24  ;;  %v7108_v8 = vpop.f32.mrb[133].mxu0 }
0x18ef   : > { %v16211_v1 = vadd.f32 %v7108_v8, %v21626_v23  ;;  %v7110_v42 = vpop.f32.mrb[134].mxu0 }
0x18f0   : > { %v16212_v5 = vadd.f32 %v7110_v42, %v21623_v24  ;;  %v7112_v16 = vpop.f32.mrb[135].mxu0  ;;  %v21636_v35 = vadd.f32 %v18476_v10, %v16210_v19  ;;  %v18486_v19 = vld [vmem:[#allocation2 + $0x50] sm:$0xff] }
0x18f1   : > { %v21638_v58 = vadd.f32 %v18477_v53, %v16211_v1  ;;  %v16213_v27 = vadd.f32 %v7112_v16, %v21626_v23  ;;  %v16164_v3 = vpop.f32.mrb[116].mxu1 }
0x18f2   : > { %v7253_v47 = vadd.f32 %v16164_v3, %v7188_v51  ;;  %v7244_v39 = vpop.f32.mrb[117].mxu1  ;;  %v21645_v7 = vadd.f32 %v18478_v29, %v16212_v5  ;;  %v18487_v5 = vld [vmem:[#allocation2 + $0x58] sm:$0xff]  ;;  %v18488_v29 = vld [vmem:[#allocation2 + $0x60] sm:$0xff] }
0x18f3   : > { %v21647_v28 = vadd.f32 %v18479_v48, %v16213_v27  ;;  %v7245_v38 = vadd.f32 %v7244_v39, %v7180_v30  ;;  %v16165_v57 = vpop.f32.mrb[118].mxu1  ;;  %v7301_v46 = vadd.f32 %v21638_v58, %v21636_v35 }
0x18f4   : > { %v7256_v21 = vadd.f32 %v16165_v57, %v7191_v15  ;;  %v7247_v13 = vpop.f32.mrb[119].mxu1  ;;  %v21671_v56 = vadd.f32 %v18485_v17, %v7253_v47  ;;  %v7204_v15 = vadd.f32 %v21570_v9, %v21629_v37  ;;  %v18491_v9 = vld [vmem:[#allocation2 + $0x80] sm:$0xff] }
0x18f5   : > { %v21653_v43 = vadd.f32 %v18480_v18, %v7245_v38  ;;  %v7248_v55 = vadd.f32 %v7247_v13, %v7183_v2  ;;  %v7116_v14 = vpop.f32.mrb[136].mxu0  ;;  %v7305_v22 = vadd.f32 %v21647_v28, %v21645_v7  ;;  %v18489_v38 = vld [vmem:[#allocation2 + $0x68] sm:$0xff]  ;;  %v7196_v13 = vadd.f32 %v21566_v49, %v21629_v37 }
0x18f6   : > { %v16214_v52 = vadd.f32 %v7116_v14, %v21623_v24  ;;  %v7118_v0 = vpop.f32.mrb[137].mxu0  ;;  %v21680_v16 = vadd.f32 %v18487_v5, %v7256_v21  ;;  %v18490_v14 = vld [vmem:[#allocation2 + $0x78] sm:$0xff] }
0x18f7   : > { %v21658_v33 = vadd.f32 %v18481_v50, %v7248_v55  ;;  %v16215_v6 = vadd.f32 %v7118_v0, %v21626_v23  ;;  %v7120_v54 = vpop.f32.mrb[138].mxu0  ;;  %v7302_v36 = vadd.f32 %v7301_v46, %v21653_v43  ;;  %v7207_v55 = vadd.f32 %v21572_v63, %v21629_v37 }
0x18f8   : > { %v21662_v41 = vadd.f32 %v18482_v61, %v16214_v52  ;;  %v16216_v32 = vadd.f32 %v7120_v54, %v21623_v24  ;;  %v7122_v34 = vpop.f32.mrb[139].mxu0  ;;  %v18492_v61 = vld [vmem:[#allocation2 + $0x70] sm:$0xff] }
0x18f9   : > { %v21665_v20 = vadd.f32 %v18483_v11, %v16215_v6  ;;  %v16217_v60 = vadd.f32 %v7122_v34, %v21626_v23  ;;  %7303 = vadd.xlane.f32.xlu0 %v7302_v36  ;;  %v7306_v59 = vadd.f32 %v7305_v22, %v21658_v33  ;;  %v7199_v6 = vadd.f32 %v21568_v44, %v21629_v37 }
0x18fa   : > { %v21669_v12 = vadd.f32 %v18484_v40, %v16216_v32  ;;  %v18493_v40 = vld [vmem:[#allocation2 + $0x88] sm:$0xff] }
0x18fb   : > { %v7309_v25 = vadd.f32 %v21665_v20, %v21662_v41  ;;  %v21675_v8 = vadd.f32 %v18486_v19, %v16217_v60  ;;  %7307 = vadd.xlane.f32.xlu1 %v7306_v59  ;;  %v18494_v19 = vld [vmem:[#allocation2 + $0x90] sm:$0xff] }
0x18fd   : > { %v7313_v1 = vadd.f32 %v21675_v8, %v21669_v12  ;;  %v7310_v42 = vadd.f32 %v7309_v25, %v21671_v56 }
0x18ff   : > { %7311 = vadd.xlane.f32.xlu0 %v7310_v42  ;;  %v7314_v51 = vadd.f32 %v7313_v1, %v21680_v16 }
0x1903   : > { %7315 = vadd.xlane.f32.xlu0 %v7314_v51  ;;  %v18495_v51 = vld [vmem:[#allocation2 + $0x98] sm:$0xff] }
0x1912   : > { %v7126_v10 = vpop.f32.mrb[140].mxu0 }
0x1913   : > { %v16218_v53 = vadd.f32 %v7126_v10, %v21623_v24  ;;  %v7128_v27 = vpop.f32.mrb[141].mxu0 }
0x1914   : > { %v16219_v3 = vadd.f32 %v7128_v27, %v21626_v23  ;;  %v7130_v30 = vpop.f32.mrb[142].mxu0 }
0x1915   : > { %v16220_v47 = vadd.f32 %v7130_v30, %v21623_v24  ;;  %v7132_v39 = vpop.f32.mrb[143].mxu0  ;;  %v21688_v48 = vadd.f32 %v18488_v29, %v16218_v53  ;;  %v18499_v29 = vld [vmem:[#allocation2 + $0xb8] sm:$0xff] }
0x1916   : > { %v21690_v57 = vadd.f32 %v18489_v38, %v16219_v3  ;;  %v16221_v2 = vadd.f32 %v7132_v39, %v21626_v23  ;;  %v16168_v21 = vpop.f32.mrb[120].mxu1  ;;  %v18496_v3 = vld [vmem:[#allocation2 + $0xa8] sm:$0xff] }
0x1917   : > { %v7269_v46 = vadd.f32 %v16168_v21, %v7204_v15  ;;  %v7260_v18 = vpop.f32.mrb[121].mxu1  ;;  %v21697_v52 = vadd.f32 %v18490_v14, %v16220_v47  ;;  %v18497_v47 = vld [vmem:[#allocation2 + $0xa0] sm:$0xff]  ;;  %v18498_v15 = vld [vmem:[#allocation2 + $0xb0] sm:$0xff] }
0x1918   : > { %v21699_v0 = vadd.f32 %v18491_v9, %v16221_v2  ;;  %v7261_v22 = vadd.f32 %v7260_v18, %v7196_v13  ;;  %v16169_v50 = vpop.f32.mrb[122].mxu1  ;;  %v7317_v49 = vadd.f32 %v21690_v57, %v21688_v48  ;;  %v17366_v18 = vld [vmem:[%s19794_s18 + $0x4] ss:$48 sps:$4 sm:$0xff]   ;;  %v17369_v14 = vld [vmem:[%s19794_s18 + $0xc] ss:$48 sps:$4 sm:$0xff]  }
0x1919   : > { %v7272_v54 = vadd.f32 %v16169_v50, %v7207_v55  ;;  %v7263_v36 = vpop.f32.mrb[123].mxu1  ;;  %v21723_v39 = vadd.f32 %v18497_v47, %v7269_v46  ;;  %v17364_v46 = vld [vmem:[%s19794_s18] ss:$48 sps:$4 sm:$0xff]   ;;  %v17367_v55 = vld [vmem:[%s19794_s18 + $0x8] ss:$48 sps:$4 sm:$0xff]   ;;  %9354 = vmatprep.subr.bf16.mxu1 %v17366_v18  ;;  %9500 = vmatprep.subr.bf16.mxu0 %v17369_v14 }
0x191a   : > { %v21705_v32 = vadd.f32 %v18492_v61, %v7261_v22  ;;  %v7264_v63 = vadd.f32 %v7263_v36, %v7199_v6  ;;  %v7136_v34 = vpop.f32.mrb[144].mxu0  ;;  %v7321_v59 = vadd.f32 %v21699_v0, %v21697_v52  ;;  %v17372_v9 = vld [vmem:[%s19794_s18 + $0x64] ss:$48 sps:$4 sm:$0xff]   ;;  %v17375_v22 = vld [vmem:[%s19794_s18 + $0x6c] ss:$48 sps:$4 sm:$0xff]   ;;  %9355 = vmatpush1.bf16.msra.mxu1 %v17364_v46  ;;  %9501 = vmatpush1.bf16.msra.mxu0 %v17367_v55 }
0x191b   : > { %v16222_v11 = vadd.f32 %v7136_v34, %v21623_v24  ;;  %v7138_v60 = vpop.f32.mrb[145].mxu0  ;;  %v21729_v38 = vadd.f32 %v18499_v29, %v7272_v54  ;;  %v17370_v50 = vld [vmem:[%s19794_s18 + $0x60] ss:$48 sps:$4 sm:$0xff]   ;;  %9356 = vmatprep.subr.bf16.mxu1 %v17372_v9  ;;  %v17373_v6 = vld [vmem:[%s19794_s18 + $0x68] ss:$48 sps:$4 sm:$0xff]   ;;  %9502 = vmatprep.subr.bf16.mxu0 %v17375_v22 }
0x191c   : > { %v21710_v17 = vadd.f32 %v18493_v40, %v7264_v63  ;;  %v16223_v44 = vadd.f32 %v7138_v60, %v21626_v23  ;;  %v7140_v37 = vpop.f32.mrb[146].mxu0  ;;  %v7318_v25 = vadd.f32 %v7317_v49, %v21705_v32  ;;  %v17378_v54 = vld [vmem:[%s19794_s18 + $0xc4] ss:$48 sps:$4 sm:$0xff]   ;;  %v17381_v36 = vld [vmem:[%s19794_s18 + $0xcc] ss:$48 sps:$4 sm:$0xff]  }
0x191d   : > { %v21714_v1 = vadd.f32 %v18494_v19, %v16222_v11  ;;  %v16224_v42 = vadd.f32 %v7140_v37, %v21623_v24  ;;  %v7142_v5 = vpop.f32.mrb[147].mxu0  ;;  %v17376_v49 = vld [vmem:[%s19794_s18 + $0xc0] ss:$48 sps:$4 sm:$0xff]   ;;  %v17379_v61 = vld [vmem:[%s19794_s18 + $0xc8] ss:$48 sps:$4 sm:$0xff]  }
0x191e   : > { %v21717_v10 = vadd.f32 %v18495_v51, %v16223_v44  ;;  %v16225_v53 = vadd.f32 %v7142_v5, %v21626_v23  ;;  %7319 = vadd.xlane.f32.xlu0 %v7318_v25  ;;  %v7322_v27 = vadd.f32 %v7321_v59, %v21710_v17  ;;  %9357 = vmatpush1.bf16.msra.mxu1 %v17370_v50  ;;  %v17384_v63 = vld [vmem:[%s19794_s18 + $0x124] ss:$48 sps:$4 sm:$0xff]   ;;  %v17387_v34 = vld [vmem:[%s19794_s18 + $0x12c] ss:$48 sps:$4 sm:$0xff]   ;;  %v17382_v11 = vld [vmem:[%s19794_s18 + $0x120] ss:$48 sps:$4 sm:$0xff]  }
0x191f   : > { %v21721_v30 = vadd.f32 %v18496_v3, %v16224_v42  ;;  %9503 = vmatpush1.bf16.msra.mxu0 %v17373_v6  ;;  %9358 = vmatprep.subr.bf16.mxu1 %v17378_v54  ;;  %v17385_v60 = vld [vmem:[%s19794_s18 + $0x128] ss:$48 sps:$4 sm:$0xff]   ;;  %v17390_v59 = vld [vmem:[%s19794_s18 + $0x184] ss:$48 sps:$4 sm:$0xff]   ;;  %v17393_v40 = vld [vmem:[%s19794_s18 + $0x18c] ss:$48 sps:$4 sm:$0xff]  }
0x1920   : > { %v7325_v24 = vadd.f32 %v21717_v10, %v21714_v1  ;;  %v21727_v23 = vadd.f32 %v18498_v15, %v16225_v53  ;;  %7323 = vadd.xlane.f32.xlu1 %v7322_v27  ;;  %9504 = vmatprep.subr.bf16.mxu0 %v17381_v36  ;;  %v17388_v44 = vld [vmem:[%s19794_s18 + $0x180] ss:$48 sps:$4 sm:$0xff]   ;;  %v17391_v37 = vld [vmem:[%s19794_s18 + $0x188] ss:$48 sps:$4 sm:$0xff]   ;;  %v17396_v25 = vld [vmem:[%s19794_s18 + $0x1e4] ss:$48 sps:$4 sm:$0xff]  }
0x1921   : > { %v17399_v19 = vld [vmem:[%s19794_s18 + $0x1ec] ss:$48 sps:$4 sm:$0xff]   ;;  %v17394_v42 = vld [vmem:[%s19794_s18 + $0x1e0] ss:$48 sps:$4 sm:$0xff]   ;;  %v17397_v5 = vld [vmem:[%s19794_s18 + $0x1e8] ss:$48 sps:$4 sm:$0xff]  }
0x1922   : > { %v7329_v2 = vadd.f32 %v21727_v23, %v21721_v30  ;;  %v7326_v21 = vadd.f32 %v7325_v24, %v21723_v39  ;;  %9359 = vmatpush1.bf16.msra.mxu1 %v17376_v49  ;;  %v17402_v51 = vld [vmem:[%s19794_s18 + $0x244] ss:$48 sps:$4 sm:$0xff]   ;;  %v17405_v53 = vld [vmem:[%s19794_s18 + $0x24c] ss:$48 sps:$4 sm:$0xff]   ;;  %v17400_v27 = vld [vmem:[%s19794_s18 + $0x240] ss:$48 sps:$4 sm:$0xff]  }
0x1923   : > { %9505 = vmatpush1.bf16.msra.mxu0 %v17379_v61  ;;  %9360 = vmatprep.subr.bf16.mxu1 %v17384_v63  ;;  %v17403_v3 = vld [vmem:[%s19794_s18 + $0x248] ss:$48 sps:$4 sm:$0xff]   ;;  %v17408_v47 = vld [vmem:[%s19794_s18 + $0x2a4] ss:$48 sps:$4 sm:$0xff]   ;;  %v17411_v24 = vld [vmem:[%s19794_s18 + $0x2ac] ss:$48 sps:$4 sm:$0xff]  }
0x1924   : > { %7327 = vadd.xlane.f32.xlu0 %v7326_v21  ;;  %v7330_v13 = vadd.f32 %v7329_v2, %v21729_v38  ;;  %9506 = vmatprep.subr.bf16.mxu0 %v17387_v34  ;;  %v17406_v15 = vld [vmem:[%s19794_s18 + $0x2a0] ss:$48 sps:$4 sm:$0xff]   ;;  %v17409_v29 = vld [vmem:[%s19794_s18 + $0x2a8] ss:$48 sps:$4 sm:$0xff]   ;;  %v17414_v2 = vld [vmem:[%s19794_s18 + $0x304] ss:$48 sps:$4 sm:$0xff]  }
0x1925   : > { %v17417_v21 = vld [vmem:[%s19794_s18 + $0x30c] ss:$48 sps:$4 sm:$0xff]   ;;  %v17415_v46 = vld [vmem:[%s19794_s18 + $0x308] ss:$48 sps:$4 sm:$0xff]   ;;  %v17420_v18 = vld [vmem:[%s19794_s18 + $0x364] ss:$48 sps:$4 sm:$0xff]  }
0x1926   : > { %7331 = vadd.xlane.f32.xlu1 %v7330_v13  ;;  %9361 = vmatpush1.bf16.msra.mxu1 %v17382_v11  ;;  %v17412_v13 = vld [vmem:[%s19794_s18 + $0x300] ss:$48 sps:$4 sm:$0xff]   ;;  %v17423_v55 = vld [vmem:[%s19794_s18 + $0x36c] ss:$48 sps:$4 sm:$0xff]   ;;  %v17421_v9 = vld [vmem:[%s19794_s18 + $0x368] ss:$48 sps:$4 sm:$0xff]  }
0x1927   : > { %9507 = vmatpush1.bf16.msra.mxu0 %v17385_v60  ;;  %9362 = vmatprep.subr.bf16.mxu1 %v17390_v59  ;;  %v17418_v14 = vld [vmem:[%s19794_s18 + $0x360] ss:$48 sps:$4 sm:$0xff]  }
0x1928   : > { %9508 = vmatprep.subr.bf16.mxu0 %v17393_v40 }
0x192a   : > { %9363 = vmatpush1.bf16.msra.mxu1 %v17388_v44 }
0x192b   : > { %9509 = vmatpush1.bf16.msra.mxu0 %v17391_v37  ;;  %9364 = vmatprep.subr.bf16.mxu1 %v17396_v25 }
0x192c   : > { %9510 = vmatprep.subr.bf16.mxu0 %v17399_v19 }
0x192e   : > { %9365 = vmatpush1.bf16.msra.mxu1 %v17394_v42 }
0x192f   : > { %9511 = vmatpush1.bf16.msra.mxu0 %v17397_v5  ;;  %9366 = vmatprep.subr.bf16.mxu1 %v17402_v51 }
0x1930   : > { %9512 = vmatprep.subr.bf16.mxu0 %v17405_v53 }
0x1932   : > { %9367 = vmatpush1.bf16.msra.mxu1 %v17400_v27 }
0x1933   : > { %9513 = vmatpush1.bf16.msra.mxu0 %v17403_v3  ;;  %9368 = vmatprep.subr.bf16.mxu1 %v17408_v47 }
0x1934   : > { %9514 = vmatprep.subr.bf16.mxu0 %v17411_v24 }
0x1936   : > { %9369 = vmatpush1.bf16.msra.mxu1 %v17406_v15 }
0x1937   : > { %9515 = vmatpush1.bf16.msra.mxu0 %v17409_v29  ;;  %9370 = vmatprep.subr.bf16.mxu1 %v17414_v2 }
0x1938   : > { %9516 = vmatprep.subr.bf16.mxu0 %v17417_v21  ;;  %v17426_v21 = vld [vmem:[%s19794_s18 + $0x3c4] ss:$48 sps:$4 sm:$0xff]  }
0x193a   : > { %9371 = vmatpush1.bf16.msra.mxu1 %v17412_v13  ;;  %v17429_v13 = vld [vmem:[%s19794_s18 + $0x3cc] ss:$48 sps:$4 sm:$0xff]  }
0x193b   : > { %9517 = vmatpush1.bf16.msra.mxu0 %v17415_v46  ;;  %9372 = vmatprep.subr.bf16.mxu1 %v17420_v18  ;;  %v17424_v46 = vld [vmem:[%s19794_s18 + $0x3c0] ss:$48 sps:$4 sm:$0xff]   ;;  %v17427_v18 = vld [vmem:[%s19794_s18 + $0x3c8] ss:$48 sps:$4 sm:$0xff]  }
0x193c   : > { %9518 = vmatprep.subr.bf16.mxu0 %v17423_v55  ;;  %v17432_v55 = vld [vmem:[%s19794_s18 + $0x424] ss:$48 sps:$4 sm:$0xff]  }
0x193e   : > { %9373 = vmatpush1.bf16.msra.mxu1 %v17418_v14  ;;  %v17435_v14 = vld [vmem:[%s19794_s18 + $0x42c] ss:$48 sps:$4 sm:$0xff]  }
0x193f   : > { %9519 = vmatpush1.bf16.msra.mxu0 %v17421_v9  ;;  %9374 = vmatprep.subr.bf16.mxu1 %v17426_v21  ;;  %v17430_v9 = vld [vmem:[%s19794_s18 + $0x420] ss:$48 sps:$4 sm:$0xff]  }
0x1940   : > { %9520 = vmatprep.subr.bf16.mxu0 %v17429_v13 }
0x1942   : > { %9375 = vmatpush1.bf16.msra.mxu1 %v17424_v46  ;;  %v17457_v46 = vld [vmem:[%s19794_s18 + $0x5a8] ss:$48 sps:$4 sm:$0xff]  }
0x1943   : > { %9521 = vmatpush1.bf16.msra.mxu0 %v17427_v18  ;;  %9376 = vmatprep.subr.bf16.mxu1 %v17432_v55 }
0x1944   : > { %9522 = vmatprep.subr.bf16.mxu0 %v17435_v14 }
0x1946   : > { %9377 = vmatpush1.bf16.msra.mxu1 %v17430_v9 }
0x1986   : > { %v7304_v22 = vpop.xlane.xlu0 %7303 }
0x1987   : > { %v7334_v50 = vmul.f32 0.0026041667, %v7304_v22  ;;  %v17433_v22 = vld [vmem:[%s19794_s18 + $0x428] ss:$48 sps:$4 sm:$0xff]  }
0x1988   : > { %v7308_v6 = vpop.xlane.xlu1 %7307  ;;  %9523 = vmatpush1.bf16.msra.mxu0 %v17433_v22 }
0x1989   : > { %v21776_v54 = vsub.f32 %v21636_v35, %v7334_v50  ;;  %v21779_v36 = vsub.f32 %v21638_v58, %v7334_v50  ;;  %v21782_v49 = vsub.f32 %v21653_v43, %v7334_v50  ;;  %v7335_v61 = vmul.f32 0.0026041667, %v7308_v6  ;;  %v17438_v50 = vld [vmem:[%s19794_s18 + $0x484] ss:$48 sps:$4 sm:$0xff]   ;;  %v17441_v6 = vld [vmem:[%s19794_s18 + $0x48c] ss:$48 sps:$4 sm:$0xff]  }
0x198a   : > { %9378 = vmatprep.subr.bf16.mxu1 %v17438_v50  ;;  %9524 = vmatprep.subr.bf16.mxu0 %v17441_v6 }
0x198b   : > { %v7366_v63 = vmul.f32 %v21776_v54, %v21776_v54  ;;  %v7367_v34 = vmul.f32 %v21779_v36, %v21779_v36  ;;  %v21789_v11 = vsub.f32 %v21645_v7, %v7335_v61  ;;  %v21792_v60 = vsub.f32 %v21647_v28, %v7335_v61 }
0x198c   : > { %v21795_v35 = vsub.f32 %v21658_v33, %v7335_v61  ;;  %v7312_v58 = vpop.xlane.xlu0 %7311  ;;  %v7368_v43 = vmul.f32 %v21782_v49, %v21782_v49  ;;  %v17436_v61 = vld [vmem:[%s19794_s18 + $0x480] ss:$48 sps:$4 sm:$0xff]  }
0x198d   : > { %v7369_v59 = vmul.f32 %v21789_v11, %v21789_v11  ;;  %v7370_v40 = vmul.f32 %v21792_v60, %v21792_v60  ;;  %v7336_v44 = vmul.f32 0.0026041667, %v7312_v58  ;;  %v7390_v37 = vadd.f32 %v7367_v34, %v7366_v63  ;;  %v17439_v63 = vld [vmem:[%s19794_s18 + $0x488] ss:$48 sps:$4 sm:$0xff]   ;;  %9379 = vmatpush1.bf16.msra.mxu1 %v17436_v61  ;;  %v17444_v58 = vld [vmem:[%s19794_s18 + $0x4e4] ss:$48 sps:$4 sm:$0xff]  }
0x198e   : > { %v7371_v42 = vmul.f32 %v21795_v35, %v21795_v35  ;;  %9525 = vmatpush1.bf16.msra.mxu0 %v17439_v63  ;;  %9380 = vmatprep.subr.bf16.mxu1 %v17444_v58 }
0x198f   : > { %v21804_v7 = vsub.f32 %v21662_v41, %v7336_v44  ;;  %v21807_v28 = vsub.f32 %v21665_v20, %v7336_v44  ;;  %v21810_v33 = vsub.f32 %v21671_v56, %v7336_v44  ;;  %v7391_v25 = vadd.f32 %v7390_v37, %v7368_v43  ;;  %v17447_v43 = vld [vmem:[%s19794_s18 + $0x4ec] ss:$48 sps:$4 sm:$0xff]   ;;  %v17445_v44 = vld [vmem:[%s19794_s18 + $0x4e8] ss:$48 sps:$4 sm:$0xff]  }
0x1990   : > { %v7316_v19 = vpop.xlane.xlu0 %7315  ;;  %v7394_v5 = vadd.f32 %v7370_v40, %v7369_v59  ;;  %v17442_v40 = vld [vmem:[%s19794_s18 + $0x4e0] ss:$48 sps:$4 sm:$0xff]   ;;  %9526 = vmatprep.subr.bf16.mxu0 %v17447_v43 }
0x1991   : > { %v7372_v51 = vmul.f32 %v21804_v7, %v21804_v7  ;;  %v7373_v53 = vmul.f32 %v21807_v28, %v21807_v28  ;;  %v7337_v41 = vmul.f32 0.0026041667, %v7316_v19  ;;  %7392 = vadd.xlane.f32.xlu0 %v7391_v25  ;;  %v7374_v56 = vmul.f32 %v21810_v33, %v21810_v33  ;;  %v17448_v25 = vld [vmem:[%s19794_s18 + $0x540] ss:$48 sps:$4 sm:$0xff]   ;;  %v17450_v19 = vld [vmem:[%s19794_s18 + $0x544] ss:$48 sps:$4 sm:$0xff]   ;;  %9381 = vmatpush1.bf16.msra.mxu1 %v17442_v40 }
0x1992   : > { %v7395_v20 = vadd.f32 %v7394_v5, %v7371_v42  ;;  %9527 = vmatpush1.bf16.msra.mxu0 %v17445_v44  ;;  %9382 = vmatprep.subr.bf16.mxu1 %v17450_v19  ;;  %v17462_v44 = vld [vmem:[%s19794_s18 + $0x604] ss:$48 sps:$4 sm:$0xff]  }
0x1993   : > { %v21821_v27 = vsub.f32 %v21669_v12, %v7337_v41  ;;  %v21824_v3 = vsub.f32 %v21675_v8, %v7337_v41  ;;  %v21827_v47 = vsub.f32 %v21680_v16, %v7337_v41  ;;  %v7398_v24 = vadd.f32 %v7373_v53, %v7372_v51  ;;  %v17451_v53 = vld [vmem:[%s19794_s18 + $0x548] ss:$48 sps:$4 sm:$0xff]   ;;  %v17453_v41 = vld [vmem:[%s19794_s18 + $0x54c] ss:$48 sps:$4 sm:$0xff]  }
0x1994   : > { %7396 = vadd.xlane.f32.xlu1 %v7395_v20  ;;  %9528 = vmatprep.subr.bf16.mxu0 %v17453_v41 }
0x1995   : > { %v7375_v15 = vmul.f32 %v21821_v27, %v21821_v27  ;;  %v7376_v29 = vmul.f32 %v21824_v3, %v21824_v3  ;;  %v7399_v2 = vadd.f32 %v7398_v24, %v7374_v56  ;;  %v7377_v12 = vmul.f32 %v21827_v47, %v21827_v47  ;;  %v17456_v56 = vld [vmem:[%s19794_s18 + $0x5a4] ss:$48 sps:$4 sm:$0xff]   ;;  %v17459_v24 = vld [vmem:[%s19794_s18 + $0x5ac] ss:$48 sps:$4 sm:$0xff]   ;;  %9383 = vmatpush1.bf16.msra.mxu1 %v17448_v25 }
0x1996   : > { %9529 = vmatpush1.bf16.msra.mxu0 %v17451_v53  ;;  %9384 = vmatprep.subr.bf16.mxu1 %v17456_v56 }
0x1997   : > { %7400 = vadd.xlane.f32.xlu0 %v7399_v2  ;;  %v7402_v8 = vadd.f32 %v7376_v29, %v7375_v15  ;;  %9530 = vmatprep.subr.bf16.mxu0 %v17459_v24 }
0x1999   : > { %v7403_v16 = vadd.f32 %v7402_v8, %v7377_v12 }
0x199a   : > { %9531 = vmatpush1.bf16.msra.mxu0 %v17457_v46 }
0x199b   : > { %7404 = vadd.xlane.f32.xlu1 %v7403_v16 }
0x19ab   : > { %v7320_v34 = vpop.xlane.xlu0 %7319 }
0x19ac   : > { %v7338_v59 = vmul.f32 0.0026041667, %v7320_v34 }
0x19ad   : > { %v7324_v37 = vpop.xlane.xlu1 %7323 }
0x19ae   : > { %v21854_v42 = vsub.f32 %v21688_v48, %v7338_v59  ;;  %v21857_v5 = vsub.f32 %v21690_v57, %v7338_v59  ;;  %v7339_v51 = vmul.f32 0.0026041667, %v7324_v37  ;;  %v21862_v20 = vsub.f32 %v21705_v32, %v7338_v59  ;;  %v17465_v37 = vld [vmem:[%s19794_s18 + $0x60c] ss:$48 sps:$4 sm:$0xff]  }
0x19af   : > { %9573 = vmatprep.subr.bf16.mxu0 %v17465_v37  ;;  %v17463_v37 = vld [vmem:[%s19794_s18 + $0x608] ss:$48 sps:$4 sm:$0xff]  }
0x19b0   : > { %v7378_v15 = vmul.f32 %v21854_v42, %v21854_v42  ;;  %v7379_v48 = vmul.f32 %v21857_v5, %v21857_v5  ;;  %v21871_v57 = vsub.f32 %v21697_v52, %v7339_v51  ;;  %v21874_v29 = vsub.f32 %v21699_v0, %v7339_v51  ;;  %v17454_v52 = vld [vmem:[%s19794_s18 + $0x5a0] ss:$48 sps:$4 sm:$0xff]  }
0x19b1   : > { %v21877_v32 = vsub.f32 %v21710_v17, %v7339_v51  ;;  %v7328_v2 = vpop.xlane.xlu0 %7327  ;;  %v7380_v0 = vmul.f32 %v21862_v20, %v21862_v20  ;;  %9385 = vmatpush1.bf16.msra.mxu1 %v17454_v52  ;;  %v21929_v52 = vld [vmem:[%s824_s24] sm:$0x7] }
0x19b2   : > { %v7381_v12 = vmul.f32 %v21871_v57, %v21871_v57  ;;  %v7382_v8 = vmul.f32 %v21874_v29, %v21874_v29  ;;  %v7340_v16 = vmul.f32 0.0026041667, %v7328_v2  ;;  %v7406_v21 = vadd.f32 %v7379_v48, %v7378_v15  ;;  %9427 = vmatprep.subr.bf16.mxu1 %v17462_v44  ;;  %v17460_v44 = vld [vmem:[%s19794_s18 + $0x600] ss:$48 sps:$4 sm:$0xff]  }
0x19b3   : > { %v7332_v13 = vpop.xlane.xlu1 %7331  ;;  %v7383_v22 = vmul.f32 %v21877_v32, %v21877_v32 }
0x19b4   : > { %v21888_v17 = vsub.f32 %v21714_v1, %v7340_v16  ;;  %v21891_v18 = vsub.f32 %v21717_v10, %v7340_v16  ;;  %v21894_v55 = vsub.f32 %v21723_v39, %v7340_v16  ;;  %v7341_v14 = vmul.f32 0.0026041667, %v7332_v13 }
0x19b5   : > { %v7407_v9 = vadd.f32 %v7406_v21, %v7380_v0  ;;  %v7410_v50 = vadd.f32 %v7382_v8, %v7381_v12  ;;  %v21923_v8 = vld [vmem:[%s815_s28] sm:$0x7] }
0x19b6   : > { %v7384_v6 = vmul.f32 %v21888_v17, %v21888_v17  ;;  %v7385_v61 = vmul.f32 %v21891_v18, %v21891_v18  ;;  %v21903_v1 = vsub.f32 %v21721_v30, %v7341_v14  ;;  %v21906_v10 = vsub.f32 %v21727_v23, %v7341_v14 }
0x19b7   : > { %v21909_v39 = vsub.f32 %v21729_v38, %v7341_v14  ;;  %7408 = vadd.xlane.f32.xlu0 %v7407_v9  ;;  %v7411_v63 = vadd.f32 %v7410_v50, %v7383_v22  ;;  %v7386_v30 = vmul.f32 %v21894_v55, %v21894_v55  ;;  %v21933_v13 = vrot.slane %v21923_v8, %v21615_v62 }
0x19b8   : > { %v7387_v34 = vmul.f32 %v21903_v1, %v21903_v1  ;;  %v7388_v58 = vmul.f32 %v21906_v10, %v21906_v10  ;;  %v7414_v23 = vadd.f32 %v7385_v61, %v7384_v6  ;;  %v21937_v0 = vrot.slane %v21923_v8, %v21612_v31 }
0x19b9   : > { %7412 = vadd.xlane.f32.xlu1 %v7411_v63  ;;  %v7389_v38 = vmul.f32 %v21909_v39, %v21909_v39  ;;  %v21947_v22 = vrot.slane %v21929_v52, %v21615_v62  ;;  %v21951_v50 = vrot.slane %v21929_v52, %v21612_v31 }
0x19ba   : > { %v7415_v43 = vadd.f32 %v7414_v23, %v7386_v30  ;;  %v7418_v59 = vadd.f32 %v7388_v58, %v7387_v34 }
0x19bc   : > { %7416 = vadd.xlane.f32.xlu0 %v7415_v43  ;;  %v7419_v40 = vadd.f32 %v7418_v59, %v7389_v38 }
0x19be   : > { %7420 = vadd.xlane.f32.xlu1 %v7419_v40 }
0x1a1e   : > { %v7393_v25 = vpop.xlane.xlu0 %7392 }
0x1a1f   : > { %v7422_v19 = vmul.f32 0.0026041667, %v7393_v25 }
0x1a21   : > { %v7430_v51 = vadd.f32 1e-05, %v7422_v19  ;;  %v7397_v53 = vpop.xlane.xlu1 %7396 }
0x1a22   : > { %v7423_v41 = vmul.f32 0.0026041667, %v7397_v53  ;;  %v17468_v53 = vld [vmem:[%s19794_s18 + $0x664] ss:$48 sps:$4 sm:$0xff]  }
0x1a23   : > { %18436 = vrsqrt.f32 %v7430_v51 }
0x1a24   : > { %v7431_v56 = vadd.f32 1e-05, %v7423_v41  ;;  %v7401_v24 = vpop.xlane.xlu0 %7400  ;;  %v17471_v41 = vld [vmem:[%s19794_s18 + $0x66c] ss:$48 sps:$4 sm:$0xff]  }
0x1a25   : > { %v7424_v15 = vmul.f32 0.0026041667, %v7401_v24  ;;  %v17466_v24 = vld [vmem:[%s19794_s18 + $0x660] ss:$48 sps:$4 sm:$0xff]  }
0x1a26   : > { %18438 = vrsqrt.f32 %v7431_v56 }
0x1a27   : > { %v7432_v48 = vadd.f32 1e-05, %v7424_v15  ;;  %v17469_v15 = vld [vmem:[%s19794_s18 + $0x668] ss:$48 sps:$4 sm:$0xff]  }
0x1a28   : > { %v7405_v2 = vpop.xlane.xlu1 %7404 }
0x1a29   : > { %18440 = vrsqrt.f32 %v7432_v48  ;;  %v7425_v12 = vmul.f32 0.0026041667, %v7405_v2 }
0x1a2b   : > { %v7433_v16 = vadd.f32 1e-05, %v7425_v12 }
0x1a2d   : > { %v21925_v21 = vpop.eup %18436  ;;  %18442 = vrsqrt.f32 %v7433_v16  ;;  %v17474_v16 = vld [vmem:[%s19794_s18 + $0x6c4] ss:$48 sps:$4 sm:$0xff]  }
0x1a2e   : > { %v7447_v46 = vmul.f32 %v21925_v21, %v21779_v36  ;;  %v7446_v14 = vmul.f32 %v21925_v21, %v21776_v54 }
0x1a30   : > { %v21943_v9 = vpop.eup %18438  ;;  %v7487_v61 = vmul.f32 %v21933_v13, %v7447_v46  ;;  %v7486_v54 = vmul.f32 %v21937_v0, %v7446_v14  ;;  %v17477_v46 = vld [vmem:[%s19794_s18 + $0x6cc] ss:$48 sps:$4 sm:$0xff]  }
0x1a31   : > { %v7450_v6 = vmul.f32 %v21943_v9, %v21792_v60  ;;  %v7449_v36 = vmul.f32 %v21943_v9, %v21789_v11 }
0x1a32   : > { %v21968_v23 = vadd.f32 %v21947_v22, %v7487_v61  ;;  %v21974_v43 = vadd.f32 %v21951_v50, %v7486_v54  ;;  %v17472_v61 = vld [vmem:[%s19794_s18 + $0x6c0] ss:$48 sps:$4 sm:$0xff]   ;;  %v17480_v54 = vld [vmem:[%s19794_s18 + $0x724] ss:$48 sps:$4 sm:$0xff]  }
0x1a33   : > { %v21959_v63 = vpop.eup %18440  ;;  %v7490_v34 = vmul.f32 %v21933_v13, %v7450_v6  ;;  %v7489_v58 = vmul.f32 %v21937_v0, %v7449_v36  ;;  %v17475_v36 = vld [vmem:[%s19794_s18 + $0x6c8] ss:$48 sps:$4 sm:$0xff]  }
0x1a34   : > { %v7453_v30 = vmul.f32 %v21959_v63, %v21807_v28  ;;  %v7452_v60 = vmul.f32 %v21959_v63, %v21804_v7 }
0x1a35   : > { %v21971_v11 = vadd.f32 %v21947_v22, %v7490_v34  ;;  %v21977_v38 = vadd.f32 %v21951_v50, %v7489_v58  ;;  %v17483_v34 = vld [vmem:[%s19794_s18 + $0x72c] ss:$48 sps:$4 sm:$0xff]   ;;  %v17478_v58 = vld [vmem:[%s19794_s18 + $0x720] ss:$48 sps:$4 sm:$0xff]  }
0x1a36   : > { %v7493_v40 = vmul.f32 %v21933_v13, %v7453_v30  ;;  %v7492_v51 = vmul.f32 %v21937_v0, %v7452_v60  ;;  %v17481_v30 = vld [vmem:[%s19794_s18 + $0x728] ss:$48 sps:$4 sm:$0xff]   ;;  %v17486_v60 = vld [vmem:[%s19794_s18 + $0x784] ss:$48 sps:$4 sm:$0xff]  }
0x1a37   : > { %v21979_v59 = vpop.eup %18442  ;;  %v21983_v28 = vpack.c.bf16 %v21971_v11, %v21968_v23  ;;  %v21987_v7 = vpack.c.bf16 %v21977_v38, %v21974_v43 }
0x1a38   : > { %v7456_v25 = vmul.f32 %v21979_v59, %v21824_v3  ;;  %v7455_v19 = vmul.f32 %v21979_v59, %v21821_v27  ;;  %v22006_v27 = vadd.f32 %v21947_v22, %v7493_v40  ;;  %v22014_v2 = vadd.f32 %v21951_v50, %v7492_v51  ;;  %v17489_v40 = vld [vmem:[%s19794_s18 + $0x78c] ss:$48 sps:$4 sm:$0xff]   ;;  %v17487_v51 = vld [vmem:[%s19794_s18 + $0x788] ss:$48 sps:$4 sm:$0xff]  }
0x1a39   : > { %9386 = vmatprep.mubr.bf16.mxu1 %v21983_v28  ;;  %9532 = vmatprep.mubr.bf16.mxu0 %v21983_v28 }
0x1a3a   : > { %9387 = vmatmul.mubr.bf16.vlgmr.msra.gmra.mrb[124].mxu1 %v21987_v7  ;;  %9533 = vmatmul.mubr.bf16.vlgmr.msra.gmra.mrb[148].mxu0 %v21987_v7  ;;  %v7496_v56 = vmul.f32 %v21933_v13, %v7456_v25  ;;  %v7495_v3 = vmul.f32 %v21937_v0, %v7455_v19  ;;  %v17484_v19 = vld [vmem:[%s19794_s18 + $0x780] ss:$48 sps:$4 sm:$0xff]  }
0x1a3b   : > { %9428 = vmatpush1.bf16.msra.mxu1 %v17460_v44  ;;  %9574 = vmatpush1.bf16.msra.mxu0 %v17463_v37 }
0x1a3c   : > { %v22011_v48 = vadd.f32 %v21947_v22, %v7496_v56  ;;  %v22017_v12 = vadd.f32 %v21951_v50, %v7495_v3  ;;  %9429 = vmatprep.subr.bf16.mxu1 %v17468_v53  ;;  %9575 = vmatprep.subr.bf16.mxu0 %v17471_v41  ;;  %v17492_v53 = vld [vmem:[%s19794_s18 + $0x7e4] ss:$48 sps:$4 sm:$0xff]   ;;  %v17495_v3 = vld [vmem:[%s19794_s18 + $0x7ec] ss:$48 sps:$4 sm:$0xff]  }
0x1a3e   : > { %v22023_v14 = vpack.c.bf16 %v22011_v48, %v22006_v27  ;;  %v22027_v6 = vpack.c.bf16 %v22017_v12, %v22014_v2 }
0x1a3f   : > { %9430 = vmatpush1.bf16.msra.mxu1 %v17466_v24  ;;  %9576 = vmatpush1.bf16.msra.mxu0 %v17469_v15 }
0x1a40   : > { %9396 = vmatprep.mubr.bf16.mxu1 %v22023_v14  ;;  %9542 = vmatprep.mubr.bf16.mxu0 %v22023_v14 }
0x1a41   : > { %9431 = vmatprep.subr.bf16.mxu1 %v17474_v16  ;;  %9577 = vmatprep.subr.bf16.mxu0 %v17477_v46  ;;  %v17490_v46 = vld [vmem:[%s19794_s18 + $0x7e0] ss:$48 sps:$4 sm:$0xff]  }
0x1a42   : > { %9397 = vmatmul.mubr.bf16.gmra.mrb[128].mxu1 %v22027_v6  ;;  %9543 = vmatmul.mubr.bf16.gmra.mrb[152].mxu0 %v22027_v6 }
0x1a43   : > { %9432 = vmatpush1.bf16.msra.mxu1 %v17472_v61  ;;  %9578 = vmatpush1.bf16.msra.mxu0 %v17475_v36  ;;  %v17493_v61 = vld [vmem:[%s19794_s18 + $0x7e8] ss:$48 sps:$4 sm:$0xff]  }
0x1a44   : > { %9433 = vmatprep.subr.bf16.mxu1 %v17480_v54  ;;  %9579 = vmatprep.subr.bf16.mxu0 %v17483_v34  ;;  %v7409_v44 = vpop.xlane.xlu0 %7408  ;;  %v17498_v54 = vld [vmem:[%s19794_s18 + $0x844] ss:$48 sps:$4 sm:$0xff]   ;;  %v17501_v34 = vld [vmem:[%s19794_s18 + $0x84c] ss:$48 sps:$4 sm:$0xff]  }
0x1a45   : > { %v7426_v37 = vmul.f32 0.0026041667, %v7409_v44  ;;  %v17499_v44 = vld [vmem:[%s19794_s18 + $0x848] ss:$48 sps:$4 sm:$0xff]  }
0x1a46   : > { %v7413_v25 = vpop.xlane.xlu1 %7412 }
0x1a47   : > { %9434 = vmatpush1.bf16.msra.mxu1 %v17478_v58  ;;  %9580 = vmatpush1.bf16.msra.mxu0 %v17481_v30  ;;  %v7434_v41 = vadd.f32 1e-05, %v7426_v37  ;;  %v7427_v56 = vmul.f32 0.0026041667, %v7413_v25  ;;  %v17504_v37 = vld [vmem:[%s19794_s18 + $0x8a4] ss:$48 sps:$4 sm:$0xff]  }
0x1a48   : > { %9435 = vmatprep.subr.bf16.mxu1 %v17486_v60  ;;  %9581 = vmatprep.subr.bf16.mxu0 %v17489_v40  ;;  %v17496_v40 = vld [vmem:[%s19794_s18 + $0x840] ss:$48 sps:$4 sm:$0xff]   ;;  %v17507_v25 = vld [vmem:[%s19794_s18 + $0x8ac] ss:$48 sps:$4 sm:$0xff]  }
0x1a49   : > { %18444 = vrsqrt.f32 %v7434_v41  ;;  %v7435_v24 = vadd.f32 1e-05, %v7427_v56  ;;  %v7417_v15 = vpop.xlane.xlu0 %7416  ;;  %v17510_v41 = vld [vmem:[%s19794_s18 + $0x14] ss:$48 sps:$4 sm:$0xff]  }
0x1a4a   : > { %v7428_v16 = vmul.f32 0.0026041667, %v7417_v15 }
0x1a4b   : > { %9436 = vmatpush1.bf16.msra.mxu1 %v17484_v19  ;;  %9582 = vmatpush1.bf16.msra.mxu0 %v17487_v51  ;;  %18446 = vrsqrt.f32 %v7435_v24  ;;  %v7421_v36 = vpop.xlane.xlu1 %7420  ;;  %v17502_v19 = vld [vmem:[%s19794_s18 + $0x8a0] ss:$48 sps:$4 sm:$0xff]   ;;  %v17513_v24 = vld [vmem:[%s19794_s18 + $0x1c] ss:$48 sps:$4 sm:$0xff]  }
0x1a4c   : > { %9437 = vmatprep.subr.bf16.mxu1 %v17492_v53  ;;  %9583 = vmatprep.subr.bf16.mxu0 %v17495_v3  ;;  %v7436_v58 = vadd.f32 1e-05, %v7428_v16  ;;  %v7429_v30 = vmul.f32 0.0026041667, %v7421_v36  ;;  %v17505_v53 = vld [vmem:[%s19794_s18 + $0x8a8] ss:$48 sps:$4 sm:$0xff]  }
0x1a4e   : > { %18448 = vrsqrt.f32 %v7436_v58  ;;  %v7437_v60 = vadd.f32 1e-05, %v7429_v30 }
0x1a4f   : > { %9438 = vmatpush1.bf16.msra.mxu1 %v17490_v46  ;;  %9584 = vmatpush1.bf16.msra.mxu0 %v17493_v61 }
0x1a50   : > { %9439 = vmatprep.subr.bf16.mxu1 %v17498_v54  ;;  %9585 = vmatprep.subr.bf16.mxu0 %v17501_v34  ;;  %18450 = vrsqrt.f32 %v7437_v60 }
0x1a53   : > { %9440 = vmatpush1.bf16.msra.mxu1 %v17496_v40  ;;  %9586 = vmatpush1.bf16.msra.mxu0 %v17499_v44  ;;  %v22054_v51 = vpop.eup %18444 }
0x1a54   : > { %9441 = vmatprep.subr.bf16.mxu1 %v17504_v37  ;;  %9587 = vmatprep.subr.bf16.mxu0 %v17507_v25  ;;  %v7459_v56 = vmul.f32 %v22054_v51, %v21857_v5  ;;  %v7458_v3 = vmul.f32 %v22054_v51, %v21854_v42 }
0x1a55   : > { %v22063_v15 = vpop.eup %18446 }
0x1a56   : > { %v7462_v16 = vmul.f32 %v22063_v15, %v21874_v29  ;;  %v7499_v46 = vmul.f32 %v21933_v13, %v7459_v56  ;;  %v7461_v61 = vmul.f32 %v22063_v15, %v21871_v57  ;;  %v7498_v36 = vmul.f32 %v21937_v0, %v7458_v3 }
0x1a57   : > { %9442 = vmatpush1.bf16.msra.mxu1 %v17502_v19  ;;  %9588 = vmatpush1.bf16.msra.mxu0 %v17505_v53  ;;  %v7451_v3 = vmul.f32 %v21943_v9, %v21795_v35 }
0x1a58   : > { %9646 = vmatprep.subr.bf16.mxu1 %v17510_v41  ;;  %v22071_v5 = vpop.eup %18448  ;;  %v7502_v42 = vmul.f32 %v21933_v13, %v7462_v16  ;;  %v7501_v54 = vmul.f32 %v21937_v0, %v7461_v61  ;;  %9792 = vmatprep.subr.bf16.mxu0 %v17513_v24  ;;  %v22080_v58 = vadd.f32 %v21947_v22, %v7499_v46  ;;  %v17511_v61 = vld [vmem:[%s19794_s18 + $0x18] ss:$48 sps:$4 sm:$0xff]  }
0x1a59   : > { %v7465_v29 = vmul.f32 %v22071_v5, %v21891_v18  ;;  %v22086_v30 = vadd.f32 %v21951_v50, %v7498_v36  ;;  %v7464_v18 = vmul.f32 %v22071_v5, %v21888_v17  ;;  %v22137_v24 = vrot.slane %v21923_v8, %v21620_v4 }
0x1a5a   : > { %v22077_v34 = vpop.eup %18450  ;;  %v22083_v57 = vadd.f32 %v21947_v22, %v7502_v42  ;;  %v22089_v60 = vadd.f32 %v21951_v50, %v7501_v54  ;;  %v7454_v46 = vmul.f32 %v21959_v63, %v21810_v33  ;;  %v17516_v42 = vld [vmem:[%s19794_s18 + $0x74] ss:$48 sps:$4 sm:$0xff]   ;;  %v17519_v54 = vld [vmem:[%s19794_s18 + $0x7c] ss:$48 sps:$4 sm:$0xff]   ;;  %v17514_v33 = vld [vmem:[%s19794_s18 + $0x70] ss:$48 sps:$4 sm:$0xff]  }
0x1a5b   : > { %v7468_v40 = vmul.f32 %v22077_v34, %v21906_v10  ;;  %v7505_v44 = vmul.f32 %v21933_v13, %v7465_v29  ;;  %v7467_v37 = vmul.f32 %v22077_v34, %v21903_v1  ;;  %v7504_v41 = vmul.f32 %v21937_v0, %v7464_v18  ;;  %v17517_v63 = vld [vmem:[%s19794_s18 + $0x78] ss:$48 sps:$4 sm:$0xff]  }
0x1a5c   : > { %24085 = vst [vmem:[#allocation50_spill] sm:$0xff] %v22083_v57  ;;  %v22100_v25 = vpack.c.bf16 %v22083_v57, %v22080_v58  ;;  %v22104_v19 = vpack.c.bf16 %v22089_v60, %v22086_v30  ;;  %v7491_v9 = vmul.f32 %v22137_v24, %v7451_v3  ;;  %v7463_v18 = vmul.f32 %v22063_v15, %v21877_v32  ;;  %v17528_v15 = vld [vmem:[%s19794_s18 + $0x134] ss:$48 sps:$4 sm:$0xff]   ;;  %v17531_v3 = vld [vmem:[%s19794_s18 + $0x13c] ss:$48 sps:$4 sm:$0xff]  }
0x1a5d   : > { %v7508_v53 = vmul.f32 %v21933_v13, %v7468_v40  ;;  %v7507_v10 = vmul.f32 %v21937_v0, %v7467_v37  ;;  %v22113_v17 = vadd.f32 %v21947_v22, %v7505_v44  ;;  %v7448_v0 = vmul.f32 %v21925_v21, %v21782_v49  ;;  %v17525_v40 = vld [vmem:[%s19794_s18 + $0xdc] ss:$48 sps:$4 sm:$0xff]  }
0x1a5e   : > { %9406 = vmatprep.mubr.bf16.mxu1 %v22100_v25  ;;  %9552 = vmatprep.mubr.bf16.mxu0 %v22100_v25  ;;  %v22149_v49 = vrot.slane %v21929_v52, %v21620_v4  ;;  %v7457_v21 = vmul.f32 %v21979_v59, %v21827_v47  ;;  %v17508_v52 = vld [vmem:[%s19794_s18 + $0x10] ss:$48 sps:$4 sm:$0xff]   ;;  %v7494_v47 = vmul.f32 %v22137_v24, %v7454_v46  ;;  %v17522_v59 = vld [vmem:[%s19794_s18 + $0xd4] ss:$48 sps:$4 sm:$0xff]  }
0x1a5f   : > { %9407 = vmatmul.mubr.bf16.gmra.mrb[132].mxu1 %v22104_v19  ;;  %9553 = vmatmul.mubr.bf16.gmra.mrb[156].mxu0 %v22104_v19  ;;  %24086 = vst [vmem:[#allocation48_spill] sm:$0xff] %v22113_v17  ;;  %v22116_v1 = vadd.f32 %v21947_v22, %v7508_v53  ;;  %v22124_v56 = vadd.f32 %v21951_v50, %v7507_v10  ;;  %v17520_v10 = vld [vmem:[%s19794_s18 + $0xd0] ss:$48 sps:$4 sm:$0xff]  }
0x1a60   : > { %v22131_v22 = vadd.f32 %v21951_v50, %v7504_v41  ;;  %v7488_v50 = vmul.f32 %v22137_v24, %v7448_v0  ;;  %v22154_v8 = vadd.f32 %v22149_v49, %v7491_v9  ;;  %v7497_v29 = vmul.f32 %v22137_v24, %v7457_v21  ;;  %v17523_v41 = vld [vmem:[%s19794_s18 + $0xd8] ss:$48 sps:$4 sm:$0xff]   ;;  %v17537_v21 = vld [vmem:[%s19794_s18 + $0x19c] ss:$48 sps:$4 sm:$0xff]  }
0x1a61   : > { %24087 = vst [vmem:[#allocation53_spill] sm:$0xff] %v22116_v1  ;;  %v22121_v13 = vpack.c.bf16 %v22116_v1, %v22113_v17  ;;  %24088 = vst [vmem:[#allocation52_spill] sm:$0xff] %v22124_v56  ;;  %v22187_v37 = vadd.f32 %v22149_v49, %v7494_v47  ;;  %v7460_v53 = vmul.f32 %v22054_v51, %v21862_v20  ;;  %v17526_v51 = vld [vmem:[%s19794_s18 + $0x130] ss:$48 sps:$4 sm:$0xff]   ;;  %v17529_v9 = vld [vmem:[%s19794_s18 + $0x138] ss:$48 sps:$4 sm:$0xff]  }
0x1a62   : > { %24089 = vst [vmem:[#allocation57_spill] sm:$0xff] %v22131_v22  ;;  %v22141_v35 = vpack.c.bf16 %v22124_v56, %v22131_v22  ;;  %v22159_v16 = vadd.f32 %v22149_v49, %v7488_v50  ;;  %v22180_v44 = vadd.f32 %v22149_v49, %v7497_v29  ;;  %v7503_v0 = vmul.f32 %v22137_v24, %v7463_v18  ;;  %v17534_v50 = vld [vmem:[%s19794_s18 + $0x194] ss:$48 sps:$4 sm:$0xff]   ;;  %v17535_v29 = vld [vmem:[%s19794_s18 + $0x198] ss:$48 sps:$4 sm:$0xff]  }
0x1a63   : > { %9416 = vmatprep.mubr.bf16.mxu1 %v22121_v13  ;;  %9562 = vmatprep.mubr.bf16.mxu0 %v22121_v13  ;;  %v7500_v20 = vmul.f32 %v22137_v24, %v7460_v53  ;;  %v17543_v47 = vld [vmem:[%s19794_s18 + $0x1fc] ss:$48 sps:$4 sm:$0xff]   ;;  %v17544_v53 = vld [vmem:[%s19794_s18 + $0x250] ss:$48 sps:$4 sm:$0xff]  }
0x1a64   : > { %v22167_v36 = vpack.c.bf16 %v22154_v8, %v22159_v16  ;;  %v22195_v32 = vpack.c.bf16 %v22180_v44, %v22187_v37  ;;  %v22208_v46 = vadd.f32 %v22149_v49, %v7503_v0  ;;  %v17553_v0 = vld [vmem:[%s19794_s18 + $0x2b8] ss:$48 sps:$4 sm:$0xff]  }
0x1a66   : > { %24090 = vst [vmem:[#allocation56_spill] sm:$0xff] %v22208_v46 }
0x1a67   : > { %9417 = vmatmul.mubr.bf16.gmra.mrb[136].mxu1 %v22141_v35  ;;  %9563 = vmatmul.mubr.bf16.gmra.mrb[160].mxu0 %v22141_v35 }
0x1a68   : > { %9459 = vmatprep.mubr.bf16.mxu1 %v24084_v45  ;;  %9605 = vmatprep.mubr.bf16.mxu0 %v24084_v45 }
0x1a6f   : > { %9460 = vmatmul.mubr.bf16.vlgmr.msra.gmra.mrb[124].mxu1 %v22167_v36  ;;  %9606 = vmatmul.mubr.bf16.vlgmr.msra.gmra.mrb[148].mxu0 %v22167_v36 }
0x1a70   : > { %9647 = vmatpush1.bf16.msra.mxu1 %v17508_v52  ;;  %9793 = vmatpush1.bf16.msra.mxu0 %v17511_v61  ;;  %v7469_v52 = vmul.f32 %v22077_v34, %v21909_v39  ;;  %v22215_v61 = vadd.f32 %v22149_v49, %v7500_v20  ;;  %v17540_v34 = vld [vmem:[%s19794_s18 + $0x1f4] ss:$48 sps:$4 sm:$0xff]  }
0x1a71   : > { %9648 = vmatprep.subr.bf16.mxu1 %v17516_v42  ;;  %9794 = vmatprep.subr.bf16.mxu0 %v17519_v54  ;;  %v7466_v42 = vmul.f32 %v22071_v5, %v21894_v55  ;;  %v17532_v54 = vld [vmem:[%s19794_s18 + $0x190] ss:$48 sps:$4 sm:$0xff]   ;;  %v17558_v20 = vld [vmem:[%s19794_s18 + $0x314] ss:$48 sps:$4 sm:$0xff]  }
0x1a72   : > { %9469 = vmatprep.mubr.bf16.mxu1 %v24084_v45  ;;  %9615 = vmatprep.mubr.bf16.mxu0 %v24084_v45  ;;  %v22223_v39 = vpack.c.bf16 %v22208_v46, %v22215_v61  ;;  %v17538_v5 = vld [vmem:[%s19794_s18 + $0x1f0] ss:$48 sps:$4 sm:$0xff]  }
0x1a73   : > { %v7506_v55 = vmul.f32 %v22137_v24, %v7466_v42  ;;  %v17562_v42 = vld [vmem:[%s19794_s18 + $0x370] ss:$48 sps:$4 sm:$0xff]  }
0x1a74   : > { %9649 = vmatpush1.bf16.msra.mxu1 %v17514_v33  ;;  %9795 = vmatpush1.bf16.msra.mxu0 %v17517_v63  ;;  %v7509_v33 = vmul.f32 %v22137_v24, %v7469_v52  ;;  %v17541_v63 = vld [vmem:[%s19794_s18 + $0x1f8] ss:$48 sps:$4 sm:$0xff]   ;;  %v17567_v52 = vld [vmem:[%s19794_s18 + $0x37c] ss:$48 sps:$4 sm:$0xff]  }
0x1a75   : > { %9650 = vmatprep.subr.bf16.mxu1 %v17522_v59  ;;  %9796 = vmatprep.subr.bf16.mxu0 %v17525_v40  ;;  %v17546_v59 = vld [vmem:[%s19794_s18 + $0x254] ss:$48 sps:$4 sm:$0xff]   ;;  %v17549_v40 = vld [vmem:[%s19794_s18 + $0x25c] ss:$48 sps:$4 sm:$0xff]   ;;  %v22241_v24 = vadd.f32 %v22149_v49, %v7506_v55 }
0x1a76   : > { %v22236_v18 = vadd.f32 %v22149_v49, %v7509_v33  ;;  %v17550_v49 = vld [vmem:[%s19794_s18 + $0x2b0] ss:$48 sps:$4 sm:$0xff]   ;;  %v17571_v33 = vld [vmem:[%s19794_s18 + $0x3d8] ss:$48 sps:$4 sm:$0xff]   ;;  %v17576_v55 = vld [vmem:[%s19794_s18 + $0x434] ss:$48 sps:$4 sm:$0xff]  }
0x1a77   : > { %9470 = vmatmul.mubr.bf16.gmra.mrb[128].mxu1 %v22195_v32  ;;  %9616 = vmatmul.mubr.bf16.gmra.mrb[152].mxu0 %v22195_v32  ;;  %24092 = vst [vmem:[#allocation49_spill] sm:$0xff] %v22241_v24 }
0x1a78   : > { %9651 = vmatpush1.bf16.msra.mxu1 %v17520_v10  ;;  %9797 = vmatpush1.bf16.msra.mxu0 %v17523_v41  ;;  %24091 = vst [vmem:[#allocation51_spill] sm:$0xff] %v22236_v18  ;;  %v17547_v10 = vld [vmem:[%s19794_s18 + $0x258] ss:$48 sps:$4 sm:$0xff]   ;;  %v22247_v41 = vpack.c.bf16 %v22236_v18, %v22241_v24 }
0x1a79   : > { %9652 = vmatprep.subr.bf16.mxu1 %v17528_v15  ;;  %9798 = vmatprep.subr.bf16.mxu0 %v17531_v3  ;;  %v17552_v15 = vld [vmem:[%s19794_s18 + $0x2b4] ss:$48 sps:$4 sm:$0xff]   ;;  %v17555_v3 = vld [vmem:[%s19794_s18 + $0x2bc] ss:$48 sps:$4 sm:$0xff]  }
0x1a7a   : > { %9479 = vmatprep.mubr.bf16.mxu1 %v24084_v45  ;;  %9625 = vmatprep.mubr.bf16.mxu0 %v24084_v45 }
0x1a7c   : > { %9653 = vmatpush1.bf16.msra.mxu1 %v17526_v51  ;;  %9799 = vmatpush1.bf16.msra.mxu0 %v17529_v9  ;;  %v17561_v51 = vld [vmem:[%s19794_s18 + $0x31c] ss:$48 sps:$4 sm:$0xff]   ;;  %v17556_v9 = vld [vmem:[%s19794_s18 + $0x310] ss:$48 sps:$4 sm:$0xff]  }
0x1a7d   : > { %9654 = vmatprep.subr.bf16.mxu1 %v17534_v50  ;;  %9800 = vmatprep.subr.bf16.mxu0 %v17537_v21  ;;  %v17559_v50 = vld [vmem:[%s19794_s18 + $0x318] ss:$48 sps:$4 sm:$0xff]   ;;  %v17564_v21 = vld [vmem:[%s19794_s18 + $0x374] ss:$48 sps:$4 sm:$0xff]  }
0x1a7f   : > { %9480 = vmatmul.mubr.bf16.gmra.mrb[132].mxu1 %v22223_v39  ;;  %9626 = vmatmul.mubr.bf16.gmra.mrb[156].mxu0 %v22223_v39 }
0x1a80   : > { %9655 = vmatpush1.bf16.msra.mxu1 %v17532_v54  ;;  %9801 = vmatpush1.bf16.msra.mxu0 %v17535_v29  ;;  %v17565_v54 = vld [vmem:[%s19794_s18 + $0x378] ss:$48 sps:$4 sm:$0xff]   ;;  %v17570_v29 = vld [vmem:[%s19794_s18 + $0x3d4] ss:$48 sps:$4 sm:$0xff]  }
0x1a81   : > { %9656 = vmatprep.subr.bf16.mxu1 %v17540_v34  ;;  %9802 = vmatprep.subr.bf16.mxu0 %v17543_v47  ;;  %v17573_v34 = vld [vmem:[%s19794_s18 + $0x3dc] ss:$48 sps:$4 sm:$0xff]   ;;  %v17568_v47 = vld [vmem:[%s19794_s18 + $0x3d0] ss:$48 sps:$4 sm:$0xff]  }
0x1a82   : > { %9489 = vmatprep.mubr.bf16.mxu1 %v24084_v45  ;;  %9635 = vmatprep.mubr.bf16.mxu0 %v24084_v45 }
0x1a84   : > { %9657 = vmatpush1.bf16.msra.mxu1 %v17538_v5  ;;  %9803 = vmatpush1.bf16.msra.mxu0 %v17541_v63  ;;  %v17579_v5 = vld [vmem:[%s19794_s18 + $0x43c] ss:$48 sps:$4 sm:$0xff]   ;;  %v17574_v63 = vld [vmem:[%s19794_s18 + $0x430] ss:$48 sps:$4 sm:$0xff]  }
0x1a85   : > { %9658 = vmatprep.subr.bf16.mxu1 %v17546_v59  ;;  %9804 = vmatprep.subr.bf16.mxu0 %v17549_v40  ;;  %v17577_v59 = vld [vmem:[%s19794_s18 + $0x438] ss:$48 sps:$4 sm:$0xff]   ;;  %v17582_v40 = vld [vmem:[%s19794_s18 + $0x494] ss:$48 sps:$4 sm:$0xff]  }
0x1a87   : > { %9490 = vmatmul.mubr.bf16.gmra.mrb[136].mxu1 %v22247_v41  ;;  %9636 = vmatmul.mubr.bf16.gmra.mrb[160].mxu0 %v22247_v41 }
0x1a88   : > { %9659 = vmatpush1.bf16.msra.mxu1 %v17544_v53  ;;  %9805 = vmatpush1.bf16.msra.mxu0 %v17547_v10  ;;  %v17585_v53 = vld [vmem:[%s19794_s18 + $0x49c] ss:$48 sps:$4 sm:$0xff]   ;;  %v17580_v10 = vld [vmem:[%s19794_s18 + $0x490] ss:$48 sps:$4 sm:$0xff]  }
0x1a89   : > { %9678 = vmatprep.mubr.bf16.mxu1 %v21983_v28  ;;  %9824 = vmatprep.mubr.bf16.mxu0 %v21983_v28 }
0x1a8a   : > { %9660 = vmatprep.subr.bf16.mxu1 %v17552_v15  ;;  %9806 = vmatprep.subr.bf16.mxu0 %v17555_v3  ;;  %v17583_v15 = vld [vmem:[%s19794_s18 + $0x498] ss:$48 sps:$4 sm:$0xff]   ;;  %v17588_v3 = vld [vmem:[%s19794_s18 + $0x4f4] ss:$48 sps:$4 sm:$0xff]  }
0x1a8c   : > { %9661 = vmatpush1.bf16.msra.mxu1 %v17550_v49  ;;  %9807 = vmatpush1.bf16.msra.mxu0 %v17553_v0  ;;  %v17591_v49 = vld [vmem:[%s19794_s18 + $0x4fc] ss:$48 sps:$4 sm:$0xff]   ;;  %v17586_v0 = vld [vmem:[%s19794_s18 + $0x4f0] ss:$48 sps:$4 sm:$0xff]  }
0x1a8d   : > { %9662 = vmatprep.subr.bf16.mxu1 %v17558_v20  ;;  %9808 = vmatprep.subr.bf16.mxu0 %v17561_v51  ;;  %v17589_v20 = vld [vmem:[%s19794_s18 + $0x4f8] ss:$48 sps:$4 sm:$0xff]   ;;  %v17594_v51 = vld [vmem:[%s19794_s18 + $0x554] ss:$48 sps:$4 sm:$0xff]  }
0x1a90   : > { %9663 = vmatpush1.bf16.msra.mxu1 %v17556_v9  ;;  %9809 = vmatpush1.bf16.msra.mxu0 %v17559_v50  ;;  %v17597_v9 = vld [vmem:[%s19794_s18 + $0x55c] ss:$48 sps:$4 sm:$0xff]   ;;  %v17592_v50 = vld [vmem:[%s19794_s18 + $0x550] ss:$48 sps:$4 sm:$0xff]  }
0x1a91   : > { %9664 = vmatprep.subr.bf16.mxu1 %v17564_v21  ;;  %9810 = vmatprep.subr.bf16.mxu0 %v17567_v52  ;;  %v17595_v21 = vld [vmem:[%s19794_s18 + $0x558] ss:$48 sps:$4 sm:$0xff]   ;;  %v17600_v52 = vld [vmem:[%s19794_s18 + $0x5b4] ss:$48 sps:$4 sm:$0xff]  }
0x1a94   : > { %9665 = vmatpush1.bf16.msra.mxu1 %v17562_v42  ;;  %9811 = vmatpush1.bf16.msra.mxu0 %v17565_v54  ;;  %v17603_v42 = vld [vmem:[%s19794_s18 + $0x5bc] ss:$48 sps:$4 sm:$0xff]   ;;  %v17598_v54 = vld [vmem:[%s19794_s18 + $0x5b0] ss:$48 sps:$4 sm:$0xff]  }
0x1a95   : > { %9666 = vmatprep.subr.bf16.mxu1 %v17570_v29  ;;  %9812 = vmatprep.subr.bf16.mxu0 %v17573_v34  ;;  %v17601_v29 = vld [vmem:[%s19794_s18 + $0x5b8] ss:$48 sps:$4 sm:$0xff]   ;;  %v17606_v34 = vld [vmem:[%s19794_s18 + $0x614] ss:$48 sps:$4 sm:$0xff]  }
0x1a98   : > { %9667 = vmatpush1.bf16.msra.mxu1 %v17568_v47  ;;  %9813 = vmatpush1.bf16.msra.mxu0 %v17571_v33  ;;  %v17609_v47 = vld [vmem:[%s19794_s18 + $0x61c] ss:$48 sps:$4 sm:$0xff]   ;;  %v17604_v33 = vld [vmem:[%s19794_s18 + $0x610] ss:$48 sps:$4 sm:$0xff]  }
0x1a99   : > { %9668 = vmatprep.subr.bf16.mxu1 %v17576_v55  ;;  %9814 = vmatprep.subr.bf16.mxu0 %v17579_v5  ;;  %v17607_v55 = vld [vmem:[%s19794_s18 + $0x618] ss:$48 sps:$4 sm:$0xff]   ;;  %v17612_v5 = vld [vmem:[%s19794_s18 + $0x674] ss:$48 sps:$4 sm:$0xff]  }
0x1a9c   : > { %9669 = vmatpush1.bf16.msra.mxu1 %v17574_v63  ;;  %9815 = vmatpush1.bf16.msra.mxu0 %v17577_v59  ;;  %v17615_v63 = vld [vmem:[%s19794_s18 + $0x67c] ss:$48 sps:$4 sm:$0xff]   ;;  %v17610_v59 = vld [vmem:[%s19794_s18 + $0x670] ss:$48 sps:$4 sm:$0xff]  }
0x1a9d   : > { %9670 = vmatprep.subr.bf16.mxu1 %v17582_v40  ;;  %9816 = vmatprep.subr.bf16.mxu0 %v17585_v53  ;;  %v17613_v40 = vld [vmem:[%s19794_s18 + $0x678] ss:$48 sps:$4 sm:$0xff]   ;;  %v17618_v53 = vld [vmem:[%s19794_s18 + $0x6d4] ss:$48 sps:$4 sm:$0xff]  }
0x1aa0   : > { %9671 = vmatpush1.bf16.msra.mxu1 %v17580_v10  ;;  %9817 = vmatpush1.bf16.msra.mxu0 %v17583_v15  ;;  %v17621_v10 = vld [vmem:[%s19794_s18 + $0x6dc] ss:$48 sps:$4 sm:$0xff]   ;;  %v17616_v15 = vld [vmem:[%s19794_s18 + $0x6d0] ss:$48 sps:$4 sm:$0xff]  }
0x1aa1   : > { %9672 = vmatprep.subr.bf16.mxu1 %v17588_v3  ;;  %9818 = vmatprep.subr.bf16.mxu0 %v17591_v49  ;;  %v17619_v3 = vld [vmem:[%s19794_s18 + $0x6d8] ss:$48 sps:$4 sm:$0xff]   ;;  %v17624_v49 = vld [vmem:[%s19794_s18 + $0x734] ss:$48 sps:$4 sm:$0xff]  }
0x1aa4   : > { %9673 = vmatpush1.bf16.msra.mxu1 %v17586_v0  ;;  %9819 = vmatpush1.bf16.msra.mxu0 %v17589_v20  ;;  %v17627_v0 = vld [vmem:[%s19794_s18 + $0x73c] ss:$48 sps:$4 sm:$0xff]   ;;  %v17622_v20 = vld [vmem:[%s19794_s18 + $0x730] ss:$48 sps:$4 sm:$0xff]  }
0x1aa5   : > { %9674 = vmatprep.subr.bf16.mxu1 %v17594_v51  ;;  %9820 = vmatprep.subr.bf16.mxu0 %v17597_v9  ;;  %v17625_v51 = vld [vmem:[%s19794_s18 + $0x738] ss:$48 sps:$4 sm:$0xff]   ;;  %v17630_v9 = vld [vmem:[%s19794_s18 + $0x794] ss:$48 sps:$4 sm:$0xff]  }
0x1aa8   : > { %9675 = vmatpush1.bf16.msra.mxu1 %v17592_v50  ;;  %9821 = vmatpush1.bf16.msra.mxu0 %v17595_v21  ;;  %v17633_v50 = vld [vmem:[%s19794_s18 + $0x79c] ss:$48 sps:$4 sm:$0xff]   ;;  %v17628_v21 = vld [vmem:[%s19794_s18 + $0x790] ss:$48 sps:$4 sm:$0xff]  }
0x1aa9   : > { %9676 = vmatprep.subr.bf16.mxu1 %v17600_v52  ;;  %9822 = vmatprep.subr.bf16.mxu0 %v17603_v42  ;;  %v17631_v52 = vld [vmem:[%s19794_s18 + $0x798] ss:$48 sps:$4 sm:$0xff]   ;;  %v17636_v42 = vld [vmem:[%s19794_s18 + $0x7f4] ss:$48 sps:$4 sm:$0xff]  }
0x1aac   : > { %9677 = vmatpush1.bf16.msra.mxu1 %v17598_v54  ;;  %9823 = vmatpush1.bf16.msra.mxu0 %v17601_v29  ;;  %v17639_v54 = vld [vmem:[%s19794_s18 + $0x7fc] ss:$48 sps:$4 sm:$0xff]   ;;  %v17634_v29 = vld [vmem:[%s19794_s18 + $0x7f0] ss:$48 sps:$4 sm:$0xff]  }
0x1aad   : > { %9719 = vmatprep.subr.bf16.mxu1 %v17606_v34  ;;  %9865 = vmatprep.subr.bf16.mxu0 %v17609_v47  ;;  %v17637_v34 = vld [vmem:[%s19794_s18 + $0x7f8] ss:$48 sps:$4 sm:$0xff]   ;;  %v17642_v47 = vld [vmem:[%s19794_s18 + $0x854] ss:$48 sps:$4 sm:$0xff]  }
0x1aaf   : > { %9679 = vmatmul.mubr.bf16.vlgmr.msra.gmra.mrb[140].mxu1 %v21987_v7  ;;  %9825 = vmatmul.mubr.bf16.vlgmr.msra.gmra.mrb[164].mxu0 %v21987_v7 }
0x1ab0   : > { %9688 = vmatprep.mubr.bf16.mxu1 %v22023_v14  ;;  %9720 = vmatpush1.bf16.msra.mxu1 %v17604_v33  ;;  %v17645_v33 = vld [vmem:[%s19794_s18 + $0x85c] ss:$48 sps:$4 sm:$0xff]  }
0x1ab1   : > { %9834 = vmatprep.mubr.bf16.mxu0 %v22023_v14  ;;  %9866 = vmatpush1.bf16.msra.mxu0 %v17607_v55  ;;  %v17640_v55 = vld [vmem:[%s19794_s18 + $0x850] ss:$48 sps:$4 sm:$0xff]  }
0x1ab2   : > { %9721 = vmatprep.subr.bf16.mxu1 %v17612_v5  ;;  %9867 = vmatprep.subr.bf16.mxu0 %v17615_v63  ;;  %v17643_v5 = vld [vmem:[%s19794_s18 + $0x858] ss:$48 sps:$4 sm:$0xff]   ;;  %v17648_v63 = vld [vmem:[%s19794_s18 + $0x8b4] ss:$48 sps:$4 sm:$0xff]  }
0x1ab4   : > { %9722 = vmatpush1.bf16.msra.mxu1 %v17610_v59  ;;  %v17651_v59 = vld [vmem:[%s19794_s18 + $0x8bc] ss:$48 sps:$4 sm:$0xff]  }
0x1ab5   : > { %9868 = vmatpush1.bf16.msra.mxu0 %v17613_v40  ;;  %9723 = vmatprep.subr.bf16.mxu1 %v17618_v53  ;;  %v17646_v40 = vld [vmem:[%s19794_s18 + $0x8b0] ss:$48 sps:$4 sm:$0xff]   ;;  %v17649_v53 = vld [vmem:[%s19794_s18 + $0x8b8] ss:$48 sps:$4 sm:$0xff]  }
0x1ab6   : > { %9869 = vmatprep.subr.bf16.mxu0 %v17621_v10  ;;  %v17654_v10 = vld [vmem:[%s19794_s18 + $0x24] ss:$48 sps:$4 sm:$0xff]  }
0x1ab7   : > { %9689 = vmatmul.mubr.bf16.gmra.mrb[144].mxu1 %v22027_v6  ;;  %9835 = vmatmul.mubr.bf16.gmra.mrb[168].mxu0 %v22027_v6 }
0x1ab8   : > { %9698 = vmatprep.mubr.bf16.mxu1 %v22100_v25  ;;  %9724 = vmatpush1.bf16.msra.mxu1 %v17616_v15  ;;  %v17657_v15 = vld [vmem:[%s19794_s18 + $0x2c] ss:$48 sps:$4 sm:$0xff]  }
0x1ab9   : > { %9844 = vmatprep.mubr.bf16.mxu0 %v22100_v25  ;;  %9870 = vmatpush1.bf16.msra.mxu0 %v17619_v3  ;;  %v17652_v3 = vld [vmem:[%s19794_s18 + $0x20] ss:$48 sps:$4 sm:$0xff]  }
0x1aba   : > { %9725 = vmatprep.subr.bf16.mxu1 %v17624_v49  ;;  %9871 = vmatprep.subr.bf16.mxu0 %v17627_v0  ;;  %v17655_v49 = vld [vmem:[%s19794_s18 + $0x28] ss:$48 sps:$4 sm:$0xff]   ;;  %v17660_v0 = vld [vmem:[%s19794_s18 + $0x84] ss:$48 sps:$4 sm:$0xff]  }
0x1abc   : > { %9726 = vmatpush1.bf16.msra.mxu1 %v17622_v20  ;;  %v17663_v20 = vld [vmem:[%s19794_s18 + $0x8c] ss:$48 sps:$4 sm:$0xff]  }
0x1abd   : > { %9872 = vmatpush1.bf16.msra.mxu0 %v17625_v51  ;;  %9727 = vmatprep.subr.bf16.mxu1 %v17630_v9  ;;  %v17658_v51 = vld [vmem:[%s19794_s18 + $0x80] ss:$48 sps:$4 sm:$0xff]   ;;  %v17661_v9 = vld [vmem:[%s19794_s18 + $0x88] ss:$48 sps:$4 sm:$0xff]  }
0x1abe   : > { %9873 = vmatprep.subr.bf16.mxu0 %v17633_v50  ;;  %v17666_v50 = vld [vmem:[%s19794_s18 + $0xe4] ss:$48 sps:$4 sm:$0xff]  }
0x1abf   : > { %9699 = vmatmul.mubr.bf16.gmra.mrb[148].mxu1 %v22104_v19  ;;  %9845 = vmatmul.mubr.bf16.gmra.mrb[172].mxu0 %v22104_v19 }
0x1ac0   : > { %9708 = vmatprep.mubr.bf16.mxu1 %v22121_v13  ;;  %9728 = vmatpush1.bf16.msra.mxu1 %v17628_v21  ;;  %v17669_v21 = vld [vmem:[%s19794_s18 + $0xec] ss:$48 sps:$4 sm:$0xff]  }
0x1ac1   : > { %9854 = vmatprep.mubr.bf16.mxu0 %v22121_v13  ;;  %9874 = vmatpush1.bf16.msra.mxu0 %v17631_v52  ;;  %v17664_v52 = vld [vmem:[%s19794_s18 + $0xe0] ss:$48 sps:$4 sm:$0xff]  }
0x1ac2   : > { %9729 = vmatprep.subr.bf16.mxu1 %v17636_v42  ;;  %9875 = vmatprep.subr.bf16.mxu0 %v17639_v54  ;;  %v17667_v42 = vld [vmem:[%s19794_s18 + $0xe8] ss:$48 sps:$4 sm:$0xff]   ;;  %v17672_v54 = vld [vmem:[%s19794_s18 + $0x144] ss:$48 sps:$4 sm:$0xff]  }
0x1ac4   : > { %9730 = vmatpush1.bf16.msra.mxu1 %v17634_v29  ;;  %v17675_v29 = vld [vmem:[%s19794_s18 + $0x14c] ss:$48 sps:$4 sm:$0xff]  }
0x1ac5   : > { %9876 = vmatpush1.bf16.msra.mxu0 %v17637_v34  ;;  %9731 = vmatprep.subr.bf16.mxu1 %v17642_v47  ;;  %v17670_v34 = vld [vmem:[%s19794_s18 + $0x140] ss:$48 sps:$4 sm:$0xff]   ;;  %v17673_v47 = vld [vmem:[%s19794_s18 + $0x148] ss:$48 sps:$4 sm:$0xff]  }
0x1ac6   : > { %9877 = vmatprep.subr.bf16.mxu0 %v17645_v33  ;;  %v17678_v33 = vld [vmem:[%s19794_s18 + $0x1a4] ss:$48 sps:$4 sm:$0xff]  }
0x1ac7   : > { %9709 = vmatmul.mubr.bf16.gmra.mrb[152].mxu1 %v22141_v35  ;;  %9855 = vmatmul.mubr.bf16.gmra.mrb[176].mxu0 %v22141_v35 }
0x1ac8   : > { %9732 = vmatpush1.bf16.msra.mxu1 %v17640_v55  ;;  %9751 = vmatprep.mubr.bf16.mxu1 %v24084_v45  ;;  %v17681_v55 = vld [vmem:[%s19794_s18 + $0x1ac] ss:$48 sps:$4 sm:$0xff]  }
0x1ac9   : > { %9878 = vmatpush1.bf16.msra.mxu0 %v17643_v5  ;;  %9733 = vmatprep.subr.bf16.mxu1 %v17648_v63  ;;  %v17676_v5 = vld [vmem:[%s19794_s18 + $0x1a0] ss:$48 sps:$4 sm:$0xff]   ;;  %v17679_v63 = vld [vmem:[%s19794_s18 + $0x1a8] ss:$48 sps:$4 sm:$0xff]  }
0x1aca   : > { %9879 = vmatprep.subr.bf16.mxu0 %v17651_v59  ;;  %9897 = vmatprep.mubr.bf16.mxu0 %v24084_v45  ;;  %v17684_v59 = vld [vmem:[%s19794_s18 + $0x204] ss:$48 sps:$4 sm:$0xff]  }
0x1acc   : > { %9734 = vmatpush1.bf16.msra.mxu1 %v17646_v40  ;;  %v17687_v40 = vld [vmem:[%s19794_s18 + $0x20c] ss:$48 sps:$4 sm:$0xff]  }
0x1acd   : > { %9880 = vmatpush1.bf16.msra.mxu0 %v17649_v53  ;;  %9938 = vmatprep.subr.bf16.mxu1 %v17654_v10  ;;  %v17682_v53 = vld [vmem:[%s19794_s18 + $0x200] ss:$48 sps:$4 sm:$0xff]   ;;  %v17685_v10 = vld [vmem:[%s19794_s18 + $0x208] ss:$48 sps:$4 sm:$0xff]  }
0x1ace   : > { %10084 = vmatprep.subr.bf16.mxu0 %v17657_v15  ;;  %v17690_v15 = vld [vmem:[%s19794_s18 + $0x264] ss:$48 sps:$4 sm:$0xff]  }
0x1acf   : > { %9752 = vmatmul.mubr.bf16.vlgmr.msra.gmra.mrb[140].mxu1 %v22167_v36 }
0x1ad0   : > { %9898 = vmatmul.mubr.bf16.vlgmr.msra.gmra.mrb[164].mxu0 %v22167_v36  ;;  %9939 = vmatpush1.bf16.msra.mxu1 %v17652_v3  ;;  %v17693_v3 = vld [vmem:[%s19794_s18 + $0x26c] ss:$48 sps:$4 sm:$0xff]  }
0x1ad1   : > { %10085 = vmatpush1.bf16.msra.mxu0 %v17655_v49  ;;  %9940 = vmatprep.subr.bf16.mxu1 %v17660_v0  ;;  %v17688_v49 = vld [vmem:[%s19794_s18 + $0x260] ss:$48 sps:$4 sm:$0xff]   ;;  %v17691_v0 = vld [vmem:[%s19794_s18 + $0x268] ss:$48 sps:$4 sm:$0xff]  }
0x1ad2   : > { %10086 = vmatprep.subr.bf16.mxu0 %v17663_v20  ;;  %9761 = vmatprep.mubr.bf16.mxu1 %v24084_v45  ;;  %v17696_v20 = vld [vmem:[%s19794_s18 + $0x2c4] ss:$48 sps:$4 sm:$0xff]  }
0x1ad3   : > { %9907 = vmatprep.mubr.bf16.mxu0 %v24084_v45 }
0x1ad4   : > { %9941 = vmatpush1.bf16.msra.mxu1 %v17658_v51  ;;  %v17699_v51 = vld [vmem:[%s19794_s18 + $0x2cc] ss:$48 sps:$4 sm:$0xff]  }
0x1ad5   : > { %10087 = vmatpush1.bf16.msra.mxu0 %v17661_v9  ;;  %9942 = vmatprep.subr.bf16.mxu1 %v17666_v50  ;;  %v17694_v9 = vld [vmem:[%s19794_s18 + $0x2c0] ss:$48 sps:$4 sm:$0xff]   ;;  %v17697_v50 = vld [vmem:[%s19794_s18 + $0x2c8] ss:$48 sps:$4 sm:$0xff]  }
0x1ad6   : > { %10088 = vmatprep.subr.bf16.mxu0 %v17669_v21  ;;  %v17702_v21 = vld [vmem:[%s19794_s18 + $0x324] ss:$48 sps:$4 sm:$0xff]  }
0x1ad7   : > { %9762 = vmatmul.mubr.bf16.gmra.mrb[144].mxu1 %v22195_v32 }
0x1ad8   : > { %9908 = vmatmul.mubr.bf16.gmra.mrb[168].mxu0 %v22195_v32  ;;  %9943 = vmatpush1.bf16.msra.mxu1 %v17664_v52  ;;  %v17705_v52 = vld [vmem:[%s19794_s18 + $0x32c] ss:$48 sps:$4 sm:$0xff]  }
0x1ad9   : > { %10089 = vmatpush1.bf16.msra.mxu0 %v17667_v42  ;;  %9944 = vmatprep.subr.bf16.mxu1 %v17672_v54  ;;  %v17700_v42 = vld [vmem:[%s19794_s18 + $0x320] ss:$48 sps:$4 sm:$0xff]   ;;  %v17703_v54 = vld [vmem:[%s19794_s18 + $0x328] ss:$48 sps:$4 sm:$0xff]  }
0x1ada   : > { %10090 = vmatprep.subr.bf16.mxu0 %v17675_v29  ;;  %9771 = vmatprep.mubr.bf16.mxu1 %v24084_v45  ;;  %v17708_v29 = vld [vmem:[%s19794_s18 + $0x384] ss:$48 sps:$4 sm:$0xff]  }
0x1adb   : > { %9917 = vmatprep.mubr.bf16.mxu0 %v24084_v45 }
0x1adc   : > { %9945 = vmatpush1.bf16.msra.mxu1 %v17670_v34  ;;  %v17711_v34 = vld [vmem:[%s19794_s18 + $0x38c] ss:$48 sps:$4 sm:$0xff]  }
0x1add   : > { %10091 = vmatpush1.bf16.msra.mxu0 %v17673_v47  ;;  %9946 = vmatprep.subr.bf16.mxu1 %v17678_v33  ;;  %v17709_v47 = vld [vmem:[%s19794_s18 + $0x388] ss:$48 sps:$4 sm:$0xff]   ;;  %v17714_v33 = vld [vmem:[%s19794_s18 + $0x3e4] ss:$48 sps:$4 sm:$0xff]  }
0x1ade   : > { %10092 = vmatprep.subr.bf16.mxu0 %v17681_v55  ;;  %v17717_v55 = vld [vmem:[%s19794_s18 + $0x3ec] ss:$48 sps:$4 sm:$0xff]  }
0x1adf   : > { %9772 = vmatmul.mubr.bf16.gmra.mrb[148].mxu1 %v22223_v39 }
0x1ae0   : > { %9918 = vmatmul.mubr.bf16.gmra.mrb[172].mxu0 %v22223_v39  ;;  %9947 = vmatpush1.bf16.msra.mxu1 %v17676_v5  ;;  %v17712_v5 = vld [vmem:[%s19794_s18 + $0x3e0] ss:$48 sps:$4 sm:$0xff]  }
0x1ae1   : > { %10093 = vmatpush1.bf16.msra.mxu0 %v17679_v63  ;;  %9948 = vmatprep.subr.bf16.mxu1 %v17684_v59  ;;  %v17715_v63 = vld [vmem:[%s19794_s18 + $0x3e8] ss:$48 sps:$4 sm:$0xff]   ;;  %v17720_v59 = vld [vmem:[%s19794_s18 + $0x444] ss:$48 sps:$4 sm:$0xff]  }
0x1ae2   : > { %10094 = vmatprep.subr.bf16.mxu0 %v17687_v40  ;;  %9781 = vmatprep.mubr.bf16.mxu1 %v24084_v45  ;;  %v17723_v40 = vld [vmem:[%s19794_s18 + $0x44c] ss:$48 sps:$4 sm:$0xff]  }
0x1ae3   : > { %9927 = vmatprep.mubr.bf16.mxu0 %v24084_v45 }
0x1ae4   : > { %9949 = vmatpush1.bf16.msra.mxu1 %v17682_v53  ;;  %v17718_v53 = vld [vmem:[%s19794_s18 + $0x440] ss:$48 sps:$4 sm:$0xff]  }
0x1ae5   : > { %10095 = vmatpush1.bf16.msra.mxu0 %v17685_v10  ;;  %9950 = vmatprep.subr.bf16.mxu1 %v17690_v15  ;;  %v17721_v10 = vld [vmem:[%s19794_s18 + $0x448] ss:$48 sps:$4 sm:$0xff]   ;;  %v17726_v15 = vld [vmem:[%s19794_s18 + $0x4a4] ss:$48 sps:$4 sm:$0xff]  }
0x1ae6   : > { %10096 = vmatprep.subr.bf16.mxu0 %v17693_v3  ;;  %v17729_v3 = vld [vmem:[%s19794_s18 + $0x4ac] ss:$48 sps:$4 sm:$0xff]  }
0x1ae7   : > { %9782 = vmatmul.mubr.bf16.gmra.mrb[152].mxu1 %v22247_v41 }
0x1ae8   : > { %9928 = vmatmul.mubr.bf16.gmra.mrb[176].mxu0 %v22247_v41  ;;  %9951 = vmatpush1.bf16.msra.mxu1 %v17688_v49  ;;  %v17724_v49 = vld [vmem:[%s19794_s18 + $0x4a0] ss:$48 sps:$4 sm:$0xff]  }
0x1ae9   : > { %9970 = vmatprep.mubr.bf16.mxu1 %v21983_v28  ;;  %10097 = vmatpush1.bf16.msra.mxu0 %v17691_v0  ;;  %v17727_v0 = vld [vmem:[%s19794_s18 + $0x4a8] ss:$48 sps:$4 sm:$0xff]  }
0x1aea   : > { %10116 = vmatprep.mubr.bf16.mxu0 %v21983_v28  ;;  %9952 = vmatprep.subr.bf16.mxu1 %v17696_v20  ;;  %v17706_v28 = vld [vmem:[%s19794_s18 + $0x380] ss:$48 sps:$4 sm:$0xff]   ;;  %v17732_v20 = vld [vmem:[%s19794_s18 + $0x504] ss:$48 sps:$4 sm:$0xff]  }
0x1aeb   : > { %10098 = vmatprep.subr.bf16.mxu0 %v17699_v51  ;;  %v17735_v51 = vld [vmem:[%s19794_s18 + $0x50c] ss:$48 sps:$4 sm:$0xff]  }
0x1aec   : > { %9953 = vmatpush1.bf16.msra.mxu1 %v17694_v9  ;;  %v17730_v9 = vld [vmem:[%s19794_s18 + $0x500] ss:$48 sps:$4 sm:$0xff]  }
0x1aed   : > { %10099 = vmatpush1.bf16.msra.mxu0 %v17697_v50  ;;  %9954 = vmatprep.subr.bf16.mxu1 %v17702_v21  ;;  %v17733_v50 = vld [vmem:[%s19794_s18 + $0x508] ss:$48 sps:$4 sm:$0xff]   ;;  %v17738_v21 = vld [vmem:[%s19794_s18 + $0x564] ss:$48 sps:$4 sm:$0xff]  }
0x1aee   : > { %10100 = vmatprep.subr.bf16.mxu0 %v17705_v52  ;;  %v17741_v52 = vld [vmem:[%s19794_s18 + $0x56c] ss:$48 sps:$4 sm:$0xff]  }
0x1af0   : > { %9955 = vmatpush1.bf16.msra.mxu1 %v17700_v42  ;;  %v17736_v42 = vld [vmem:[%s19794_s18 + $0x560] ss:$48 sps:$4 sm:$0xff]  }
0x1af1   : > { %10101 = vmatpush1.bf16.msra.mxu0 %v17703_v54  ;;  %9956 = vmatprep.subr.bf16.mxu1 %v17708_v29  ;;  %v17739_v54 = vld [vmem:[%s19794_s18 + $0x568] ss:$48 sps:$4 sm:$0xff]   ;;  %v17744_v29 = vld [vmem:[%s19794_s18 + $0x5c4] ss:$48 sps:$4 sm:$0xff]  }
0x1af2   : > { %10102 = vmatprep.subr.bf16.mxu0 %v17711_v34  ;;  %v17747_v34 = vld [vmem:[%s19794_s18 + $0x5cc] ss:$48 sps:$4 sm:$0xff]  }
0x1af4   : > { %9957 = vmatpush1.bf16.msra.mxu1 %v17706_v28  ;;  %v17742_v28 = vld [vmem:[%s19794_s18 + $0x5c0] ss:$48 sps:$4 sm:$0xff]  }
0x1af5   : > { %10103 = vmatpush1.bf16.msra.mxu0 %v17709_v47  ;;  %9958 = vmatprep.subr.bf16.mxu1 %v17714_v33  ;;  %v17745_v47 = vld [vmem:[%s19794_s18 + $0x5c8] ss:$48 sps:$4 sm:$0xff]   ;;  %v17750_v33 = vld [vmem:[%s19794_s18 + $0x624] ss:$48 sps:$4 sm:$0xff]  }
0x1af6   : > { %10104 = vmatprep.subr.bf16.mxu0 %v17717_v55  ;;  %v17753_v55 = vld [vmem:[%s19794_s18 + $0x62c] ss:$48 sps:$4 sm:$0xff]  }
0x1af8   : > { %9959 = vmatpush1.bf16.msra.mxu1 %v17712_v5  ;;  %v17748_v5 = vld [vmem:[%s19794_s18 + $0x620] ss:$48 sps:$4 sm:$0xff]  }
0x1af9   : > { %10105 = vmatpush1.bf16.msra.mxu0 %v17715_v63  ;;  %9960 = vmatprep.subr.bf16.mxu1 %v17720_v59  ;;  %v17751_v63 = vld [vmem:[%s19794_s18 + $0x628] ss:$48 sps:$4 sm:$0xff]   ;;  %v17756_v59 = vld [vmem:[%s19794_s18 + $0x684] ss:$48 sps:$4 sm:$0xff]  }
0x1afa   : > { %10106 = vmatprep.subr.bf16.mxu0 %v17723_v40  ;;  %v17759_v40 = vld [vmem:[%s19794_s18 + $0x68c] ss:$48 sps:$4 sm:$0xff]  }
0x1afc   : > { %9961 = vmatpush1.bf16.msra.mxu1 %v17718_v53  ;;  %v17754_v53 = vld [vmem:[%s19794_s18 + $0x680] ss:$48 sps:$4 sm:$0xff]  }
0x1afd   : > { %10107 = vmatpush1.bf16.msra.mxu0 %v17721_v10  ;;  %9962 = vmatprep.subr.bf16.mxu1 %v17726_v15  ;;  %v17757_v10 = vld [vmem:[%s19794_s18 + $0x688] ss:$48 sps:$4 sm:$0xff]   ;;  %v17762_v15 = vld [vmem:[%s19794_s18 + $0x6e4] ss:$48 sps:$4 sm:$0xff]  }
0x1afe   : > { %10108 = vmatprep.subr.bf16.mxu0 %v17729_v3  ;;  %v17765_v3 = vld [vmem:[%s19794_s18 + $0x6ec] ss:$48 sps:$4 sm:$0xff]  }
0x1b00   : > { %9963 = vmatpush1.bf16.msra.mxu1 %v17724_v49  ;;  %v17760_v49 = vld [vmem:[%s19794_s18 + $0x6e0] ss:$48 sps:$4 sm:$0xff]  }
0x1b01   : > { %10109 = vmatpush1.bf16.msra.mxu0 %v17727_v0  ;;  %9964 = vmatprep.subr.bf16.mxu1 %v17732_v20  ;;  %v17768_v0 = vld [vmem:[%s19794_s18 + $0x744] ss:$48 sps:$4 sm:$0xff]   ;;  %v17766_v20 = vld [vmem:[%s19794_s18 + $0x740] ss:$48 sps:$4 sm:$0xff]  }
0x1b02   : > { %10110 = vmatprep.subr.bf16.mxu0 %v17735_v51  ;;  %v17769_v51 = vld [vmem:[%s19794_s18 + $0x748] ss:$48 sps:$4 sm:$0xff]  }
0x1b04   : > { %9965 = vmatpush1.bf16.msra.mxu1 %v17730_v9  ;;  %v17774_v9 = vld [vmem:[%s19794_s18 + $0x7a4] ss:$48 sps:$4 sm:$0xff]  }
0x1b05   : > { %10111 = vmatpush1.bf16.msra.mxu0 %v17733_v50  ;;  %9966 = vmatprep.subr.bf16.mxu1 %v17738_v21  ;;  %v17777_v50 = vld [vmem:[%s19794_s18 + $0x7ac] ss:$48 sps:$4 sm:$0xff]   ;;  %v17772_v21 = vld [vmem:[%s19794_s18 + $0x7a0] ss:$48 sps:$4 sm:$0xff]  }
0x1b06   : > { %10112 = vmatprep.subr.bf16.mxu0 %v17741_v52  ;;  %v17780_v52 = vld [vmem:[%s19794_s18 + $0x804] ss:$48 sps:$4 sm:$0xff]  }
0x1b08   : > { %9967 = vmatpush1.bf16.msra.mxu1 %v17736_v42  ;;  %v17778_v42 = vld [vmem:[%s19794_s18 + $0x800] ss:$48 sps:$4 sm:$0xff]  }
0x1b09   : > { %10113 = vmatpush1.bf16.msra.mxu0 %v17739_v54  ;;  %9968 = vmatprep.subr.bf16.mxu1 %v17744_v29  ;;  %v17781_v54 = vld [vmem:[%s19794_s18 + $0x808] ss:$48 sps:$4 sm:$0xff]   ;;  %v17786_v29 = vld [vmem:[%s19794_s18 + $0x864] ss:$48 sps:$4 sm:$0xff]  }
0x1b0a   : > { %10114 = vmatprep.subr.bf16.mxu0 %v17747_v34  ;;  %v17789_v34 = vld [vmem:[%s19794_s18 + $0x86c] ss:$48 sps:$4 sm:$0xff]  }
0x1b0c   : > { %9969 = vmatpush1.bf16.msra.mxu1 %v17742_v28  ;;  %v17784_v28 = vld [vmem:[%s19794_s18 + $0x860] ss:$48 sps:$4 sm:$0xff]  }
0x1b0d   : > { %10115 = vmatpush1.bf16.msra.mxu0 %v17745_v47  ;;  %10011 = vmatprep.subr.bf16.mxu1 %v17750_v33  ;;  %v17792_v47 = vld [vmem:[%s19794_s18 + $0x8c4] ss:$48 sps:$4 sm:$0xff]   ;;  %v17790_v33 = vld [vmem:[%s19794_s18 + $0x8c0] ss:$48 sps:$4 sm:$0xff]  }
0x1b0e   : > { %10157 = vmatprep.subr.bf16.mxu0 %v17753_v55  ;;  %v17793_v55 = vld [vmem:[%s19794_s18 + $0x8c8] ss:$48 sps:$4 sm:$0xff]  }
0x1b0f   : > { %9971 = vmatmul.mubr.bf16.vlgmr.msra.gmra.mrb[156].mxu1 %v21987_v7 }
0x1b10   : > { %10117 = vmatmul.mubr.bf16.vlgmr.msra.gmra.mrb[180].mxu0 %v21987_v7  ;;  %9980 = vmatprep.mubr.bf16.mxu1 %v22023_v14  ;;  %v17763_v7 = vld [vmem:[%s19794_s18 + $0x6e8] ss:$48 sps:$4 sm:$0xff]  }
0x1b11   : > { %10012 = vmatpush1.bf16.msra.mxu1 %v17748_v5  ;;  %10126 = vmatprep.mubr.bf16.mxu0 %v22023_v14  ;;  %v17771_v14 = vld [vmem:[%s19794_s18 + $0x74c] ss:$48 sps:$4 sm:$0xff]  }
0x1b12   : > { %10158 = vmatpush1.bf16.msra.mxu0 %v17751_v63  ;;  %10013 = vmatprep.subr.bf16.mxu1 %v17756_v59  ;;  %v17798_v5 = vld [vmem:[%s19798_s0 + $0x4] ss:$12 sps:$4 sm:$0xff]   ;;  %v17799_v63 = vld [vmem:[%s19798_s0 + $0xc8] ss:$12 sps:$4 sm:$0xff]   ;;  %v17796_v59 = vld [vmem:[%s19798_s0] ss:$12 sps:$4 sm:$0xff]  }
0x1b13   : > { %10159 = vmatprep.subr.bf16.mxu0 %v17759_v40  ;;  %v17803_v40 = vld [vmem:[%s19798_s0 + $0x1c] ss:$12 sps:$4 sm:$0xff]  }
0x1b15   : > { %10014 = vmatpush1.bf16.msra.mxu1 %v17754_v53  ;;  %v17804_v53 = vld [vmem:[%s19798_s0 + $0xe0] ss:$12 sps:$4 sm:$0xff]  }
0x1b16   : > { %10160 = vmatpush1.bf16.msra.mxu0 %v17757_v10  ;;  %10015 = vmatprep.subr.bf16.mxu1 %v17762_v15  ;;  %v17801_v10 = vld [vmem:[%s19798_s0 + $0x18] ss:$12 sps:$4 sm:$0xff]   ;;  %v17805_v15 = vld [vmem:[%s19798_s0 + $0x20] ss:$12 sps:$4 sm:$0xff]  }
0x1b17   : > { %9981 = vmatmul.mubr.bf16.gmra.mrb[160].mxu1 %v22027_v6  ;;  %10161 = vmatprep.subr.bf16.mxu0 %v17765_v3  ;;  %v17808_v3 = vld [vmem:[%s19798_s0 + $0x34] ss:$12 sps:$4 sm:$0xff]  }
0x1b18   : > { %10127 = vmatmul.mubr.bf16.gmra.mrb[184].mxu0 %v22027_v6  ;;  %9990 = vmatprep.mubr.bf16.mxu1 %v22100_v25  ;;  %v17775_v6 = vld [vmem:[%s19794_s18 + $0x7a8] ss:$48 sps:$4 sm:$0xff]  }
0x1b19   : > { %10016 = vmatpush1.bf16.msra.mxu1 %v17760_v49  ;;  %10136 = vmatprep.mubr.bf16.mxu0 %v22100_v25  ;;  %v17783_v25 = vld [vmem:[%s19794_s18 + $0x80c] ss:$48 sps:$4 sm:$0xff]  }
0x1b1a   : > { %10162 = vmatpush1.bf16.msra.mxu0 %v17763_v7  ;;  %10017 = vmatprep.subr.bf16.mxu1 %v17768_v0  ;;  %v17809_v49 = vld [vmem:[%s19798_s0 + $0xf8] ss:$12 sps:$4 sm:$0xff]   ;;  %v17806_v7 = vld [vmem:[%s19798_s0 + $0x30] ss:$12 sps:$4 sm:$0xff]  }
0x1b1b   : > { %10163 = vmatprep.subr.bf16.mxu0 %v17771_v14  ;;  %v17813_v0 = vld [vmem:[%s19798_s0 + $0x4c] ss:$12 sps:$4 sm:$0xff]   ;;  %v17814_v14 = vld [vmem:[%s19798_s0 + $0x110] ss:$12 sps:$4 sm:$0xff]  }
0x1b1d   : > { %10018 = vmatpush1.bf16.msra.mxu1 %v17766_v20  ;;  %v17811_v20 = vld [vmem:[%s19798_s0 + $0x48] ss:$12 sps:$4 sm:$0xff]  }
0x1b1e   : > { %10164 = vmatpush1.bf16.msra.mxu0 %v17769_v51  ;;  %10019 = vmatprep.subr.bf16.mxu1 %v17774_v9  ;;  %v17815_v51 = vld [vmem:[%s19798_s0 + $0x50] ss:$12 sps:$4 sm:$0xff]  }
0x1b1f   : > { %9991 = vmatmul.mubr.bf16.gmra.mrb[164].mxu1 %v22104_v19  ;;  %10165 = vmatprep.subr.bf16.mxu0 %v17777_v50  ;;  %v17818_v9 = vld [vmem:[%s19798_s0 + $0x64] ss:$12 sps:$4 sm:$0xff]   ;;  %v17819_v50 = vld [vmem:[%s19798_s0 + $0x128] ss:$12 sps:$4 sm:$0xff]  }
0x1b20   : > { %10137 = vmatmul.mubr.bf16.gmra.mrb[188].mxu0 %v22104_v19  ;;  %10000 = vmatprep.mubr.bf16.mxu1 %v22121_v13  ;;  %v17787_v19 = vld [vmem:[%s19794_s18 + $0x868] ss:$48 sps:$4 sm:$0xff]  }
0x1b21   : > { %10020 = vmatpush1.bf16.msra.mxu1 %v17772_v21  ;;  %10146 = vmatprep.mubr.bf16.mxu0 %v22121_v13  ;;  %v17795_v13 = vld [vmem:[%s19794_s18 + $0x8cc] ss:$48 sps:$4 sm:$0xff]  }
0x1b22   : > { %10166 = vmatpush1.bf16.msra.mxu0 %v17775_v6  ;;  %10021 = vmatprep.subr.bf16.mxu1 %v17780_v52  ;;  %v22492_v21 = vld [vmem:[%s19796_s19] sm:$0xff]  ;;  %v23936_v6 = vsub.s32 3, %v21609_v26 }
0x1b23   : > { %10167 = vmatprep.subr.bf16.mxu0 %v17783_v25  ;;  %v17820_v52 = vld [vmem:[%s19798_s0 + $0x68] ss:$12 sps:$4 sm:$0xff]  }
0x1b24   : > { %v17823_v25 = vld [vmem:[%s19798_s0 + $0x7c] ss:$12 sps:$4 sm:$0xff]  }
0x1b25   : > { %10022 = vmatpush1.bf16.msra.mxu1 %v17778_v42  ;;  %v22500_v42 = vrot.slane %v22492_v21, %v21612_v31 }
0x1b26   : > { %10168 = vmatpush1.bf16.msra.mxu0 %v17781_v54  ;;  %10023 = vmatprep.subr.bf16.mxu1 %v17786_v29  ;;  %v22504_v54 = vrot.slane %v22492_v21, %v21620_v4  ;;  %v17824_v29 = vld [vmem:[%s19798_s0 + $0x140] ss:$12 sps:$4 sm:$0xff]  }
0x1b27   : > { %10001 = vmatmul.mubr.bf16.gmra.mrb[168].mxu1 %v22141_v35  ;;  %10169 = vmatprep.subr.bf16.mxu0 %v17789_v34  ;;  %v22510_v34 = vrot.slane %v22492_v21, %v21615_v62 }
0x1b28   : > { %10147 = vmatmul.mubr.bf16.gmra.mrb[192].mxu0 %v22141_v35  ;;  %10043 = vmatprep.mubr.bf16.mxu1 %v24084_v45  ;;  %v17800_v35 = vld [vmem:[%s19798_s0 + $0x8] ss:$12 sps:$4 sm:$0xff]  }
0x1b29   : > { %10024 = vmatpush1.bf16.msra.mxu1 %v17784_v28  ;;  %10189 = vmatprep.mubr.bf16.mxu0 %v24084_v45  ;;  %v22515_v28 = vrot.slane %v22492_v21, %v23936_v6 }
0x1b2a   : > { %10170 = vmatpush1.bf16.msra.mxu0 %v17787_v19  ;;  %10025 = vmatprep.subr.bf16.mxu1 %v17792_v47  ;;  %v17821_v19 = vld [vmem:[%s19798_s0 + $0x78] ss:$12 sps:$4 sm:$0xff]  }
0x1b2b   : > { %10171 = vmatprep.subr.bf16.mxu0 %v17795_v13 }
0x1b2d   : > { %10026 = vmatpush1.bf16.msra.mxu1 %v17790_v33  ;;  %v17825_v33 = vld [vmem:[%s19798_s0 + $0x80] ss:$12 sps:$4 sm:$0xff]  }
0x1b2e   : > { %10172 = vmatpush1.bf16.msra.mxu0 %v17793_v55  ;;  %12311 = vmatprep.subr.bf16.mxu1 %v17798_v5  ;;  %v17828_v55 = vld [vmem:[%s19798_s0 + $0x94] ss:$12 sps:$4 sm:$0xff]  }
0x1b2f   : > { %15574 = vmatprep.subr.bf16.mxu0 %v17799_v63 }
0x1b30   : > { %10044 = vmatmul.mubr.bf16.vlgmr.msra.gmra.mrb[156].mxu1 %v22167_v36 }
0x1b31   : > { %10190 = vmatmul.mubr.bf16.vlgmr.msra.gmra.mrb[180].mxu0 %v22167_v36  ;;  %12312 = vmatpush1.bf16.msra.mxu1 %v17796_v59  ;;  %v17810_v36 = vld [vmem:[%s19798_s0 + $0x38] ss:$12 sps:$4 sm:$0xff]  }
0x1b32   : > { %15575 = vmatpush3.bf16.msra.mxu0 %v17800_v35  ;;  %12313 = vmatprep.subr.bf16.mxu1 %v17803_v40  ;;  %v17829_v40 = vld [vmem:[%s19798_s0 + $0x158] ss:$12 sps:$4 sm:$0xff]  }
0x1b33   : > { %15576 = vmatprep.subr.bf16.mxu0 %v17804_v53  ;;  %10053 = vmatprep.mubr.bf16.mxu1 %v24084_v45 }
0x1b34   : > { %10199 = vmatprep.mubr.bf16.mxu0 %v24084_v45 }
0x1b35   : > { %12314 = vmatpush1.bf16.msra.mxu1 %v17801_v10 }
0x1b36   : > { %15577 = vmatpush3.bf16.msra.mxu0 %v17805_v15  ;;  %12315 = vmatprep.subr.bf16.mxu1 %v17808_v3 }
0x1b37   : > { %15578 = vmatprep.subr.bf16.mxu0 %v17809_v49 }
0x1b38   : > { %10054 = vmatmul.mubr.bf16.gmra.mrb[160].mxu1 %v22195_v32 }
0x1b39   : > { %10200 = vmatmul.mubr.bf16.gmra.mrb[184].mxu0 %v22195_v32  ;;  %12316 = vmatpush1.bf16.msra.mxu1 %v17806_v7  ;;  %v17816_v32 = vld [vmem:[%s19798_s0 + $0x60] ss:$12 sps:$4 sm:$0xff]  }
0x1b3a   : > { %15579 = vmatpush3.bf16.msra.mxu0 %v17810_v36  ;;  %12317 = vmatprep.subr.bf16.mxu1 %v17813_v0  ;;  %v17826_v0 = vld [vmem:[%s19798_s0 + $0x90] ss:$12 sps:$4 sm:$0xff]  }
0x1b3b   : > { %15580 = vmatprep.subr.bf16.mxu0 %v17814_v14  ;;  %10063 = vmatprep.mubr.bf16.mxu1 %v24084_v45 }
0x1b3c   : > { %10209 = vmatprep.mubr.bf16.mxu0 %v24084_v45 }
0x1b3d   : > { %12318 = vmatpush1.bf16.msra.mxu1 %v17811_v20 }
0x1b3e   : > { %15581 = vmatpush3.bf16.msra.mxu0 %v17815_v51  ;;  %12319 = vmatprep.subr.bf16.mxu1 %v17818_v9  ;;  %v17830_v51 = vld [vmem:[%s19798_s0 + $0x98] ss:$12 sps:$4 sm:$0xff]  }
0x1b3f   : > { %15582 = vmatprep.subr.bf16.mxu0 %v17819_v50  ;;  %v17833_v9 = vld [vmem:[%s19798_s0 + $0xac] ss:$12 sps:$4 sm:$0xff]  }
0x1b40   : > { %10064 = vmatmul.mubr.bf16.gmra.mrb[164].mxu1 %v22223_v39 }
0x1b41   : > { %10210 = vmatmul.mubr.bf16.gmra.mrb[188].mxu0 %v22223_v39  ;;  %12320 = vmatpush1.bf16.msra.mxu1 %v17816_v32 }
0x1b42   : > { %15583 = vmatpush3.bf16.msra.mxu0 %v17820_v52  ;;  %v9461_v47 = vpop.f32.mrb[124].mxu1  ;;  %v9607_v13 = vpop.f32.mrb[148].mxu0  ;;  %12321 = vmatprep.subr.bf16.mxu1 %v17823_v25  ;;  %v17834_v25 = vld [vmem:[%s19798_s0 + $0x170] ss:$12 sps:$4 sm:$0xff]  }
0x1b43   : > { %v16226_v5 = vadd.f32 %v9461_v47, %v22500_v42  ;;  %v16242_v63 = vadd.f32 %v9607_v13, %v22504_v54  ;;  %15584 = vmatprep.subr.bf16.mxu0 %v17824_v29  ;;  %v9463_v59 = vpop.f32.mrb[125].mxu1  ;;  %v9609_v35 = vpop.f32.mrb[149].mxu0  ;;  %10073 = vmatprep.mubr.bf16.mxu1 %v24084_v45 }
0x1b44   : > { %v16227_v39 = vadd.f32 %v9463_v59, %v22510_v34  ;;  %v16243_v53 = vadd.f32 %v9609_v35, %v22515_v28  ;;  %v9465_v10 = vpop.f32.mrb[126].mxu1  ;;  %v9611_v15 = vpop.f32.mrb[150].mxu0  ;;  %10219 = vmatprep.mubr.bf16.mxu0 %v24084_v45 }
0x1b45   : > { %12322 = vmatpush1.bf16.msra.mxu1 %v17821_v19  ;;  %v16228_v3 = vadd.f32 %v9465_v10, %v22500_v42  ;;  %v16244_v49 = vadd.f32 %v9611_v15, %v22504_v54  ;;  %v9467_v7 = vpop.f32.mrb[127].mxu1  ;;  %v9613_v36 = vpop.f32.mrb[151].mxu0  ;;  %v10230_v50 = vmax.f32 %v16226_v5, 0.0  ;;  %v10232_v45 = vmax.f32 %v16242_v63, 0.0  ;;  %v17831_v5 = vld [vmem:[%s19798_s0 + $0xa8] ss:$12 sps:$4 sm:$0xff]  }
0x1b46   : > { %15585 = vmatpush3.bf16.msra.mxu0 %v17825_v33  ;;  %v16229_v14 = vadd.f32 %v9467_v7, %v22510_v34  ;;  %v16245_v20 = vadd.f32 %v9613_v36, %v22515_v28  ;;  %12323 = vmatprep.subr.bf16.mxu1 %v17828_v55  ;;  %v10231_v29 = vmax.f32 %v16227_v39, 0.0  ;;  %v10233_v19 = vmax.f32 %v16243_v53, 0.0  ;;  %v17835_v39 = vld [vmem:[%s19798_s0 + $0xb0] ss:$12 sps:$4 sm:$0xff]  }
0x1b47   : > { %v10242_v32 = vmax.f32 %v16228_v3, 0.0  ;;  %v10244_v52 = vmax.f32 %v16244_v49, 0.0  ;;  %15586 = vmatprep.subr.bf16.mxu0 %v17829_v40  ;;  %v17838_v53 = vld [vmem:[%s19798_s0 + $0xc4] ss:$12 sps:$4 sm:$0xff]   ;;  %v17839_v49 = vld [vmem:[%s19798_s0 + $0x248] ss:$12 sps:$4 sm:$0xff]  }
0x1b48   : > { %v10243_v47 = vmax.f32 %v16229_v14, 0.0  ;;  %v10245_v13 = vmax.f32 %v16245_v20, 0.0  ;;  %10074 = vmatmul.mubr.bf16.gmra.mrb[168].mxu1 %v22247_v41 }
0x1b49   : > { %v22537_v33 = vpack.c.bf16 %v10242_v32, %v10230_v50  ;;  %v22539_v55 = vpack.c.bf16 %v10244_v52, %v10232_v45  ;;  %10220 = vmatmul.mubr.bf16.gmra.mrb[192].mxu0 %v22247_v41  ;;  %12324 = vmatpush1.bf16.msra.mxu1 %v17826_v0  ;;  %v17836_v45 = vld [vmem:[%s19798_s0 + $0xc0] ss:$12 sps:$4 sm:$0xff]  }
0x1b4a   : > { %v10327_v63 = vpack.c.bf16 %v10243_v47, %v10231_v29  ;;  %v22543_v59 = vpack.c.bf16 %v10245_v13, %v10233_v19  ;;  %15587 = vmatpush3.bf16.msra.mxu0 %v17830_v51  ;;  %v9471_v35 = vpop.f32.mrb[128].mxu1  ;;  %v9617_v40 = vpop.f32.mrb[152].mxu0  ;;  %12325 = vmatprep.subr.bf16.mxu1 %v17833_v9  ;;  %v17843_v29 = vld [vmem:[%s19798_s0 + $0xdc] ss:$12 sps:$4 sm:$0xff]  }
0x1b4b   : > { %v16230_v10 = vadd.f32 %v9471_v35, %v22500_v42  ;;  %v16246_v15 = vadd.f32 %v9617_v40, %v22504_v54  ;;  %15588 = vmatprep.subr.bf16.mxu0 %v17834_v25  ;;  %v9473_v3 = vpop.f32.mrb[129].mxu1  ;;  %v9619_v41 = vpop.f32.mrb[153].mxu0  ;;  %v17840_v25 = vld [vmem:[%s19798_s0 + $0x188] ss:$12 sps:$4 sm:$0xff]  }
0x1b4c   : > { %v16231_v7 = vadd.f32 %v9473_v3, %v22510_v34  ;;  %v16247_v36 = vadd.f32 %v9619_v41, %v22515_v28  ;;  %v9475_v0 = vpop.f32.mrb[130].mxu1  ;;  %v9621_v14 = vpop.f32.mrb[154].mxu0  ;;  %12343 = vmatprep.mubr.bf16.mxu1 %v10327_v63  ;;  %12781 = vmatprep.mubr.bf16.mxu0 %v10327_v63  ;;  %v17844_v63 = vld [vmem:[%s19798_s0 + $0x260] ss:$12 sps:$4 sm:$0xff]  }
0x1b4d   : > { %12326 = vmatpush1.bf16.msra.mxu1 %v17831_v5  ;;  %v16232_v20 = vadd.f32 %v9475_v0, %v22500_v42  ;;  %v16248_v51 = vadd.f32 %v9621_v14, %v22504_v54  ;;  %v9477_v9 = vpop.f32.mrb[131].mxu1  ;;  %v9623_v50 = vpop.f32.mrb[155].mxu0  ;;  %v10254_v19 = vmax.f32 %v16230_v10, 0.0  ;;  %v10256_v47 = vmax.f32 %v16246_v15, 0.0  ;;  %v17848_v14 = vld [vmem:[%s19798_s0 + $0xf4] ss:$12 sps:$4 sm:$0xff]  }
0x1b4e   : > { %15589 = vmatpush3.bf16.msra.mxu0 %v17835_v39  ;;  %v16233_v32 = vadd.f32 %v9477_v9, %v22510_v34  ;;  %v16249_v52 = vadd.f32 %v9623_v50, %v22515_v28  ;;  %12327 = vmatprep.subr.bf16.mxu1 %v17838_v53  ;;  %v10255_v35 = vmax.f32 %v16231_v7, 0.0  ;;  %v10257_v40 = vmax.f32 %v16247_v36, 0.0  ;;  %v17841_v53 = vld [vmem:[%s19798_s0 + $0xd8] ss:$12 sps:$4 sm:$0xff]   ;;  %v17845_v36 = vld [vmem:[%s19798_s0 + $0x1a0] ss:$12 sps:$4 sm:$0xff]  }
0x1b4f   : > { %v10266_v13 = vmax.f32 %v16232_v20, 0.0  ;;  %v10268_v5 = vmax.f32 %v16248_v51, 0.0  ;;  %15614 = vmatprep.subr.bf16.mxu0 %v17839_v49 }
0x1b50   : > { %v10267_v3 = vmax.f32 %v16233_v32, 0.0  ;;  %v10269_v39 = vmax.f32 %v16249_v52, 0.0 }
0x1b51   : > { %v22560_v41 = vpack.c.bf16 %v10266_v13, %v10254_v19  ;;  %v22562_v0 = vpack.c.bf16 %v10268_v5, %v10256_v47  ;;  %12782 = vmatmul.mubr.bf16.vlgmr.msra.gmra.mrb[196].mxu0 %v22537_v33  ;;  %12328 = vmatpush1.bf16.msra.mxu1 %v17836_v45  ;;  %v17849_v45 = vld [vmem:[%s19798_s0 + $0x278] ss:$12 sps:$4 sm:$0xff]  }
0x1b52   : > { %v22566_v10 = vpack.c.bf16 %v10267_v3, %v10255_v35  ;;  %v22568_v15 = vpack.c.bf16 %v10269_v39, %v10257_v40  ;;  %15615 = vmatpush3.bf16.msra.mxu0 %v17840_v25  ;;  %v9481_v49 = vpop.f32.mrb[132].mxu1  ;;  %v9627_v7 = vpop.f32.mrb[156].mxu0  ;;  %12329 = vmatprep.subr.bf16.mxu1 %v17843_v29  ;;  %v17850_v3 = vld [vmem:[%s19798_s0 + $0x1b8] ss:$12 sps:$4 sm:$0xff]  }
0x1b53   : > { %v16234_v20 = vadd.f32 %v9481_v49, %v22500_v42  ;;  %v16250_v51 = vadd.f32 %v9627_v7, %v22504_v54  ;;  %15616 = vmatprep.subr.bf16.mxu0 %v17844_v63  ;;  %v9483_v9 = vpop.f32.mrb[133].mxu1  ;;  %v9629_v50 = vpop.f32.mrb[157].mxu0  ;;  %v17846_v63 = vld [vmem:[%s19798_s0 + $0xf0] ss:$12 sps:$4 sm:$0xff]   ;;  %v17853_v39 = vld [vmem:[%s19798_s0 + $0x10c] ss:$12 sps:$4 sm:$0xff]  }
0x1b54   : > { %v16235_v32 = vadd.f32 %v9483_v9, %v22510_v34  ;;  %v16251_v52 = vadd.f32 %v9629_v50, %v22515_v28  ;;  %v9485_v25 = vpop.f32.mrb[134].mxu1  ;;  %v9631_v19 = vpop.f32.mrb[158].mxu0  ;;  %12789 = vmatprep.mubr.bf16.mxu0 %v22566_v10  ;;  %v17854_v50 = vld [vmem:[%s19798_s0 + $0x290] ss:$12 sps:$4 sm:$0xff]  }
0x1b55   : > { %12330 = vmatpush1.bf16.msra.mxu1 %v17841_v53  ;;  %v16236_v29 = vadd.f32 %v9485_v25, %v22500_v42  ;;  %v16252_v47 = vadd.f32 %v9631_v19, %v22504_v54  ;;  %v9487_v13 = vpop.f32.mrb[135].mxu1  ;;  %v9633_v5 = vpop.f32.mrb[159].mxu0  ;;  %v10278_v49 = vmax.f32 %v16234_v20, 0.0  ;;  %v10280_v7 = vmax.f32 %v16250_v51, 0.0 }
0x1b56   : > { %15617 = vmatpush3.bf16.msra.mxu0 %v17845_v36  ;;  %v16237_v35 = vadd.f32 %v9487_v13, %v22510_v34  ;;  %v16253_v40 = vadd.f32 %v9633_v5, %v22515_v28  ;;  %12331 = vmatprep.subr.bf16.mxu1 %v17848_v14  ;;  %v10279_v25 = vmax.f32 %v16235_v32, 0.0  ;;  %v10281_v19 = vmax.f32 %v16251_v52, 0.0  ;;  %v17851_v14 = vld [vmem:[%s19798_s0 + $0x108] ss:$12 sps:$4 sm:$0xff]   ;;  %v17855_v52 = vld [vmem:[%s19798_s0 + $0x1d0] ss:$12 sps:$4 sm:$0xff]  }
0x1b57   : > { %v10290_v53 = vmax.f32 %v16236_v29, 0.0  ;;  %v10292_v9 = vmax.f32 %v16252_v47, 0.0  ;;  %15618 = vmatprep.subr.bf16.mxu0 %v17849_v45  ;;  %v17858_v29 = vld [vmem:[%s19798_s0 + $0x124] ss:$12 sps:$4 sm:$0xff]  }
0x1b58   : > { %v10291_v6 = vmax.f32 %v16237_v35, 0.0  ;;  %v10293_v36 = vmax.f32 %v16253_v40, 0.0 }
0x1b59   : > { %v22586_v18 = vpack.c.bf16 %v10290_v53, %v10278_v49  ;;  %v22588_v13 = vpack.c.bf16 %v10292_v9, %v10280_v7  ;;  %12790 = vmatmul.mubr.bf16.gmra.mrb[200].mxu0 %v22560_v41  ;;  %12332 = vmatpush1.bf16.msra.mxu1 %v17846_v63  ;;  %v17859_v63 = vld [vmem:[%s19798_s0 + $0x2a8] ss:$12 sps:$4 sm:$0xff]  }
0x1b5a   : > { %v22592_v20 = vpack.c.bf16 %v10291_v6, %v10279_v25  ;;  %v22594_v51 = vpack.c.bf16 %v10293_v36, %v10281_v19  ;;  %15619 = vmatpush3.bf16.msra.mxu0 %v17850_v3  ;;  %v9491_v45 = vpop.f32.mrb[136].mxu1  ;;  %v9637_v32 = vpop.f32.mrb[160].mxu0  ;;  %12333 = vmatprep.subr.bf16.mxu1 %v17853_v39  ;;  %v17856_v25 = vld [vmem:[%s19798_s0 + $0x120] ss:$12 sps:$4 sm:$0xff]  }
0x1b5b   : > { %v16238_v47 = vadd.f32 %v9491_v45, %v22500_v42  ;;  %v16254_v5 = vadd.f32 %v9637_v32, %v22504_v54  ;;  %15620 = vmatprep.subr.bf16.mxu0 %v17854_v50  ;;  %v9493_v35 = vpop.f32.mrb[137].mxu1  ;;  %v9639_v40 = vpop.f32.mrb[161].mxu0  ;;  %v17860_v45 = vld [vmem:[%s19798_s0 + $0x1e8] ss:$12 sps:$4 sm:$0xff]  }
0x1b5c   : > { %v16239_v6 = vadd.f32 %v9493_v35, %v22510_v34  ;;  %v16255_v3 = vadd.f32 %v9639_v40, %v22515_v28  ;;  %v9495_v49 = vpop.f32.mrb[138].mxu1  ;;  %v9641_v7 = vpop.f32.mrb[162].mxu0  ;;  %12797 = vmatprep.mubr.bf16.mxu0 %v22592_v20  ;;  %v17863_v32 = vld [vmem:[%s19798_s0 + $0x13c] ss:$12 sps:$4 sm:$0xff]  }
0x1b5d   : > { %12334 = vmatpush1.bf16.msra.mxu1 %v17851_v14  ;;  %v16240_v39 = vadd.f32 %v9495_v49, %v22500_v42  ;;  %v16256_v53 = vadd.f32 %v9641_v7, %v22504_v54  ;;  %v9497_v9 = vpop.f32.mrb[139].mxu1  ;;  %v9643_v50 = vpop.f32.mrb[163].mxu0  ;;  %v10302_v35 = vmax.f32 %v16238_v47, 0.0  ;;  %v10304_v40 = vmax.f32 %v16254_v5, 0.0  ;;  %v17864_v42 = vld [vmem:[%s19798_s0 + $0x2c0] ss:$12 sps:$4 sm:$0xff]  }
0x1b5e   : > { %15621 = vmatpush3.bf16.msra.mxu0 %v17855_v52  ;;  %v16241_v19 = vadd.f32 %v9497_v9, %v22510_v34  ;;  %v16257_v36 = vadd.f32 %v9643_v50, %v22515_v28  ;;  %12335 = vmatprep.subr.bf16.mxu1 %v17858_v29  ;;  %v10303_v54 = vmax.f32 %v16239_v6, 0.0  ;;  %v10305_v49 = vmax.f32 %v16255_v3, 0.0  ;;  %v17861_v29 = vld [vmem:[%s19798_s0 + $0x138] ss:$12 sps:$4 sm:$0xff]   ;;  %v17868_v6 = vld [vmem:[%s19798_s0 + $0x154] ss:$12 sps:$4 sm:$0xff]  }
0x1b5f   : > { %v10314_v14 = vmax.f32 %v16240_v39, 0.0  ;;  %v10316_v1 = vmax.f32 %v16256_v53, 0.0  ;;  %15622 = vmatprep.subr.bf16.mxu0 %v17859_v63  ;;  %v17865_v63 = vld [vmem:[%s19798_s0 + $0x200] ss:$12 sps:$4 sm:$0xff]   ;;  %v17866_v3 = vld [vmem:[%s19798_s0 + $0x150] ss:$12 sps:$4 sm:$0xff]  }
0x1b60   : > { %v10315_v52 = vmax.f32 %v16241_v19, 0.0  ;;  %v10317_v7 = vmax.f32 %v16257_v36, 0.0  ;;  %v17870_v39 = vld [vmem:[%s19798_s0 + $0x218] ss:$12 sps:$4 sm:$0xff]   ;;  %v17874_v9 = vld [vmem:[%s19798_s0 + $0x2f0] ss:$12 sps:$4 sm:$0xff]  }
0x1b61   : > { %v22612_v34 = vpack.c.bf16 %v10314_v14, %v10302_v35  ;;  %v22614_v28 = vpack.c.bf16 %v10316_v1, %v10304_v40  ;;  %12798 = vmatmul.mubr.bf16.gmra.mrb[204].mxu0 %v22586_v18  ;;  %12336 = vmatpush1.bf16.msra.mxu1 %v17856_v25  ;;  %v17869_v1 = vld [vmem:[%s19798_s0 + $0x2d8] ss:$12 sps:$4 sm:$0xff]   ;;  %v17871_v50 = vld [vmem:[%s19798_s0 + $0x168] ss:$12 sps:$4 sm:$0xff]   ;;  %v17875_v25 = vld [vmem:[%s19798_s0 + $0x230] ss:$12 sps:$4 sm:$0xff]  }
0x1b62   : > { %v22618_v47 = vpack.c.bf16 %v10315_v52, %v10303_v54  ;;  %v22620_v5 = vpack.c.bf16 %v10317_v7, %v10305_v49  ;;  %15623 = vmatpush3.bf16.msra.mxu0 %v17860_v45  ;;  %12337 = vmatprep.subr.bf16.mxu1 %v17863_v32  ;;  %v17873_v53 = vld [vmem:[%s19798_s0 + $0x16c] ss:$12 sps:$4 sm:$0xff]   ;;  %v17878_v19 = vld [vmem:[%s19798_s0 + $0x184] ss:$12 sps:$4 sm:$0xff]   ;;  %v17900_v36 = vld [vmem:[%s19798_s0 + $0x3c8] ss:$12 sps:$4 sm:$0xff]  }
0x1b63   : > { %15624 = vmatprep.subr.bf16.mxu0 %v17864_v42  ;;  %v17876_v45 = vld [vmem:[%s19798_s0 + $0x180] ss:$12 sps:$4 sm:$0xff]   ;;  %v17881_v32 = vld [vmem:[%s19798_s0 + $0x19c] ss:$12 sps:$4 sm:$0xff]   ;;  %v17879_v14 = vld [vmem:[%s19798_s0 + $0x198] ss:$12 sps:$4 sm:$0xff]  }
0x1b64   : > { %12805 = vmatprep.mubr.bf16.mxu0 %v22618_v47  ;;  %v17901_v35 = vld [vmem:[%s19798_s0 + $0x308] ss:$12 sps:$4 sm:$0xff]   ;;  %v17905_v40 = vld [vmem:[%s19798_s0 + $0x3e0] ss:$12 sps:$4 sm:$0xff]   ;;  %v17910_v49 = vld [vmem:[%s19798_s0 + $0x3f8] ss:$12 sps:$4 sm:$0xff]  }
0x1b65   : > { %12338 = vmatpush1.bf16.msra.mxu1 %v17861_v29  ;;  %v17884_v42 = vld [vmem:[%s19798_s0 + $0x1b4] ss:$12 sps:$4 sm:$0xff]   ;;  %v17887_v52 = vld [vmem:[%s19798_s0 + $0x1cc] ss:$12 sps:$4 sm:$0xff]   ;;  %v17915_v7 = vld [vmem:[%s19798_s0 + $0x410] ss:$12 sps:$4 sm:$0xff]  }
0x1b66   : > { %15625 = vmatpush3.bf16.msra.mxu0 %v17865_v63  ;;  %12339 = vmatprep.subr.bf16.mxu1 %v17868_v6  ;;  %v17906_v54 = vld [vmem:[%s19798_s0 + $0x320] ss:$12 sps:$4 sm:$0xff]   ;;  %v17885_v29 = vld [vmem:[%s19798_s0 + $0x1c8] ss:$12 sps:$4 sm:$0xff]   ;;  %v17890_v63 = vld [vmem:[%s19798_s0 + $0x1e4] ss:$12 sps:$4 sm:$0xff]  }
0x1b67   : > { %15626 = vmatprep.subr.bf16.mxu0 %v17869_v1  ;;  %v17916_v6 = vld [vmem:[%s19798_s0 + $0x350] ss:$12 sps:$4 sm:$0xff]   ;;  %v17888_v1 = vld [vmem:[%s19798_s0 + $0x1e0] ss:$12 sps:$4 sm:$0xff]  }
0x1b69   : > { %12806 = vmatmul.mubr.bf16.gmra.mrb[208].mxu0 %v22612_v34  ;;  %12340 = vmatpush1.bf16.msra.mxu1 %v17866_v3  ;;  %v17893_v3 = vld [vmem:[%s19798_s0 + $0x1fc] ss:$12 sps:$4 sm:$0xff]  }
0x1b6a   : > { %15627 = vmatpush3.bf16.msra.mxu0 %v17870_v39  ;;  %12846 = vmatprep.mubr.bf16.mxu0 %v22543_v59  ;;  %v17925_v39 = vld [vmem:[%s19798_s0 + $0x440] ss:$12 sps:$4 sm:$0xff]  }
0x1b6b   : > { %12341 = vmatprep.subr.bf16.mxu1 %v17873_v53  ;;  %15628 = vmatprep.subr.bf16.mxu0 %v17874_v9  ;;  %v17891_v53 = vld [vmem:[%s19798_s0 + $0x1f8] ss:$12 sps:$4 sm:$0xff]   ;;  %v17896_v9 = vld [vmem:[%s19798_s0 + $0x214] ss:$12 sps:$4 sm:$0xff]  }
0x1b6d   : > { %12342 = vmatpush1.bf16.msra.mxu1 %v17871_v50  ;;  %v17926_v50 = vld [vmem:[%s19798_s0 + $0x380] ss:$12 sps:$4 sm:$0xff]  }
0x1b6e   : > { %15629 = vmatpush3.bf16.msra.mxu0 %v17875_v25  ;;  %12384 = vmatprep.subr.bf16.mxu1 %v17878_v19  ;;  %v17894_v25 = vld [vmem:[%s19798_s0 + $0x210] ss:$12 sps:$4 sm:$0xff]   ;;  %v17899_v19 = vld [vmem:[%s19798_s0 + $0x22c] ss:$12 sps:$4 sm:$0xff]  }
0x1b6f   : > { %15654 = vmatprep.subr.bf16.mxu0 %v17900_v36  ;;  %v17935_v36 = vld [vmem:[%s19798_s0 + $0x470] ss:$12 sps:$4 sm:$0xff]  }
0x1b70   : > { %12344 = vmatmul.mubr.bf16.vlgmr.msra.gmra.mrb[172].mxu1 %v22537_v33  ;;  %v17882_v33 = vld [vmem:[%s19798_s0 + $0x1b0] ss:$12 sps:$4 sm:$0xff]  }
0x1b71   : > { %12847 = vmatmul.mubr.bf16.vlgmr.msra.gmra.mrb[212].mxu0 %v22539_v55  ;;  %12353 = vmatprep.mubr.bf16.mxu1 %v22566_v10  ;;  %v17911_v10 = vld [vmem:[%s19798_s0 + $0x338] ss:$12 sps:$4 sm:$0xff]  }
0x1b72   : > { %12385 = vmatpush1.bf16.msra.mxu1 %v17876_v45  ;;  %12854 = vmatprep.mubr.bf16.mxu0 %v22568_v15  ;;  %v17897_v45 = vld [vmem:[%s19798_s0 + $0x228] ss:$12 sps:$4 sm:$0xff]  }
0x1b73   : > { %12386 = vmatprep.subr.bf16.mxu1 %v17881_v32  ;;  %15655 = vmatpush3.bf16.msra.mxu0 %v17901_v35  ;;  %v17904_v32 = vld [vmem:[%s19798_s0 + $0x244] ss:$12 sps:$4 sm:$0xff]  }
0x1b74   : > { %15656 = vmatprep.subr.bf16.mxu0 %v17905_v40  ;;  %v17936_v35 = vld [vmem:[%s19798_s0 + $0x3b0] ss:$12 sps:$4 sm:$0xff]   ;;  %v17940_v40 = vld [vmem:[%s19798_s0 + $0x548] ss:$12 sps:$4 sm:$0xff]  }
0x1b76   : > { %12387 = vmatpush1.bf16.msra.mxu1 %v17879_v14  ;;  %v17909_v14 = vld [vmem:[%s19798_s0 + $0x25c] ss:$12 sps:$4 sm:$0xff]  }
0x1b77   : > { %12388 = vmatprep.subr.bf16.mxu1 %v17884_v42  ;;  %15657 = vmatpush3.bf16.msra.mxu0 %v17906_v54  ;;  %v17914_v42 = vld [vmem:[%s19798_s0 + $0x274] ss:$12 sps:$4 sm:$0xff]   ;;  %v17912_v54 = vld [vmem:[%s19798_s0 + $0x270] ss:$12 sps:$4 sm:$0xff]  }
0x1b78   : > { %12354 = vmatmul.mubr.bf16.gmra.mrb[176].mxu1 %v22560_v41  ;;  %15658 = vmatprep.subr.bf16.mxu0 %v17910_v49  ;;  %v17920_v41 = vld [vmem:[%s19798_s0 + $0x428] ss:$12 sps:$4 sm:$0xff]   ;;  %v17919_v49 = vld [vmem:[%s19798_s0 + $0x28c] ss:$12 sps:$4 sm:$0xff]  }
0x1b79   : > { %12855 = vmatmul.mubr.bf16.gmra.mrb[216].mxu0 %v22562_v0  ;;  %12363 = vmatprep.mubr.bf16.mxu1 %v22592_v20  ;;  %v17921_v20 = vld [vmem:[%s19798_s0 + $0x368] ss:$12 sps:$4 sm:$0xff]  }
0x1b7a   : > { %12389 = vmatpush1.bf16.msra.mxu1 %v17882_v33  ;;  %12862 = vmatprep.mubr.bf16.mxu0 %v22594_v51  ;;  %v17917_v33 = vld [vmem:[%s19798_s0 + $0x288] ss:$12 sps:$4 sm:$0xff]  }
0x1b7b   : > { %12390 = vmatprep.subr.bf16.mxu1 %v17887_v52  ;;  %15659 = vmatpush3.bf16.msra.mxu0 %v17911_v10  ;;  %v17924_v52 = vld [vmem:[%s19798_s0 + $0x2a4] ss:$12 sps:$4 sm:$0xff]   ;;  %v7872_v10 = vsub.s32 4, %v21609_v26 }
0x1b7c   : > { %15660 = vmatprep.subr.bf16.mxu0 %v17915_v7  ;;  %v7880_v7 = vsub.s32 6, %v21609_v26 }
0x1b7e   : > { %12391 = vmatpush1.bf16.msra.mxu1 %v17885_v29  ;;  %v7876_v29 = vsub.s32 5, %v21609_v26 }
0x1b7f   : > { %12392 = vmatprep.subr.bf16.mxu1 %v17890_v63  ;;  %15661 = vmatpush3.bf16.msra.mxu0 %v17916_v6  ;;  %v7884_v63 = vsub.s32 7, %v21609_v26  ;;  %v17922_v6 = vld [vmem:[%s19798_s0 + $0x2a0] ss:$12 sps:$4 sm:$0xff]  }
0x1b80   : > { %12364 = vmatmul.mubr.bf16.gmra.mrb[180].mxu1 %v22586_v18  ;;  %15662 = vmatprep.subr.bf16.mxu0 %v17920_v41  ;;  %v17930_v18 = vld [vmem:[%s19798_s0 + $0x458] ss:$12 sps:$4 sm:$0xff]   ;;  %v22697_v41 = vrot.slane %v22492_v21, %v7872_v10 }
0x1b81   : > { %12863 = vmatmul.mubr.bf16.gmra.mrb[220].mxu0 %v22588_v13  ;;  %12373 = vmatprep.mubr.bf16.mxu1 %v22618_v47  ;;  %v17931_v47 = vld [vmem:[%s19798_s0 + $0x398] ss:$12 sps:$4 sm:$0xff]  }
0x1b82   : > { %12393 = vmatpush1.bf16.msra.mxu1 %v17888_v1  ;;  %12870 = vmatprep.mubr.bf16.mxu0 %v22620_v5  ;;  %v17929_v1 = vld [vmem:[%s19798_s0 + $0x2bc] ss:$12 sps:$4 sm:$0xff]   ;;  %v17939_v10 = vld [vmem:[%s19798_s0 + $0x2ec] ss:$12 sps:$4 sm:$0xff]  }
0x1b83   : > { %12394 = vmatprep.subr.bf16.mxu1 %v17893_v3  ;;  %15663 = vmatpush3.bf16.msra.mxu0 %v17921_v20  ;;  %v22701_v3 = vrot.slane %v22492_v21, %v7880_v7  ;;  %v22704_v20 = vrot.slane %v22492_v21, %v7876_v29 }
0x1b84   : > { %15664 = vmatprep.subr.bf16.mxu0 %v17925_v39  ;;  %v22707_v39 = vrot.slane %v22492_v21, %v7884_v63 }
0x1b86   : > { %12395 = vmatpush1.bf16.msra.mxu1 %v17891_v53 }
0x1b87   : > { %12396 = vmatprep.subr.bf16.mxu1 %v17896_v9  ;;  %15665 = vmatpush3.bf16.msra.mxu0 %v17926_v50  ;;  %v17927_v9 = vld [vmem:[%s19798_s0 + $0x2b8] ss:$12 sps:$4 sm:$0xff]  }
0x1b88   : > { %12374 = vmatmul.mubr.bf16.gmra.mrb[184].mxu1 %v22612_v34  ;;  %15666 = vmatprep.subr.bf16.mxu0 %v17930_v18  ;;  %v17902_v34 = vld [vmem:[%s19798_s0 + $0x240] ss:$12 sps:$4 sm:$0xff]  }
0x1b89   : > { %12871 = vmatmul.mubr.bf16.gmra.mrb[224].mxu0 %v22614_v28  ;;  %12416 = vmatprep.mubr.bf16.mxu1 %v22543_v59  ;;  %v17907_v59 = vld [vmem:[%s19798_s0 + $0x258] ss:$12 sps:$4 sm:$0xff]  }
0x1b8a   : > { %12397 = vmatpush1.bf16.msra.mxu1 %v17894_v25 }
0x1b8b   : > { %12398 = vmatprep.subr.bf16.mxu1 %v17899_v19  ;;  %15667 = vmatpush3.bf16.msra.mxu0 %v17931_v47  ;;  %v17934_v19 = vld [vmem:[%s19798_s0 + $0x2d4] ss:$12 sps:$4 sm:$0xff]  }
0x1b8c   : > { %15668 = vmatprep.subr.bf16.mxu0 %v17935_v36 }
0x1b8e   : > { %12399 = vmatpush1.bf16.msra.mxu1 %v17897_v45 }
0x1b8f   : > { %12400 = vmatprep.subr.bf16.mxu1 %v17904_v32  ;;  %15669 = vmatpush3.bf16.msra.mxu0 %v17936_v35 }
0x1b90   : > { %15694 = vmatprep.subr.bf16.mxu0 %v17940_v40 }
0x1b92   : > { %12401 = vmatpush1.bf16.msra.mxu1 %v17902_v34 }
0x1b93   : > { %12402 = vmatprep.subr.bf16.mxu1 %v17909_v14 }
0x1b96   : > { %12403 = vmatpush1.bf16.msra.mxu1 %v17907_v59 }
0x1b97   : > { %12404 = vmatprep.subr.bf16.mxu1 %v17914_v42 }
0x1b9a   : > { %12405 = vmatpush1.bf16.msra.mxu1 %v17912_v54  ;;  %v17932_v54 = vld [vmem:[%s19798_s0 + $0x2d0] ss:$12 sps:$4 sm:$0xff]  }
0x1b9b   : > { %12406 = vmatprep.subr.bf16.mxu1 %v17919_v49 }
0x1b9e   : > { %12407 = vmatpush1.bf16.msra.mxu1 %v17917_v33 }
0x1b9f   : > { %12408 = vmatprep.subr.bf16.mxu1 %v17924_v52 }
0x1ba2   : > { %12409 = vmatpush1.bf16.msra.mxu1 %v17922_v6  ;;  %v9753_v53 = vpop.f32.mrb[140].mxu1 }
0x1ba3   : > { %v16258_v50 = vadd.f32 %v9753_v53, %v22697_v41  ;;  %v9899_v18 = vpop.f32.mrb[164].mxu0  ;;  %v9755_v25 = vpop.f32.mrb[141].mxu1  ;;  %12410 = vmatprep.subr.bf16.mxu1 %v17929_v1 }
0x1ba4   : > { %v16274_v47 = vadd.f32 %v9899_v18, %v22701_v3  ;;  %v16259_v36 = vadd.f32 %v9755_v25, %v22704_v20  ;;  %v9901_v45 = vpop.f32.mrb[165].mxu0  ;;  %v9757_v32 = vpop.f32.mrb[142].mxu1 }
0x1ba5   : > { %v16275_v21 = vadd.f32 %v9901_v45, %v22707_v39  ;;  %v16260_v35 = vadd.f32 %v9757_v32, %v22697_v41  ;;  %v9903_v40 = vpop.f32.mrb[166].mxu0  ;;  %v9759_v34 = vpop.f32.mrb[143].mxu1  ;;  %v10234_v49 = vmax.f32 %v16258_v50, 0.0  ;;  %v17937_v45 = vld [vmem:[%s19798_s0 + $0x2e8] ss:$12 sps:$4 sm:$0xff]  }
0x1ba6   : > { %v16276_v14 = vadd.f32 %v9903_v40, %v22701_v3  ;;  %12411 = vmatpush1.bf16.msra.mxu1 %v17927_v9  ;;  %v16261_v59 = vadd.f32 %v9759_v34, %v22704_v20  ;;  %v9905_v42 = vpop.f32.mrb[167].mxu0  ;;  %v10236_v7 = vmax.f32 %v16274_v47, 0.0  ;;  %v10235_v29 = vmax.f32 %v16259_v36, 0.0  ;;  %v17941_v32 = vld [vmem:[%s19798_s0 + $0x488] ss:$12 sps:$4 sm:$0xff]  }
0x1ba7   : > { %v10246_v33 = vmax.f32 %v16260_v35, 0.0  ;;  %v16277_v52 = vadd.f32 %v9905_v42, %v22707_v39  ;;  %12412 = vmatprep.subr.bf16.mxu1 %v17934_v19  ;;  %v10237_v1 = vmax.f32 %v16275_v21, 0.0  ;;  %v17944_v40 = vld [vmem:[%s19798_s0 + $0x304] ss:$12 sps:$4 sm:$0xff]   ;;  %v17945_v21 = vld [vmem:[%s19798_s0 + $0x560] ss:$12 sps:$4 sm:$0xff]  }
0x1ba8   : > { %v10248_v63 = vmax.f32 %v16276_v14, 0.0  ;;  %v10247_v6 = vmax.f32 %v16261_v59, 0.0 }
0x1ba9   : > { %v22721_v53 = vpack.c.bf16 %v10246_v33, %v10234_v49  ;;  %v10249_v9 = vmax.f32 %v16277_v52, 0.0 }
0x1baa   : > { %v22723_v18 = vpack.c.bf16 %v10248_v63, %v10236_v7  ;;  %v22725_v50 = vpack.c.bf16 %v10247_v6, %v10235_v29  ;;  %12413 = vmatpush1.bf16.msra.mxu1 %v17932_v54  ;;  %v9763_v25 = vpop.f32.mrb[144].mxu1  ;;  %v17942_v63 = vld [vmem:[%s19798_s0 + $0x300] ss:$12 sps:$4 sm:$0xff]  }
0x1bab   : > { %v22729_v19 = vpack.c.bf16 %v10249_v9, %v10237_v1  ;;  %v16262_v47 = vadd.f32 %v9763_v25, %v22697_v41  ;;  %v9909_v36 = vpop.f32.mrb[168].mxu0  ;;  %v9765_v35 = vpop.f32.mrb[145].mxu1  ;;  %12414 = vmatprep.subr.bf16.mxu1 %v17939_v10  ;;  %v17946_v25 = vld [vmem:[%s19798_s0 + $0x4a0] ss:$12 sps:$4 sm:$0xff]  }
0x1bac   : > { %v16278_v34 = vadd.f32 %v9909_v36, %v22701_v3  ;;  %v16263_v14 = vadd.f32 %v9765_v35, %v22704_v20  ;;  %v9911_v59 = vpop.f32.mrb[169].mxu0  ;;  %v9767_v42 = vpop.f32.mrb[146].mxu1  ;;  %12911 = vmatprep.mubr.bf16.mxu0 %v22725_v50  ;;  %v17949_v36 = vld [vmem:[%s19798_s0 + $0x31c] ss:$12 sps:$4 sm:$0xff]  }
0x1bad   : > { %v16279_v54 = vadd.f32 %v9911_v59, %v22707_v39  ;;  %v16264_v49 = vadd.f32 %v9767_v42, %v22697_v41  ;;  %v9913_v33 = vpop.f32.mrb[170].mxu0  ;;  %v9769_v52 = vpop.f32.mrb[147].mxu1  ;;  %12912 = vmatmul.mubr.bf16.vlgmr.msra.gmra.mrb[228].mxu0 %v22721_v53  ;;  %v10258_v6 = vmax.f32 %v16262_v47, 0.0 }
0x1bae   : > { %v16280_v10 = vadd.f32 %v9913_v33, %v22701_v3  ;;  %12415 = vmatpush1.bf16.msra.mxu1 %v17937_v45  ;;  %v16265_v7 = vadd.f32 %v9769_v52, %v22704_v20  ;;  %v9915_v29 = vpop.f32.mrb[171].mxu0  ;;  %15695 = vmatpush3.bf16.msra.mxu0 %v17941_v32  ;;  %v10260_v35 = vmax.f32 %v16278_v34, 0.0  ;;  %v10259_v59 = vmax.f32 %v16263_v14, 0.0  ;;  %v17950_v45 = vld [vmem:[%s19798_s0 + $0x578] ss:$12 sps:$4 sm:$0xff]  }
0x1baf   : > { %v10270_v1 = vmax.f32 %v16264_v49, 0.0  ;;  %v16281_v9 = vadd.f32 %v9915_v29, %v22707_v39  ;;  %12457 = vmatprep.subr.bf16.mxu1 %v17944_v40  ;;  %15696 = vmatprep.subr.bf16.mxu0 %v17945_v21  ;;  %v10261_v24 = vmax.f32 %v16279_v54, 0.0  ;;  %v17947_v34 = vld [vmem:[%s19798_s0 + $0x318] ss:$12 sps:$4 sm:$0xff]  }
0x1bb0   : > { %v10272_v42 = vmax.f32 %v16280_v10, 0.0  ;;  %v10271_v33 = vmax.f32 %v16265_v7, 0.0  ;;  %v17951_v7 = vld [vmem:[%s19798_s0 + $0x4b8] ss:$12 sps:$4 sm:$0xff]  }
0x1bb1   : > { %v22747_v52 = vpack.c.bf16 %v10270_v1, %v10258_v6  ;;  %v10273_v32 = vmax.f32 %v16281_v9, 0.0  ;;  %12417 = vmatmul.mubr.bf16.vlgmr.msra.gmra.mrb[172].mxu1 %v22539_v55  ;;  %v17954_v55 = vld [vmem:[%s19798_s0 + $0x334] ss:$12 sps:$4 sm:$0xff]  }
0x1bb2   : > { %v22750_v47 = vpack.c.bf16 %v10272_v42, %v10260_v35  ;;  %v22752_v40 = vpack.c.bf16 %v10271_v33, %v10259_v59  ;;  %12426 = vmatprep.mubr.bf16.mxu1 %v22568_v15  ;;  %12458 = vmatpush1.bf16.msra.mxu1 %v17942_v63  ;;  %v9773_v21 = vpop.f32.mrb[148].mxu1  ;;  %v17952_v33 = vld [vmem:[%s19798_s0 + $0x330] ss:$12 sps:$4 sm:$0xff]  }
0x1bb3   : > { %v22756_v14 = vpack.c.bf16 %v10273_v32, %v10261_v24  ;;  %v16266_v54 = vadd.f32 %v9773_v21, %v22697_v41  ;;  %v9919_v49 = vpop.f32.mrb[172].mxu0  ;;  %15697 = vmatpush3.bf16.msra.mxu0 %v17946_v25  ;;  %v9775_v10 = vpop.f32.mrb[149].mxu1  ;;  %12459 = vmatprep.subr.bf16.mxu1 %v17949_v36  ;;  %v17955_v24 = vld [vmem:[%s19798_s0 + $0x590] ss:$12 sps:$4 sm:$0xff]  }
0x1bb4   : > { %v16282_v29 = vadd.f32 %v9919_v49, %v22701_v3  ;;  %v16267_v6 = vadd.f32 %v9775_v10, %v22704_v20  ;;  %v9921_v15 = vpop.f32.mrb[173].mxu0  ;;  %v9777_v63 = vpop.f32.mrb[150].mxu1  ;;  %12919 = vmatprep.mubr.bf16.mxu0 %v22752_v40  ;;  %15698 = vmatprep.subr.bf16.mxu0 %v17950_v45  ;;  %v17956_v49 = vld [vmem:[%s19798_s0 + $0x4d0] ss:$12 sps:$4 sm:$0xff]   ;;  %v17959_v10 = vld [vmem:[%s19798_s0 + $0x34c] ss:$12 sps:$4 sm:$0xff]  }
0x1bb5   : > { %v16283_v1 = vadd.f32 %v9921_v15, %v22707_v39  ;;  %v16268_v9 = vadd.f32 %v9777_v63, %v22697_v41  ;;  %v9923_v25 = vpop.f32.mrb[174].mxu0  ;;  %v9779_v36 = vpop.f32.mrb[151].mxu1  ;;  %12920 = vmatmul.mubr.bf16.gmra.mrb[232].mxu0 %v22747_v52  ;;  %v10282_v45 = vmax.f32 %v16266_v54, 0.0 }
0x1bb6   : > { %v16284_v35 = vadd.f32 %v9923_v25, %v22701_v3  ;;  %12460 = vmatpush1.bf16.msra.mxu1 %v17947_v34  ;;  %v16269_v59 = vadd.f32 %v9779_v36, %v22704_v20  ;;  %v9925_v42 = vpop.f32.mrb[175].mxu0  ;;  %v10284_v15 = vmax.f32 %v16282_v29, 0.0  ;;  %v10283_v63 = vmax.f32 %v16267_v6, 0.0  ;;  %v17960_v34 = vld [vmem:[%s19798_s0 + $0x5a8] ss:$12 sps:$4 sm:$0xff]  }
0x1bb7   : > { %v10294_v32 = vmax.f32 %v16268_v9, 0.0  ;;  %v16285_v21 = vadd.f32 %v9925_v42, %v22707_v39  ;;  %15699 = vmatpush3.bf16.msra.mxu0 %v17951_v7  ;;  %12461 = vmatprep.subr.bf16.mxu1 %v17954_v55  ;;  %v10285_v25 = vmax.f32 %v16283_v1, 0.0  ;;  %v17957_v29 = vld [vmem:[%s19798_s0 + $0x348] ss:$12 sps:$4 sm:$0xff]  }
0x1bb8   : > { %v10296_v56 = vmax.f32 %v16284_v35, 0.0  ;;  %v10295_v17 = vmax.f32 %v16269_v59, 0.0  ;;  %15700 = vmatprep.subr.bf16.mxu0 %v17955_v24  ;;  %v17961_v59 = vld [vmem:[%s19798_s0 + $0x4e8] ss:$12 sps:$4 sm:$0xff]  }
0x1bb9   : > { %v22775_v36 = vpack.c.bf16 %v10294_v32, %v10282_v45  ;;  %v10297_v54 = vmax.f32 %v16285_v21, 0.0  ;;  %12427 = vmatmul.mubr.bf16.gmra.mrb[176].mxu1 %v22562_v0  ;;  %v17964_v0 = vld [vmem:[%s19798_s0 + $0x364] ss:$12 sps:$4 sm:$0xff]  }
0x1bba   : > { %v22778_v9 = vpack.c.bf16 %v10296_v56, %v10284_v15  ;;  %v22780_v7 = vpack.c.bf16 %v10295_v17, %v10283_v63  ;;  %12436 = vmatprep.mubr.bf16.mxu1 %v22594_v51  ;;  %12462 = vmatpush1.bf16.msra.mxu1 %v17952_v33  ;;  %v9783_v55 = vpop.f32.mrb[152].mxu1  ;;  %v17965_v33 = vld [vmem:[%s19798_s0 + $0x5c0] ss:$12 sps:$4 sm:$0xff]  }
0x1bbb   : > { %v22784_v6 = vpack.c.bf16 %v10297_v54, %v10285_v25  ;;  %v16270_v24 = vadd.f32 %v9783_v55, %v22697_v41  ;;  %v9929_v1 = vpop.f32.mrb[176].mxu0  ;;  %15701 = vmatpush3.bf16.msra.mxu0 %v17956_v49  ;;  %v9785_v35 = vpop.f32.mrb[153].mxu1  ;;  %12463 = vmatprep.subr.bf16.mxu1 %v17959_v10  ;;  %v17962_v25 = vld [vmem:[%s19798_s0 + $0x360] ss:$12 sps:$4 sm:$0xff]  }
0x1bbc   : > { %v16286_v56 = vadd.f32 %v9929_v1, %v22701_v3  ;;  %v16271_v17 = vadd.f32 %v9785_v35, %v22704_v20  ;;  %v9931_v51 = vpop.f32.mrb[177].mxu0  ;;  %v9787_v42 = vpop.f32.mrb[154].mxu1  ;;  %12927 = vmatprep.mubr.bf16.mxu0 %v22780_v7  ;;  %15702 = vmatprep.subr.bf16.mxu0 %v17960_v34  ;;  %v17966_v1 = vld [vmem:[%s19798_s0 + $0x500] ss:$12 sps:$4 sm:$0xff]  }
0x1bbd   : > { %v16287_v45 = vadd.f32 %v9931_v51, %v22707_v39  ;;  %v16272_v32 = vadd.f32 %v9787_v42, %v22697_v41  ;;  %v9933_v21 = vpop.f32.mrb[178].mxu0  ;;  %v9789_v49 = vpop.f32.mrb[155].mxu1  ;;  %12928 = vmatmul.mubr.bf16.gmra.mrb[236].mxu0 %v22775_v36  ;;  %v10306_v34 = vmax.f32 %v16270_v24, 0.0  ;;  %v17969_v41 = vld [vmem:[%s19798_s0 + $0x37c] ss:$12 sps:$4 sm:$0xff]  }
0x1bbe   : > { %v16288_v10 = vadd.f32 %v9933_v21, %v22701_v3  ;;  %12464 = vmatpush1.bf16.msra.mxu1 %v17957_v29  ;;  %v16273_v15 = vadd.f32 %v9789_v49, %v22704_v20  ;;  %v9935_v63 = vpop.f32.mrb[179].mxu0  ;;  %v10308_v35 = vmax.f32 %v16286_v56, 0.0  ;;  %v10307_v51 = vmax.f32 %v16271_v17, 0.0  ;;  %v17970_v29 = vld [vmem:[%s19798_s0 + $0x5d8] ss:$12 sps:$4 sm:$0xff]  }
0x1bbf   : > { %v10318_v54 = vmax.f32 %v16272_v32, 0.0  ;;  %v16289_v55 = vadd.f32 %v9935_v63, %v22707_v39  ;;  %15703 = vmatpush3.bf16.msra.mxu0 %v17961_v59  ;;  %12465 = vmatprep.subr.bf16.mxu1 %v17964_v0  ;;  %v10309_v20 = vmax.f32 %v16287_v45, 0.0  ;;  %v17967_v0 = vld [vmem:[%s19798_s0 + $0x378] ss:$12 sps:$4 sm:$0xff]   ;;  %v17976_v45 = vld [vmem:[%s19798_s0 + $0x530] ss:$12 sps:$4 sm:$0xff]  }
0x1bc0   : > { %v10320_v42 = vmax.f32 %v16288_v10, 0.0  ;;  %v10319_v3 = vmax.f32 %v16273_v15, 0.0  ;;  %15704 = vmatprep.subr.bf16.mxu0 %v17965_v33  ;;  %v17971_v17 = vld [vmem:[%s19798_s0 + $0x518] ss:$12 sps:$4 sm:$0xff]   ;;  %v17974_v33 = vld [vmem:[%s19798_s0 + $0x394] ss:$12 sps:$4 sm:$0xff]  }
0x1bc1   : > { %v22803_v21 = vpack.c.bf16 %v10318_v54, %v10306_v34  ;;  %v10321_v24 = vmax.f32 %v16289_v55, 0.0  ;;  %12437 = vmatmul.mubr.bf16.gmra.mrb[180].mxu1 %v22588_v13  ;;  %v17975_v13 = vld [vmem:[%s19798_s0 + $0x5f0] ss:$12 sps:$4 sm:$0xff]   ;;  %v17979_v32 = vld [vmem:[%s19798_s0 + $0x3ac] ss:$12 sps:$4 sm:$0xff]  }
0x1bc2   : > { %v22806_v39 = vpack.c.bf16 %v10320_v42, %v10308_v35  ;;  %v22808_v59 = vpack.c.bf16 %v10319_v3, %v10307_v51  ;;  %12446 = vmatprep.mubr.bf16.mxu1 %v22620_v5  ;;  %12466 = vmatpush1.bf16.msra.mxu1 %v17962_v25  ;;  %v17972_v5 = vld [vmem:[%s19798_s0 + $0x390] ss:$12 sps:$4 sm:$0xff]   ;;  %v18004_v49 = vld [vmem:[%s19798_s0 + $0x6c8] ss:$12 sps:$4 sm:$0xff]   ;;  %v18009_v25 = vld [vmem:[%s19798_s0 + $0x6e0] ss:$12 sps:$4 sm:$0xff]  }
0x1bc3   : > { %v22812_v56 = vpack.c.bf16 %v10321_v24, %v10309_v20  ;;  %15705 = vmatpush3.bf16.msra.mxu0 %v17966_v1  ;;  %12467 = vmatprep.subr.bf16.mxu1 %v17969_v41  ;;  %v17977_v10 = vld [vmem:[%s19798_s0 + $0x3a8] ss:$12 sps:$4 sm:$0xff]   ;;  %v17982_v15 = vld [vmem:[%s19798_s0 + $0x3c4] ss:$12 sps:$4 sm:$0xff]   ;;  %v18010_v34 = vld [vmem:[%s19798_s0 + $0x620] ss:$12 sps:$4 sm:$0xff]  }
0x1bc4   : > { %12935 = vmatprep.mubr.bf16.mxu0 %v22808_v59  ;;  %15706 = vmatprep.subr.bf16.mxu0 %v17970_v29  ;;  %v18005_v63 = vld [vmem:[%s19798_s0 + $0x608] ss:$12 sps:$4 sm:$0xff]   ;;  %v18014_v54 = vld [vmem:[%s19798_s0 + $0x6f8] ss:$12 sps:$4 sm:$0xff]   ;;  %v18019_v35 = vld [vmem:[%s19798_s0 + $0x710] ss:$12 sps:$4 sm:$0xff]  }
0x1bc5   : > { %12936 = vmatmul.mubr.bf16.gmra.mrb[240].mxu0 %v22803_v21  ;;  %v17983_v55 = vld [vmem:[%s19798_s0 + $0x3d8] ss:$12 sps:$4 sm:$0xff]   ;;  %v17988_v1 = vld [vmem:[%s19798_s0 + $0x3f4] ss:$12 sps:$4 sm:$0xff]   ;;  %v17986_v51 = vld [vmem:[%s19798_s0 + $0x3f0] ss:$12 sps:$4 sm:$0xff]  }
0x1bc6   : > { %12468 = vmatpush1.bf16.msra.mxu1 %v17967_v0  ;;  %12976 = vmatprep.mubr.bf16.mxu0 %v22729_v19  ;;  %v18015_v41 = vld [vmem:[%s19798_s0 + $0x638] ss:$12 sps:$4 sm:$0xff]   ;;  %v18020_v3 = vld [vmem:[%s19798_s0 + $0x650] ss:$12 sps:$4 sm:$0xff]   ;;  %v18024_v29 = vld [vmem:[%s19798_s0 + $0x728] ss:$12 sps:$4 sm:$0xff]  }
0x1bc7   : > { %15707 = vmatpush3.bf16.msra.mxu0 %v17971_v17  ;;  %12469 = vmatprep.subr.bf16.mxu1 %v17974_v33  ;;  %v17991_v42 = vld [vmem:[%s19798_s0 + $0x40c] ss:$12 sps:$4 sm:$0xff]   ;;  %v17989_v20 = vld [vmem:[%s19798_s0 + $0x408] ss:$12 sps:$4 sm:$0xff]   ;;  %v17994_v24 = vld [vmem:[%s19798_s0 + $0x424] ss:$12 sps:$4 sm:$0xff]  }
0x1bc8   : > { %15708 = vmatprep.subr.bf16.mxu0 %v17975_v13  ;;  %v18025_v0 = vld [vmem:[%s19798_s0 + $0x668] ss:$12 sps:$4 sm:$0xff]   ;;  %v18029_v17 = vld [vmem:[%s19798_s0 + $0x740] ss:$12 sps:$4 sm:$0xff]  }
0x1bc9   : > { %12447 = vmatmul.mubr.bf16.gmra.mrb[184].mxu1 %v22614_v28  ;;  %v17980_v28 = vld [vmem:[%s19798_s0 + $0x3c0] ss:$12 sps:$4 sm:$0xff]   ;;  %v17997_v13 = vld [vmem:[%s19798_s0 + $0x43c] ss:$12 sps:$4 sm:$0xff]  }
0x1bca   : > { %12470 = vmatpush1.bf16.msra.mxu1 %v17972_v5  ;;  %12489 = vmatprep.mubr.bf16.mxu1 %v22725_v50  ;;  %v17985_v50 = vld [vmem:[%s19798_s0 + $0x3dc] ss:$12 sps:$4 sm:$0xff]   ;;  %v17992_v33 = vld [vmem:[%s19798_s0 + $0x420] ss:$12 sps:$4 sm:$0xff]  }
0x1bcb   : > { %15709 = vmatpush3.bf16.msra.mxu0 %v17976_v45  ;;  %12471 = vmatprep.subr.bf16.mxu1 %v17979_v32  ;;  %v18030_v5 = vld [vmem:[%s19798_s0 + $0x680] ss:$12 sps:$4 sm:$0xff]   ;;  %v18034_v45 = vld [vmem:[%s19798_s0 + $0x758] ss:$12 sps:$4 sm:$0xff]  }
0x1bcc   : > { %15734 = vmatprep.subr.bf16.mxu0 %v18004_v49  ;;  %v17995_v32 = vld [vmem:[%s19798_s0 + $0x438] ss:$12 sps:$4 sm:$0xff]   ;;  %v18000_v49 = vld [vmem:[%s19798_s0 + $0x454] ss:$12 sps:$4 sm:$0xff]  }
0x1bce   : > { %12472 = vmatpush1.bf16.msra.mxu1 %v17977_v10  ;;  %12977 = vmatmul.mubr.bf16.vlgmr.msra.gmra.mrb[244].mxu0 %v22723_v18  ;;  %v18035_v10 = vld [vmem:[%s19798_s0 + $0x698] ss:$12 sps:$4 sm:$0xff]  }
0x1bcf   : > { %12984 = vmatprep.mubr.bf16.mxu0 %v22756_v14  ;;  %12473 = vmatprep.subr.bf16.mxu1 %v17982_v15  ;;  %v18039_v15 = vld [vmem:[%s19798_s0 + $0x770] ss:$12 sps:$4 sm:$0xff]  }
0x1bd0   : > { %15735 = vmatpush3.bf16.msra.mxu0 %v18005_v63  ;;  %v17998_v63 = vld [vmem:[%s19798_s0 + $0x450] ss:$12 sps:$4 sm:$0xff]  }
0x1bd1   : > { %15736 = vmatprep.subr.bf16.mxu0 %v18009_v25  ;;  %v18003_v25 = vld [vmem:[%s19798_s0 + $0x46c] ss:$12 sps:$4 sm:$0xff]  }
0x1bd2   : > { %12474 = vmatpush1.bf16.msra.mxu1 %v17980_v28  ;;  %v18040_v28 = vld [vmem:[%s19798_s0 + $0x6b0] ss:$12 sps:$4 sm:$0xff]  }
0x1bd3   : > { %12475 = vmatprep.subr.bf16.mxu1 %v17985_v50  ;;  %v18044_v50 = vld [vmem:[%s19798_s0 + $0x848] ss:$12 sps:$4 sm:$0xff]  }
0x1bd4   : > { %15737 = vmatpush3.bf16.msra.mxu0 %v18010_v34  ;;  %v18001_v34 = vld [vmem:[%s19798_s0 + $0x468] ss:$12 sps:$4 sm:$0xff]  }
0x1bd5   : > { %15738 = vmatprep.subr.bf16.mxu0 %v18014_v54  ;;  %v18008_v54 = vld [vmem:[%s19798_s0 + $0x484] ss:$12 sps:$4 sm:$0xff]  }
0x1bd6   : > { %12476 = vmatpush1.bf16.msra.mxu1 %v17983_v55  ;;  %12985 = vmatmul.mubr.bf16.gmra.mrb[248].mxu0 %v22750_v47  ;;  %v18006_v55 = vld [vmem:[%s19798_s0 + $0x480] ss:$12 sps:$4 sm:$0xff]  }
0x1bd7   : > { %12992 = vmatprep.mubr.bf16.mxu0 %v22784_v6  ;;  %12477 = vmatprep.subr.bf16.mxu1 %v17988_v1  ;;  %v18013_v1 = vld [vmem:[%s19798_s0 + $0x49c] ss:$12 sps:$4 sm:$0xff]  }
0x1bd8   : > { %15739 = vmatpush3.bf16.msra.mxu0 %v18015_v41  ;;  %v18011_v41 = vld [vmem:[%s19798_s0 + $0x498] ss:$12 sps:$4 sm:$0xff]  }
0x1bd9   : > { %15740 = vmatprep.subr.bf16.mxu0 %v18019_v35  ;;  %v18018_v35 = vld [vmem:[%s19798_s0 + $0x4b4] ss:$12 sps:$4 sm:$0xff]  }
0x1bda   : > { %12478 = vmatpush1.bf16.msra.mxu1 %v17986_v51  ;;  %v18016_v51 = vld [vmem:[%s19798_s0 + $0x4b0] ss:$12 sps:$4 sm:$0xff]  }
0x1bdb   : > { %12479 = vmatprep.subr.bf16.mxu1 %v17991_v42  ;;  %v18023_v42 = vld [vmem:[%s19798_s0 + $0x4cc] ss:$12 sps:$4 sm:$0xff]  }
0x1bdc   : > { %15741 = vmatpush3.bf16.msra.mxu0 %v18020_v3  ;;  %v18028_v3 = vld [vmem:[%s19798_s0 + $0x4e4] ss:$12 sps:$4 sm:$0xff]  }
0x1bdd   : > { %15742 = vmatprep.subr.bf16.mxu0 %v18024_v29  ;;  %v18026_v29 = vld [vmem:[%s19798_s0 + $0x4e0] ss:$12 sps:$4 sm:$0xff]  }
0x1bde   : > { %12480 = vmatpush1.bf16.msra.mxu1 %v17989_v20  ;;  %12993 = vmatmul.mubr.bf16.gmra.mrb[252].mxu0 %v22778_v9  ;;  %v18033_v20 = vld [vmem:[%s19798_s0 + $0x4fc] ss:$12 sps:$4 sm:$0xff]  }
0x1bdf   : > { %13000 = vmatprep.mubr.bf16.mxu0 %v22812_v56  ;;  %12481 = vmatprep.subr.bf16.mxu1 %v17994_v24 }
0x1be0   : > { %15743 = vmatpush3.bf16.msra.mxu0 %v18025_v0  ;;  %v24093_v0 = vsub.s32 3, %v21609_v26 }
0x1be1   : > { %15744 = vmatprep.subr.bf16.mxu0 %v18029_v17 }
0x1be2   : > { %12482 = vmatpush1.bf16.msra.mxu1 %v17992_v33  ;;  %v18031_v33 = vld [vmem:[%s19798_s0 + $0x4f8] ss:$12 sps:$4 sm:$0xff]  }
0x1be3   : > { %12483 = vmatprep.subr.bf16.mxu1 %v17997_v13 }
0x1be4   : > { %15745 = vmatpush3.bf16.msra.mxu0 %v18030_v5  ;;  %v18038_v5 = vld [vmem:[%s19798_s0 + $0x514] ss:$12 sps:$4 sm:$0xff]  }
0x1be5   : > { %15746 = vmatprep.subr.bf16.mxu0 %v18034_v45 }
0x1be6   : > { %12484 = vmatpush1.bf16.msra.mxu1 %v17995_v32  ;;  %13001 = vmatmul.mubr.bf16.gmra.mrb[0].mxu0 %v22806_v39 }
0x1be7   : > { %12485 = vmatprep.subr.bf16.mxu1 %v18000_v49 }
0x1be8   : > { %15747 = vmatpush3.bf16.msra.mxu0 %v18035_v10 }
0x1be9   : > { %15748 = vmatprep.subr.bf16.mxu0 %v18039_v15 }
0x1bea   : > { %12486 = vmatpush1.bf16.msra.mxu1 %v17998_v63 }
0x1beb   : > { %12487 = vmatprep.subr.bf16.mxu1 %v18003_v25 }
0x1bec   : > { %15749 = vmatpush3.bf16.msra.mxu0 %v18040_v28 }
0x1bed   : > { %15774 = vmatprep.subr.bf16.mxu0 %v18044_v50  ;;  %v18036_v50 = vld [vmem:[%s19798_s0 + $0x510] ss:$12 sps:$4 sm:$0xff]  }
0x1bee   : > { %12488 = vmatpush1.bf16.msra.mxu1 %v18001_v34 }
0x1bef   : > { %12530 = vmatprep.subr.bf16.mxu1 %v18008_v54 }
0x1bf1   : > { %12490 = vmatmul.mubr.bf16.vlgmr.msra.gmra.mrb[172].mxu1 %v22721_v53  ;;  %v18021_v53 = vld [vmem:[%s19798_s0 + $0x4c8] ss:$12 sps:$4 sm:$0xff]  }
0x1bf2   : > { %12499 = vmatprep.mubr.bf16.mxu1 %v22752_v40  ;;  %12531 = vmatpush1.bf16.msra.mxu1 %v18006_v55  ;;  %v7851_v40 = vld [vmem:[%s19796_s19 + $0x8] sm:$0xf] }
0x1bf3   : > { %12532 = vmatprep.subr.bf16.mxu1 %v18013_v1  ;;  %v22883_v24 = vrot.slane %v7851_v40, %v21612_v31  ;;  %v22895_v17 = vrot.slane %v7851_v40, %v24093_v0  ;;  %v18043_v1 = vld [vmem:[%s19798_s0 + $0x52c] ss:$12 sps:$4 sm:$0xff]  }
0x1bf6   : > { %12533 = vmatpush1.bf16.msra.mxu1 %v18011_v41 }
0x1bf7   : > { %12534 = vmatprep.subr.bf16.mxu1 %v18018_v35 }
0x1bf9   : > { %12500 = vmatmul.mubr.bf16.gmra.mrb[176].mxu1 %v22747_v52  ;;  %v22887_v52 = vrot.slane %v7851_v40, %v21620_v4 }
0x1bfa   : > { %12509 = vmatprep.mubr.bf16.mxu1 %v22780_v7  ;;  %12535 = vmatpush1.bf16.msra.mxu1 %v18016_v51  ;;  %v22890_v7 = vrot.slane %v7851_v40, %v21615_v62 }
0x1bfb   : > { %12536 = vmatprep.subr.bf16.mxu1 %v18023_v42 }
0x1bfe   : > { %12537 = vmatpush1.bf16.msra.mxu1 %v18021_v53 }
0x1bff   : > { %12538 = vmatprep.subr.bf16.mxu1 %v18028_v3 }
0x1c01   : > { %12510 = vmatmul.mubr.bf16.gmra.mrb[180].mxu1 %v22775_v36 }
0x1c02   : > { %12519 = vmatprep.mubr.bf16.mxu1 %v22808_v59  ;;  %12539 = vmatpush1.bf16.msra.mxu1 %v18026_v29 }
0x1c03   : > { %v10045_v13 = vpop.f32.mrb[156].mxu1  ;;  %12540 = vmatprep.subr.bf16.mxu1 %v18033_v20 }
0x1c04   : > { %v16290_v36 = vadd.f32 %v10045_v13, %v22883_v24  ;;  %v10191_v45 = vpop.f32.mrb[180].mxu0  ;;  %v10047_v32 = vpop.f32.mrb[157].mxu1 }
0x1c05   : > { %v16306_v49 = vadd.f32 %v10191_v45, %v22887_v52  ;;  %v16291_v10 = vadd.f32 %v10047_v32, %v22890_v7  ;;  %v10193_v59 = vpop.f32.mrb[181].mxu0  ;;  %v10049_v15 = vpop.f32.mrb[158].mxu1  ;;  %v18045_v45 = vld [vmem:[%s19798_s0 + $0x788] ss:$12 sps:$4 sm:$0xff]   ;;  %v18048_v32 = vld [vmem:[%s19798_s0 + $0x544] ss:$12 sps:$4 sm:$0xff]  }
0x1c06   : > { %v16307_v26 = vadd.f32 %v10193_v59, %v22895_v17  ;;  %v16292_v63 = vadd.f32 %v10049_v15, %v22883_v24  ;;  %v10195_v25 = vpop.f32.mrb[182].mxu0  ;;  %12541 = vmatpush1.bf16.msra.mxu1 %v18031_v33  ;;  %v10051_v28 = vpop.f32.mrb[159].mxu1  ;;  %v10238_v41 = vmax.f32 %v16290_v36, 0.0  ;;  %v18041_v33 = vld [vmem:[%s19798_s0 + $0x528] ss:$12 sps:$4 sm:$0xff]  }
0x1c07   : > { %v16308_v34 = vadd.f32 %v10195_v25, %v22887_v52  ;;  %v16293_v54 = vadd.f32 %v10051_v28, %v22890_v7  ;;  %v10197_v55 = vpop.f32.mrb[183].mxu0  ;;  %12542 = vmatprep.subr.bf16.mxu1 %v18038_v5  ;;  %v10240_v42 = vmax.f32 %v16306_v49, 0.0  ;;  %v10239_v53 = vmax.f32 %v16291_v10, 0.0  ;;  %v18049_v15 = vld [vmem:[%s19798_s0 + $0x860] ss:$12 sps:$4 sm:$0xff]  }
0x1c08   : > { %v10250_v35 = vmax.f32 %v16292_v63, 0.0  ;;  %v16309_v51 = vadd.f32 %v10197_v55, %v22895_v17  ;;  %v10241_v29 = vmax.f32 %v16307_v26, 0.0  ;;  %v18046_v55 = vld [vmem:[%s19798_s0 + $0x540] ss:$12 sps:$4 sm:$0xff]  }
0x1c09   : > { %v10252_v3 = vmax.f32 %v16308_v34, 0.0  ;;  %v10251_v40 = vmax.f32 %v16293_v54, 0.0  ;;  %12520 = vmatmul.mubr.bf16.gmra.mrb[184].mxu1 %v22803_v21 }
0x1c0a   : > { %v22910_v20 = vpack.c.bf16 %v10250_v35, %v10238_v41  ;;  %v10253_v0 = vmax.f32 %v16309_v51, 0.0  ;;  %12543 = vmatpush1.bf16.msra.mxu1 %v18036_v50  ;;  %12562 = vmatprep.mubr.bf16.mxu1 %v22729_v19  ;;  %v18050_v51 = vld [vmem:[%s19798_s0 + $0x7a0] ss:$12 sps:$4 sm:$0xff]  }
0x1c0b   : > { %v22914_v13 = vpack.c.bf16 %v10252_v3, %v10240_v42  ;;  %v22916_v5 = vpack.c.bf16 %v10251_v40, %v10239_v53  ;;  %v10055_v36 = vpop.f32.mrb[160].mxu1  ;;  %12544 = vmatprep.subr.bf16.mxu1 %v18043_v1  ;;  %v18053_v42 = vld [vmem:[%s19798_s0 + $0x55c] ss:$12 sps:$4 sm:$0xff]  }
0x1c0c   : > { %v22920_v49 = vpack.c.bf16 %v10253_v0, %v10241_v29  ;;  %v16294_v21 = vadd.f32 %v10055_v36, %v22883_v24  ;;  %v10201_v10 = vpop.f32.mrb[184].mxu0  ;;  %v10057_v59 = vpop.f32.mrb[161].mxu1  ;;  %v18054_v29 = vld [vmem:[%s19798_s0 + $0x878] ss:$12 sps:$4 sm:$0xff]  }
0x1c0d   : > { %v16310_v26 = vadd.f32 %v10201_v10, %v22887_v52  ;;  %v16295_v19 = vadd.f32 %v10057_v59, %v22890_v7  ;;  %v10203_v63 = vpop.f32.mrb[185].mxu0  ;;  %v10059_v25 = vpop.f32.mrb[162].mxu1  ;;  %13041 = vmatprep.mubr.bf16.mxu0 %v22916_v5 }
0x1c0e   : > { %v16311_v28 = vadd.f32 %v10203_v63, %v22895_v17  ;;  %v16296_v50 = vadd.f32 %v10059_v25, %v22883_v24  ;;  %v10205_v34 = vpop.f32.mrb[186].mxu0  ;;  %12545 = vmatpush1.bf16.msra.mxu1 %v18041_v33  ;;  %v10061_v54 = vpop.f32.mrb[163].mxu1  ;;  %13042 = vmatmul.mubr.bf16.vlgmr.msra.gmra.mrb[4].mxu0 %v22910_v20  ;;  %v10262_v53 = vmax.f32 %v16294_v21, 0.0 }
0x1c0f   : > { %v16312_v1 = vadd.f32 %v10205_v34, %v22887_v52  ;;  %v16297_v41 = vadd.f32 %v10061_v54, %v22890_v7  ;;  %v10207_v35 = vpop.f32.mrb[187].mxu0  ;;  %15775 = vmatpush3.bf16.msra.mxu0 %v18045_v45  ;;  %12546 = vmatprep.subr.bf16.mxu1 %v18048_v32  ;;  %v10264_v0 = vmax.f32 %v16310_v26, 0.0  ;;  %v10263_v33 = vmax.f32 %v16295_v19, 0.0  ;;  %v18051_v32 = vld [vmem:[%s19798_s0 + $0x558] ss:$12 sps:$4 sm:$0xff]  }
0x1c10   : > { %v10274_v3 = vmax.f32 %v16296_v50, 0.0  ;;  %v16313_v40 = vadd.f32 %v10207_v35, %v22895_v17  ;;  %15776 = vmatprep.subr.bf16.mxu0 %v18049_v15  ;;  %v10265_v59 = vmax.f32 %v16311_v28, 0.0  ;;  %v18055_v15 = vld [vmem:[%s19798_s0 + $0x7b8] ss:$12 sps:$4 sm:$0xff]   ;;  %v18058_v34 = vld [vmem:[%s19798_s0 + $0x574] ss:$12 sps:$4 sm:$0xff]  }
0x1c11   : > { %v10276_v36 = vmax.f32 %v16312_v1, 0.0  ;;  %v10275_v10 = vmax.f32 %v16297_v41, 0.0  ;;  %v18059_v1 = vld [vmem:[%s19798_s0 + $0x890] ss:$12 sps:$4 sm:$0xff]  }
0x1c12   : > { %v22937_v63 = vpack.c.bf16 %v10274_v3, %v10262_v53  ;;  %v10277_v45 = vmax.f32 %v16313_v40, 0.0  ;;  %12547 = vmatpush1.bf16.msra.mxu1 %v18046_v55 }
0x1c13   : > { %v22940_v25 = vpack.c.bf16 %v10276_v36, %v10264_v0  ;;  %v22942_v21 = vpack.c.bf16 %v10275_v10, %v10263_v33  ;;  %v10065_v50 = vpop.f32.mrb[164].mxu1  ;;  %15777 = vmatpush3.bf16.msra.mxu0 %v18050_v51  ;;  %12548 = vmatprep.subr.bf16.mxu1 %v18053_v42  ;;  %v18060_v10 = vld [vmem:[%s19798_s0 + $0x7d0] ss:$12 sps:$4 sm:$0xff]  }
0x1c14   : > { %v22946_v26 = vpack.c.bf16 %v10277_v45, %v10265_v59  ;;  %v16298_v19 = vadd.f32 %v10065_v50, %v22883_v24  ;;  %v10211_v28 = vpop.f32.mrb[188].mxu0  ;;  %v10067_v54 = vpop.f32.mrb[165].mxu1  ;;  %15778 = vmatprep.subr.bf16.mxu0 %v18054_v29  ;;  %v18056_v29 = vld [vmem:[%s19798_s0 + $0x570] ss:$12 sps:$4 sm:$0xff]   ;;  %v18063_v59 = vld [vmem:[%s19798_s0 + $0x58c] ss:$12 sps:$4 sm:$0xff]  }
0x1c15   : > { %v16314_v55 = vadd.f32 %v10211_v28, %v22887_v52  ;;  %v16299_v41 = vadd.f32 %v10067_v54, %v22890_v7  ;;  %v10213_v35 = vpop.f32.mrb[189].mxu0  ;;  %v10069_v51 = vpop.f32.mrb[166].mxu1  ;;  %13049 = vmatprep.mubr.bf16.mxu0 %v22942_v21 }
0x1c16   : > { %v16315_v42 = vadd.f32 %v10213_v35, %v22895_v17  ;;  %v16300_v53 = vadd.f32 %v10069_v51, %v22883_v24  ;;  %v10215_v3 = vpop.f32.mrb[190].mxu0  ;;  %12549 = vmatpush1.bf16.msra.mxu1 %v18051_v32  ;;  %v10071_v40 = vpop.f32.mrb[167].mxu1  ;;  %13050 = vmatmul.mubr.bf16.gmra.mrb[8].mxu0 %v22937_v63  ;;  %v10286_v45 = vmax.f32 %v16298_v19, 0.0  ;;  %v18064_v32 = vld [vmem:[%s19798_s0 + $0x8a8] ss:$12 sps:$4 sm:$0xff]  }
0x1c17   : > { %v16316_v0 = vadd.f32 %v10215_v3, %v22887_v52  ;;  %v16301_v33 = vadd.f32 %v10071_v40, %v22890_v7  ;;  %v10217_v36 = vpop.f32.mrb[191].mxu0  ;;  %15779 = vmatpush3.bf16.msra.mxu0 %v18055_v15  ;;  %12550 = vmatprep.subr.bf16.mxu1 %v18058_v34  ;;  %v10288_v54 = vmax.f32 %v16314_v55, 0.0  ;;  %v10287_v35 = vmax.f32 %v16299_v41, 0.0  ;;  %v18061_v34 = vld [vmem:[%s19798_s0 + $0x588] ss:$12 sps:$4 sm:$0xff]  }
0x1c18   : > { %v10298_v50 = vmax.f32 %v16300_v53, 0.0  ;;  %v16317_v28 = vadd.f32 %v10217_v36, %v22895_v17  ;;  %15780 = vmatprep.subr.bf16.mxu0 %v18059_v1  ;;  %v10289_v22 = vmax.f32 %v16315_v42, 0.0  ;;  %v18065_v1 = vld [vmem:[%s19798_s0 + $0x7e8] ss:$12 sps:$4 sm:$0xff]   ;;  %v18068_v36 = vld [vmem:[%s19798_s0 + $0x5a4] ss:$12 sps:$4 sm:$0xff]  }
0x1c19   : > { %v10300_v51 = vmax.f32 %v16316_v0, 0.0  ;;  %v10299_v3 = vmax.f32 %v16301_v33, 0.0  ;;  %v18069_v33 = vld [vmem:[%s19798_s0 + $0x8c0] ss:$12 sps:$4 sm:$0xff]  }
0x1c1a   : > { %v22963_v40 = vpack.c.bf16 %v10298_v50, %v10286_v45  ;;  %v10301_v15 = vmax.f32 %v16317_v28, 0.0  ;;  %12551 = vmatpush1.bf16.msra.mxu1 %v18056_v29 }
0x1c1b   : > { %v22966_v46 = vpack.c.bf16 %v10300_v51, %v10288_v54  ;;  %v22968_v19 = vpack.c.bf16 %v10299_v3, %v10287_v35  ;;  %v10075_v53 = vpop.f32.mrb[168].mxu1  ;;  %15781 = vmatpush3.bf16.msra.mxu0 %v18060_v10  ;;  %12552 = vmatprep.subr.bf16.mxu1 %v18063_v59 }
0x1c1c   : > { %v22972_v55 = vpack.c.bf16 %v10301_v15, %v10289_v22  ;;  %v16302_v41 = vadd.f32 %v10075_v53, %v22883_v24  ;;  %v10221_v42 = vpop.f32.mrb[192].mxu0  ;;  %v10077_v0 = vpop.f32.mrb[169].mxu1  ;;  %15782 = vmatprep.subr.bf16.mxu0 %v18064_v32  ;;  %v18066_v32 = vld [vmem:[%s19798_s0 + $0x5a0] ss:$12 sps:$4 sm:$0xff]   ;;  %v18073_v53 = vld [vmem:[%s19798_s0 + $0x5bc] ss:$12 sps:$4 sm:$0xff]  }
0x1c1d   : > { %v16318_v29 = vadd.f32 %v10221_v42, %v22887_v52  ;;  %v16303_v45 = vadd.f32 %v10077_v0, %v22890_v7  ;;  %v10223_v50 = vpop.f32.mrb[193].mxu0  ;;  %v10079_v10 = vpop.f32.mrb[170].mxu1  ;;  %13057 = vmatprep.mubr.bf16.mxu0 %v22968_v19  ;;  %v18070_v15 = vld [vmem:[%s19798_s0 + $0x800] ss:$12 sps:$4 sm:$0xff]  }
0x1c1e   : > { %v16319_v22 = vadd.f32 %v10223_v50, %v22895_v17  ;;  %v16304_v59 = vadd.f32 %v10079_v10, %v22883_v24  ;;  %v10225_v28 = vpop.f32.mrb[194].mxu0  ;;  %12553 = vmatpush1.bf16.msra.mxu1 %v18061_v34  ;;  %v10081_v54 = vpop.f32.mrb[171].mxu1  ;;  %13058 = vmatmul.mubr.bf16.gmra.mrb[12].mxu0 %v22963_v40  ;;  %v10310_v42 = vmax.f32 %v16302_v41, 0.0  ;;  %v18074_v34 = vld [vmem:[%s19798_s0 + $0x8d8] ss:$12 sps:$4 sm:$0xff]  }
0x1c1f   : > { %v16320_v35 = vadd.f32 %v10225_v28, %v22887_v52  ;;  %v16305_v51 = vadd.f32 %v10081_v54, %v22890_v7  ;;  %v10227_v3 = vpop.f32.mrb[195].mxu0  ;;  %15783 = vmatpush3.bf16.msra.mxu0 %v18065_v1  ;;  %12554 = vmatprep.subr.bf16.mxu1 %v18068_v36  ;;  %v10312_v50 = vmax.f32 %v16318_v29, 0.0  ;;  %v10311_v10 = vmax.f32 %v16303_v45, 0.0  ;;  %v18071_v36 = vld [vmem:[%s19798_s0 + $0x5b8] ss:$12 sps:$4 sm:$0xff]  }
0x1c20   : > { %v10322_v0 = vmax.f32 %v16304_v59, 0.0  ;;  %v16321_v24 = vadd.f32 %v10227_v3, %v22895_v17  ;;  %15784 = vmatprep.subr.bf16.mxu0 %v18069_v33  ;;  %v10313_v7 = vmax.f32 %v16319_v22, 0.0  ;;  %v18075_v17 = vld [vmem:[%s19798_s0 + $0x818] ss:$12 sps:$4 sm:$0xff]   ;;  %v18078_v45 = vld [vmem:[%s19798_s0 + $0x5d4] ss:$12 sps:$4 sm:$0xff]  }
0x1c21   : > { %v10324_v57 = vmax.f32 %v16320_v35, 0.0  ;;  %v10323_v52 = vmax.f32 %v16305_v51, 0.0  ;;  %v18079_v22 = vld [vmem:[%s19798_s0 + $0x8f0] ss:$12 sps:$4 sm:$0xff]  }
0x1c22   : > { %v22989_v28 = vpack.c.bf16 %v10322_v0, %v10310_v42  ;;  %v10325_v1 = vmax.f32 %v16321_v24, 0.0  ;;  %12555 = vmatpush1.bf16.msra.mxu1 %v18066_v32  ;;  %v18076_v35 = vld [vmem:[%s19798_s0 + $0x5d0] ss:$12 sps:$4 sm:$0xff]   ;;  %v18081_v42 = vld [vmem:[%s19798_s0 + $0x5e8] ss:$12 sps:$4 sm:$0xff]  }
0x1c23   : > { %v22992_v54 = vpack.c.bf16 %v10324_v57, %v10312_v50  ;;  %v22994_v41 = vpack.c.bf16 %v10323_v52, %v10311_v10  ;;  %15785 = vmatpush3.bf16.msra.mxu0 %v18070_v15  ;;  %12556 = vmatprep.subr.bf16.mxu1 %v18073_v53  ;;  %v18080_v3 = vld [vmem:[%s19798_s0 + $0x830] ss:$12 sps:$4 sm:$0xff]   ;;  %v18083_v15 = vld [vmem:[%s19798_s0 + $0x5ec] ss:$12 sps:$4 sm:$0xff]  }
0x1c24   : > { %v22997_v33 = vpack.c.bf16 %v10325_v1, %v10313_v7  ;;  %v15590_v29 = vpop.f32.mrb[196].mxu0  ;;  %15786 = vmatprep.subr.bf16.mxu0 %v18074_v34  ;;  %v18086_v0 = vld [vmem:[%s19798_s0 + $0x604] ss:$12 sps:$4 sm:$0xff]   ;;  %v18084_v52 = vld [vmem:[%s19798_s0 + $0x600] ss:$12 sps:$4 sm:$0xff]  }
0x1c25   : > { %v15591_v59 = vpop.f32.mrb[197].mxu0  ;;  %13065 = vmatprep.mubr.bf16.mxu0 %v22994_v41  ;;  %v18089_v1 = vld [vmem:[%s19798_s0 + $0x61c] ss:$12 sps:$4 sm:$0xff]  }
0x1c26   : > { %v23002_v57 = vadd.f32 %v15591_v59, %v15590_v29  ;;  %12557 = vmatpush1.bf16.msra.mxu1 %v18071_v36  ;;  %v15593_v32 = vpop.f32.mrb[198].mxu0  ;;  %13066 = vmatmul.mubr.bf16.gmra.mrb[16].mxu0 %v22989_v28  ;;  %v18092_v29 = vld [vmem:[%s19798_s0 + $0x634] ss:$12 sps:$4 sm:$0xff]  }
0x1c27   : > { %v15594_v51 = vpop.f32.mrb[199].mxu0  ;;  %15787 = vmatpush3.bf16.msra.mxu0 %v18075_v17  ;;  %13106 = vmatprep.mubr.bf16.mxu0 %v22920_v49  ;;  %v18087_v17 = vld [vmem:[%s19798_s0 + $0x618] ss:$12 sps:$4 sm:$0xff]  }
0x1c28   : > { %v23009_v53 = vadd.f32 %v15594_v51, %v15593_v32  ;;  %12558 = vmatprep.subr.bf16.mxu1 %v18078_v45  ;;  %15788 = vmatprep.subr.bf16.mxu0 %v18079_v22 }
0x1c2a   : > { %12559 = vmatpush1.bf16.msra.mxu1 %v18076_v35  ;;  %v18090_v35 = vld [vmem:[%s19798_s0 + $0x630] ss:$12 sps:$4 sm:$0xff]  }
0x1c2b   : > { %15789 = vmatpush3.bf16.msra.mxu0 %v18080_v3  ;;  %12560 = vmatprep.subr.bf16.mxu1 %v18083_v15  ;;  %v18093_v3 = vld [vmem:[%s19798_s0 + $0x648] ss:$12 sps:$4 sm:$0xff]   ;;  %v18098_v15 = vld [vmem:[%s19798_s0 + $0x664] ss:$12 sps:$4 sm:$0xff]  }
0x1c2c   : > { %v15596_v24 = vpop.f32.mrb[200].mxu0 }
0x1c2d   : > { %v15597_v34 = vpop.f32.mrb[201].mxu0 }
0x1c2e   : > { %v23013_v50 = vadd.f32 %v15597_v34, %v15596_v24  ;;  %12561 = vmatpush1.bf16.msra.mxu1 %v18081_v42  ;;  %v15599_v10 = vpop.f32.mrb[202].mxu0  ;;  %13107 = vmatmul.mubr.bf16.vlgmr.msra.gmra.mrb[20].mxu0 %v22914_v13 }
0x1c2f   : > { %v15600_v7 = vpop.f32.mrb[203].mxu0  ;;  %13114 = vmatprep.mubr.bf16.mxu0 %v22946_v26  ;;  %12603 = vmatprep.subr.bf16.mxu1 %v18086_v0 }
0x1c30   : > { %v23019_v36 = vadd.f32 %v15600_v7, %v15599_v10  ;;  %v18096_v10 = vld [vmem:[%s19798_s0 + $0x660] ss:$12 sps:$4 sm:$0xff]  }
0x1c31   : > { %12563 = vmatmul.mubr.bf16.vlgmr.msra.gmra.mrb[172].mxu1 %v22723_v18  ;;  %v18095_v18 = vld [vmem:[%s19798_s0 + $0x64c] ss:$12 sps:$4 sm:$0xff]  }
0x1c32   : > { %12572 = vmatprep.mubr.bf16.mxu1 %v22756_v14  ;;  %12604 = vmatpush1.bf16.msra.mxu1 %v18084_v52  ;;  %v18101_v52 = vld [vmem:[%s19798_s0 + $0x67c] ss:$12 sps:$4 sm:$0xff]  }
0x1c33   : > { %12605 = vmatprep.subr.bf16.mxu1 %v18089_v1 }
0x1c34   : > { %v15602_v45 = vpop.f32.mrb[204].mxu0 }
0x1c35   : > { %v15603_v22 = vpop.f32.mrb[205].mxu0 }
0x1c36   : > { %v23025_v59 = vadd.f32 %v15603_v22, %v15602_v45  ;;  %12606 = vmatpush1.bf16.msra.mxu1 %v18087_v17  ;;  %v15605_v32 = vpop.f32.mrb[206].mxu0  ;;  %13115 = vmatmul.mubr.bf16.gmra.mrb[24].mxu0 %v22940_v25  ;;  %v18099_v17 = vld [vmem:[%s19798_s0 + $0x678] ss:$12 sps:$4 sm:$0xff]  }
0x1c37   : > { %v15606_v51 = vpop.f32.mrb[207].mxu0  ;;  %13122 = vmatprep.mubr.bf16.mxu0 %v22972_v55  ;;  %12607 = vmatprep.subr.bf16.mxu1 %v18092_v29  ;;  %v18104_v29 = vld [vmem:[%s19798_s0 + $0x694] ss:$12 sps:$4 sm:$0xff]  }
0x1c38   : > { %v23031_v14 = vadd.f32 %v15606_v51, %v15605_v32  ;;  %v18102_v51 = vld [vmem:[%s19798_s0 + $0x690] ss:$12 sps:$4 sm:$0xff]  }
0x1c39   : > { %12573 = vmatmul.mubr.bf16.gmra.mrb[176].mxu1 %v22750_v47  ;;  %v23043_v47 = vld [vmem:[%s860_s22] sm:$0x7] }
0x1c3a   : > { %12582 = vmatprep.mubr.bf16.mxu1 %v22784_v6  ;;  %12608 = vmatpush1.bf16.msra.mxu1 %v18090_v35  ;;  %v23052_v1 = vrot.slane %v23043_v47, %v21620_v4 }
0x1c3b   : > { %12609 = vmatprep.subr.bf16.mxu1 %v18095_v18 }
0x1c3c   : > { %v15608_v42 = vpop.f32.mrb[208].mxu0  ;;  %v12784_v32 = vadd.f32 %v23002_v57, %v23052_v1 }
0x1c3d   : > { %v15609_v0 = vpop.f32.mrb[209].mxu0 }
0x1c3e   : > { %v23037_v24 = vadd.f32 %v15609_v0, %v15608_v42  ;;  %12610 = vmatpush1.bf16.msra.mxu1 %v18093_v3  ;;  %v15611_v34 = vpop.f32.mrb[210].mxu0  ;;  %13123 = vmatmul.mubr.bf16.gmra.mrb[28].mxu0 %v22966_v46  ;;  %v12787_v3 = vadd.f32 %v23009_v53, %v23052_v1  ;;  %v18105_v0 = vld [vmem:[%s19798_s0 + $0x6a8] ss:$12 sps:$4 sm:$0xff]   ;;  %v12792_v53 = vadd.f32 %v23013_v50, %v23052_v1 }
0x1c3f   : > { %v15612_v6 = vpop.f32.mrb[211].mxu0  ;;  %13130 = vmatprep.mubr.bf16.mxu0 %v22997_v33  ;;  %12611 = vmatprep.subr.bf16.mxu1 %v18098_v15  ;;  %v18116_v50 = vld [vmem:[%s19798_s0 + $0x6f4] ss:$12 sps:$4 sm:$0xff]  }
0x1c40   : > { %v23047_v7 = vadd.f32 %v15612_v6, %v15611_v34  ;;  %v18110_v34 = vld [vmem:[%s19798_s0 + $0x6c4] ss:$12 sps:$4 sm:$0xff]  }
0x1c41   : > { %12583 = vmatmul.mubr.bf16.gmra.mrb[180].mxu1 %v22778_v9 }
0x1c42   : > { %12592 = vmatprep.mubr.bf16.mxu1 %v22812_v56  ;;  %12612 = vmatpush1.bf16.msra.mxu1 %v18096_v10  ;;  %v18107_v56 = vld [vmem:[%s19798_s0 + $0x6ac] ss:$12 sps:$4 sm:$0xff]  }
0x1c43   : > { %12613 = vmatprep.subr.bf16.mxu1 %v18101_v52 }
0x1c44   : > { %v15630_v45 = vpop.f32.mrb[212].mxu0 }
0x1c45   : > { %v15631_v22 = vpop.f32.mrb[213].mxu0 }
0x1c46   : > { %v15632_v35 = vadd.f32 %v15631_v22, %v15630_v45  ;;  %12614 = vmatpush1.bf16.msra.mxu1 %v18099_v17  ;;  %v15633_v9 = vpop.f32.mrb[214].mxu0  ;;  %13131 = vmatmul.mubr.bf16.gmra.mrb[32].mxu0 %v22992_v54  ;;  %v18113_v45 = vld [vmem:[%s19798_s0 + $0x6dc] ss:$12 sps:$4 sm:$0xff]  }
0x1c47   : > { %v15634_v18 = vpop.f32.mrb[215].mxu0  ;;  %12615 = vmatprep.subr.bf16.mxu1 %v18104_v29 }
0x1c48   : > { %v23064_v15 = vadd.f32 %v15632_v35, %v12784_v32  ;;  %v15635_v42 = vadd.f32 %v15634_v18, %v15633_v9  ;;  %v18111_v9 = vld [vmem:[%s19798_s0 + $0x6d8] ss:$12 sps:$4 sm:$0xff]  }
0x1c49   : > { %12593 = vmatmul.mubr.bf16.gmra.mrb[184].mxu1 %v22806_v39  ;;  %v18108_v39 = vld [vmem:[%s19798_s0 + $0x6c0] ss:$12 sps:$4 sm:$0xff]  }
0x1c4a   : > { %v23067_v57 = vadd.f32 %v15635_v42, %v12787_v3  ;;  %12616 = vmatpush1.bf16.msra.mxu1 %v18102_v51  ;;  %12635 = vmatprep.mubr.bf16.mxu1 %v22916_v5  ;;  %v12795_v5 = vadd.f32 %v23019_v36, %v23052_v1  ;;  %v18114_v42 = vld [vmem:[%s19798_s0 + $0x6f0] ss:$12 sps:$4 sm:$0xff]  }
0x1c4b   : > { %12617 = vmatprep.subr.bf16.mxu1 %v18107_v56  ;;  %v12800_v56 = vadd.f32 %v23025_v59, %v23052_v1  ;;  %v18122_v59 = vld [vmem:[%s19798_s0 + $0x724] ss:$12 sps:$4 sm:$0xff]  }
0x1c4c   : > { %v15636_v10 = vpop.f32.mrb[216].mxu0 }
0x1c4d   : > { %v15637_v6 = vpop.f32.mrb[217].mxu0 }
0x1c4e   : > { %v15638_v52 = vadd.f32 %v15637_v6, %v15636_v10  ;;  %12618 = vmatpush1.bf16.msra.mxu1 %v18105_v0  ;;  %v15639_v17 = vpop.f32.mrb[218].mxu0  ;;  %v12803_v10 = vadd.f32 %v23031_v14, %v23052_v1 }
0x1c4f   : > { %v15640_v29 = vpop.f32.mrb[219].mxu0  ;;  %12619 = vmatprep.subr.bf16.mxu1 %v18110_v34  ;;  %v18119_v34 = vld [vmem:[%s19798_s0 + $0x70c] ss:$12 sps:$4 sm:$0xff]  }
0x1c50   : > { %v23078_v22 = vadd.f32 %v15638_v52, %v12792_v53  ;;  %v15641_v32 = vadd.f32 %v15640_v29, %v15639_v17  ;;  %v18117_v17 = vld [vmem:[%s19798_s0 + $0x708] ss:$12 sps:$4 sm:$0xff]  }
0x1c52   : > { %v23080_v35 = vadd.f32 %v15641_v32, %v12795_v5  ;;  %12620 = vmatpush1.bf16.msra.mxu1 %v18108_v39  ;;  %v18120_v32 = vld [vmem:[%s19798_s0 + $0x720] ss:$12 sps:$4 sm:$0xff]  }
0x1c53   : > { %12621 = vmatprep.subr.bf16.mxu1 %v18113_v45  ;;  %v12808_v45 = vadd.f32 %v23037_v24, %v23052_v1  ;;  %v18123_v24 = vld [vmem:[%s19798_s0 + $0x738] ss:$12 sps:$4 sm:$0xff]  }
0x1c54   : > { %v15642_v51 = vpop.f32.mrb[220].mxu0 }
0x1c55   : > { %v15643_v18 = vpop.f32.mrb[221].mxu0 }
0x1c56   : > { %v15644_v3 = vadd.f32 %v15643_v18, %v15642_v51  ;;  %12622 = vmatpush1.bf16.msra.mxu1 %v18111_v9  ;;  %v15645_v36 = vpop.f32.mrb[222].mxu0  ;;  %v12811_v51 = vadd.f32 %v23047_v7, %v23052_v1  ;;  %v18129_v7 = vld [vmem:[%s19798_s0 + $0x768] ss:$12 sps:$4 sm:$0xff]   ;;  %v18134_v1 = vld [vmem:[%s19798_s0 + $0x784] ss:$12 sps:$4 sm:$0xff]  }
0x1c57   : > { %v15646_v0 = vpop.f32.mrb[223].mxu0  ;;  %12623 = vmatprep.subr.bf16.mxu1 %v18116_v50  ;;  %v18125_v50 = vld [vmem:[%s19798_s0 + $0x73c] ss:$12 sps:$4 sm:$0xff]  }
0x1c58   : > { %v23090_v6 = vadd.f32 %v15644_v3, %v12800_v56  ;;  %v15647_v53 = vadd.f32 %v15646_v0, %v15645_v36  ;;  %v18128_v36 = vld [vmem:[%s19798_s0 + $0x754] ss:$12 sps:$4 sm:$0xff]   ;;  %v18131_v0 = vld [vmem:[%s19798_s0 + $0x76c] ss:$12 sps:$4 sm:$0xff]  }
0x1c5a   : > { %v23092_v52 = vadd.f32 %v15647_v53, %v12803_v10  ;;  %12624 = vmatpush1.bf16.msra.mxu1 %v18114_v42  ;;  %v18126_v42 = vld [vmem:[%s19798_s0 + $0x750] ss:$12 sps:$4 sm:$0xff]   ;;  %v18135_v53 = vld [vmem:[%s19798_s0 + $0x798] ss:$12 sps:$4 sm:$0xff]  }
0x1c5b   : > { %12625 = vmatprep.subr.bf16.mxu1 %v18119_v34  ;;  %v18132_v34 = vld [vmem:[%s19798_s0 + $0x780] ss:$12 sps:$4 sm:$0xff]   ;;  %v18137_v10 = vld [vmem:[%s19798_s0 + $0x79c] ss:$12 sps:$4 sm:$0xff]  }
0x1c5c   : > { %v15648_v39 = vpop.f32.mrb[224].mxu0 }
0x1c5d   : > { %v15649_v29 = vpop.f32.mrb[225].mxu0 }
0x1c5e   : > { %v15650_v5 = vadd.f32 %v15649_v29, %v15648_v39  ;;  %12626 = vmatpush1.bf16.msra.mxu1 %v18117_v17  ;;  %v15651_v14 = vpop.f32.mrb[226].mxu0  ;;  %v18140_v17 = vld [vmem:[%s19798_s0 + $0x7b4] ss:$12 sps:$4 sm:$0xff]   ;;  %v18143_v39 = vld [vmem:[%s19798_s0 + $0x7cc] ss:$12 sps:$4 sm:$0xff]  }
0x1c5f   : > { %v15652_v9 = vpop.f32.mrb[227].mxu0  ;;  %12627 = vmatprep.subr.bf16.mxu1 %v18122_v59  ;;  %v18138_v59 = vld [vmem:[%s19798_s0 + $0x7b0] ss:$12 sps:$4 sm:$0xff]   ;;  %v18141_v29 = vld [vmem:[%s19798_s0 + $0x7c8] ss:$12 sps:$4 sm:$0xff]  }
0x1c60   : > { %v23102_v18 = vadd.f32 %v15650_v5, %v12808_v45  ;;  %v15653_v56 = vadd.f32 %v15652_v9, %v15651_v14  ;;  %v18149_v45 = vld [vmem:[%s19798_s0 + $0x7fc] ss:$12 sps:$4 sm:$0xff]  }
0x1c62   : > { %v23104_v3 = vadd.f32 %v15653_v56, %v12811_v51  ;;  %12628 = vmatpush1.bf16.msra.mxu1 %v18120_v32  ;;  %v18147_v32 = vld [vmem:[%s19798_s0 + $0x7f8] ss:$12 sps:$4 sm:$0xff]  }
0x1c63   : > { %12629 = vmatprep.subr.bf16.mxu1 %v18125_v50  ;;  %v18152_v50 = vld [vmem:[%s19798_s0 + $0x814] ss:$12 sps:$4 sm:$0xff]  }
0x1c66   : > { %12630 = vmatpush1.bf16.msra.mxu1 %v18123_v24 }
0x1c67   : > { %12631 = vmatprep.subr.bf16.mxu1 %v18128_v36 }
0x1c6a   : > { %12632 = vmatpush1.bf16.msra.mxu1 %v18126_v42 }
0x1c6b   : > { %12633 = vmatprep.subr.bf16.mxu1 %v18131_v0 }
0x1c6e   : > { %12634 = vmatpush1.bf16.msra.mxu1 %v18129_v7  ;;  %v18153_v7 = vld [vmem:[%s19798_s0 + $0x828] ss:$12 sps:$4 sm:$0xff]  }
0x1c6f   : > { %12676 = vmatprep.subr.bf16.mxu1 %v18134_v1  ;;  %v18158_v1 = vld [vmem:[%s19798_s0 + $0x844] ss:$12 sps:$4 sm:$0xff]  }
0x1c71   : > { %12636 = vmatmul.mubr.bf16.vlgmr.msra.gmra.mrb[172].mxu1 %v22910_v20  ;;  %v18146_v20 = vld [vmem:[%s19798_s0 + $0x7e4] ss:$12 sps:$4 sm:$0xff]  }
0x1c72   : > { %12645 = vmatprep.mubr.bf16.mxu1 %v22942_v21  ;;  %12677 = vmatpush1.bf16.msra.mxu1 %v18132_v34  ;;  %v18144_v21 = vld [vmem:[%s19798_s0 + $0x7e0] ss:$12 sps:$4 sm:$0xff]  }
0x1c73   : > { %12678 = vmatprep.subr.bf16.mxu1 %v18137_v10 }
0x1c76   : > { %12679 = vmatpush1.bf16.msra.mxu1 %v18135_v53 }
0x1c77   : > { %12680 = vmatprep.subr.bf16.mxu1 %v18140_v17 }
0x1c79   : > { %12646 = vmatmul.mubr.bf16.gmra.mrb[176].mxu1 %v22937_v63 }
0x1c7a   : > { %12655 = vmatprep.mubr.bf16.mxu1 %v22968_v19  ;;  %12681 = vmatpush1.bf16.msra.mxu1 %v18138_v59 }
0x1c7b   : > { %12682 = vmatprep.subr.bf16.mxu1 %v18143_v39 }
0x1c7e   : > { %12683 = vmatpush1.bf16.msra.mxu1 %v18141_v29 }
0x1c7f   : > { %12684 = vmatprep.subr.bf16.mxu1 %v18146_v20  ;;  %v18159_v20 = vld [vmem:[%s19798_s0 + $0x858] ss:$12 sps:$4 sm:$0xff]  }
0x1c80   : > { %v15670_v5 = vpop.f32.mrb[228].mxu0 }
0x1c81   : > { %12656 = vmatmul.mubr.bf16.gmra.mrb[180].mxu1 %v22963_v40  ;;  %v15671_v14 = vpop.f32.mrb[229].mxu0  ;;  %v18150_v40 = vld [vmem:[%s19798_s0 + $0x810] ss:$12 sps:$4 sm:$0xff]  }
0x1c82   : > { %12665 = vmatprep.mubr.bf16.mxu1 %v22994_v41  ;;  %12685 = vmatpush1.bf16.msra.mxu1 %v18144_v21  ;;  %v15672_v63 = vadd.f32 %v15671_v14, %v15670_v5  ;;  %v15673_v19 = vpop.f32.mrb[230].mxu0  ;;  %v18155_v41 = vld [vmem:[%s19798_s0 + $0x82c] ss:$12 sps:$4 sm:$0xff]   ;;  %v18164_v21 = vld [vmem:[%s19798_s0 + $0x874] ss:$12 sps:$4 sm:$0xff]  }
0x1c83   : > { %12686 = vmatprep.subr.bf16.mxu1 %v18149_v45  ;;  %v15674_v9 = vpop.f32.mrb[231].mxu0  ;;  %v18162_v14 = vld [vmem:[%s19798_s0 + $0x870] ss:$12 sps:$4 sm:$0xff]  }
0x1c84   : > { %v23131_v51 = vadd.f32 %v15672_v63, %v23064_v15  ;;  %v15675_v56 = vadd.f32 %v15674_v9, %v15673_v19  ;;  %v18167_v63 = vld [vmem:[%s19798_s0 + $0x88c] ss:$12 sps:$4 sm:$0xff]  }
0x1c86   : > { %v23134_v24 = vadd.f32 %v15675_v56, %v23067_v57  ;;  %12687 = vmatpush1.bf16.msra.mxu1 %v18147_v32  ;;  %v18165_v56 = vld [vmem:[%s19798_s0 + $0x888] ss:$12 sps:$4 sm:$0xff]  }
0x1c87   : > { %12688 = vmatprep.subr.bf16.mxu1 %v18152_v50 }
0x1c88   : > { %v15676_v36 = vpop.f32.mrb[232].mxu0 }
0x1c89   : > { %12666 = vmatmul.mubr.bf16.gmra.mrb[184].mxu1 %v22989_v28  ;;  %v15677_v42 = vpop.f32.mrb[233].mxu0  ;;  %v18156_v28 = vld [vmem:[%s19798_s0 + $0x840] ss:$12 sps:$4 sm:$0xff]  }
0x1c8a   : > { %12689 = vmatpush1.bf16.msra.mxu1 %v18150_v40  ;;  %12708 = vmatprep.mubr.bf16.mxu1 %v22920_v49  ;;  %v15678_v15 = vadd.f32 %v15677_v42, %v15676_v36  ;;  %v15679_v0 = vpop.f32.mrb[234].mxu0  ;;  %v18161_v49 = vld [vmem:[%s19798_s0 + $0x85c] ss:$12 sps:$4 sm:$0xff]   ;;  %v18168_v42 = vld [vmem:[%s19798_s0 + $0x8a0] ss:$12 sps:$4 sm:$0xff]  }
0x1c8b   : > { %12690 = vmatprep.subr.bf16.mxu1 %v18155_v41  ;;  %v15680_v57 = vpop.f32.mrb[235].mxu0 }
0x1c8c   : > { %v23143_v34 = vadd.f32 %v15678_v15, %v23078_v22  ;;  %v15681_v10 = vadd.f32 %v15680_v57, %v15679_v0  ;;  %v18173_v15 = vld [vmem:[%s19798_s0 + $0x8bc] ss:$12 sps:$4 sm:$0xff]   ;;  %v18171_v57 = vld [vmem:[%s19798_s0 + $0x8b8] ss:$12 sps:$4 sm:$0xff]  }
0x1c8e   : > { %v23146_v53 = vadd.f32 %v15681_v10, %v23080_v35  ;;  %12691 = vmatpush1.bf16.msra.mxu1 %v18153_v7 }
0x1c8f   : > { %12692 = vmatprep.subr.bf16.mxu1 %v18158_v1 }
0x1c90   : > { %v15682_v17 = vpop.f32.mrb[236].mxu0 }
0x1c91   : > { %v15683_v59 = vpop.f32.mrb[237].mxu0 }
0x1c92   : > { %12693 = vmatpush1.bf16.msra.mxu1 %v18156_v28  ;;  %v15684_v39 = vadd.f32 %v15683_v59, %v15682_v17  ;;  %v15685_v29 = vpop.f32.mrb[238].mxu0  ;;  %v18176_v28 = vld [vmem:[%s19798_s0 + $0x8d4] ss:$12 sps:$4 sm:$0xff]  }
0x1c93   : > { %12694 = vmatprep.subr.bf16.mxu1 %v18161_v49  ;;  %v15686_v22 = vpop.f32.mrb[239].mxu0 }
0x1c94   : > { %v12930_v35 = vadd.f32 %v15684_v39, %v23090_v6  ;;  %v15687_v45 = vadd.f32 %v15686_v22, %v15685_v29  ;;  %v18170_v6 = vld [vmem:[%s19798_s0 + $0x8a4] ss:$12 sps:$4 sm:$0xff]   ;;  %v18179_v39 = vld [vmem:[%s19798_s0 + $0x8ec] ss:$12 sps:$4 sm:$0xff]   ;;  %v18177_v22 = vld [vmem:[%s19798_s0 + $0x8e8] ss:$12 sps:$4 sm:$0xff]  }
0x1c96   : > { %v12933_v5 = vadd.f32 %v15687_v45, %v23092_v52  ;;  %12695 = vmatpush1.bf16.msra.mxu1 %v18159_v20 }
0x1c97   : > { %12696 = vmatprep.subr.bf16.mxu1 %v18164_v21 }
0x1c98   : > { %v15688_v19 = vpop.f32.mrb[240].mxu0 }
0x1c99   : > { %v15689_v32 = vpop.f32.mrb[241].mxu0 }
0x1c9a   : > { %12697 = vmatpush1.bf16.msra.mxu1 %v18162_v14  ;;  %v15690_v9 = vadd.f32 %v15689_v32, %v15688_v19  ;;  %v15691_v50 = vpop.f32.mrb[242].mxu0 }
0x1c9b   : > { %12698 = vmatprep.subr.bf16.mxu1 %v18167_v63  ;;  %v15692_v40 = vpop.f32.mrb[243].mxu0 }
0x1c9c   : > { %v12938_v41 = vadd.f32 %v15690_v9, %v23102_v18  ;;  %v15693_v52 = vadd.f32 %v15692_v40, %v15691_v50 }
0x1c9e   : > { %v12941_v36 = vadd.f32 %v15693_v52, %v23104_v3  ;;  %12699 = vmatpush1.bf16.msra.mxu1 %v18165_v56  ;;  %v18174_v3 = vld [vmem:[%s19798_s0 + $0x8d0] ss:$12 sps:$4 sm:$0xff]  }
0x1c9f   : > { %12700 = vmatprep.subr.bf16.mxu1 %v18170_v6 }
0x1ca1   : > { %v15710_v0 = vpop.f32.mrb[244].mxu0 }
0x1ca2   : > { %12701 = vmatpush1.bf16.msra.mxu1 %v18168_v42  ;;  %v15711_v7 = vpop.f32.mrb[245].mxu0 }
0x1ca3   : > { %v15712_v1 = vadd.f32 %v15711_v7, %v15710_v0  ;;  %v15713_v10 = vpop.f32.mrb[246].mxu0  ;;  %12702 = vmatprep.subr.bf16.mxu1 %v18173_v15 }
0x1ca4   : > { %v15714_v49 = vpop.f32.mrb[247].mxu0 }
0x1ca5   : > { %v12979_v18 = vadd.f32 %v15712_v1, %v23131_v51  ;;  %v15715_v17 = vadd.f32 %v15714_v49, %v15713_v10 }
0x1ca6   : > { %12703 = vmatpush1.bf16.msra.mxu1 %v18171_v57 }
0x1ca7   : > { %v12982_v59 = vadd.f32 %v15715_v17, %v23134_v24  ;;  %12704 = vmatprep.subr.bf16.mxu1 %v18176_v28 }
0x1ca9   : > { %v15716_v29 = vpop.f32.mrb[248].mxu0 }
0x1caa   : > { %12705 = vmatpush1.bf16.msra.mxu1 %v18174_v3  ;;  %v15717_v20 = vpop.f32.mrb[249].mxu0 }
0x1cab   : > { %v15718_v21 = vadd.f32 %v15717_v20, %v15716_v29  ;;  %v15719_v45 = vpop.f32.mrb[250].mxu0  ;;  %12706 = vmatprep.subr.bf16.mxu1 %v18179_v39 }
0x1cac   : > { %v15720_v14 = vpop.f32.mrb[251].mxu0 }
0x1cad   : > { %v12987_v63 = vadd.f32 %v15718_v21, %v23143_v34  ;;  %v15721_v19 = vadd.f32 %v15720_v14, %v15719_v45 }
0x1cae   : > { %12707 = vmatpush1.bf16.msra.mxu1 %v18177_v22 }
0x1caf   : > { %v12990_v51 = vadd.f32 %v15721_v19, %v23146_v53 }
0x1cb1   : > { %12709 = vmatmul.mubr.bf16.vlgmr.msra.gmra.mrb[172].mxu1 %v22914_v13  ;;  %v15722_v32 = vpop.f32.mrb[252].mxu0 }
0x1cb2   : > { %12718 = vmatprep.mubr.bf16.mxu1 %v22946_v26  ;;  %v15723_v24 = vpop.f32.mrb[253].mxu0 }
0x1cb3   : > { %v15724_v9 = vadd.f32 %v15723_v24, %v15722_v32  ;;  %v15725_v50 = vpop.f32.mrb[254].mxu0 }
0x1cb4   : > { %v15726_v56 = vpop.f32.mrb[255].mxu0 }
0x1cb5   : > { %v12995_v40 = vadd.f32 %v15724_v9, %v12930_v35  ;;  %v15727_v6 = vadd.f32 %v15726_v56, %v15725_v50 }
0x1cb7   : > { %v12998_v52 = vadd.f32 %v15727_v6, %v12933_v5 }
0x1cb9   : > { %12719 = vmatmul.mubr.bf16.gmra.mrb[176].mxu1 %v22940_v25  ;;  %v15728_v42 = vpop.f32.mrb[0].mxu0 }
0x1cba   : > { %12728 = vmatprep.mubr.bf16.mxu1 %v22972_v55  ;;  %v15729_v34 = vpop.f32.mrb[1].mxu0 }
0x1cbb   : > { %v15730_v15 = vadd.f32 %v15729_v34, %v15728_v42  ;;  %v15731_v53 = vpop.f32.mrb[2].mxu0 }
0x1cbc   : > { %v15732_v0 = vpop.f32.mrb[3].mxu0 }
0x1cbd   : > { %v13003_v13 = vadd.f32 %v15730_v15, %v12938_v41  ;;  %v15733_v7 = vadd.f32 %v15732_v0, %v15731_v53 }
0x1cbf   : > { %v13006_v57 = vadd.f32 %v15733_v7, %v12941_v36 }
0x1cc1   : > { %12729 = vmatmul.mubr.bf16.gmra.mrb[180].mxu1 %v22966_v46 }
0x1cc2   : > { %12738 = vmatprep.mubr.bf16.mxu1 %v22997_v33 }
0x1cc9   : > { %12739 = vmatmul.mubr.bf16.gmra.mrb[184].mxu1 %v22992_v54 }
0x1ce1   : > { %v15750_v26 = vpop.f32.mrb[4].mxu0 }
0x1ce2   : > { %v15751_v35 = vpop.f32.mrb[5].mxu0 }
0x1ce3   : > { %v15752_v5 = vadd.f32 %v15751_v35, %v15750_v26  ;;  %v15753_v25 = vpop.f32.mrb[6].mxu0 }
0x1ce4   : > { %v15754_v1 = vpop.f32.mrb[7].mxu0 }
0x1ce5   : > { %v13044_v10 = vadd.f32 %v15752_v5, %v12979_v18  ;;  %v15755_v55 = vadd.f32 %v15754_v1, %v15753_v25 }
0x1ce7   : > { %v13047_v28 = vadd.f32 %v15755_v55, %v12982_v59 }
0x1ce9   : > { %v15756_v49 = vpop.f32.mrb[8].mxu0 }
0x1cea   : > { %v15757_v17 = vpop.f32.mrb[9].mxu0 }
0x1ceb   : > { %v15758_v3 = vadd.f32 %v15757_v17, %v15756_v49  ;;  %v15759_v41 = vpop.f32.mrb[10].mxu0 }
0x1cec   : > { %v15760_v39 = vpop.f32.mrb[11].mxu0 }
0x1ced   : > { %v13052_v36 = vadd.f32 %v15758_v3, %v12987_v63  ;;  %v15761_v29 = vadd.f32 %v15760_v39, %v15759_v41 }
0x1cef   : > { %v13055_v46 = vadd.f32 %v15761_v29, %v12990_v51 }
0x1cf1   : > { %v15762_v20 = vpop.f32.mrb[12].mxu0 }
0x1cf2   : > { %v15763_v33 = vpop.f32.mrb[13].mxu0 }
0x1cf3   : > { %v15764_v22 = vadd.f32 %v15763_v33, %v15762_v20  ;;  %v15765_v54 = vpop.f32.mrb[14].mxu0 }
0x1cf4   : > { %v15766_v21 = vpop.f32.mrb[15].mxu0 }
0x1cf5   : > { %v13060_v45 = vadd.f32 %v15764_v22, %v12995_v40  ;;  %v15767_v14 = vadd.f32 %v15766_v21, %v15765_v54 }
0x1cf7   : > { %v13063_v19 = vadd.f32 %v15767_v14, %v12998_v52 }
0x1cf9   : > { %v15768_v32 = vpop.f32.mrb[16].mxu0 }
0x1cfa   : > { %v15769_v18 = vpop.f32.mrb[17].mxu0 }
0x1cfb   : > { %v15770_v24 = vadd.f32 %v15769_v18, %v15768_v32  ;;  %v15771_v59 = vpop.f32.mrb[18].mxu0 }
0x1cfc   : > { %v15772_v9 = vpop.f32.mrb[19].mxu0 }
0x1cfd   : > { %v13068_v50 = vadd.f32 %v15770_v24, %v13003_v13  ;;  %v15773_v56 = vadd.f32 %v15772_v9, %v15771_v59 }
0x1cff   : > { %v13071_v6 = vadd.f32 %v15773_v56, %v13006_v57 }
0x1d01   : > { %v15790_v42 = vpop.f32.mrb[20].mxu0 }
0x1d02   : > { %v15791_v63 = vpop.f32.mrb[21].mxu0 }
0x1d03   : > { %v15792_v34 = vadd.f32 %v15791_v63, %v15790_v42  ;;  %v15793_v51 = vpop.f32.mrb[22].mxu0 }
0x1d04   : > { %v15794_v15 = vpop.f32.mrb[23].mxu0 }
0x1d05   : > { %v13109_v53 = vadd.f32 %v15792_v34, %v13044_v10  ;;  %v15795_v0 = vadd.f32 %v15794_v15, %v15793_v51 }
0x1d07   : > { %v13112_v7 = vadd.f32 %v15795_v0, %v13047_v28  ;;  %v23208_v42 = vadd.f32 %v13109_v53, %v22159_v16 }
0x1d09   : > { %v15796_v26 = vpop.f32.mrb[24].mxu0  ;;  %v23216_v34 = vadd.f32 %v13112_v7, %v22154_v8 }
0x1d0a   : > { %v15797_v40 = vpop.f32.mrb[25].mxu0 }
0x1d0b   : > { %v15798_v35 = vadd.f32 %v15797_v40, %v15796_v26  ;;  %v15799_v52 = vpop.f32.mrb[26].mxu0 }
0x1d0c   : > { %v15800_v5 = vpop.f32.mrb[27].mxu0 }
0x1d0d   : > { %v13117_v25 = vadd.f32 %v15798_v35, %v13052_v36  ;;  %v15801_v1 = vadd.f32 %v15800_v5, %v15799_v52 }
0x1d0f   : > { %v13120_v55 = vadd.f32 %v15801_v1, %v13055_v46  ;;  %v23188_v46 = vrot.slane %v23043_v47, %v21612_v31  ;;  %v23236_v5 = vadd.f32 %v13117_v25, %v22187_v37 }
0x1d11   : > { %v15802_v49 = vpop.f32.mrb[28].mxu0 }
0x1d12   : > { %v15803_v13 = vpop.f32.mrb[29].mxu0 }
0x1d13   : > { %v15804_v17 = vadd.f32 %v15803_v13, %v15802_v49  ;;  %v15805_v57 = vpop.f32.mrb[30].mxu0  ;;  %v23244_v49 = vadd.f32 %v13120_v55, %v22180_v44 }
0x1d14   : > { %v15806_v3 = vpop.f32.mrb[31].mxu0 }
0x1d15   : > { %v23178_v41 = vadd.f32 %v15804_v17, %v13060_v45  ;;  %v15807_v39 = vadd.f32 %v15806_v3, %v15805_v57  ;;  %v23192_v45 = vrot.slane %v23043_v47, %v21615_v62 }
0x1d17   : > { %v23180_v29 = vadd.f32 %v15807_v39, %v13063_v19 }
0x1d19   : > { %v15808_v10 = vpop.f32.mrb[32].mxu0 }
0x1d1a   : > { %v15809_v28 = vpop.f32.mrb[33].mxu0 }
0x1d1b   : > { %v15810_v20 = vadd.f32 %v15809_v28, %v15808_v10  ;;  %v15811_v33 = vpop.f32.mrb[34].mxu0 }
0x1d1c   : > { %v15812_v22 = vpop.f32.mrb[35].mxu0 }
0x1d1d   : > { %v23182_v54 = vadd.f32 %v15810_v20, %v13068_v50  ;;  %v15813_v36 = vadd.f32 %v15812_v22, %v15811_v33  ;;  %v23265_v20 = vadd.f32 %v23178_v41, %v22215_v61  ;;  %v24094_v33 = vld [vmem:[#allocation50_spill] sm:$0xff] }
0x1d1f   : > { %v23184_v21 = vadd.f32 %v15813_v36, %v13071_v6  ;;  %v24095_v36 = vld [vmem:[#allocation56_spill] sm:$0xff] }
0x1d84   : > { %v12710_v14 = vpop.f32.mrb[172].mxu1 }
0x1d85   : > { %v16322_v19 = vadd.f32 %v12710_v14, %v23188_v46  ;;  %v12712_v32 = vpop.f32.mrb[173].mxu1 }
0x1d86   : > { %v16323_v18 = vadd.f32 %v12712_v32, %v23192_v45  ;;  %v12714_v24 = vpop.f32.mrb[174].mxu1 }
0x1d87   : > { %v23197_v59 = vadd.f32 %v16322_v19, %v21974_v43  ;;  %v16324_v9 = vadd.f32 %v12714_v24, %v23188_v46  ;;  %v12716_v50 = vpop.f32.mrb[175].mxu1 }
0x1d88   : > { %v23201_v56 = vadd.f32 %v16323_v18, %v21968_v23  ;;  %v16325_v6 = vadd.f32 %v12716_v50, %v23192_v45 }
0x1d89   : > { %v23205_v47 = vadd.f32 %v16324_v9, %v21977_v38  ;;  %v24096_v9 = vld [vmem:[#allocation57_spill] sm:$0xff] }
0x1d8a   : > { %v13165_v63 = vadd.f32 %v23201_v56, %v23197_v59  ;;  %v23213_v43 = vadd.f32 %v16325_v6, %v21971_v11 }
0x1d8c   : > { %v13169_v23 = vadd.f32 %v23213_v43, %v23205_v47  ;;  %v12720_v51 = vpop.f32.mrb[176].mxu1  ;;  %v13166_v15 = vadd.f32 %v13165_v63, %v23208_v42  ;;  %v24097_v63 = vld [vmem:[#allocation48_spill] sm:$0xff] }
0x1d8d   : > { %v16326_v38 = vadd.f32 %v12720_v51, %v23188_v46  ;;  %v12722_v0 = vpop.f32.mrb[177].mxu1 }
0x1d8e   : > { %v16327_v16 = vadd.f32 %v12722_v0, %v23192_v45  ;;  %v12724_v53 = vpop.f32.mrb[178].mxu1  ;;  %13167 = vadd.xlane.f32.xlu0 %v13166_v15  ;;  %v13170_v26 = vadd.f32 %v13169_v23, %v23216_v34  ;;  %v24098_v15 = vld [vmem:[#allocation52_spill] sm:$0xff]  ;;  %v24099_v0 = vld [vmem:[#allocation49_spill] sm:$0xff] }
0x1d8f   : > { %v23225_v11 = vadd.f32 %v16326_v38, %v22014_v2  ;;  %v16328_v8 = vadd.f32 %v12724_v53, %v23188_v46  ;;  %v12726_v7 = vpop.f32.mrb[179].mxu1 }
0x1d90   : > { %v23229_v40 = vadd.f32 %v16327_v16, %v22006_v27  ;;  %v16329_v35 = vadd.f32 %v12726_v7, %v23192_v45  ;;  %13171 = vadd.xlane.f32.xlu1 %v13170_v26  ;;  %v23295_v16 = vadd.f32 %v23182_v54, %v24099_v0  ;;  %v24100_v26 = vld [vmem:[#allocation53_spill] sm:$0xff] }
0x1d91   : > { %v23233_v52 = vadd.f32 %v16328_v8, %v22017_v12 }
0x1d92   : > { %v13173_v1 = vadd.f32 %v23229_v40, %v23225_v11  ;;  %v23241_v2 = vadd.f32 %v16329_v35, %v22011_v48 }
0x1d94   : > { %v13177_v27 = vadd.f32 %v23241_v2, %v23233_v52  ;;  %v12730_v13 = vpop.f32.mrb[180].mxu1  ;;  %v13174_v17 = vadd.f32 %v13173_v1, %v23236_v5 }
0x1d95   : > { %v16330_v12 = vadd.f32 %v12730_v13, %v23188_v46  ;;  %v12732_v57 = vpop.f32.mrb[181].mxu1 }
0x1d96   : > { %v16331_v37 = vadd.f32 %v12732_v57, %v23192_v45  ;;  %v12734_v25 = vpop.f32.mrb[182].mxu1  ;;  %13175 = vadd.xlane.f32.xlu0 %v13174_v17  ;;  %v13178_v3 = vadd.f32 %v13177_v27, %v23244_v49 }
0x1d97   : > { %v23253_v48 = vadd.f32 %v16330_v12, %v22086_v30  ;;  %v16332_v44 = vadd.f32 %v12734_v25, %v23188_v46  ;;  %v12736_v55 = vpop.f32.mrb[183].mxu1 }
0x1d98   : > { %v23257_v39 = vadd.f32 %v16331_v37, %v22080_v58  ;;  %v16333_v10 = vadd.f32 %v12736_v55, %v23192_v45  ;;  %13179 = vadd.xlane.f32.xlu1 %v13178_v3  ;;  %v23274_v58 = vadd.f32 %v23180_v29, %v24095_v36 }
0x1d99   : > { %v23261_v28 = vadd.f32 %v16332_v44, %v22089_v60 }
0x1d9a   : > { %v13181_v30 = vadd.f32 %v23257_v39, %v23253_v48  ;;  %v23270_v22 = vadd.f32 %v16333_v10, %v24094_v33 }
0x1d9c   : > { %v13185_v14 = vadd.f32 %v23270_v22, %v23261_v28  ;;  %v12740_v19 = vpop.f32.mrb[184].mxu1  ;;  %v13182_v60 = vadd.f32 %v13181_v30, %v23265_v20 }
0x1d9d   : > { %v16334_v32 = vadd.f32 %v12740_v19, %v23188_v46  ;;  %v12742_v61 = vpop.f32.mrb[185].mxu1 }
0x1d9e   : > { %v16335_v41 = vadd.f32 %v12742_v61, %v23192_v45  ;;  %v12744_v18 = vpop.f32.mrb[186].mxu1  ;;  %13183 = vadd.xlane.f32.xlu0 %v13182_v60  ;;  %v13186_v24 = vadd.f32 %v13185_v14, %v23274_v58 }
0x1d9f   : > { %v23283_v50 = vadd.f32 %v16334_v32, %v24096_v9  ;;  %v16336_v29 = vadd.f32 %v12744_v18, %v23188_v46  ;;  %v12746_v6 = vpop.f32.mrb[187].mxu1  ;;  %v24101_v46 = vld [vmem:[#allocation51_spill] sm:$0xff] }
0x1da0   : > { %v23287_v23 = vadd.f32 %v16335_v41, %v24097_v63  ;;  %v16337_v51 = vadd.f32 %v12746_v6, %v23192_v45  ;;  %13187 = vadd.xlane.f32.xlu1 %v13186_v24  ;;  %v23304_v7 = vadd.f32 %v23184_v21, %v24101_v46 }
0x1da1   : > { %v23291_v38 = vadd.f32 %v16336_v29, %v24098_v15 }
0x1da2   : > { %v13189_v53 = vadd.f32 %v23287_v23, %v23283_v50  ;;  %v23300_v8 = vadd.f32 %v16337_v51, %v24100_v26 }
0x1da4   : > { %v13193_v45 = vadd.f32 %v23300_v8, %v23291_v38  ;;  %v13190_v35 = vadd.f32 %v13189_v53, %v23295_v16 }
0x1da6   : > { %13191 = vadd.xlane.f32.xlu0 %v13190_v35  ;;  %v13194_v1 = vadd.f32 %v13193_v45, %v23304_v7 }
0x1da8   : > { %13195 = vadd.xlane.f32.xlu1 %v13194_v1 }
0x1e1b   : > { %v13168_v54 = vpop.xlane.xlu0 %13167 }
0x1e1c   : > { %v13197_v27 = vmul.f32 0.0026041667, %v13168_v54 }
0x1e1d   : > { %v13172_v13 = vpop.xlane.xlu1 %13171 }
0x1e1e   : > { %v23311_v17 = vsub.f32 %v23197_v59, %v13197_v27  ;;  %v23314_v12 = vsub.f32 %v23201_v56, %v13197_v27  ;;  %v23317_v21 = vsub.f32 %v23208_v42, %v13197_v27  ;;  %v13198_v57 = vmul.f32 0.0026041667, %v13172_v13 }
0x1e20   : > { %v13229_v37 = vmul.f32 %v23311_v17, %v23311_v17  ;;  %v13230_v25 = vmul.f32 %v23314_v12, %v23314_v12  ;;  %v23324_v3 = vsub.f32 %v23205_v47, %v13198_v57  ;;  %v23327_v44 = vsub.f32 %v23213_v43, %v13198_v57 }
0x1e21   : > { %v23330_v59 = vsub.f32 %v23216_v34, %v13198_v57  ;;  %v13231_v55 = vmul.f32 %v23317_v21, %v23317_v21 }
0x1e22   : > { %v13232_v56 = vmul.f32 %v23324_v3, %v23324_v3  ;;  %v13233_v42 = vmul.f32 %v23327_v44, %v23327_v44  ;;  %v13253_v10 = vadd.f32 %v13230_v25, %v13229_v37 }
0x1e23   : > { %v13176_v30 = vpop.xlane.xlu0 %13175  ;;  %v13234_v43 = vmul.f32 %v23330_v59, %v23330_v59 }
0x1e24   : > { %v13199_v33 = vmul.f32 0.0026041667, %v13176_v30  ;;  %v13254_v47 = vadd.f32 %v13253_v10, %v13231_v55  ;;  %v13257_v36 = vadd.f32 %v13233_v42, %v13232_v56 }
0x1e25   : > { %v13180_v14 = vpop.xlane.xlu1 %13179 }
0x1e26   : > { %v23341_v34 = vsub.f32 %v23225_v11, %v13199_v33  ;;  %v23344_v19 = vsub.f32 %v23229_v40, %v13199_v33  ;;  %v23347_v60 = vsub.f32 %v23236_v5, %v13199_v33  ;;  %v13200_v32 = vmul.f32 0.0026041667, %v13180_v14  ;;  %13255 = vadd.xlane.f32.xlu0 %v13254_v47 }
0x1e27   : > { %v13258_v61 = vadd.f32 %v13257_v36, %v13234_v43 }
0x1e28   : > { %v13235_v41 = vmul.f32 %v23341_v34, %v23341_v34  ;;  %v13236_v18 = vmul.f32 %v23344_v19, %v23344_v19  ;;  %v23354_v24 = vsub.f32 %v23233_v52, %v13200_v32  ;;  %v23357_v11 = vsub.f32 %v23241_v2, %v13200_v32 }
0x1e29   : > { %v23360_v40 = vsub.f32 %v23244_v49, %v13200_v32  ;;  %13259 = vadd.xlane.f32.xlu1 %v13258_v61  ;;  %v13237_v29 = vmul.f32 %v23347_v60, %v23347_v60 }
0x1e2a   : > { %v13238_v5 = vmul.f32 %v23354_v24, %v23354_v24  ;;  %v13239_v9 = vmul.f32 %v23357_v11, %v23357_v11  ;;  %v13261_v6 = vadd.f32 %v13236_v18, %v13235_v41 }
0x1e2b   : > { %v13184_v63 = vpop.xlane.xlu0 %13183  ;;  %v13240_v49 = vmul.f32 %v23360_v40, %v23360_v40 }
0x1e2c   : > { %v13201_v52 = vmul.f32 0.0026041667, %v13184_v63  ;;  %v13262_v51 = vadd.f32 %v13261_v6, %v13237_v29  ;;  %v13265_v15 = vadd.f32 %v13239_v9, %v13238_v5 }
0x1e2d   : > { %v13188_v2 = vpop.xlane.xlu1 %13187 }
0x1e2e   : > { %v23371_v0 = vsub.f32 %v23253_v48, %v13201_v52  ;;  %v23374_v53 = vsub.f32 %v23257_v39, %v13201_v52  ;;  %v23377_v26 = vsub.f32 %v23265_v20, %v13201_v52  ;;  %v13202_v46 = vmul.f32 0.0026041667, %v13188_v2  ;;  %13263 = vadd.xlane.f32.xlu0 %v13262_v51 }
0x1e2f   : > { %v13266_v45 = vadd.f32 %v13265_v15, %v13240_v49  ;;  %v13163_v15 = vld [vmem:[%s869_s5] sm:$0x7] }
0x1e30   : > { %v13241_v35 = vmul.f32 %v23371_v0, %v23371_v0  ;;  %v13242_v1 = vmul.f32 %v23374_v53, %v23374_v53  ;;  %v23384_v54 = vsub.f32 %v23261_v28, %v13202_v46  ;;  %v23387_v48 = vsub.f32 %v23270_v22, %v13202_v46 }
0x1e31   : > { %v23390_v39 = vsub.f32 %v23274_v58, %v13202_v46  ;;  %13267 = vadd.xlane.f32.xlu1 %v13266_v45  ;;  %v13243_v13 = vmul.f32 %v23377_v26, %v23377_v26  ;;  %v13164_v46 = vld [vmem:[%s878_s30] sm:$0x7] }
0x1e32   : > { %v13244_v20 = vmul.f32 %v23384_v54, %v23384_v54  ;;  %v13245_v27 = vmul.f32 %v23387_v48, %v23387_v48  ;;  %v13269_v57 = vadd.f32 %v13242_v1, %v13241_v35  ;;  %v23435_v35 = vrot.slane %v13163_v15, %v21612_v31 }
0x1e33   : > { %v13192_v37 = vpop.xlane.xlu0 %13191  ;;  %v13246_v58 = vmul.f32 %v23390_v39, %v23390_v39  ;;  %v23438_v1 = vrot.slane %v13163_v15, %v21615_v62 }
0x1e34   : > { %v13203_v28 = vmul.f32 0.0026041667, %v13192_v37  ;;  %v13270_v25 = vadd.f32 %v13269_v57, %v13243_v13  ;;  %v13273_v56 = vadd.f32 %v13245_v27, %v13244_v20  ;;  %v23441_v20 = vrot.slane %v13163_v15, %v21620_v4 }
0x1e35   : > { %v13196_v22 = vpop.xlane.xlu1 %13195  ;;  %v23444_v57 = vrot.slane %v13164_v46, %v21612_v31  ;;  %v23447_v37 = vrot.slane %v13164_v46, %v21615_v62 }
0x1e36   : > { %v23401_v42 = vsub.f32 %v23283_v50, %v13203_v28  ;;  %v23404_v55 = vsub.f32 %v23287_v23, %v13203_v28  ;;  %v23407_v10 = vsub.f32 %v23295_v16, %v13203_v28  ;;  %v13204_v30 = vmul.f32 0.0026041667, %v13196_v22  ;;  %13271 = vadd.xlane.f32.xlu0 %v13270_v25 }
0x1e37   : > { %v13274_v33 = vadd.f32 %v13273_v56, %v13246_v58  ;;  %v23450_v28 = vrot.slane %v13164_v46, %v21620_v4 }
0x1e38   : > { %v13247_v47 = vmul.f32 %v23401_v42, %v23401_v42  ;;  %v13248_v36 = vmul.f32 %v23404_v55, %v23404_v55  ;;  %v23414_v14 = vsub.f32 %v23291_v38, %v13204_v30  ;;  %v23417_v50 = vsub.f32 %v23300_v8, %v13204_v30 }
0x1e39   : > { %v23420_v23 = vsub.f32 %v23304_v7, %v13204_v30  ;;  %13275 = vadd.xlane.f32.xlu1 %v13274_v33  ;;  %v13249_v32 = vmul.f32 %v23407_v10, %v23407_v10 }
0x1e3a   : > { %v13250_v16 = vmul.f32 %v23414_v14, %v23414_v14  ;;  %v13251_v43 = vmul.f32 %v23417_v50, %v23417_v50  ;;  %v13277_v61 = vadd.f32 %v13248_v36, %v13247_v47 }
0x1e3b   : > { %v13252_v38 = vmul.f32 %v23420_v23, %v23420_v23 }
0x1e3c   : > { %v13278_v41 = vadd.f32 %v13277_v61, %v13249_v32  ;;  %v13281_v8 = vadd.f32 %v13251_v43, %v13250_v16 }
0x1e3e   : > { %13279 = vadd.xlane.f32.xlu0 %v13278_v41  ;;  %v13282_v7 = vadd.f32 %v13281_v8, %v13252_v38 }
0x1e40   : > { %13283 = vadd.xlane.f32.xlu1 %v13282_v7 }
0x1eb3   : > { %v13256_v18 = vpop.xlane.xlu0 %13255 }
0x1eb4   : > { %v13285_v5 = vmul.f32 0.0026041667, %v13256_v18 }
0x1eb6   : > { %v13293_v9 = vadd.f32 1e-05, %v13285_v5  ;;  %v13260_v29 = vpop.xlane.xlu1 %13259 }
0x1eb7   : > { %v13286_v6 = vmul.f32 0.0026041667, %v13260_v29 }
0x1eb8   : > { %18452 = vrsqrt.f32 %v13293_v9 }
0x1eb9   : > { %v13294_v63 = vadd.f32 1e-05, %v13286_v6 }
0x1ebb   : > { %18454 = vrsqrt.f32 %v13294_v63  ;;  %v13264_v52 = vpop.xlane.xlu0 %13263 }
0x1ebc   : > { %v13287_v51 = vmul.f32 0.0026041667, %v13264_v52 }
0x1ebe   : > { %v13295_v2 = vadd.f32 1e-05, %v13287_v51  ;;  %v13268_v49 = vpop.xlane.xlu1 %13267 }
0x1ebf   : > { %v13288_v45 = vmul.f32 0.0026041667, %v13268_v49 }
0x1ec0   : > { %18456 = vrsqrt.f32 %v13295_v2 }
0x1ec1   : > { %v13296_v27 = vadd.f32 1e-05, %v13288_v45 }
0x1ec2   : > { %v18453_v13 = vpop.eup %18452 }
0x1ec3   : > { %v13309_v25 = vmul.f32 %v18453_v13, %v23311_v17  ;;  %v13310_v56 = vmul.f32 %v18453_v13, %v23314_v12  ;;  %v13311_v22 = vmul.f32 %v18453_v13, %v23317_v21  ;;  %18458 = vrsqrt.f32 %v13296_v27  ;;  %v13272_v58 = vpop.xlane.xlu0 %13271 }
0x1ec4   : > { %v13289_v30 = vmul.f32 0.0026041667, %v13272_v58 }
0x1ec5   : > { %v18455_v33 = vpop.eup %18454  ;;  %v13349_v47 = vmul.f32 %v23435_v35, %v13309_v25  ;;  %v13350_v36 = vmul.f32 %v23438_v1, %v13310_v56  ;;  %v13351_v16 = vmul.f32 %v23441_v20, %v13311_v22 }
0x1ec6   : > { %v13312_v43 = vmul.f32 %v18455_v33, %v23324_v3  ;;  %v13313_v32 = vmul.f32 %v18455_v33, %v23327_v44  ;;  %v13314_v17 = vmul.f32 %v18455_v33, %v23330_v59  ;;  %v13297_v61 = vadd.f32 1e-05, %v13289_v30  ;;  %v13276_v12 = vpop.xlane.xlu1 %13275 }
0x1ec7   : > { %v23462_v21 = vadd.f32 %v23444_v57, %v13349_v47  ;;  %v23465_v41 = vadd.f32 %v23447_v37, %v13350_v36  ;;  %v23468_v38 = vadd.f32 %v23450_v28, %v13351_v16  ;;  %v13290_v8 = vmul.f32 0.0026041667, %v13276_v12 }
0x1ec8   : > { %v13352_v7 = vmul.f32 %v23435_v35, %v13312_v43  ;;  %v13353_v3 = vmul.f32 %v23438_v1, %v13313_v32  ;;  %v13354_v44 = vmul.f32 %v23441_v20, %v13314_v17  ;;  %18460 = vrsqrt.f32 %v13297_v61 }
0x1ec9   : > { %13413 = vst [vmem:[#allocation2] sm:$0xff] %v23462_v21  ;;  %13414 = vst [vmem:[#allocation2 + $0x8] sm:$0xff] %v23465_v41  ;;  %v13298_v59 = vadd.f32 1e-05, %v13290_v8 }
0x1eca   : > { %13415 = vst [vmem:[#allocation2 + $0x10] sm:$0xff] %v23468_v38  ;;  %v18457_v18 = vpop.eup %18456  ;;  %v23477_v5 = vadd.f32 %v23444_v57, %v13352_v7  ;;  %v23480_v9 = vadd.f32 %v23447_v37, %v13353_v3  ;;  %v23483_v29 = vadd.f32 %v23450_v28, %v13354_v44 }
0x1ecb   : > { %v13315_v6 = vmul.f32 %v18457_v18, %v23341_v34  ;;  %v13316_v63 = vmul.f32 %v18457_v18, %v23344_v19  ;;  %v13317_v52 = vmul.f32 %v18457_v18, %v23347_v60  ;;  %18462 = vrsqrt.f32 %v13298_v59  ;;  %v13280_v51 = vpop.xlane.xlu0 %13279 }
0x1ecc   : > { %13416 = vst [vmem:[#allocation2 + $0x18] sm:$0xff] %v23477_v5  ;;  %13417 = vst [vmem:[#allocation2 + $0x20] sm:$0xff] %v23480_v9  ;;  %v13291_v15 = vmul.f32 0.0026041667, %v13280_v51 }
0x1ecd   : > { %13418 = vst [vmem:[#allocation2 + $0x28] sm:$0xff] %v23483_v29  ;;  %v18459_v2 = vpop.eup %18458  ;;  %v13355_v49 = vmul.f32 %v23435_v35, %v13315_v6  ;;  %v13356_v46 = vmul.f32 %v23438_v1, %v13316_v63  ;;  %v13357_v34 = vmul.f32 %v23441_v20, %v13317_v52  ;;  %v13284_v45 = vpop.xlane.xlu1 %13283 }
0x1ece   : > { %v13318_v19 = vmul.f32 %v18459_v2, %v23354_v24  ;;  %v13319_v60 = vmul.f32 %v18459_v2, %v23357_v11  ;;  %v13320_v27 = vmul.f32 %v18459_v2, %v23360_v40  ;;  %v13299_v13 = vadd.f32 1e-05, %v13291_v15 }
0x1ecf   : > { %v23498_v25 = vadd.f32 %v23444_v57, %v13355_v49  ;;  %v23501_v56 = vadd.f32 %v23447_v37, %v13356_v46  ;;  %v23504_v22 = vadd.f32 %v23450_v28, %v13357_v34  ;;  %v13292_v58 = vmul.f32 0.0026041667, %v13284_v45 }
0x1ed0   : > { %v13358_v30 = vmul.f32 %v23435_v35, %v13318_v19  ;;  %v13359_v33 = vmul.f32 %v23438_v1, %v13319_v60  ;;  %v13360_v24 = vmul.f32 %v23441_v20, %v13320_v27  ;;  %18464 = vrsqrt.f32 %v13299_v13 }
0x1ed1   : > { %13419 = vst [vmem:[#allocation2 + $0x30] sm:$0xff] %v23498_v25  ;;  %13420 = vst [vmem:[#allocation2 + $0x38] sm:$0xff] %v23501_v56  ;;  %v13300_v11 = vadd.f32 1e-05, %v13292_v58 }
0x1ed2   : > { %13421 = vst [vmem:[#allocation2 + $0x40] sm:$0xff] %v23504_v22  ;;  %v18461_v40 = vpop.eup %18460  ;;  %v23513_v47 = vadd.f32 %v23444_v57, %v13358_v30  ;;  %v23516_v36 = vadd.f32 %v23447_v37, %v13359_v33  ;;  %v23519_v16 = vadd.f32 %v23450_v28, %v13360_v24 }
0x1ed3   : > { %v13321_v43 = vmul.f32 %v18461_v40, %v23371_v0  ;;  %v13322_v32 = vmul.f32 %v18461_v40, %v23374_v53  ;;  %v13323_v17 = vmul.f32 %v18461_v40, %v23377_v26  ;;  %18466 = vrsqrt.f32 %v13300_v11 }
0x1ed4   : > { %13422 = vst [vmem:[#allocation2 + $0x48] sm:$0xff] %v23513_v47  ;;  %13423 = vst [vmem:[#allocation2 + $0x50] sm:$0xff] %v23516_v36 }
0x1ed5   : > { %13424 = vst [vmem:[#allocation2 + $0x58] sm:$0xff] %v23519_v16  ;;  %v18463_v61 = vpop.eup %18462  ;;  %v13361_v12 = vmul.f32 %v23435_v35, %v13321_v43  ;;  %v13362_v8 = vmul.f32 %v23438_v1, %v13322_v32  ;;  %v13363_v7 = vmul.f32 %v23441_v20, %v13323_v17 }
0x1ed6   : > { %v13324_v0 = vmul.f32 %v18463_v61, %v23384_v54  ;;  %v13325_v53 = vmul.f32 %v18463_v61, %v23387_v48  ;;  %v13326_v26 = vmul.f32 %v18463_v61, %v23390_v39 }
0x1ed7   : > { %v23534_v3 = vadd.f32 %v23444_v57, %v13361_v12  ;;  %v23537_v44 = vadd.f32 %v23447_v37, %v13362_v8  ;;  %v23540_v59 = vadd.f32 %v23450_v28, %v13363_v7  ;;  %v18500_v7 = vld [vmem:[#allocation22 + $0x40] sm:$0xff] (!%p15312_p3)  }
0x1ed8   : > { %v13364_v18 = vmul.f32 %v23435_v35, %v13324_v0  ;;  %v13365_v6 = vmul.f32 %v23438_v1, %v13325_v53  ;;  %v13366_v63 = vmul.f32 %v23441_v20, %v13326_v26  ;;  %v18501_v0 = vld [vmem:[#allocation22] sm:$0xff] (!%p15312_p3)   ;;  %15814 = vmatprep.subr.bf16.mxu0 (!%p15312_p3), %v18500_v7 }
0x1ed9   : > { %13425 = vst [vmem:[#allocation2 + $0x60] sm:$0xff] %v23534_v3  ;;  %13426 = vst [vmem:[#allocation2 + $0x68] sm:$0xff] %v23537_v44  ;;  %v13459_v33 = vadd.f32 (!%p15312_p3), %v23537_v44, %v23534_v3  ;;  %v18502_v53 = vld [vmem:[#allocation22 + $0x80] sm:$0xff] (!%p15312_p3)   ;;  %15815 = vmatpush3.bf16.msra.mxu0 (!%p15312_p3), %v18501_v0 }
0x1eda   : > { %13427 = vst [vmem:[#allocation2 + $0x70] sm:$0xff] %v23540_v59  ;;  %v18465_v54 = vpop.eup %18464  ;;  %v23549_v48 = vadd.f32 %v23444_v57, %v13364_v18  ;;  %v23552_v39 = vadd.f32 %v23447_v37, %v13365_v6  ;;  %v23555_v52 = vadd.f32 %v23450_v28, %v13366_v63  ;;  %16170 = vmatprep.subr.bf16.mxu1 (!%p15312_p3), %v18502_v53 }
0x1edb   : > { %v13327_v51 = vmul.f32 %v18465_v54, %v23401_v42  ;;  %v13328_v15 = vmul.f32 %v18465_v54, %v23404_v55  ;;  %v13329_v2 = vmul.f32 %v18465_v54, %v23407_v10  ;;  %v13460_v32 = vadd.f32 (!%p15312_p3), %v13459_v33, %v23540_v59  ;;  %16171 = vmatpush3.bf16.msra.mxu1 (!%p15312_p3), %v18502_v53 }
0x1edc   : > { %13428 = vst [vmem:[#allocation2 + $0x78] sm:$0xff] %v23549_v48  ;;  %13429 = vst [vmem:[#allocation2 + $0x80] sm:$0xff] %v23552_v39  ;;  %v13463_v40 = vadd.f32 (!%p15312_p3), %v23552_v39, %v23549_v48 }
0x1edd   : > { %13430 = vst [vmem:[#allocation2 + $0x88] sm:$0xff] %v23555_v52  ;;  %v18467_v49 = vpop.eup %18466  ;;  %v13367_v46 = vmul.f32 %v23435_v35, %v13327_v51  ;;  %v13368_v34 = vmul.f32 %v23438_v1, %v13328_v15  ;;  %v13369_v45 = vmul.f32 %v23441_v20, %v13329_v2 }
0x1ede   : > { %v13330_v19 = vmul.f32 %v18467_v49, %v23414_v14  ;;  %v13331_v42 = vmul.f32 %v18467_v49, %v23417_v50  ;;  %v13332_v55 = vmul.f32 %v18467_v49, %v23420_v23  ;;  %v13464_v17 = vadd.f32 (!%p15312_p3), %v13463_v40, %v23555_v52 }
0x1edf   : > { %v23570_v10 = vadd.f32 %v23444_v57, %v13367_v46  ;;  %v23573_v60 = vadd.f32 %v23447_v37, %v13368_v34  ;;  %v23576_v27 = vadd.f32 %v23450_v28, %v13369_v45  ;;  %13440 = sbr.rel (%p15312_p3) target bundleno = 8478 (0x211e), region = 164 }
0x1ee0   : > { %v13370_v13 = vmul.f32 %v23435_v35, %v13330_v19  ;;  %v13371_v58 = vmul.f32 %v23438_v1, %v13331_v42  ;;  %v13372_v30 = vmul.f32 %v23441_v20, %v13332_v55  ;;  %v13443_v35 = vadd.f32 (!%p15312_p3), %v23465_v41, %v23462_v21 }
0x1ee1   : > { %13431 = vst [vmem:[#allocation2 + $0x90] sm:$0xff] %v23570_v10  ;;  %13432 = vst [vmem:[#allocation2 + $0x98] sm:$0xff] %v23573_v60  ;;  %v13451_v1 = vadd.f32 (!%p15312_p3), %v23501_v56, %v23498_v25  ;;  %v13447_v20 = vadd.f32 (!%p15312_p3), %v23480_v9, %v23477_v5  ;;  %v13467_v43 = vadd.f32 (!%p15312_p3), %v23573_v60, %v23570_v10 }
0x1ee2   : > { %13433 = vst [vmem:[#allocation2 + $0xa0] sm:$0xff] %v23576_v27  ;;  %v23585_v14 = vadd.f32 %v23444_v57, %v13370_v13  ;;  %v23588_v50 = vadd.f32 %v23447_v37, %v13371_v58  ;;  %v23591_v23 = vadd.f32 %v23450_v28, %v13372_v30  ;;  %v13455_v57 = vadd.f32 (!%p15312_p3), %v23516_v36, %v23513_v47 }
0x1ee3   : > { %v13444_v37 = vadd.f32 (!%p15312_p3), %v13443_v35, %v23468_v38  ;;  %v13452_v28 = vadd.f32 (!%p15312_p3), %v13451_v1, %v23504_v22  ;;  %v13448_v24 = vadd.f32 (!%p15312_p3), %v13447_v20, %v23483_v29  ;;  %v13468_v12 = vadd.f32 (!%p15312_p3), %v13467_v43, %v23576_v27 }
0x1ee4   : > { %13434 = vst [vmem:[#allocation2 + $0xa8] sm:$0xff] %v23585_v14  ;;  %13435 = vst [vmem:[#allocation2 + $0xb0] sm:$0xff] %v23588_v50  ;;  %v13456_v11 = vadd.f32 (!%p15312_p3), %v13455_v57, %v23519_v16  ;;  %v13471_v61 = vadd.f32 (!%p15312_p3), %v23588_v50, %v23585_v14 }
0x1ee5   : > { %13436 = vst [vmem:[#allocation2 + $0xb8] sm:$0xff] %v23591_v23  ;;  %13445 = vadd.xlane.f32.xlu0 (!%p15312_p3), %v13444_v37  ;;  %13453 = vadd.xlane.f32.xlu1 (!%p15312_p3), %v13452_v28 }
0x1ee6   : > { %v13472_v8 = vadd.f32 %v13471_v61, %v23591_v23 }
0x1ee9   : > { %13449 = vadd.xlane.f32.xlu0 %v13448_v24  ;;  %13457 = vadd.xlane.f32.xlu1 %v13456_v11 }
0x1eed   : > { %13461 = vadd.xlane.f32.xlu0 %v13460_v32  ;;  %13465 = vadd.xlane.f32.xlu1 %v13464_v17 }
0x1ef1   : > { %13469 = vadd.xlane.f32.xlu0 %v13468_v12  ;;  %13473 = vadd.xlane.f32.xlu1 %v13472_v8 }
0x1f72   : > { %v13446_v26 = vpop.xlane.xlu0 %13445  ;;  %v13454_v18 = vpop.xlane.xlu1 %13453 }
0x1f73   : > { %v13475_v6 = vmul.f32 0.0026041667, %v13446_v26  ;;  %v13477_v63 = vmul.f32 0.0026041667, %v13454_v18 }
0x1f75   : > { %v23622_v54 = vsub.f32 %v23462_v21, %v13475_v6  ;;  %v23625_v51 = vsub.f32 %v23465_v41, %v13475_v6  ;;  %v23628_v15 = vsub.f32 %v23468_v38, %v13475_v6  ;;  %v23631_v2 = vsub.f32 %v23498_v25, %v13477_v63 }
0x1f76   : > { %v23634_v49 = vsub.f32 %v23501_v56, %v13477_v63  ;;  %v23637_v46 = vsub.f32 %v23504_v22, %v13477_v63  ;;  %v13450_v34 = vpop.xlane.xlu0 %13449  ;;  %v13458_v45 = vpop.xlane.xlu1 %13457 }
0x1f77   : > { %v13476_v19 = vmul.f32 0.0026041667, %v13450_v34  ;;  %v13478_v21 = vmul.f32 0.0026041667, %v13458_v45  ;;  %v13507_v41 = vmul.f32 %v23622_v54, %v23622_v54  ;;  %v13508_v38 = vmul.f32 %v23625_v51, %v23625_v51 }
0x1f78   : > { %v13509_v25 = vmul.f32 %v23628_v15, %v23628_v15  ;;  %v13513_v56 = vmul.f32 %v23631_v2, %v23631_v2  ;;  %v13514_v22 = vmul.f32 %v23634_v49, %v23634_v49  ;;  %v13515_v42 = vmul.f32 %v23637_v46, %v23637_v46 }
0x1f79   : > { %v23652_v55 = vsub.f32 %v23477_v5, %v13476_v19  ;;  %v23655_v13 = vsub.f32 %v23480_v9, %v13476_v19  ;;  %v23658_v58 = vsub.f32 %v23483_v29, %v13476_v19  ;;  %v23661_v30 = vsub.f32 %v23513_v47, %v13478_v21 }
0x1f7a   : > { %v23664_v35 = vsub.f32 %v23516_v36, %v13478_v21  ;;  %v23667_v1 = vsub.f32 %v23519_v16, %v13478_v21  ;;  %v13462_v20 = vpop.xlane.xlu0 %13461  ;;  %v13531_v57 = vadd.f32 %v13508_v38, %v13507_v41  ;;  %v13466_v37 = vpop.xlane.xlu1 %13465  ;;  %v13539_v5 = vadd.f32 %v13514_v22, %v13513_v56 }
0x1f7b   : > { %v13479_v28 = vmul.f32 0.0026041667, %v13462_v20  ;;  %v13480_v33 = vmul.f32 0.0026041667, %v13466_v37  ;;  %v13510_v9 = vmul.f32 %v23652_v55, %v23652_v55  ;;  %v13511_v29 = vmul.f32 %v23655_v13, %v23655_v13 }
0x1f7c   : > { %v13532_v47 = vadd.f32 %v13531_v57, %v13509_v25  ;;  %v13540_v24 = vadd.f32 %v13539_v5, %v13515_v42  ;;  %v13512_v36 = vmul.f32 %v23658_v58, %v23658_v58  ;;  %v13516_v16 = vmul.f32 %v23661_v30, %v23661_v30 }
0x1f7d   : > { %v23678_v11 = vsub.f32 %v23534_v3, %v13479_v28  ;;  %v23681_v40 = vsub.f32 %v23537_v44, %v13479_v28  ;;  %v23684_v43 = vsub.f32 %v23540_v59, %v13479_v28  ;;  %v23687_v32 = vsub.f32 %v23549_v48, %v13480_v33 }
0x1f7e   : > { %13533 = vadd.xlane.f32.xlu0 %v13532_v47  ;;  %v23690_v17 = vsub.f32 %v23552_v39, %v13480_v33  ;;  %v23693_v61 = vsub.f32 %v23555_v52, %v13480_v33  ;;  %v13470_v12 = vpop.xlane.xlu0 %13469  ;;  %v13535_v8 = vadd.f32 %v13511_v29, %v13510_v9  ;;  %v13474_v3 = vpop.xlane.xlu1 %13473  ;;  %v13517_v44 = vmul.f32 %v23664_v35, %v23664_v35  ;;  %v18503_v33 = vld [vmem:[#allocation22 + $0x48] sm:$0xff]   ;;  %v18506_v47 = vld [vmem:[#allocation22 + $0x50] sm:$0xff]  }
0x1f7f   : > { %v13481_v7 = vmul.f32 0.0026041667, %v13470_v12  ;;  %v13482_v0 = vmul.f32 0.0026041667, %v13474_v3  ;;  %v13518_v59 = vmul.f32 %v23667_v1, %v23667_v1  ;;  %v13519_v48 = vmul.f32 %v23678_v11, %v23678_v11  ;;  %v18504_v9 = vld [vmem:[#allocation22 + $0x8] sm:$0xff]   ;;  %15816 = vmatprep.subr.bf16.mxu0 %v18503_v33  ;;  %v18510_v12 = vld [vmem:[#allocation22 + $0x18] sm:$0xff]  }
0x1f80   : > { %v13536_v53 = vadd.f32 %v13535_v8, %v13512_v36  ;;  %v13543_v39 = vadd.f32 %v13517_v44, %v13516_v16  ;;  %v13520_v52 = vmul.f32 %v23681_v40, %v23681_v40  ;;  %v13521_v26 = vmul.f32 %v23684_v43, %v23684_v43  ;;  %15817 = vmatpush3.bf16.msra.mxu0 %v18504_v9  ;;  %v18505_v29 = vld [vmem:[#allocation22 + $0x88] sm:$0xff]   ;;  %v18508_v36 = vld [vmem:[#allocation22 + $0x90] sm:$0xff]   ;;  %v18509_v16 = vld [vmem:[#allocation22 + $0x58] sm:$0xff]  }
0x1f81   : > { %v23706_v18 = vsub.f32 %v23570_v10, %v13481_v7  ;;  %v23709_v6 = vsub.f32 %v23573_v60, %v13481_v7  ;;  %v23712_v63 = vsub.f32 %v23576_v27, %v13481_v7  ;;  %v23715_v34 = vsub.f32 %v23585_v14, %v13482_v0  ;;  %16172 = vmatprep.subr.bf16.mxu1 %v18505_v29  ;;  %v18511_v8 = vld [vmem:[#allocation22 + $0x98] sm:$0xff]   ;;  %v18512_v3 = vld [vmem:[#allocation22 + $0x60] sm:$0xff]  }
0x1f82   : > { %13541 = vadd.xlane.f32.xlu0 %v13540_v24  ;;  %13537 = vadd.xlane.f32.xlu1 %v13536_v53  ;;  %v23718_v45 = vsub.f32 %v23588_v50, %v13482_v0  ;;  %v23721_v19 = vsub.f32 %v23591_v23, %v13482_v0  ;;  %v13544_v21 = vadd.f32 %v13543_v39, %v13518_v59  ;;  %v18507_v24 = vld [vmem:[#allocation22 + $0x10] sm:$0xff]   ;;  %v18513_v44 = vld [vmem:[#allocation22 + $0x20] sm:$0xff]   ;;  %v18515_v0 = vld [vmem:[#allocation22 + $0x68] sm:$0xff]  }
0x1f83   : > { %v13547_v10 = vadd.f32 %v13520_v52, %v13519_v48  ;;  %v13522_v60 = vmul.f32 %v23687_v32, %v23687_v32  ;;  %v13523_v27 = vmul.f32 %v23690_v17, %v23690_v17  ;;  %v13524_v14 = vmul.f32 %v23693_v61, %v23693_v61  ;;  %15818 = vmatprep.subr.bf16.mxu0 %v18506_v47  ;;  %v18514_v7 = vld [vmem:[#allocation22 + $0xa0] sm:$0xff]   ;;  %v18516_v59 = vld [vmem:[#allocation22 + $0x28] sm:$0xff]   ;;  %v18518_v53 = vld [vmem:[#allocation22 + $0x70] sm:$0xff]  }
0x1f84   : > { %v13525_v41 = vmul.f32 %v23706_v18, %v23706_v18  ;;  %v13526_v50 = vmul.f32 %v23709_v6, %v23709_v6  ;;  %v13527_v23 = vmul.f32 %v23712_v63, %v23712_v63  ;;  %v13528_v38 = vmul.f32 %v23715_v34, %v23715_v34  ;;  %16173 = vmatpush3.bf16.msra.mxu1 %v18505_v29  ;;  %v18517_v48 = vld [vmem:[#allocation22 + $0xa8] sm:$0xff]   ;;  %v18519_v39 = vld [vmem:[#allocation22 + $0x30] sm:$0xff]  }
0x1f85   : > { %v13548_v25 = vadd.f32 %v13547_v10, %v13521_v26  ;;  %v13551_v56 = vadd.f32 %v13523_v27, %v13522_v60  ;;  %v13529_v22 = vmul.f32 %v23718_v45, %v23718_v45  ;;  %v13530_v20 = vmul.f32 %v23721_v19, %v23721_v19  ;;  %15819 = vmatpush3.bf16.msra.mxu0 %v18507_v24  ;;  %v18520_v52 = vld [vmem:[#allocation22 + $0xb0] sm:$0xff]   ;;  %v18521_v26 = vld [vmem:[#allocation22 + $0x78] sm:$0xff]  }
0x1f86   : > { %13545 = vadd.xlane.f32.xlu1 %v13544_v21  ;;  %v13555_v42 = vadd.f32 %v13526_v50, %v13525_v41  ;;  %16174 = vmatprep.subr.bf16.mxu1 %v18508_v36  ;;  %v18522_v21 = vld [vmem:[#allocation22 + $0x38] sm:$0xff]  }
0x1f87   : > { %13549 = vadd.xlane.f32.xlu0 %v13548_v25  ;;  %v13552_v57 = vadd.f32 %v13551_v56, %v13524_v14  ;;  %v13559_v37 = vadd.f32 %v13529_v22, %v13528_v38  ;;  %15820 = vmatprep.subr.bf16.mxu0 %v18509_v16  ;;  %v18523_v10 = vld [vmem:[#allocation22 + $0xb8] sm:$0xff]  }
0x1f88   : > { %v13556_v5 = vadd.f32 %v13555_v42, %v13527_v23  ;;  %16175 = vmatpush3.bf16.msra.mxu1 %v18508_v36  ;;  %v13442_v24 = vld [vmem:[#allocation20] sm:$0x7] }
0x1f89   : > { %v13560_v28 = vadd.f32 %v13559_v37, %v13530_v20  ;;  %15821 = vmatpush3.bf16.msra.mxu0 %v18510_v12  ;;  %16176 = vmatprep.subr.bf16.mxu1 %v18511_v8 }
0x1f8a   : > { %13553 = vadd.xlane.f32.xlu1 %v13552_v57  ;;  %15822 = vmatprep.subr.bf16.mxu0 %v18512_v3 }
0x1f8b   : > { %13557 = vadd.xlane.f32.xlu0 %v13556_v5  ;;  %v13441_v5 = vld [vmem:[#allocation19] sm:$0x7] }
0x1f8c   : > { %16177 = vmatpush3.bf16.msra.mxu1 %v18511_v8  ;;  %v23742_v36 = vrot.slane %v13441_v5, %v21615_v62  ;;  %v23745_v16 = vrot.slane %v13441_v5, %v21620_v4  ;;  %v23748_v3 = vrot.slane %v13441_v5, %v21612_v31 }
0x1f8d   : > { %15823 = vmatpush3.bf16.msra.mxu0 %v18513_v44  ;;  %16178 = vmatprep.subr.bf16.mxu1 %v18514_v7 }
0x1f8e   : > { %13561 = vadd.xlane.f32.xlu1 %v13560_v28  ;;  %15824 = vmatprep.subr.bf16.mxu0 %v18515_v0 }
0x1f90   : > { %16179 = vmatpush3.bf16.msra.mxu1 %v18514_v7 }
0x1f91   : > { %15825 = vmatpush3.bf16.msra.mxu0 %v18516_v59  ;;  %16180 = vmatprep.subr.bf16.mxu1 %v18517_v48 }
0x1f92   : > { %15826 = vmatprep.subr.bf16.mxu0 %v18518_v53 }
0x1f94   : > { %16181 = vmatpush3.bf16.msra.mxu1 %v18517_v48 }
0x1f95   : > { %15827 = vmatpush3.bf16.msra.mxu0 %v18519_v39  ;;  %16182 = vmatprep.subr.bf16.mxu1 %v18520_v52  ;;  %v23754_v39 = vrot.slane %v13442_v24, %v21615_v62 }
0x1f96   : > { %15828 = vmatprep.subr.bf16.mxu0 %v18521_v26 }
0x1f98   : > { %16183 = vmatpush3.bf16.msra.mxu1 %v18520_v52 }
0x1f99   : > { %15829 = vmatpush3.bf16.msra.mxu0 %v18522_v21  ;;  %16184 = vmatprep.subr.bf16.mxu1 %v18523_v10  ;;  %v23759_v21 = vrot.slane %v13442_v24, %v21620_v4 }
0x1f9c   : > { %16185 = vmatpush3.bf16.msra.mxu1 %v18523_v10 }
0x200b   : > { %v13534_v60 = vpop.xlane.xlu0 %13533 }
0x200c   : > { %v13563_v27 = vmul.f32 0.0026041667, %v13534_v60 }
0x200e   : > { %v13571_v14 = vadd.f32 1e-05, %v13563_v27 }
0x200f   : > { %v13538_v41 = vpop.xlane.xlu1 %13537  ;;  %v13542_v50 = vpop.xlane.xlu0 %13541 }
0x2010   : > { %18524 = vrsqrt.f32 %v13571_v14  ;;  %v13564_v23 = vmul.f32 0.0026041667, %v13538_v41  ;;  %v13565_v38 = vmul.f32 0.0026041667, %v13542_v50 }
0x2012   : > { %v13572_v25 = vadd.f32 1e-05, %v13564_v23  ;;  %v13573_v56 = vadd.f32 1e-05, %v13565_v38 }
0x2013   : > { %v13546_v22 = vpop.xlane.xlu1 %13545 }
0x2014   : > { %18526 = vrsqrt.f32 %v13572_v25  ;;  %v13566_v42 = vmul.f32 0.0026041667, %v13546_v22  ;;  %v13550_v20 = vpop.xlane.xlu0 %13549 }
0x2015   : > { %18528 = vrsqrt.f32 %v13573_v56  ;;  %v13567_v57 = vmul.f32 0.0026041667, %v13550_v20 }
0x2016   : > { %v13574_v37 = vadd.f32 1e-05, %v13566_v42 }
0x2017   : > { %v13575_v28 = vadd.f32 1e-05, %v13567_v57  ;;  %v13554_v33 = vpop.xlane.xlu1 %13553 }
0x2018   : > { %18530 = vrsqrt.f32 %v13574_v37  ;;  %v13568_v9 = vmul.f32 0.0026041667, %v13554_v33  ;;  %v13558_v29 = vpop.xlane.xlu0 %13557 }
0x2019   : > { %18532 = vrsqrt.f32 %v13575_v28  ;;  %v13569_v47 = vmul.f32 0.0026041667, %v13558_v29 }
0x201a   : > { %v18525_v12 = vpop.eup %18524  ;;  %v13576_v8 = vadd.f32 1e-05, %v13568_v9 }
0x201b   : > { %v13577_v44 = vadd.f32 1e-05, %v13569_v47  ;;  %v13562_v7 = vpop.xlane.xlu1 %13561  ;;  %v13588_v0 = vmul.f32 %v18525_v12, %v23625_v51  ;;  %v13589_v59 = vmul.f32 %v18525_v12, %v23628_v15  ;;  %v13587_v48 = vmul.f32 %v18525_v12, %v23622_v54 }
0x201c   : > { %18534 = vrsqrt.f32 %v13576_v8  ;;  %v13570_v53 = vmul.f32 0.0026041667, %v13562_v7  ;;  %v23763_v15 = vrot.slane %v13442_v24, %v21612_v31 }
0x201d   : > { %18536 = vrsqrt.f32 %v13577_v44  ;;  %v13628_v52 = vmul.f32 %v23742_v36, %v13588_v0  ;;  %v13629_v26 = vmul.f32 %v23745_v16, %v13589_v59  ;;  %v13627_v51 = vmul.f32 %v23748_v3, %v13587_v48 }
0x201e   : > { %v18527_v10 = vpop.eup %18526  ;;  %v13578_v60 = vadd.f32 1e-05, %v13570_v53 }
0x201f   : > { %v18529_v54 = vpop.eup %18528  ;;  %v13591_v27 = vmul.f32 %v18527_v10, %v23655_v13  ;;  %v13592_v62 = vmul.f32 %v18527_v10, %v23658_v58  ;;  %v13668_v14 = vadd.f32 %v23754_v39, %v13628_v52  ;;  %v13590_v41 = vmul.f32 %v18527_v10, %v23652_v55 }
0x2020   : > { %18538 = vrsqrt.f32 %v13578_v60  ;;  %v13594_v4 = vmul.f32 %v18529_v54, %v23634_v49  ;;  %v13669_v38 = vadd.f32 %v23759_v21, %v13629_v26  ;;  %v13595_v31 = vmul.f32 %v18529_v54, %v23637_v46 }
0x2021   : > { %v13631_v50 = vmul.f32 %v23742_v36, %v13591_v27  ;;  %v13632_v23 = vmul.f32 %v23745_v16, %v13592_v62  ;;  %v13630_v13 = vmul.f32 %v23748_v3, %v13590_v41  ;;  %v13667_v58 = vadd.f32 %v23763_v15, %v13627_v51 }
0x2022   : > { %v18531_v25 = vpop.eup %18530  ;;  %v13634_v56 = vmul.f32 %v23742_v36, %v13594_v4  ;;  %v13593_v22 = vmul.f32 %v18529_v54, %v23631_v2  ;;  %v13635_v5 = vmul.f32 %v23745_v16, %v13595_v31 }
0x2023   : > { %v18533_v55 = vpop.eup %18532  ;;  %v13671_v49 = vadd.f32 %v23754_v39, %v13631_v50  ;;  %v13672_v42 = vadd.f32 %v23759_v21, %v13632_v23  ;;  %v13597_v20 = vmul.f32 %v18531_v25, %v23664_v35  ;;  %v13598_v57 = vmul.f32 %v18531_v25, %v23667_v1 }
0x2024   : > { %v13670_v46 = vadd.f32 %v23763_v15, %v13630_v13  ;;  %v13674_v37 = vadd.f32 %v23754_v39, %v13634_v56  ;;  %v13601_v28 = vmul.f32 %v18533_v55, %v23684_v43  ;;  %v13675_v35 = vadd.f32 %v23759_v21, %v13635_v5 }
0x2025   : > { %v13692_v33 = vpack.c.bf16 %v13671_v49, %v13668_v14  ;;  %v13693_v9 = vpack.c.bf16 %v13672_v42, %v13669_v38  ;;  %v13637_v2 = vmul.f32 %v23742_v36, %v13597_v20  ;;  %v13638_v29 = vmul.f32 %v23745_v16, %v13598_v57 }
0x2026   : > { %v18535_v47 = vpop.eup %18534  ;;  %v13691_v24 = vpack.c.bf16 %v13670_v46, %v13667_v58  ;;  %v13641_v1 = vmul.f32 %v23745_v16, %v13601_v28  ;;  %v13596_v12 = vmul.f32 %v18531_v25, %v23661_v30  ;;  %v13633_v0 = vmul.f32 %v23748_v3, %v13593_v22 }
0x2027   : > { %v18537_v8 = vpop.eup %18536  ;;  %13934 = vmatprep.mubr.bf16.mxu0 %v13692_v33  ;;  %16186 = vmatprep.mubr.bf16.mxu1 %v13693_v9  ;;  %v13677_v44 = vadd.f32 %v23754_v39, %v13637_v2  ;;  %v13678_v43 = vadd.f32 %v23759_v21, %v13638_v29  ;;  %v13604_v7 = vmul.f32 %v18535_v47, %v23693_v61  ;;  %v15313_v2 = vld [vmem:[#allocation23] ss:$0 sm:$0xff] }
0x2028   : > { %13935 = vmatmul.mubr.bf16.vlgmr.msra.gmra.mrb[0].mxu0 %v13691_v24  ;;  %v13636_v59 = vmul.f32 %v23748_v3, %v13596_v12  ;;  %v13600_v48 = vmul.f32 %v18533_v55, %v23681_v40  ;;  %v13603_v26 = vmul.f32 %v18535_v47, %v23690_v17  ;;  %v13681_v60 = vadd.f32 %v23759_v21, %v13641_v1 }
0x2029   : > { %v13695_v53 = vpack.c.bf16 %v13677_v44, %v13674_v37  ;;  %v13696_v52 = vpack.c.bf16 %v13678_v43, %v13675_v35  ;;  %v13644_v30 = vmul.f32 %v23745_v16, %v13604_v7  ;;  %v13607_v54 = vmul.f32 %v18537_v8, %v23712_v63 }
0x202a   : > { %v18539_v10 = vpop.eup %18538  ;;  %v13676_v51 = vadd.f32 %v23763_v15, %v13636_v59  ;;  %v13640_v61 = vmul.f32 %v23742_v36, %v13600_v48  ;;  %v13643_v40 = vmul.f32 %v23742_v36, %v13603_v26  ;;  %v13673_v14 = vadd.f32 %v23763_v15, %v13633_v0 }
0x202b   : > { %13942 = vmatprep.mubr.bf16.mxu0 %v13695_v53  ;;  %16187 = vmatmul.mubr.bf16.vlgmr.msra.gmra.mrb[0].mxu1 %v13696_v52  ;;  %v13684_v27 = vadd.f32 %v23759_v21, %v13644_v30  ;;  %v13610_v62 = vmul.f32 %v18539_v10, %v23721_v19  ;;  %v13647_v41 = vmul.f32 %v23745_v16, %v13607_v54 }
0x202c   : > { %v13680_v17 = vadd.f32 %v23754_v39, %v13640_v61  ;;  %v13599_v4 = vmul.f32 %v18533_v55, %v23678_v11  ;;  %v13683_v23 = vadd.f32 %v23754_v39, %v13643_v40  ;;  %v13602_v38 = vmul.f32 %v18535_v47, %v23687_v32 }
0x202d   : > { %v13699_v50 = vpack.c.bf16 %v13684_v27, %v13681_v60  ;;  %v13650_v63 = vmul.f32 %v23745_v16, %v13610_v62  ;;  %v13694_v31 = vpack.c.bf16 %v13676_v51, %v13673_v14  ;;  %v13606_v25 = vmul.f32 %v18537_v8, %v23709_v6 }
0x202e   : > { %v13609_v19 = vmul.f32 %v18539_v10, %v23718_v45  ;;  %v13698_v13 = vpack.c.bf16 %v13683_v23, %v13680_v17  ;;  %v13687_v58 = vadd.f32 %v23759_v21, %v13647_v41  ;;  %v13642_v11 = vmul.f32 %v23748_v3, %v13602_v38 }
0x202f   : > { %16190 = vmatprep.mubr.bf16.mxu1 %v13699_v50  ;;  %v13690_v56 = vadd.f32 %v23759_v21, %v13650_v63  ;;  %v13639_v22 = vmul.f32 %v23748_v3, %v13599_v4  ;;  %v13646_v55 = vmul.f32 %v23742_v36, %v13606_v25  ;;  %v13608_v45 = vmul.f32 %v18539_v10, %v23715_v34 }
0x2030   : > { %13943 = vmatmul.mubr.bf16.gmra.mrb[4].mxu0 %v13694_v31  ;;  %v13649_v16 = vmul.f32 %v23742_v36, %v13609_v19  ;;  %v13682_v6 = vadd.f32 %v23763_v15, %v13642_v11  ;;  %v13605_v42 = vmul.f32 %v18537_v8, %v23706_v18 }
0x2031   : > { %13950 = vmatprep.mubr.bf16.mxu0 %v13698_v13  ;;  %v13702_v32 = vpack.c.bf16 %v13690_v56, %v13687_v58  ;;  %v13679_v21 = vadd.f32 %v23763_v15, %v13639_v22  ;;  %v13686_v20 = vadd.f32 %v23754_v39, %v13646_v55  ;;  %v13648_v46 = vmul.f32 %v23748_v3, %v13608_v45 }
0x2032   : > { %v13689_v49 = vadd.f32 %v23754_v39, %v13649_v16  ;;  %v13645_v36 = vmul.f32 %v23748_v3, %v13605_v42 }
0x2033   : > { %16191 = vmatmul.mubr.bf16.gmra.mrb[4].mxu1 %v13702_v32  ;;  %v13697_v57 = vpack.c.bf16 %v13682_v6, %v13679_v21  ;;  %v13688_v5 = vadd.f32 %v23763_v15, %v13648_v46 }
0x2034   : > { %v13701_v37 = vpack.c.bf16 %v13689_v49, %v13686_v20  ;;  %v13685_v34 = vadd.f32 %v23763_v15, %v13645_v36 }
0x2036   : > { %v13700_v28 = vpack.c.bf16 %v13688_v5, %v13685_v34 }
0x2038   : > { %13951 = vmatmul.mubr.bf16.gmra.mrb[8].mxu0 %v13697_v57 }
0x2039   : > { %13958 = vmatprep.mubr.bf16.mxu0 %v13701_v37 }
0x2040   : > { %13959 = vmatmul.mubr.bf16.gmra.mrb[12].mxu0 %v13700_v28 }
0x20fb   : > { %v15830_v33 = vpop.f32.mrb[0].mxu0 }
0x20fc   : > { %v15831_v9 = vpop.f32.mrb[1].mxu0 }
0x20fd   : > { %v15832_v18 = vadd.f32 %v15831_v9, %v15830_v33  ;;  %v15833_v29 = vpop.f32.mrb[2].mxu0 }
0x20fe   : > { %v15834_v39 = vpop.f32.mrb[3].mxu0  ;;  %v16188_v47 = vpop.f32.mrb[0].mxu1 }
0x20ff   : > { %v15835_v24 = vadd.f32 %v15834_v39, %v15833_v29  ;;  %v13937_v35 = vadd.f32 %v15832_v18, %v15313_v2  ;;  %v14001_v1 = vpop.f32.mrb[1].mxu1 }
0x2100   : > { %v16189_v12 = vpop.f32.mrb[2].mxu1 }
0x2101   : > { %v14002_v8 = vadd.f32 %v14001_v1, %v13937_v35  ;;  %v13940_v3 = vadd.f32 %v15835_v24, %v15313_v2  ;;  %v14004_v44 = vpop.f32.mrb[3].mxu1 }
0x2103   : > { %14032 = vst [vmem:[#allocation25] sm:$0xff] %v14002_v8  ;;  %v14005_v43 = vadd.f32 %v14004_v44, %v13940_v3  ;;  %v15836_v7 = vpop.f32.mrb[4].mxu0 }
0x2104   : > { %v15837_v15 = vpop.f32.mrb[5].mxu0 }
0x2105   : > { %14033 = vst [vmem:[#allocation25 + $0x8] sm:$0xff] %v14005_v43  ;;  %v15838_v0 = vadd.f32 %v15837_v15, %v15836_v7  ;;  %v15839_v59 = vpop.f32.mrb[6].mxu0 }
0x2106   : > { %v15840_v48 = vpop.f32.mrb[7].mxu0  ;;  %v16192_v53 = vpop.f32.mrb[4].mxu1 }
0x2107   : > { %v13945_v52 = vadd.f32 %v15838_v0, %v15313_v2  ;;  %v15841_v30 = vadd.f32 %v15840_v48, %v15839_v59  ;;  %v14017_v26 = vpop.f32.mrb[5].mxu1 }
0x2108   : > { %v16193_v10 = vpop.f32.mrb[6].mxu1 }
0x2109   : > { %v14010_v60 = vadd.f32 %v16188_v47, %v13945_v52  ;;  %v13948_v51 = vadd.f32 %v15841_v30, %v15313_v2  ;;  %v14020_v61 = vpop.f32.mrb[7].mxu1 }
0x210b   : > { %14034 = vst [vmem:[#allocation25 + $0x10] sm:$0xff] %v14010_v60  ;;  %v14013_v54 = vadd.f32 %v16189_v12, %v13948_v51  ;;  %v15842_v27 = vpop.f32.mrb[8].mxu0 }
0x210c   : > { %v15843_v40 = vpop.f32.mrb[9].mxu0 }
0x210d   : > { %14035 = vst [vmem:[#allocation25 + $0x18] sm:$0xff] %v14013_v54  ;;  %v15844_v62 = vadd.f32 %v15843_v40, %v15842_v27  ;;  %v15845_v14 = vpop.f32.mrb[10].mxu0 }
0x210e   : > { %v15846_v17 = vpop.f32.mrb[11].mxu0 }
0x210f   : > { %v13953_v41 = vadd.f32 %v15844_v62, %v15313_v2  ;;  %v15847_v4 = vadd.f32 %v15846_v17, %v15845_v14 }
0x2111   : > { %v14018_v50 = vadd.f32 %v14017_v26, %v13953_v41  ;;  %v13956_v23 = vadd.f32 %v15847_v4, %v15313_v2 }
0x2113   : > { %14036 = vst [vmem:[#allocation25 + $0x20] sm:$0xff] %v14018_v50  ;;  %v14021_v63 = vadd.f32 %v14020_v61, %v13956_v23  ;;  %v15848_v38 = vpop.f32.mrb[12].mxu0 }
0x2114   : > { %v15849_v31 = vpop.f32.mrb[13].mxu0 }
0x2115   : > { %14037 = vst [vmem:[#allocation25 + $0x28] sm:$0xff] %v14021_v63  ;;  %v15850_v25 = vadd.f32 %v15849_v31, %v15848_v38  ;;  %v15851_v19 = vpop.f32.mrb[14].mxu0 }
0x2116   : > { %v15852_v13 = vpop.f32.mrb[15].mxu0 }
0x2117   : > { %v13961_v58 = vadd.f32 %v15850_v25, %v15313_v2  ;;  %v15853_v56 = vadd.f32 %v15852_v13, %v15851_v19 }
0x2119   : > { %v14026_v11 = vadd.f32 %v16192_v53, %v13961_v58  ;;  %v13964_v22 = vadd.f32 %v15853_v56, %v15313_v2 }
0x211b   : > { %14038 = vst [vmem:[#allocation25 + $0x30] sm:$0xff] %v14026_v11  ;;  %v14029_v16 = vadd.f32 %v16193_v10, %v13964_v22 }
0x211d   : > { %14039 = vst [vmem:[#allocation25 + $0x38] sm:$0xff] %v14029_v16 }
0x211e PF: > { %s24103_s23 = sld [smem:[#allocation35_spill]]  ;;  %s19161_s27 = smov [#allocation25]  }
0x211f   : > { %s14046_s4 = sshll.u32 %s19161_s27, 4  ;;  %s14047_s4 = int_to_ptr.vmem [resolvable:$true] %s14046_s4 }
0x2120   : > { %s19038_s16 = scalar_lea.vmem %s14047_s4, 1024  ;;  %p19045_p6 = scmp.lt.s32.totalorder %s14047_s4, %s14047_s4 }
0x2121   : > { %p19039_p7 = scmp.ne.s32.totalorder %s14047_s4, %s19038_s16  ;;  %p19046_p13 = scmp.lt.s32.totalorder %s19038_s16, %s19038_s16 }
0x2123   : > { %p19047_p9 = por %p19046_p13, %p19045_p6 }
0x2124   : > { %p16753_p0 = scmp.eq.s32.totalorder %s24103_s23, 7 }
0x2126   : > { %p19040_p8 = pnand %p19039_p7, %p16753_p0 }
0x2128   : > { %p19041_p4 = pneg %p19040_p8 }
0x212a   : > { %p19048_p12 = pnand %p19047_p9, %p19041_p4 }
0x212c   : > { %19051 = shalt.err (!%p19048_p12)
}
0x212d   : > { %s24104_s10 = sld [smem:[#allocation77_spill]] }
0x2133   : > { %s19052_s8 = scalar_lea.hbm %s24104_s10, 1024 }
0x2134   : > { %p19053_p5 = scmp.ne.s32.totalorder %s24104_s10, %s19052_s8  ;;  %p19058_p10 = scmp.lt.u32.totalorder %s19052_s8, %s24104_s10 }
0x2136   : > { %p19054_p11 = pnand %p19053_p5, %p16753_p0 }
0x2138   : > { %p19055_p2 = pneg %p19054_p11 }
0x213a   : > { %p19060_p1 = pnand %p19058_p10, %p19055_p2 }
0x213c   : > { %19063 = shalt.err (!%p19060_p1)
}
0x213d   : > { %s19162_s0 = smov 128   ;;  %s19163_s22 = smov 8  }
0x213e   : > { %16684 = dma.vmem_to_hbm [thread:$0]  (%p16753_p0), %s14047_s4, 1024, %s24104_s10, [#allocation5], %s19162_s0, %s19162_s0, %s19163_s22  }
0x213f   : > { %19105 = dma.done.wait (%p16753_p0), [#allocation5], 1024  }
0x2140   : > { %19107 = vsyncadd (%p16753_p0), [#allocation5], 4294966272 }
0x2141 PF: > { %s24105_s27 = sld [smem:[#allocation38_spill]]  ;;  %s24106_s24 = sld [smem:[#allocation33_spill]] }
0x2142   : > { %s24107_s25 = sld [smem:[#allocation34_spill]]  ;;  %s24108_s26 = sld [smem:[#allocation39_spill]] }
0x2147   : > { %p29_p3 = scmp.ge.s32.totalorder %s24105_s27, 10  }
0x2149   :  { %31 = sbr.rel (!%p29_p3) target bundleno = 23 (0x17), region = 266 }
0x2150   :  { %14062 = vsyncpa [#allocation4], 1 }
0x2151   :  { %14064 = vsyncpa [#allocation4 + $0x1], 1 }
0x2152   :  { %14065 = vsyncpa [#allocation7], 1 }
0x2153   :  { %14066 = vsyncpa [#allocation21], 1 }
0x2154   :  { %14067 = vsyncpa [#allocation24], 1 }
0x2155   :  { %14068 = vsyncpa [#allocation5], 1 }
0x2156   :  { %14070 = vsyncpa [#allocation5 + $0x1], 1 }

</bundles_post_ra>
